<compile_context>
chip_gen: v5e
topology: v5e:2x2
jax: 0.10.0
libtpu: 0.0.40
codegen_flags: <defaults>
</compile_context>

<pallas_src>
import math

import jax
import jax.numpy as jnp
from jax.experimental import pallas as pl
from jax.experimental.pallas import tpu as pltpu

EPS = 1.1920928955078125e-07  # torch.finfo(float32).eps == F.rms_norm default


def _rmsnorm(v):
    return v * jax.lax.rsqrt(jnp.mean(v * v, axis=-1, keepdims=True) + EPS)


def _softmax(s):
    m = jnp.max(s, axis=-1, keepdims=True)
    e = jnp.exp(s - m)
    return e * pl.reciprocal(jnp.sum(e, axis=-1, keepdims=True), approx=True)


def _dot_nt(a, b):
    # a @ b.T without materializing a transpose
    return jax.lax.dot_general(
        a, b, (((1,), (1,)), ((), ())), preferred_element_type=jnp.float32)


def make_model_kernel(B, T, S, C, H):
    hd = C // H                     # head_dim
    scale = 1.0 / math.sqrt(hd)
    N = B * T                       # flattened token rows

    def kernel(x_ref, ckn_ref, cv_ref, cos_ref, sin_ref, hm_ref, sw_ref,
               wfc_ref, wattn_ref, wcp_ref, wmlp_ref, hw_ref, hb_ref,
               o_ref, x_s, attn_s):
        l = pl.program_id(0)
        n_layers = pl.num_programs(0)

        @pl.when(l == 0)
        def _():
            x_s[...] = x_ref[...]   # load the full (B*T, C) activation once

        x = x_s[...]                            # (N, C) f32, resident across layers
        COS = cos_ref[...].astype(jnp.float32)  # (N, C)
        SIN = sin_ref[...].astype(jnp.float32)  # (N, C) second half of head negated
        HM = hm_ref[...]                        # (C, C) bf16 block-diag 1/hd
        SW = sw_ref[...]                        # (C, C) bf16 per-head half-swap
        wfc = wfc_ref[0]                        # (C, 8C) bf16
        wattn = wattn_ref[0]                    # (C, C)  bf16
        wcp = wcp_ref[0]                        # (C, C)  bf16
        wmlp = wmlp_ref[0]                      # (4C, C) bf16

        # --- fused qkv / mlp / cross_q projection (bf16 MXU, f32 accum) ---
        xn = _rmsnorm(x)
        fc = jnp.dot(xn.astype(jnp.bfloat16), wfc,
                     preferred_element_type=jnp.float32)            # (N, 8C)
        q = fc[:, 0:C]
        k = fc[:, C:2 * C]
        v = fc[:, 2 * C:3 * C]
        mlp_inter = fc[:, 3 * C:7 * C]
        cross_q = fc[:, 7 * C:8 * C]

        # per-head rms_norm at full lane width (head means via bf16 block matmul)
        def head_rms(t):
            ms = jnp.dot((t * t).astype(jnp.bfloat16), HM,
                         preferred_element_type=jnp.float32)
            return t * jax.lax.rsqrt(ms + EPS)

        # full-width rotary: y = x*COS + swap_halves(x)*SIN  (matches torch)
        def rope(t):
            sw = jnp.dot(t.astype(jnp.bfloat16), SW,
                         preferred_element_type=jnp.float32)
            return t * COS + sw * SIN

        qr = rope(head_rms(q)).astype(jnp.bfloat16)                 # (N, C)
        kr = rope(head_rms(k)).astype(jnp.bfloat16)                 # (N, C)
        vb = v.astype(jnp.bfloat16)

        # --- self-attention (non-causal), per (batch, head); head outputs go
        #     straight into the attn_s VMEM scratch (no concatenate) ---
        for b in range(B):
            rs = slice(b * T, (b + 1) * T)
            qb, kb, vbb = qr[rs], kr[rs], vb[rs]
            for h in range(H):
                cs = slice(h * hd, (h + 1) * hd)
                s = _dot_nt(qb[:, cs], kb[:, cs]) * scale           # (T, T)
                p = _softmax(s)
                attn_s[rs, cs] = jnp.dot(p.astype(jnp.bfloat16), vbb[:, cs],
                                         preferred_element_type=jnp.float32)
        x = x + jnp.dot(attn_s[...].astype(jnp.bfloat16), wattn,
                        preferred_element_type=jnp.float32)

        # --- cross-attention over the S conditioning tokens ---
        cq = head_rms(cross_q).astype(jnp.bfloat16)
        CKN = ckn_ref[0]            # (B, S, C) bf16, per-head-normalized already
        CV = cv_ref[0]              # (B, S, C) bf16
        for b in range(B):
            rs = slice(b * T, (b + 1) * T)
            cqb = cq[rs]
            ckb = CKN[b]
            cvb = CV[b]
            for h in range(H):
                cs = slice(h * hd, (h + 1) * hd)
                s = _dot_nt(cqb[:, cs], ckb[:, cs]) * scale         # (T, S)
                p = _softmax(s)
                attn_s[rs, cs] = jnp.dot(p.astype(jnp.bfloat16), cvb[:, cs],
                                         preferred_element_type=jnp.float32)
        x = x + jnp.dot(attn_s[...].astype(jnp.bfloat16), wcp,
                        preferred_element_type=jnp.float32)

        # --- MLP: relu(h)^2 @ W_mlp ---
        act = jnp.maximum(mlp_inter, 0.0)
        act = act * act
        x = x + jnp.dot(act.astype(jnp.bfloat16), wmlp,
                        preferred_element_type=jnp.float32)

        x_s[...] = x

        # --- final rms_norm + planner head, fused into the last layer step;
        #     lane-dense (1, B*T) output, scalar bias from SMEM ---
        @pl.when(l == n_layers - 1)
        def _():
            xn2 = _rmsnorm(x)
            logits = jax.lax.dot_general(
                hw_ref[...], xn2, (((1,), (1,)), ((), ())),
                preferred_element_type=jnp.float32)                 # (1, N)
            o_ref[...] = logits + hb_ref[0, 0]

    return kernel


def rotary_cos_sin(C, n_head, T, base=100.0, grid_h=64, grid_w=64, hw=(32, 32)):
    # Matches Rotary(dim=C // (2*n_head), base=100, h=64, w=64) with
    # height_width=(32, 32), then slicing to the first T positions.
    dim = C // (2 * n_head)
    inv_freq = 1.0 / (base ** (jnp.arange(0, dim, 2, dtype=jnp.float32) / dim))
    t_h = jnp.arange(grid_h, dtype=jnp.float32)
    t_w = jnp.arange(grid_w, dtype=jnp.float32)
    freqs_h = jnp.tile(jnp.outer(t_h, inv_freq)[:, None, :], (1, grid_w, 1))
    freqs_w = jnp.tile(jnp.outer(t_w, inv_freq)[None, :, :], (grid_h, 1, 1))
    freqs_hw = jnp.concatenate([freqs_h, freqs_w], axis=2)   # (64, 64, dim)
    th, tw = hw
    fr = freqs_hw[:th, :tw].reshape(th * tw, dim)
    return jnp.cos(fr)[:T], jnp.sin(fr)[:T]


def ddpd_forward(params, idx, time, class_labels, n_head):
    # planner model_type: `time` is accepted but unused (matches the torch branch)
    del time
    B, T = idx.shape
    C = params['wte'].shape[1]
    H = n_head
    hd = C // H
    d = hd // 2
    L = len(params['blocks'])
    S = 4
    N = B * T
    assert T % 8 == 0, "T must be a multiple of 8 for sublane-aligned row slices"

    x = params['wte'][idx].reshape(N, C)                      # (B*T, C) f32
    cond = params['wce'][class_labels].reshape(B, S, C)       # (B, S, C)

    # rotary tables, lane-dense (B*T, C): same (cos|cos) / (sin|-sin) per head,
    # tiled across the batch rows (row b*T+t uses position t).
    # torch apply_rotary_emb: y1 = x1*cos + x2*sin ; y2 = -x1*sin + x2*cos.
    cos, sin = rotary_cos_sin(C, H, T)                        # (T, d)
    cos_tc = jnp.tile(jnp.concatenate([cos, cos], axis=1), (1, H))
    sin_tc = jnp.tile(jnp.concatenate([sin, -sin], axis=1), (1, H))
    cos_nc = jnp.tile(cos_tc, (B, 1)).astype(jnp.bfloat16)    # (N, C) bf16
    sin_nc = jnp.tile(sin_tc, (B, 1)).astype(jnp.bfloat16)    # (N, C) bf16

    # per-head block-mean matrix and per-head half-swap permutation, (C,C) bf16
    # (1/hd and {0,1} are exactly representable in bf16)
    col = jnp.arange(C)
    same_head = (col[:, None] // hd) == (col[None, :] // hd)
    headmask = (same_head.astype(jnp.float32) / hd).astype(jnp.bfloat16)
    src = jnp.where((col % hd) < d, col + d, col - d)
    swap = (col[:, None] == src[None, :]).astype(jnp.bfloat16)

    # stack per-layer weights; bf16 for everything fed to the MXU
    def stack(name):
        return jnp.stack([blk[name] for blk in params['blocks']])
    wfc = stack('wfc').astype(jnp.bfloat16)        # (L, C, 8C)
    wattn = stack('wattn').astype(jnp.bfloat16)    # (L, C, C)
    wcp = stack('wcp').astype(jnp.bfloat16)        # (L, C, C)
    wmlp = stack('wmlp').astype(jnp.bfloat16)      # (L, 4C, C)
    wck = stack('wck')                             # (L, C, C) f32
    wcv = stack('wcv')                             # (L, C, C) f32

    # hoist cross-attention K/V projections (+ per-head rms_norm of K) to XLA
    ck = jnp.einsum('bsc,lcd->lbsd', cond, wck)               # (L, B, S, C)
    ckh = ck.reshape(L, B, S, H, hd)
    ckh = ckh * jax.lax.rsqrt(jnp.mean(ckh * ckh, axis=-1, keepdims=True) + EPS)
    ckn = ckh.reshape(L, B, S, C).astype(jnp.bfloat16)
    cv = jnp.einsum('bsc,lcd->lbsd', cond, wcv).astype(jnp.bfloat16)

    kernel = make_model_kernel(B, T, S, C, H)
    logits = pl.pallas_call(
        kernel,
        out_shape=jax.ShapeDtypeStruct((1, N), jnp.float32),
        grid=(L,),
        in_specs=[
            pl.BlockSpec((N, C), lambda l: (0, 0)),                 # x (flattened)
            pl.BlockSpec((1, B, S, C), lambda l: (l, 0, 0, 0)),     # cross k (norm)
            pl.BlockSpec((1, B, S, C), lambda l: (l, 0, 0, 0)),     # cross v
            pl.BlockSpec((N, C), lambda l: (0, 0)),                 # cos table
            pl.BlockSpec((N, C), lambda l: (0, 0)),                 # sin table
            pl.BlockSpec((C, C), lambda l: (0, 0)),                 # head-mean mask
            pl.BlockSpec((C, C), lambda l: (0, 0)),                 # half-swap perm
            pl.BlockSpec((1, C, 8 * C), lambda l: (l, 0, 0)),       # chunked_fc
            pl.BlockSpec((1, C, C), lambda l: (l, 0, 0)),           # attn_proj
            pl.BlockSpec((1, C, C), lambda l: (l, 0, 0)),           # cross_proj
            pl.BlockSpec((1, 4 * C, C), lambda l: (l, 0, 0)),       # mlp_proj
            pl.BlockSpec((1, C), lambda l: (0, 0)),                 # head weight
            pl.BlockSpec(memory_space=pltpu.MemorySpace.SMEM),      # head bias (scalar)
        ],
        out_specs=pl.BlockSpec((1, N), lambda l: (0, 0)),
        scratch_shapes=[pltpu.VMEM((N, C), jnp.float32),   # resident activation
                        pltpu.VMEM((N, C), jnp.float32)],  # head-output staging
        compiler_params=pltpu.CompilerParams(
            dimension_semantics=("arbitrary",)),
    )(x, ckn, cv, cos_nc, sin_nc, headmask, swap,
      wfc, wattn, wcp, wmlp, params['head_w'], params['head_b'])

    return logits.reshape(B, T).astype(jnp.float32)         # planner: (B, T)


def init_params(key, *, C, n_layer, vocab, n_classes):
    keys = jax.random.split(key, 4 + n_layer)

    def nrm(k, shape, std):
        return std * jax.random.normal(k, shape, dtype=jnp.float32)

    proj_std = 0.002 / math.sqrt(2 * n_layer)
    params = {
        'wte': nrm(keys[0], (vocab, C), 0.02),
        'wce': nrm(keys[1], (n_classes, 4 * C), 0.02),
        # torch zero-inits head.weight; use a small normal so the kernel output
        # is non-trivial (synthetic weights, shapes match nn.Linear(C, 1)).
        'head_w': nrm(keys[2], (1, C), 0.02),
        'head_b': nrm(keys[3], (1, 1), 0.02),
        'blocks': [],
    }
    for li in range(n_layer):
        kb = jax.random.split(keys[4 + li], 6)
        params['blocks'].append({
            'wfc':   nrm(kb[0], (C, 8 * C), 0.02 / math.sqrt(C)),
            'wattn': nrm(kb[1], (C, C), proj_std),
            'wck':   nrm(kb[2], (C, C), 0.02),
            'wcv':   nrm(kb[3], (C, C), 0.02),
            'wcp':   nrm(kb[4], (C, C), proj_std),
            'wmlp':  nrm(kb[5], (4 * C, C), proj_std),
        })
    return params


if __name__ == "__main__":
    B, T = 2, 64          # T <= 32*32 rotary positions; B*T = 128 (lane-dense out)
    C, H = 128, 4         # n_embd, n_head  -> head_dim=32, rotary half-dim=16
    N_LAYER = 2
    VOCAB, N_CLASSES = 17, 10

    key = jax.random.PRNGKey(0)
    kp, ki, kc, kt = jax.random.split(key, 4)
    params = init_params(kp, C=C, n_layer=N_LAYER, vocab=VOCAB,
                         n_classes=N_CLASSES)

    idx = jax.random.randint(ki, (B, T), 0, VOCAB, dtype=jnp.int32)
    class_labels = jax.random.randint(kc, (B,), 0, N_CLASSES, dtype=jnp.int32)
    time = jax.random.uniform(kt, (B,), dtype=jnp.float32)

    logits = ddpd_forward(params, idx, time, class_labels, n_head=H)
    jax.block_until_ready(logits)
    assert logits.shape == (B, T) and logits.dtype == jnp.float32
    print("KERNEL_OK")
</pallas_src>

<mosaic_0001>
module attributes {stable_mosaic.version = 11 : i64} {
  func.func @kernel(%arg0: i32, %arg1: memref<128x128xf32, #tpu.memory_space<vmem>>, %arg2: memref<1x2x4x128xbf16, #tpu.memory_space<vmem>>, %arg3: memref<1x2x4x128xbf16, #tpu.memory_space<vmem>>, %arg4: memref<128x128xbf16, #tpu.memory_space<vmem>>, %arg5: memref<128x128xbf16, #tpu.memory_space<vmem>>, %arg6: memref<128x128xbf16, #tpu.memory_space<vmem>>, %arg7: memref<128x128xbf16, #tpu.memory_space<vmem>>, %arg8: memref<1x128x1024xbf16, #tpu.memory_space<vmem>>, %arg9: memref<1x128x128xbf16, #tpu.memory_space<vmem>>, %arg10: memref<1x128x128xbf16, #tpu.memory_space<vmem>>, %arg11: memref<1x512x128xbf16, #tpu.memory_space<vmem>>, %arg12: memref<1x128xf32, #tpu.memory_space<vmem>>, %arg13: memref<1x1xf32, #tpu.memory_space<smem>>, %arg14: memref<1x128xf32, #tpu.memory_space<vmem>>, %arg15: memref<128x128xf32, #tpu.memory_space<vmem>>, %arg16: memref<128x128xf32, #tpu.memory_space<vmem>>) attributes {dimension_semantics = [#tpu.dimension_semantics<arbitrary>], iteration_bounds = array<i64: 2>, scalar_prefetch = 0 : i64, scratch_operands = 2 : i64, tpu.core_type = #tpu.core_type<tc>, window_params = [{pipeline_mode = #tpu.pipeline_mode<synchronous>, transform_indices = @transform_0, window_bounds = array<i64: 128, 128>}, {transform_indices = @transform_1, window_bounds = array<i64: 1, 2, 4, 128>}, {transform_indices = @transform_2, window_bounds = array<i64: 1, 2, 4, 128>}, {pipeline_mode = #tpu.pipeline_mode<synchronous>, transform_indices = @transform_3, window_bounds = array<i64: 128, 128>}, {pipeline_mode = #tpu.pipeline_mode<synchronous>, transform_indices = @transform_4, window_bounds = array<i64: 128, 128>}, {pipeline_mode = #tpu.pipeline_mode<synchronous>, transform_indices = @transform_5, window_bounds = array<i64: 128, 128>}, {pipeline_mode = #tpu.pipeline_mode<synchronous>, transform_indices = @transform_6, window_bounds = array<i64: 128, 128>}, {transform_indices = @transform_7, window_bounds = array<i64: 1, 128, 1024>}, {transform_indices = @transform_8, window_bounds = array<i64: 1, 128, 128>}, {transform_indices = @transform_9, window_bounds = array<i64: 1, 128, 128>}, {transform_indices = @transform_10, window_bounds = array<i64: 1, 512, 128>}, {pipeline_mode = #tpu.pipeline_mode<synchronous>, transform_indices = @transform_11, window_bounds = array<i64: 1, 128>}, {transform_indices = @transform_12, window_bounds = array<i64: 1, 1>}, {pipeline_mode = #tpu.pipeline_mode<synchronous>, transform_indices = @transform_13, window_bounds = array<i64: 1, 128>}]} {
    %c0_i32 = arith.constant 0 : i32
    %0 = arith.cmpi eq, %arg0, %c0_i32 : i32
    %1 = arith.extui %0 : i1 to i32
    %c0_i32_0 = arith.constant 0 : i32
    %2 = arith.cmpi ne, %1, %c0_i32_0 : i32
    scf.if %2 {
      %c0_161 = arith.constant 0 : index
      %c0_162 = arith.constant 0 : index
      %412 = vector.load %arg1[%c0_161, %c0_162] : memref<128x128xf32, #tpu.memory_space<vmem>>, vector<128x128xf32>
      %c0_163 = arith.constant 0 : index
      %c0_164 = arith.constant 0 : index
      %413 = vector.load %arg15[%c0_163, %c0_164] : memref<128x128xf32, #tpu.memory_space<vmem>>, vector<128x128xf32>
      tpu.vector_store %arg15[%c0_163, %c0_164], %412 {strides = array<i32>} : memref<128x128xf32, #tpu.memory_space<vmem>>, vector<128x128xf32>,
    } else {
    }
    %c0 = arith.constant 0 : index
    %c0_1 = arith.constant 0 : index
    %3 = vector.load %arg15[%c0, %c0_1] : memref<128x128xf32, #tpu.memory_space<vmem>>, vector<128x128xf32>
    %c0_2 = arith.constant 0 : index
    %c0_3 = arith.constant 0 : index
    %4 = vector.load %arg4[%c0_2, %c0_3] : memref<128x128xbf16, #tpu.memory_space<vmem>>, vector<128x128xbf16>
    %5 = arith.extf %4 : vector<128x128xbf16> to vector<128x128xf32>
    %c0_4 = arith.constant 0 : index
    %c0_5 = arith.constant 0 : index
    %6 = vector.load %arg5[%c0_4, %c0_5] : memref<128x128xbf16, #tpu.memory_space<vmem>>, vector<128x128xbf16>
    %7 = arith.extf %6 : vector<128x128xbf16> to vector<128x128xf32>
    %c0_6 = arith.constant 0 : index
    %c0_7 = arith.constant 0 : index
    %8 = vector.load %arg6[%c0_6, %c0_7] : memref<128x128xbf16, #tpu.memory_space<vmem>>, vector<128x128xbf16>
    %c0_8 = arith.constant 0 : index
    %c0_9 = arith.constant 0 : index
    %9 = vector.load %arg7[%c0_8, %c0_9] : memref<128x128xbf16, #tpu.memory_space<vmem>>, vector<128x128xbf16>
    %c0_10 = arith.constant 0 : index
    %c0_11 = arith.constant 0 : index
    %c0_12 = arith.constant 0 : index
    %10 = vector.load %arg8[%c0_10, %c0_11, %c0_12] : memref<1x128x1024xbf16, #tpu.memory_space<vmem>>, vector<1x128x1024xbf16>
    %11 = vector.shape_cast %10 : vector<1x128x1024xbf16> to vector<128x1024xbf16>
    %c0_13 = arith.constant 0 : index
    %c0_14 = arith.constant 0 : index
    %c0_15 = arith.constant 0 : index
    %12 = vector.load %arg9[%c0_13, %c0_14, %c0_15] : memref<1x128x128xbf16, #tpu.memory_space<vmem>>, vector<1x128x128xbf16>
    %13 = vector.shape_cast %12 : vector<1x128x128xbf16> to vector<128x128xbf16>
    %c0_16 = arith.constant 0 : index
    %c0_17 = arith.constant 0 : index
    %c0_18 = arith.constant 0 : index
    %14 = vector.load %arg10[%c0_16, %c0_17, %c0_18] : memref<1x128x128xbf16, #tpu.memory_space<vmem>>, vector<1x128x128xbf16>
    %15 = vector.shape_cast %14 : vector<1x128x128xbf16> to vector<128x128xbf16>
    %c0_19 = arith.constant 0 : index
    %c0_20 = arith.constant 0 : index
    %c0_21 = arith.constant 0 : index
    %16 = vector.load %arg11[%c0_19, %c0_20, %c0_21] : memref<1x512x128xbf16, #tpu.memory_space<vmem>>, vector<1x512x128xbf16>
    %17 = vector.shape_cast %16 : vector<1x512x128xbf16> to vector<512x128xbf16>
    %18 = arith.mulf %3, %3 : vector<128x128xf32>
    %cst = arith.constant dense<0.000000e+00> : vector<128xf32>
    %19 = vector.multi_reduction <add>, %18, %cst [1] : vector<128x128xf32> to vector<128xf32>
    %20 = vector.shape_cast %19 : vector<128xf32> to vector<128x1xf32>
    %cst_22 = arith.constant 1.280000e+02 : f32
    %21 = vector.broadcast %cst_22 : f32 to vector<128x1xf32>
    %22 = arith.divf %20, %21 : vector<128x1xf32>
    %cst_23 = arith.constant 1.1920929E-7 : f32
    %23 = vector.broadcast %cst_23 : f32 to vector<128x1xf32>
    %24 = arith.addf %22, %23 : vector<128x1xf32>
    %25 = math.rsqrt %24 : vector<128x1xf32>
    %26 = vector.broadcast %25 : vector<128x1xf32> to vector<128x128xf32>
    %27 = arith.mulf %3, %26 : vector<128x128xf32>
    %28 = arith.truncf %27 : vector<128x128xf32> to vector<128x128xbf16>
    %cst_24 = arith.constant dense<0.000000e+00> : vector<128x1024xf32>
    %29 = tpu.matmul %28, %11, %cst_24 {dimension_numbers = #tpu.dot_dimension_numbers<[1], [0], [0], [1], [0, 0, 1, 1], [], []>} : vector<128x128xbf16>, vector<128x1024xbf16>, vector<128x1024xf32> -> vector<128x1024xf32>
    %30 = vector.extract_strided_slice %29 {offsets = [0, 0], sizes = [128, 128], strides = [1, 1]} : vector<128x1024xf32> to vector<128x128xf32>
    %31 = vector.extract_strided_slice %29 {offsets = [0, 128], sizes = [128, 128], strides = [1, 1]} : vector<128x1024xf32> to vector<128x128xf32>
    %32 = vector.extract_strided_slice %29 {offsets = [0, 256], sizes = [128, 128], strides = [1, 1]} : vector<128x1024xf32> to vector<128x128xf32>
    %33 = vector.extract_strided_slice %29 {offsets = [0, 384], sizes = [128, 512], strides = [1, 1]} : vector<128x1024xf32> to vector<128x512xf32>
    %34 = vector.extract_strided_slice %29 {offsets = [0, 896], sizes = [128, 128], strides = [1, 1]} : vector<128x1024xf32> to vector<128x128xf32>
    %35 = arith.mulf %30, %30 : vector<128x128xf32>
    %36 = arith.truncf %35 : vector<128x128xf32> to vector<128x128xbf16>
    %cst_25 = arith.constant dense<0.000000e+00> : vector<128x128xf32>
    %37 = tpu.matmul %36, %8, %cst_25 {dimension_numbers = #tpu.dot_dimension_numbers<[1], [0], [0], [1], [0, 0, 1, 1], [], []>} : vector<128x128xbf16>, vector<128x128xbf16>, vector<128x128xf32> -> vector<128x128xf32>
    %cst_26 = arith.constant 1.1920929E-7 : f32
    %38 = vector.broadcast %cst_26 : f32 to vector<128x128xf32>
    %39 = arith.addf %37, %38 : vector<128x128xf32>
    %40 = math.rsqrt %39 : vector<128x128xf32>
    %41 = arith.mulf %30, %40 : vector<128x128xf32>
    %42 = arith.truncf %41 : vector<128x128xf32> to vector<128x128xbf16>
    %cst_27 = arith.constant dense<0.000000e+00> : vector<128x128xf32>
    %43 = tpu.matmul %42, %9, %cst_27 {dimension_numbers = #tpu.dot_dimension_numbers<[1], [0], [0], [1], [0, 0, 1, 1], [], []>} : vector<128x128xbf16>, vector<128x128xbf16>, vector<128x128xf32> -> vector<128x128xf32>
    %44 = arith.mulf %41, %5 : vector<128x128xf32>
    %45 = arith.mulf %43, %7 : vector<128x128xf32>
    %46 = arith.addf %44, %45 : vector<128x128xf32>
    %47 = arith.truncf %46 : vector<128x128xf32> to vector<128x128xbf16>
    %48 = arith.mulf %31, %31 : vector<128x128xf32>
    %49 = arith.truncf %48 : vector<128x128xf32> to vector<128x128xbf16>
    %cst_28 = arith.constant dense<0.000000e+00> : vector<128x128xf32>
    %50 = tpu.matmul %49, %8, %cst_28 {dimension_numbers = #tpu.dot_dimension_numbers<[1], [0], [0], [1], [0, 0, 1, 1], [], []>} : vector<128x128xbf16>, vector<128x128xbf16>, vector<128x128xf32> -> vector<128x128xf32>
    %cst_29 = arith.constant 1.1920929E-7 : f32
    %51 = vector.broadcast %cst_29 : f32 to vector<128x128xf32>
    %52 = arith.addf %50, %51 : vector<128x128xf32>
    %53 = math.rsqrt %52 : vector<128x128xf32>
    %54 = arith.mulf %31, %53 : vector<128x128xf32>
    %55 = arith.truncf %54 : vector<128x128xf32> to vector<128x128xbf16>
    %cst_30 = arith.constant dense<0.000000e+00> : vector<128x128xf32>
    %56 = tpu.matmul %55, %9, %cst_30 {dimension_numbers = #tpu.dot_dimension_numbers<[1], [0], [0], [1], [0, 0, 1, 1], [], []>} : vector<128x128xbf16>, vector<128x128xbf16>, vector<128x128xf32> -> vector<128x128xf32>
    %57 = arith.mulf %54, %5 : vector<128x128xf32>
    %58 = arith.mulf %56, %7 : vector<128x128xf32>
    %59 = arith.addf %57, %58 : vector<128x128xf32>
    %60 = arith.truncf %59 : vector<128x128xf32> to vector<128x128xbf16>
    %61 = arith.truncf %32 : vector<128x128xf32> to vector<128x128xbf16>
    %62 = vector.extract_strided_slice %47 {offsets = [0, 0], sizes = [64, 128], strides = [1, 1]} : vector<128x128xbf16> to vector<64x128xbf16>
    %63 = vector.extract_strided_slice %60 {offsets = [0, 0], sizes = [64, 128], strides = [1, 1]} : vector<128x128xbf16> to vector<64x128xbf16>
    %64 = vector.extract_strided_slice %61 {offsets = [0, 0], sizes = [64, 128], strides = [1, 1]} : vector<128x128xbf16> to vector<64x128xbf16>
    %65 = vector.extract_strided_slice %62 {offsets = [0, 0], sizes = [64, 32], strides = [1, 1]} : vector<64x128xbf16> to vector<64x32xbf16>
    %66 = vector.extract_strided_slice %63 {offsets = [0, 0], sizes = [64, 32], strides = [1, 1]} : vector<64x128xbf16> to vector<64x32xbf16>
    %cst_31 = arith.constant dense<0.000000e+00> : vector<64x64xf32>
    %67 = tpu.matmul %65, %66, %cst_31 {dimension_numbers = #tpu.dot_dimension_numbers<[1], [1], [0], [0], [0, 0, 1, 0], [], []>} : vector<64x32xbf16>, vector<64x32xbf16>, vector<64x64xf32> -> vector<64x64xf32>
    %cst_32 = arith.constant 0.176776692 : f32
    %68 = vector.broadcast %cst_32 : f32 to vector<64x64xf32>
    %69 = arith.mulf %67, %68 : vector<64x64xf32>
    %cst_33 = arith.constant dense<0xFF800000> : vector<64xf32>
    %70 = vector.multi_reduction <maximumf>, %69, %cst_33 [1] : vector<64x64xf32> to vector<64xf32>
    %71 = vector.shape_cast %70 : vector<64xf32> to vector<64x1xf32>
    %72 = vector.broadcast %71 : vector<64x1xf32> to vector<64x64xf32>
    %73 = arith.subf %69, %72 : vector<64x64xf32>
    %74 = math.exp %73 : vector<64x64xf32>
    %cst_34 = arith.constant dense<0.000000e+00> : vector<64xf32>
    %75 = vector.multi_reduction <add>, %74, %cst_34 [1] : vector<64x64xf32> to vector<64xf32>
    %76 = vector.shape_cast %75 : vector<64xf32> to vector<64x1xf32>
    %77 = tpu.reciprocal %76 {approx = true} : vector<64x1xf32> -> vector<64x1xf32>
    %78 = vector.broadcast %77 : vector<64x1xf32> to vector<64x64xf32>
    %79 = arith.mulf %74, %78 : vector<64x64xf32>
    %80 = arith.truncf %79 : vector<64x64xf32> to vector<64x64xbf16>
    %81 = vector.extract_strided_slice %64 {offsets = [0, 0], sizes = [64, 32], strides = [1, 1]} : vector<64x128xbf16> to vector<64x32xbf16>
    %cst_35 = arith.constant dense<0.000000e+00> : vector<64x32xf32>
    %82 = tpu.matmul %80, %81, %cst_35 {dimension_numbers = #tpu.dot_dimension_numbers<[1], [0], [0], [1], [0, 0, 1, 1], [], []>} : vector<64x64xbf16>, vector<64x32xbf16>, vector<64x32xf32> -> vector<64x32xf32>
    %c0_36 = arith.constant 0 : index
    %c0_37 = arith.constant 0 : index
    %83 = vector.load %arg16[%c0_36, %c0_37] : memref<128x128xf32, #tpu.memory_space<vmem>>, vector<64x32xf32>
    tpu.vector_store %arg16[%c0_36, %c0_37], %82 {strides = array<i32>} : memref<128x128xf32, #tpu.memory_space<vmem>>, vector<64x32xf32>,
    %84 = vector.extract_strided_slice %62 {offsets = [0, 32], sizes = [64, 32], strides = [1, 1]} : vector<64x128xbf16> to vector<64x32xbf16>
    %85 = vector.extract_strided_slice %63 {offsets = [0, 32], sizes = [64, 32], strides = [1, 1]} : vector<64x128xbf16> to vector<64x32xbf16>
    %cst_38 = arith.constant dense<0.000000e+00> : vector<64x64xf32>
    %86 = tpu.matmul %84, %85, %cst_38 {dimension_numbers = #tpu.dot_dimension_numbers<[1], [1], [0], [0], [0, 0, 1, 0], [], []>} : vector<64x32xbf16>, vector<64x32xbf16>, vector<64x64xf32> -> vector<64x64xf32>
    %cst_39 = arith.constant 0.176776692 : f32
    %87 = vector.broadcast %cst_39 : f32 to vector<64x64xf32>
    %88 = arith.mulf %86, %87 : vector<64x64xf32>
    %cst_40 = arith.constant dense<0xFF800000> : vector<64xf32>
    %89 = vector.multi_reduction <maximumf>, %88, %cst_40 [1] : vector<64x64xf32> to vector<64xf32>
    %90 = vector.shape_cast %89 : vector<64xf32> to vector<64x1xf32>
    %91 = vector.broadcast %90 : vector<64x1xf32> to vector<64x64xf32>
    %92 = arith.subf %88, %91 : vector<64x64xf32>
    %93 = math.exp %92 : vector<64x64xf32>
    %cst_41 = arith.constant dense<0.000000e+00> : vector<64xf32>
    %94 = vector.multi_reduction <add>, %93, %cst_41 [1] : vector<64x64xf32> to vector<64xf32>
    %95 = vector.shape_cast %94 : vector<64xf32> to vector<64x1xf32>
    %96 = tpu.reciprocal %95 {approx = true} : vector<64x1xf32> -> vector<64x1xf32>
    %97 = vector.broadcast %96 : vector<64x1xf32> to vector<64x64xf32>
    %98 = arith.mulf %93, %97 : vector<64x64xf32>
    %99 = arith.truncf %98 : vector<64x64xf32> to vector<64x64xbf16>
    %100 = vector.extract_strided_slice %64 {offsets = [0, 32], sizes = [64, 32], strides = [1, 1]} : vector<64x128xbf16> to vector<64x32xbf16>
    %cst_42 = arith.constant dense<0.000000e+00> : vector<64x32xf32>
    %101 = tpu.matmul %99, %100, %cst_42 {dimension_numbers = #tpu.dot_dimension_numbers<[1], [0], [0], [1], [0, 0, 1, 1], [], []>} : vector<64x64xbf16>, vector<64x32xbf16>, vector<64x32xf32> -> vector<64x32xf32>
    %c0_43 = arith.constant 0 : index
    %c32 = arith.constant 32 : index
    %102 = vector.load %arg16[%c0_43, %c32] : memref<128x128xf32, #tpu.memory_space<vmem>>, vector<64x32xf32>
    tpu.vector_store %arg16[%c0_43, %c32], %101 {strides = array<i32>} : memref<128x128xf32, #tpu.memory_space<vmem>>, vector<64x32xf32>,
    %103 = vector.extract_strided_slice %62 {offsets = [0, 64], sizes = [64, 32], strides = [1, 1]} : vector<64x128xbf16> to vector<64x32xbf16>
    %104 = vector.extract_strided_slice %63 {offsets = [0, 64], sizes = [64, 32], strides = [1, 1]} : vector<64x128xbf16> to vector<64x32xbf16>
    %cst_44 = arith.constant dense<0.000000e+00> : vector<64x64xf32>
    %105 = tpu.matmul %103, %104, %cst_44 {dimension_numbers = #tpu.dot_dimension_numbers<[1], [1], [0], [0], [0, 0, 1, 0], [], []>} : vector<64x32xbf16>, vector<64x32xbf16>, vector<64x64xf32> -> vector<64x64xf32>
    %cst_45 = arith.constant 0.176776692 : f32
    %106 = vector.broadcast %cst_45 : f32 to vector<64x64xf32>
    %107 = arith.mulf %105, %106 : vector<64x64xf32>
    %cst_46 = arith.constant dense<0xFF800000> : vector<64xf32>
    %108 = vector.multi_reduction <maximumf>, %107, %cst_46 [1] : vector<64x64xf32> to vector<64xf32>
    %109 = vector.shape_cast %108 : vector<64xf32> to vector<64x1xf32>
    %110 = vector.broadcast %109 : vector<64x1xf32> to vector<64x64xf32>
    %111 = arith.subf %107, %110 : vector<64x64xf32>
    %112 = math.exp %111 : vector<64x64xf32>
    %cst_47 = arith.constant dense<0.000000e+00> : vector<64xf32>
    %113 = vector.multi_reduction <add>, %112, %cst_47 [1] : vector<64x64xf32> to vector<64xf32>
    %114 = vector.shape_cast %113 : vector<64xf32> to vector<64x1xf32>
    %115 = tpu.reciprocal %114 {approx = true} : vector<64x1xf32> -> vector<64x1xf32>
    %116 = vector.broadcast %115 : vector<64x1xf32> to vector<64x64xf32>
    %117 = arith.mulf %112, %116 : vector<64x64xf32>
    %118 = arith.truncf %117 : vector<64x64xf32> to vector<64x64xbf16>
    %119 = vector.extract_strided_slice %64 {offsets = [0, 64], sizes = [64, 32], strides = [1, 1]} : vector<64x128xbf16> to vector<64x32xbf16>
    %cst_48 = arith.constant dense<0.000000e+00> : vector<64x32xf32>
    %120 = tpu.matmul %118, %119, %cst_48 {dimension_numbers = #tpu.dot_dimension_numbers<[1], [0], [0], [1], [0, 0, 1, 1], [], []>} : vector<64x64xbf16>, vector<64x32xbf16>, vector<64x32xf32> -> vector<64x32xf32>
    %c0_49 = arith.constant 0 : index
    %c64 = arith.constant 64 : index
    %121 = vector.load %arg16[%c0_49, %c64] : memref<128x128xf32, #tpu.memory_space<vmem>>, vector<64x32xf32>
    tpu.vector_store %arg16[%c0_49, %c64], %120 {strides = array<i32>} : memref<128x128xf32, #tpu.memory_space<vmem>>, vector<64x32xf32>,
    %122 = vector.extract_strided_slice %62 {offsets = [0, 96], sizes = [64, 32], strides = [1, 1]} : vector<64x128xbf16> to vector<64x32xbf16>
    %123 = vector.extract_strided_slice %63 {offsets = [0, 96], sizes = [64, 32], strides = [1, 1]} : vector<64x128xbf16> to vector<64x32xbf16>
    %cst_50 = arith.constant dense<0.000000e+00> : vector<64x64xf32>
    %124 = tpu.matmul %122, %123, %cst_50 {dimension_numbers = #tpu.dot_dimension_numbers<[1], [1], [0], [0], [0, 0, 1, 0], [], []>} : vector<64x32xbf16>, vector<64x32xbf16>, vector<64x64xf32> -> vector<64x64xf32>
    %cst_51 = arith.constant 0.176776692 : f32
    %125 = vector.broadcast %cst_51 : f32 to vector<64x64xf32>
    %126 = arith.mulf %124, %125 : vector<64x64xf32>
    %cst_52 = arith.constant dense<0xFF800000> : vector<64xf32>
    %127 = vector.multi_reduction <maximumf>, %126, %cst_52 [1] : vector<64x64xf32> to vector<64xf32>
    %128 = vector.shape_cast %127 : vector<64xf32> to vector<64x1xf32>
    %129 = vector.broadcast %128 : vector<64x1xf32> to vector<64x64xf32>
    %130 = arith.subf %126, %129 : vector<64x64xf32>
    %131 = math.exp %130 : vector<64x64xf32>
    %cst_53 = arith.constant dense<0.000000e+00> : vector<64xf32>
    %132 = vector.multi_reduction <add>, %131, %cst_53 [1] : vector<64x64xf32> to vector<64xf32>
    %133 = vector.shape_cast %132 : vector<64xf32> to vector<64x1xf32>
    %134 = tpu.reciprocal %133 {approx = true} : vector<64x1xf32> -> vector<64x1xf32>
    %135 = vector.broadcast %134 : vector<64x1xf32> to vector<64x64xf32>
    %136 = arith.mulf %131, %135 : vector<64x64xf32>
    %137 = arith.truncf %136 : vector<64x64xf32> to vector<64x64xbf16>
    %138 = vector.extract_strided_slice %64 {offsets = [0, 96], sizes = [64, 32], strides = [1, 1]} : vector<64x128xbf16> to vector<64x32xbf16>
    %cst_54 = arith.constant dense<0.000000e+00> : vector<64x32xf32>
    %139 = tpu.matmul %137, %138, %cst_54 {dimension_numbers = #tpu.dot_dimension_numbers<[1], [0], [0], [1], [0, 0, 1, 1], [], []>} : vector<64x64xbf16>, vector<64x32xbf16>, vector<64x32xf32> -> vector<64x32xf32>
    %c0_55 = arith.constant 0 : index
    %c96 = arith.constant 96 : index
    %140 = vector.load %arg16[%c0_55, %c96] : memref<128x128xf32, #tpu.memory_space<vmem>>, vector<64x32xf32>
    tpu.vector_store %arg16[%c0_55, %c96], %139 {strides = array<i32>} : memref<128x128xf32, #tpu.memory_space<vmem>>, vector<64x32xf32>,
    %141 = vector.extract_strided_slice %47 {offsets = [64, 0], sizes = [64, 128], strides = [1, 1]} : vector<128x128xbf16> to vector<64x128xbf16>
    %142 = vector.extract_strided_slice %60 {offsets = [64, 0], sizes = [64, 128], strides = [1, 1]} : vector<128x128xbf16> to vector<64x128xbf16>
    %143 = vector.extract_strided_slice %61 {offsets = [64, 0], sizes = [64, 128], strides = [1, 1]} : vector<128x128xbf16> to vector<64x128xbf16>
    %144 = vector.extract_strided_slice %141 {offsets = [0, 0], sizes = [64, 32], strides = [1, 1]} : vector<64x128xbf16> to vector<64x32xbf16>
    %145 = vector.extract_strided_slice %142 {offsets = [0, 0], sizes = [64, 32], strides = [1, 1]} : vector<64x128xbf16> to vector<64x32xbf16>
    %cst_56 = arith.constant dense<0.000000e+00> : vector<64x64xf32>
    %146 = tpu.matmul %144, %145, %cst_56 {dimension_numbers = #tpu.dot_dimension_numbers<[1], [1], [0], [0], [0, 0, 1, 0], [], []>} : vector<64x32xbf16>, vector<64x32xbf16>, vector<64x64xf32> -> vector<64x64xf32>
    %cst_57 = arith.constant 0.176776692 : f32
    %147 = vector.broadcast %cst_57 : f32 to vector<64x64xf32>
    %148 = arith.mulf %146, %147 : vector<64x64xf32>
    %cst_58 = arith.constant dense<0xFF800000> : vector<64xf32>
    %149 = vector.multi_reduction <maximumf>, %148, %cst_58 [1] : vector<64x64xf32> to vector<64xf32>
    %150 = vector.shape_cast %149 : vector<64xf32> to vector<64x1xf32>
    %151 = vector.broadcast %150 : vector<64x1xf32> to vector<64x64xf32>
    %152 = arith.subf %148, %151 : vector<64x64xf32>
    %153 = math.exp %152 : vector<64x64xf32>
    %cst_59 = arith.constant dense<0.000000e+00> : vector<64xf32>
    %154 = vector.multi_reduction <add>, %153, %cst_59 [1] : vector<64x64xf32> to vector<64xf32>
    %155 = vector.shape_cast %154 : vector<64xf32> to vector<64x1xf32>
    %156 = tpu.reciprocal %155 {approx = true} : vector<64x1xf32> -> vector<64x1xf32>
    %157 = vector.broadcast %156 : vector<64x1xf32> to vector<64x64xf32>
    %158 = arith.mulf %153, %157 : vector<64x64xf32>
    %159 = arith.truncf %158 : vector<64x64xf32> to vector<64x64xbf16>
    %160 = vector.extract_strided_slice %143 {offsets = [0, 0], sizes = [64, 32], strides = [1, 1]} : vector<64x128xbf16> to vector<64x32xbf16>
    %cst_60 = arith.constant dense<0.000000e+00> : vector<64x32xf32>
    %161 = tpu.matmul %159, %160, %cst_60 {dimension_numbers = #tpu.dot_dimension_numbers<[1], [0], [0], [1], [0, 0, 1, 1], [], []>} : vector<64x64xbf16>, vector<64x32xbf16>, vector<64x32xf32> -> vector<64x32xf32>
    %c64_61 = arith.constant 64 : index
    %c0_62 = arith.constant 0 : index
    %162 = vector.load %arg16[%c64_61, %c0_62] : memref<128x128xf32, #tpu.memory_space<vmem>>, vector<64x32xf32>
    tpu.vector_store %arg16[%c64_61, %c0_62], %161 {strides = array<i32>} : memref<128x128xf32, #tpu.memory_space<vmem>>, vector<64x32xf32>,
    %163 = vector.extract_strided_slice %141 {offsets = [0, 32], sizes = [64, 32], strides = [1, 1]} : vector<64x128xbf16> to vector<64x32xbf16>
    %164 = vector.extract_strided_slice %142 {offsets = [0, 32], sizes = [64, 32], strides = [1, 1]} : vector<64x128xbf16> to vector<64x32xbf16>
    %cst_63 = arith.constant dense<0.000000e+00> : vector<64x64xf32>
    %165 = tpu.matmul %163, %164, %cst_63 {dimension_numbers = #tpu.dot_dimension_numbers<[1], [1], [0], [0], [0, 0, 1, 0], [], []>} : vector<64x32xbf16>, vector<64x32xbf16>, vector<64x64xf32> -> vector<64x64xf32>
    %cst_64 = arith.constant 0.176776692 : f32
    %166 = vector.broadcast %cst_64 : f32 to vector<64x64xf32>
    %167 = arith.mulf %165, %166 : vector<64x64xf32>
    %cst_65 = arith.constant dense<0xFF800000> : vector<64xf32>
    %168 = vector.multi_reduction <maximumf>, %167, %cst_65 [1] : vector<64x64xf32> to vector<64xf32>
    %169 = vector.shape_cast %168 : vector<64xf32> to vector<64x1xf32>
    %170 = vector.broadcast %169 : vector<64x1xf32> to vector<64x64xf32>
    %171 = arith.subf %167, %170 : vector<64x64xf32>
    %172 = math.exp %171 : vector<64x64xf32>
    %cst_66 = arith.constant dense<0.000000e+00> : vector<64xf32>
    %173 = vector.multi_reduction <add>, %172, %cst_66 [1] : vector<64x64xf32> to vector<64xf32>
    %174 = vector.shape_cast %173 : vector<64xf32> to vector<64x1xf32>
    %175 = tpu.reciprocal %174 {approx = true} : vector<64x1xf32> -> vector<64x1xf32>
    %176 = vector.broadcast %175 : vector<64x1xf32> to vector<64x64xf32>
    %177 = arith.mulf %172, %176 : vector<64x64xf32>
    %178 = arith.truncf %177 : vector<64x64xf32> to vector<64x64xbf16>
    %179 = vector.extract_strided_slice %143 {offsets = [0, 32], sizes = [64, 32], strides = [1, 1]} : vector<64x128xbf16> to vector<64x32xbf16>
    %cst_67 = arith.constant dense<0.000000e+00> : vector<64x32xf32>
    %180 = tpu.matmul %178, %179, %cst_67 {dimension_numbers = #tpu.dot_dimension_numbers<[1], [0], [0], [1], [0, 0, 1, 1], [], []>} : vector<64x64xbf16>, vector<64x32xbf16>, vector<64x32xf32> -> vector<64x32xf32>
    %c64_68 = arith.constant 64 : index
    %c32_69 = arith.constant 32 : index
    %181 = vector.load %arg16[%c64_68, %c32_69] : memref<128x128xf32, #tpu.memory_space<vmem>>, vector<64x32xf32>
    tpu.vector_store %arg16[%c64_68, %c32_69], %180 {strides = array<i32>} : memref<128x128xf32, #tpu.memory_space<vmem>>, vector<64x32xf32>,
    %182 = vector.extract_strided_slice %141 {offsets = [0, 64], sizes = [64, 32], strides = [1, 1]} : vector<64x128xbf16> to vector<64x32xbf16>
    %183 = vector.extract_strided_slice %142 {offsets = [0, 64], sizes = [64, 32], strides = [1, 1]} : vector<64x128xbf16> to vector<64x32xbf16>
    %cst_70 = arith.constant dense<0.000000e+00> : vector<64x64xf32>
    %184 = tpu.matmul %182, %183, %cst_70 {dimension_numbers = #tpu.dot_dimension_numbers<[1], [1], [0], [0], [0, 0, 1, 0], [], []>} : vector<64x32xbf16>, vector<64x32xbf16>, vector<64x64xf32> -> vector<64x64xf32>
    %cst_71 = arith.constant 0.176776692 : f32
    %185 = vector.broadcast %cst_71 : f32 to vector<64x64xf32>
    %186 = arith.mulf %184, %185 : vector<64x64xf32>
    %cst_72 = arith.constant dense<0xFF800000> : vector<64xf32>
    %187 = vector.multi_reduction <maximumf>, %186, %cst_72 [1] : vector<64x64xf32> to vector<64xf32>
    %188 = vector.shape_cast %187 : vector<64xf32> to vector<64x1xf32>
    %189 = vector.broadcast %188 : vector<64x1xf32> to vector<64x64xf32>
    %190 = arith.subf %186, %189 : vector<64x64xf32>
    %191 = math.exp %190 : vector<64x64xf32>
    %cst_73 = arith.constant dense<0.000000e+00> : vector<64xf32>
    %192 = vector.multi_reduction <add>, %191, %cst_73 [1] : vector<64x64xf32> to vector<64xf32>
    %193 = vector.shape_cast %192 : vector<64xf32> to vector<64x1xf32>
    %194 = tpu.reciprocal %193 {approx = true} : vector<64x1xf32> -> vector<64x1xf32>
    %195 = vector.broadcast %194 : vector<64x1xf32> to vector<64x64xf32>
    %196 = arith.mulf %191, %195 : vector<64x64xf32>
    %197 = arith.truncf %196 : vector<64x64xf32> to vector<64x64xbf16>
    %198 = vector.extract_strided_slice %143 {offsets = [0, 64], sizes = [64, 32], strides = [1, 1]} : vector<64x128xbf16> to vector<64x32xbf16>
    %cst_74 = arith.constant dense<0.000000e+00> : vector<64x32xf32>
    %199 = tpu.matmul %197, %198, %cst_74 {dimension_numbers = #tpu.dot_dimension_numbers<[1], [0], [0], [1], [0, 0, 1, 1], [], []>} : vector<64x64xbf16>, vector<64x32xbf16>, vector<64x32xf32> -> vector<64x32xf32>
    %c64_75 = arith.constant 64 : index
    %c64_76 = arith.constant 64 : index
    %200 = vector.load %arg16[%c64_75, %c64_76] : memref<128x128xf32, #tpu.memory_space<vmem>>, vector<64x32xf32>
    tpu.vector_store %arg16[%c64_75, %c64_76], %199 {strides = array<i32>} : memref<128x128xf32, #tpu.memory_space<vmem>>, vector<64x32xf32>,
    %201 = vector.extract_strided_slice %141 {offsets = [0, 96], sizes = [64, 32], strides = [1, 1]} : vector<64x128xbf16> to vector<64x32xbf16>
    %202 = vector.extract_strided_slice %142 {offsets = [0, 96], sizes = [64, 32], strides = [1, 1]} : vector<64x128xbf16> to vector<64x32xbf16>
    %cst_77 = arith.constant dense<0.000000e+00> : vector<64x64xf32>
    %203 = tpu.matmul %201, %202, %cst_77 {dimension_numbers = #tpu.dot_dimension_numbers<[1], [1], [0], [0], [0, 0, 1, 0], [], []>} : vector<64x32xbf16>, vector<64x32xbf16>, vector<64x64xf32> -> vector<64x64xf32>
    %cst_78 = arith.constant 0.176776692 : f32
    %204 = vector.broadcast %cst_78 : f32 to vector<64x64xf32>
    %205 = arith.mulf %203, %204 : vector<64x64xf32>
    %cst_79 = arith.constant dense<0xFF800000> : vector<64xf32>
    %206 = vector.multi_reduction <maximumf>, %205, %cst_79 [1] : vector<64x64xf32> to vector<64xf32>
    %207 = vector.shape_cast %206 : vector<64xf32> to vector<64x1xf32>
    %208 = vector.broadcast %207 : vector<64x1xf32> to vector<64x64xf32>
    %209 = arith.subf %205, %208 : vector<64x64xf32>
    %210 = math.exp %209 : vector<64x64xf32>
    %cst_80 = arith.constant dense<0.000000e+00> : vector<64xf32>
    %211 = vector.multi_reduction <add>, %210, %cst_80 [1] : vector<64x64xf32> to vector<64xf32>
    %212 = vector.shape_cast %211 : vector<64xf32> to vector<64x1xf32>
    %213 = tpu.reciprocal %212 {approx = true} : vector<64x1xf32> -> vector<64x1xf32>
    %214 = vector.broadcast %213 : vector<64x1xf32> to vector<64x64xf32>
    %215 = arith.mulf %210, %214 : vector<64x64xf32>
    %216 = arith.truncf %215 : vector<64x64xf32> to vector<64x64xbf16>
    %217 = vector.extract_strided_slice %143 {offsets = [0, 96], sizes = [64, 32], strides = [1, 1]} : vector<64x128xbf16> to vector<64x32xbf16>
    %cst_81 = arith.constant dense<0.000000e+00> : vector<64x32xf32>
    %218 = tpu.matmul %216, %217, %cst_81 {dimension_numbers = #tpu.dot_dimension_numbers<[1], [0], [0], [1], [0, 0, 1, 1], [], []>} : vector<64x64xbf16>, vector<64x32xbf16>, vector<64x32xf32> -> vector<64x32xf32>
    %c64_82 = arith.constant 64 : index
    %c96_83 = arith.constant 96 : index
    %219 = vector.load %arg16[%c64_82, %c96_83] : memref<128x128xf32, #tpu.memory_space<vmem>>, vector<64x32xf32>
    tpu.vector_store %arg16[%c64_82, %c96_83], %218 {strides = array<i32>} : memref<128x128xf32, #tpu.memory_space<vmem>>, vector<64x32xf32>,
    %c0_84 = arith.constant 0 : index
    %c0_85 = arith.constant 0 : index
    %220 = vector.load %arg16[%c0_84, %c0_85] : memref<128x128xf32, #tpu.memory_space<vmem>>, vector<128x128xf32>
    %221 = arith.truncf %220 : vector<128x128xf32> to vector<128x128xbf16>
    %cst_86 = arith.constant dense<0.000000e+00> : vector<128x128xf32>
    %222 = tpu.matmul %221, %13, %cst_86 {dimension_numbers = #tpu.dot_dimension_numbers<[1], [0], [0], [1], [0, 0, 1, 1], [], []>} : vector<128x128xbf16>, vector<128x128xbf16>, vector<128x128xf32> -> vector<128x128xf32>
    %223 = arith.addf %3, %222 : vector<128x128xf32>
    %224 = arith.mulf %34, %34 : vector<128x128xf32>
    %225 = arith.truncf %224 : vector<128x128xf32> to vector<128x128xbf16>
    %cst_87 = arith.constant dense<0.000000e+00> : vector<128x128xf32>
    %226 = tpu.matmul %225, %8, %cst_87 {dimension_numbers = #tpu.dot_dimension_numbers<[1], [0], [0], [1], [0, 0, 1, 1], [], []>} : vector<128x128xbf16>, vector<128x128xbf16>, vector<128x128xf32> -> vector<128x128xf32>
    %cst_88 = arith.constant 1.1920929E-7 : f32
    %227 = vector.broadcast %cst_88 : f32 to vector<128x128xf32>
    %228 = arith.addf %226, %227 : vector<128x128xf32>
    %229 = math.rsqrt %228 : vector<128x128xf32>
    %230 = arith.mulf %34, %229 : vector<128x128xf32>
    %231 = arith.truncf %230 : vector<128x128xf32> to vector<128x128xbf16>
    %c0_89 = arith.constant 0 : index
    %c0_90 = arith.constant 0 : index
    %c0_91 = arith.constant 0 : index
    %c0_92 = arith.constant 0 : index
    %232 = vector.load %arg2[%c0_89, %c0_90, %c0_91, %c0_92] : memref<1x2x4x128xbf16, #tpu.memory_space<vmem>>, vector<1x2x4x128xbf16>
    %233 = vector.shape_cast %232 : vector<1x2x4x128xbf16> to vector<2x4x128xbf16>
    %c0_93 = arith.constant 0 : index
    %c0_94 = arith.constant 0 : index
    %c0_95 = arith.constant 0 : index
    %c0_96 = arith.constant 0 : index
    %234 = vector.load %arg3[%c0_93, %c0_94, %c0_95, %c0_96] : memref<1x2x4x128xbf16, #tpu.memory_space<vmem>>, vector<1x2x4x128xbf16>
    %235 = vector.shape_cast %234 : vector<1x2x4x128xbf16> to vector<2x4x128xbf16>
    %236 = vector.extract_strided_slice %231 {offsets = [0, 0], sizes = [64, 128], strides = [1, 1]} : vector<128x128xbf16> to vector<64x128xbf16>
    %237 = vector.extract_strided_slice %233 {offsets = [0, 0, 0], sizes = [1, 4, 128], strides = [1, 1, 1]} : vector<2x4x128xbf16> to vector<1x4x128xbf16>
    %238 = vector.shape_cast %237 : vector<1x4x128xbf16> to vector<4x128xbf16>
    %239 = vector.extract_strided_slice %235 {offsets = [0, 0, 0], sizes = [1, 4, 128], strides = [1, 1, 1]} : vector<2x4x128xbf16> to vector<1x4x128xbf16>
    %240 = vector.shape_cast %239 : vector<1x4x128xbf16> to vector<4x128xbf16>
    %241 = vector.extract_strided_slice %236 {offsets = [0, 0], sizes = [64, 32], strides = [1, 1]} : vector<64x128xbf16> to vector<64x32xbf16>
    %242 = vector.extract_strided_slice %238 {offsets = [0, 0], sizes = [4, 32], strides = [1, 1]} : vector<4x128xbf16> to vector<4x32xbf16>
    %cst_97 = arith.constant dense<0.000000e+00> : vector<64x4xf32>
    %243 = tpu.matmul %241, %242, %cst_97 {dimension_numbers = #tpu.dot_dimension_numbers<[1], [1], [0], [0], [0, 0, 1, 0], [], []>} : vector<64x32xbf16>, vector<4x32xbf16>, vector<64x4xf32> -> vector<64x4xf32>
    %cst_98 = arith.constant 0.176776692 : f32
    %244 = vector.broadcast %cst_98 : f32 to vector<64x4xf32>
    %245 = arith.mulf %243, %244 : vector<64x4xf32>
    %cst_99 = arith.constant dense<0xFF800000> : vector<64xf32>
    %246 = vector.multi_reduction <maximumf>, %245, %cst_99 [1] : vector<64x4xf32> to vector<64xf32>
    %247 = vector.shape_cast %246 : vector<64xf32> to vector<64x1xf32>
    %248 = vector.broadcast %247 : vector<64x1xf32> to vector<64x4xf32>
    %249 = arith.subf %245, %248 : vector<64x4xf32>
    %250 = math.exp %249 : vector<64x4xf32>
    %cst_100 = arith.constant dense<0.000000e+00> : vector<64xf32>
    %251 = vector.multi_reduction <add>, %250, %cst_100 [1] : vector<64x4xf32> to vector<64xf32>
    %252 = vector.shape_cast %251 : vector<64xf32> to vector<64x1xf32>
    %253 = tpu.reciprocal %252 {approx = true} : vector<64x1xf32> -> vector<64x1xf32>
    %254 = vector.broadcast %253 : vector<64x1xf32> to vector<64x4xf32>
    %255 = arith.mulf %250, %254 : vector<64x4xf32>
    %256 = arith.truncf %255 : vector<64x4xf32> to vector<64x4xbf16>
    %257 = vector.extract_strided_slice %240 {offsets = [0, 0], sizes = [4, 32], strides = [1, 1]} : vector<4x128xbf16> to vector<4x32xbf16>
    %cst_101 = arith.constant dense<0.000000e+00> : vector<64x32xf32>
    %258 = tpu.matmul %256, %257, %cst_101 {dimension_numbers = #tpu.dot_dimension_numbers<[1], [0], [0], [1], [0, 0, 1, 1], [], []>} : vector<64x4xbf16>, vector<4x32xbf16>, vector<64x32xf32> -> vector<64x32xf32>
    %c0_102 = arith.constant 0 : index
    %c0_103 = arith.constant 0 : index
    %259 = vector.load %arg16[%c0_102, %c0_103] : memref<128x128xf32, #tpu.memory_space<vmem>>, vector<64x32xf32>
    tpu.vector_store %arg16[%c0_102, %c0_103], %258 {strides = array<i32>} : memref<128x128xf32, #tpu.memory_space<vmem>>, vector<64x32xf32>,
    %260 = vector.extract_strided_slice %236 {offsets = [0, 32], sizes = [64, 32], strides = [1, 1]} : vector<64x128xbf16> to vector<64x32xbf16>
    %261 = vector.extract_strided_slice %238 {offsets = [0, 32], sizes = [4, 32], strides = [1, 1]} : vector<4x128xbf16> to vector<4x32xbf16>
    %cst_104 = arith.constant dense<0.000000e+00> : vector<64x4xf32>
    %262 = tpu.matmul %260, %261, %cst_104 {dimension_numbers = #tpu.dot_dimension_numbers<[1], [1], [0], [0], [0, 0, 1, 0], [], []>} : vector<64x32xbf16>, vector<4x32xbf16>, vector<64x4xf32> -> vector<64x4xf32>
    %cst_105 = arith.constant 0.176776692 : f32
    %263 = vector.broadcast %cst_105 : f32 to vector<64x4xf32>
    %264 = arith.mulf %262, %263 : vector<64x4xf32>
    %cst_106 = arith.constant dense<0xFF800000> : vector<64xf32>
    %265 = vector.multi_reduction <maximumf>, %264, %cst_106 [1] : vector<64x4xf32> to vector<64xf32>
    %266 = vector.shape_cast %265 : vector<64xf32> to vector<64x1xf32>
    %267 = vector.broadcast %266 : vector<64x1xf32> to vector<64x4xf32>
    %268 = arith.subf %264, %267 : vector<64x4xf32>
    %269 = math.exp %268 : vector<64x4xf32>
    %cst_107 = arith.constant dense<0.000000e+00> : vector<64xf32>
    %270 = vector.multi_reduction <add>, %269, %cst_107 [1] : vector<64x4xf32> to vector<64xf32>
    %271 = vector.shape_cast %270 : vector<64xf32> to vector<64x1xf32>
    %272 = tpu.reciprocal %271 {approx = true} : vector<64x1xf32> -> vector<64x1xf32>
    %273 = vector.broadcast %272 : vector<64x1xf32> to vector<64x4xf32>
    %274 = arith.mulf %269, %273 : vector<64x4xf32>
    %275 = arith.truncf %274 : vector<64x4xf32> to vector<64x4xbf16>
    %276 = vector.extract_strided_slice %240 {offsets = [0, 32], sizes = [4, 32], strides = [1, 1]} : vector<4x128xbf16> to vector<4x32xbf16>
    %cst_108 = arith.constant dense<0.000000e+00> : vector<64x32xf32>
    %277 = tpu.matmul %275, %276, %cst_108 {dimension_numbers = #tpu.dot_dimension_numbers<[1], [0], [0], [1], [0, 0, 1, 1], [], []>} : vector<64x4xbf16>, vector<4x32xbf16>, vector<64x32xf32> -> vector<64x32xf32>
    %c0_109 = arith.constant 0 : index
    %c32_110 = arith.constant 32 : index
    %278 = vector.load %arg16[%c0_109, %c32_110] : memref<128x128xf32, #tpu.memory_space<vmem>>, vector<64x32xf32>
    tpu.vector_store %arg16[%c0_109, %c32_110], %277 {strides = array<i32>} : memref<128x128xf32, #tpu.memory_space<vmem>>, vector<64x32xf32>,
    %279 = vector.extract_strided_slice %236 {offsets = [0, 64], sizes = [64, 32], strides = [1, 1]} : vector<64x128xbf16> to vector<64x32xbf16>
    %280 = vector.extract_strided_slice %238 {offsets = [0, 64], sizes = [4, 32], strides = [1, 1]} : vector<4x128xbf16> to vector<4x32xbf16>
    %cst_111 = arith.constant dense<0.000000e+00> : vector<64x4xf32>
    %281 = tpu.matmul %279, %280, %cst_111 {dimension_numbers = #tpu.dot_dimension_numbers<[1], [1], [0], [0], [0, 0, 1, 0], [], []>} : vector<64x32xbf16>, vector<4x32xbf16>, vector<64x4xf32> -> vector<64x4xf32>
    %cst_112 = arith.constant 0.176776692 : f32
    %282 = vector.broadcast %cst_112 : f32 to vector<64x4xf32>
    %283 = arith.mulf %281, %282 : vector<64x4xf32>
    %cst_113 = arith.constant dense<0xFF800000> : vector<64xf32>
    %284 = vector.multi_reduction <maximumf>, %283, %cst_113 [1] : vector<64x4xf32> to vector<64xf32>
    %285 = vector.shape_cast %284 : vector<64xf32> to vector<64x1xf32>
    %286 = vector.broadcast %285 : vector<64x1xf32> to vector<64x4xf32>
    %287 = arith.subf %283, %286 : vector<64x4xf32>
    %288 = math.exp %287 : vector<64x4xf32>
    %cst_114 = arith.constant dense<0.000000e+00> : vector<64xf32>
    %289 = vector.multi_reduction <add>, %288, %cst_114 [1] : vector<64x4xf32> to vector<64xf32>
    %290 = vector.shape_cast %289 : vector<64xf32> to vector<64x1xf32>
    %291 = tpu.reciprocal %290 {approx = true} : vector<64x1xf32> -> vector<64x1xf32>
    %292 = vector.broadcast %291 : vector<64x1xf32> to vector<64x4xf32>
    %293 = arith.mulf %288, %292 : vector<64x4xf32>
    %294 = arith.truncf %293 : vector<64x4xf32> to vector<64x4xbf16>
    %295 = vector.extract_strided_slice %240 {offsets = [0, 64], sizes = [4, 32], strides = [1, 1]} : vector<4x128xbf16> to vector<4x32xbf16>
    %cst_115 = arith.constant dense<0.000000e+00> : vector<64x32xf32>
    %296 = tpu.matmul %294, %295, %cst_115 {dimension_numbers = #tpu.dot_dimension_numbers<[1], [0], [0], [1], [0, 0, 1, 1], [], []>} : vector<64x4xbf16>, vector<4x32xbf16>, vector<64x32xf32> -> vector<64x32xf32>
    %c0_116 = arith.constant 0 : index
    %c64_117 = arith.constant 64 : index
    %297 = vector.load %arg16[%c0_116, %c64_117] : memref<128x128xf32, #tpu.memory_space<vmem>>, vector<64x32xf32>
    tpu.vector_store %arg16[%c0_116, %c64_117], %296 {strides = array<i32>} : memref<128x128xf32, #tpu.memory_space<vmem>>, vector<64x32xf32>,
    %298 = vector.extract_strided_slice %236 {offsets = [0, 96], sizes = [64, 32], strides = [1, 1]} : vector<64x128xbf16> to vector<64x32xbf16>
    %299 = vector.extract_strided_slice %238 {offsets = [0, 96], sizes = [4, 32], strides = [1, 1]} : vector<4x128xbf16> to vector<4x32xbf16>
    %cst_118 = arith.constant dense<0.000000e+00> : vector<64x4xf32>
    %300 = tpu.matmul %298, %299, %cst_118 {dimension_numbers = #tpu.dot_dimension_numbers<[1], [1], [0], [0], [0, 0, 1, 0], [], []>} : vector<64x32xbf16>, vector<4x32xbf16>, vector<64x4xf32> -> vector<64x4xf32>
    %cst_119 = arith.constant 0.176776692 : f32
    %301 = vector.broadcast %cst_119 : f32 to vector<64x4xf32>
    %302 = arith.mulf %300, %301 : vector<64x4xf32>
    %cst_120 = arith.constant dense<0xFF800000> : vector<64xf32>
    %303 = vector.multi_reduction <maximumf>, %302, %cst_120 [1] : vector<64x4xf32> to vector<64xf32>
    %304 = vector.shape_cast %303 : vector<64xf32> to vector<64x1xf32>
    %305 = vector.broadcast %304 : vector<64x1xf32> to vector<64x4xf32>
    %306 = arith.subf %302, %305 : vector<64x4xf32>
    %307 = math.exp %306 : vector<64x4xf32>
    %cst_121 = arith.constant dense<0.000000e+00> : vector<64xf32>
    %308 = vector.multi_reduction <add>, %307, %cst_121 [1] : vector<64x4xf32> to vector<64xf32>
    %309 = vector.shape_cast %308 : vector<64xf32> to vector<64x1xf32>
    %310 = tpu.reciprocal %309 {approx = true} : vector<64x1xf32> -> vector<64x1xf32>
    %311 = vector.broadcast %310 : vector<64x1xf32> to vector<64x4xf32>
    %312 = arith.mulf %307, %311 : vector<64x4xf32>
    %313 = arith.truncf %312 : vector<64x4xf32> to vector<64x4xbf16>
    %314 = vector.extract_strided_slice %240 {offsets = [0, 96], sizes = [4, 32], strides = [1, 1]} : vector<4x128xbf16> to vector<4x32xbf16>
    %cst_122 = arith.constant dense<0.000000e+00> : vector<64x32xf32>
    %315 = tpu.matmul %313, %314, %cst_122 {dimension_numbers = #tpu.dot_dimension_numbers<[1], [0], [0], [1], [0, 0, 1, 1], [], []>} : vector<64x4xbf16>, vector<4x32xbf16>, vector<64x32xf32> -> vector<64x32xf32>
    %c0_123 = arith.constant 0 : index
    %c96_124 = arith.constant 96 : index
    %316 = vector.load %arg16[%c0_123, %c96_124] : memref<128x128xf32, #tpu.memory_space<vmem>>, vector<64x32xf32>
    tpu.vector_store %arg16[%c0_123, %c96_124], %315 {strides = array<i32>} : memref<128x128xf32, #tpu.memory_space<vmem>>, vector<64x32xf32>,
    %317 = vector.extract_strided_slice %231 {offsets = [64, 0], sizes = [64, 128], strides = [1, 1]} : vector<128x128xbf16> to vector<64x128xbf16>
    %318 = vector.extract_strided_slice %233 {offsets = [1, 0, 0], sizes = [1, 4, 128], strides = [1, 1, 1]} : vector<2x4x128xbf16> to vector<1x4x128xbf16>
    %319 = vector.shape_cast %318 : vector<1x4x128xbf16> to vector<4x128xbf16>
    %320 = vector.extract_strided_slice %235 {offsets = [1, 0, 0], sizes = [1, 4, 128], strides = [1, 1, 1]} : vector<2x4x128xbf16> to vector<1x4x128xbf16>
    %321 = vector.shape_cast %320 : vector<1x4x128xbf16> to vector<4x128xbf16>
    %322 = vector.extract_strided_slice %317 {offsets = [0, 0], sizes = [64, 32], strides = [1, 1]} : vector<64x128xbf16> to vector<64x32xbf16>
    %323 = vector.extract_strided_slice %319 {offsets = [0, 0], sizes = [4, 32], strides = [1, 1]} : vector<4x128xbf16> to vector<4x32xbf16>
    %cst_125 = arith.constant dense<0.000000e+00> : vector<64x4xf32>
    %324 = tpu.matmul %322, %323, %cst_125 {dimension_numbers = #tpu.dot_dimension_numbers<[1], [1], [0], [0], [0, 0, 1, 0], [], []>} : vector<64x32xbf16>, vector<4x32xbf16>, vector<64x4xf32> -> vector<64x4xf32>
    %cst_126 = arith.constant 0.176776692 : f32
    %325 = vector.broadcast %cst_126 : f32 to vector<64x4xf32>
    %326 = arith.mulf %324, %325 : vector<64x4xf32>
    %cst_127 = arith.constant dense<0xFF800000> : vector<64xf32>
    %327 = vector.multi_reduction <maximumf>, %326, %cst_127 [1] : vector<64x4xf32> to vector<64xf32>
    %328 = vector.shape_cast %327 : vector<64xf32> to vector<64x1xf32>
    %329 = vector.broadcast %328 : vector<64x1xf32> to vector<64x4xf32>
    %330 = arith.subf %326, %329 : vector<64x4xf32>
    %331 = math.exp %330 : vector<64x4xf32>
    %cst_128 = arith.constant dense<0.000000e+00> : vector<64xf32>
    %332 = vector.multi_reduction <add>, %331, %cst_128 [1] : vector<64x4xf32> to vector<64xf32>
    %333 = vector.shape_cast %332 : vector<64xf32> to vector<64x1xf32>
    %334 = tpu.reciprocal %333 {approx = true} : vector<64x1xf32> -> vector<64x1xf32>
    %335 = vector.broadcast %334 : vector<64x1xf32> to vector<64x4xf32>
    %336 = arith.mulf %331, %335 : vector<64x4xf32>
    %337 = arith.truncf %336 : vector<64x4xf32> to vector<64x4xbf16>
    %338 = vector.extract_strided_slice %321 {offsets = [0, 0], sizes = [4, 32], strides = [1, 1]} : vector<4x128xbf16> to vector<4x32xbf16>
    %cst_129 = arith.constant dense<0.000000e+00> : vector<64x32xf32>
    %339 = tpu.matmul %337, %338, %cst_129 {dimension_numbers = #tpu.dot_dimension_numbers<[1], [0], [0], [1], [0, 0, 1, 1], [], []>} : vector<64x4xbf16>, vector<4x32xbf16>, vector<64x32xf32> -> vector<64x32xf32>
    %c64_130 = arith.constant 64 : index
    %c0_131 = arith.constant 0 : index
    %340 = vector.load %arg16[%c64_130, %c0_131] : memref<128x128xf32, #tpu.memory_space<vmem>>, vector<64x32xf32>
    tpu.vector_store %arg16[%c64_130, %c0_131], %339 {strides = array<i32>} : memref<128x128xf32, #tpu.memory_space<vmem>>, vector<64x32xf32>,
    %341 = vector.extract_strided_slice %317 {offsets = [0, 32], sizes = [64, 32], strides = [1, 1]} : vector<64x128xbf16> to vector<64x32xbf16>
    %342 = vector.extract_strided_slice %319 {offsets = [0, 32], sizes = [4, 32], strides = [1, 1]} : vector<4x128xbf16> to vector<4x32xbf16>
    %cst_132 = arith.constant dense<0.000000e+00> : vector<64x4xf32>
    %343 = tpu.matmul %341, %342, %cst_132 {dimension_numbers = #tpu.dot_dimension_numbers<[1], [1], [0], [0], [0, 0, 1, 0], [], []>} : vector<64x32xbf16>, vector<4x32xbf16>, vector<64x4xf32> -> vector<64x4xf32>
    %cst_133 = arith.constant 0.176776692 : f32
    %344 = vector.broadcast %cst_133 : f32 to vector<64x4xf32>
    %345 = arith.mulf %343, %344 : vector<64x4xf32>
    %cst_134 = arith.constant dense<0xFF800000> : vector<64xf32>
    %346 = vector.multi_reduction <maximumf>, %345, %cst_134 [1] : vector<64x4xf32> to vector<64xf32>
    %347 = vector.shape_cast %346 : vector<64xf32> to vector<64x1xf32>
    %348 = vector.broadcast %347 : vector<64x1xf32> to vector<64x4xf32>
    %349 = arith.subf %345, %348 : vector<64x4xf32>
    %350 = math.exp %349 : vector<64x4xf32>
    %cst_135 = arith.constant dense<0.000000e+00> : vector<64xf32>
    %351 = vector.multi_reduction <add>, %350, %cst_135 [1] : vector<64x4xf32> to vector<64xf32>
    %352 = vector.shape_cast %351 : vector<64xf32> to vector<64x1xf32>
    %353 = tpu.reciprocal %352 {approx = true} : vector<64x1xf32> -> vector<64x1xf32>
    %354 = vector.broadcast %353 : vector<64x1xf32> to vector<64x4xf32>
    %355 = arith.mulf %350, %354 : vector<64x4xf32>
    %356 = arith.truncf %355 : vector<64x4xf32> to vector<64x4xbf16>
    %357 = vector.extract_strided_slice %321 {offsets = [0, 32], sizes = [4, 32], strides = [1, 1]} : vector<4x128xbf16> to vector<4x32xbf16>
    %cst_136 = arith.constant dense<0.000000e+00> : vector<64x32xf32>
    %358 = tpu.matmul %356, %357, %cst_136 {dimension_numbers = #tpu.dot_dimension_numbers<[1], [0], [0], [1], [0, 0, 1, 1], [], []>} : vector<64x4xbf16>, vector<4x32xbf16>, vector<64x32xf32> -> vector<64x32xf32>
    %c64_137 = arith.constant 64 : index
    %c32_138 = arith.constant 32 : index
    %359 = vector.load %arg16[%c64_137, %c32_138] : memref<128x128xf32, #tpu.memory_space<vmem>>, vector<64x32xf32>
    tpu.vector_store %arg16[%c64_137, %c32_138], %358 {strides = array<i32>} : memref<128x128xf32, #tpu.memory_space<vmem>>, vector<64x32xf32>,
    %360 = vector.extract_strided_slice %317 {offsets = [0, 64], sizes = [64, 32], strides = [1, 1]} : vector<64x128xbf16> to vector<64x32xbf16>
    %361 = vector.extract_strided_slice %319 {offsets = [0, 64], sizes = [4, 32], strides = [1, 1]} : vector<4x128xbf16> to vector<4x32xbf16>
    %cst_139 = arith.constant dense<0.000000e+00> : vector<64x4xf32>
    %362 = tpu.matmul %360, %361, %cst_139 {dimension_numbers = #tpu.dot_dimension_numbers<[1], [1], [0], [0], [0, 0, 1, 0], [], []>} : vector<64x32xbf16>, vector<4x32xbf16>, vector<64x4xf32> -> vector<64x4xf32>
    %cst_140 = arith.constant 0.176776692 : f32
    %363 = vector.broadcast %cst_140 : f32 to vector<64x4xf32>
    %364 = arith.mulf %362, %363 : vector<64x4xf32>
    %cst_141 = arith.constant dense<0xFF800000> : vector<64xf32>
    %365 = vector.multi_reduction <maximumf>, %364, %cst_141 [1] : vector<64x4xf32> to vector<64xf32>
    %366 = vector.shape_cast %365 : vector<64xf32> to vector<64x1xf32>
    %367 = vector.broadcast %366 : vector<64x1xf32> to vector<64x4xf32>
    %368 = arith.subf %364, %367 : vector<64x4xf32>
    %369 = math.exp %368 : vector<64x4xf32>
    %cst_142 = arith.constant dense<0.000000e+00> : vector<64xf32>
    %370 = vector.multi_reduction <add>, %369, %cst_142 [1] : vector<64x4xf32> to vector<64xf32>
    %371 = vector.shape_cast %370 : vector<64xf32> to vector<64x1xf32>
    %372 = tpu.reciprocal %371 {approx = true} : vector<64x1xf32> -> vector<64x1xf32>
    %373 = vector.broadcast %372 : vector<64x1xf32> to vector<64x4xf32>
    %374 = arith.mulf %369, %373 : vector<64x4xf32>
    %375 = arith.truncf %374 : vector<64x4xf32> to vector<64x4xbf16>
    %376 = vector.extract_strided_slice %321 {offsets = [0, 64], sizes = [4, 32], strides = [1, 1]} : vector<4x128xbf16> to vector<4x32xbf16>
    %cst_143 = arith.constant dense<0.000000e+00> : vector<64x32xf32>
    %377 = tpu.matmul %375, %376, %cst_143 {dimension_numbers = #tpu.dot_dimension_numbers<[1], [0], [0], [1], [0, 0, 1, 1], [], []>} : vector<64x4xbf16>, vector<4x32xbf16>, vector<64x32xf32> -> vector<64x32xf32>
    %c64_144 = arith.constant 64 : index
    %c64_145 = arith.constant 64 : index
    %378 = vector.load %arg16[%c64_144, %c64_145] : memref<128x128xf32, #tpu.memory_space<vmem>>, vector<64x32xf32>
    tpu.vector_store %arg16[%c64_144, %c64_145], %377 {strides = array<i32>} : memref<128x128xf32, #tpu.memory_space<vmem>>, vector<64x32xf32>,
    %379 = vector.extract_strided_slice %317 {offsets = [0, 96], sizes = [64, 32], strides = [1, 1]} : vector<64x128xbf16> to vector<64x32xbf16>
    %380 = vector.extract_strided_slice %319 {offsets = [0, 96], sizes = [4, 32], strides = [1, 1]} : vector<4x128xbf16> to vector<4x32xbf16>
    %cst_146 = arith.constant dense<0.000000e+00> : vector<64x4xf32>
    %381 = tpu.matmul %379, %380, %cst_146 {dimension_numbers = #tpu.dot_dimension_numbers<[1], [1], [0], [0], [0, 0, 1, 0], [], []>} : vector<64x32xbf16>, vector<4x32xbf16>, vector<64x4xf32> -> vector<64x4xf32>
    %cst_147 = arith.constant 0.176776692 : f32
    %382 = vector.broadcast %cst_147 : f32 to vector<64x4xf32>
    %383 = arith.mulf %381, %382 : vector<64x4xf32>
    %cst_148 = arith.constant dense<0xFF800000> : vector<64xf32>
    %384 = vector.multi_reduction <maximumf>, %383, %cst_148 [1] : vector<64x4xf32> to vector<64xf32>
    %385 = vector.shape_cast %384 : vector<64xf32> to vector<64x1xf32>
    %386 = vector.broadcast %385 : vector<64x1xf32> to vector<64x4xf32>
    %387 = arith.subf %383, %386 : vector<64x4xf32>
    %388 = math.exp %387 : vector<64x4xf32>
    %cst_149 = arith.constant dense<0.000000e+00> : vector<64xf32>
    %389 = vector.multi_reduction <add>, %388, %cst_149 [1] : vector<64x4xf32> to vector<64xf32>
    %390 = vector.shape_cast %389 : vector<64xf32> to vector<64x1xf32>
    %391 = tpu.reciprocal %390 {approx = true} : vector<64x1xf32> -> vector<64x1xf32>
    %392 = vector.broadcast %391 : vector<64x1xf32> to vector<64x4xf32>
    %393 = arith.mulf %388, %392 : vector<64x4xf32>
    %394 = arith.truncf %393 : vector<64x4xf32> to vector<64x4xbf16>
    %395 = vector.extract_strided_slice %321 {offsets = [0, 96], sizes = [4, 32], strides = [1, 1]} : vector<4x128xbf16> to vector<4x32xbf16>
    %cst_150 = arith.constant dense<0.000000e+00> : vector<64x32xf32>
    %396 = tpu.matmul %394, %395, %cst_150 {dimension_numbers = #tpu.dot_dimension_numbers<[1], [0], [0], [1], [0, 0, 1, 1], [], []>} : vector<64x4xbf16>, vector<4x32xbf16>, vector<64x32xf32> -> vector<64x32xf32>
    %c64_151 = arith.constant 64 : index
    %c96_152 = arith.constant 96 : index
    %397 = vector.load %arg16[%c64_151, %c96_152] : memref<128x128xf32, #tpu.memory_space<vmem>>, vector<64x32xf32>
    tpu.vector_store %arg16[%c64_151, %c96_152], %396 {strides = array<i32>} : memref<128x128xf32, #tpu.memory_space<vmem>>, vector<64x32xf32>,
    %c0_153 = arith.constant 0 : index
    %c0_154 = arith.constant 0 : index
    %398 = vector.load %arg16[%c0_153, %c0_154] : memref<128x128xf32, #tpu.memory_space<vmem>>, vector<128x128xf32>
    %399 = arith.truncf %398 : vector<128x128xf32> to vector<128x128xbf16>
    %cst_155 = arith.constant dense<0.000000e+00> : vector<128x128xf32>
    %400 = tpu.matmul %399, %15, %cst_155 {dimension_numbers = #tpu.dot_dimension_numbers<[1], [0], [0], [1], [0, 0, 1, 1], [], []>} : vector<128x128xbf16>, vector<128x128xbf16>, vector<128x128xf32> -> vector<128x128xf32>
    %401 = arith.addf %223, %400 : vector<128x128xf32>
    %cst_156 = arith.constant 0.000000e+00 : f32
    %402 = vector.broadcast %cst_156 : f32 to vector<128x512xf32>
    %403 = arith.maximumf %33, %402 : vector<128x512xf32>
    %404 = arith.mulf %403, %403 : vector<128x512xf32>
    %405 = arith.truncf %404 : vector<128x512xf32> to vector<128x512xbf16>
    %cst_157 = arith.constant dense<0.000000e+00> : vector<128x128xf32>
    %406 = tpu.matmul %405, %17, %cst_157 {dimension_numbers = #tpu.dot_dimension_numbers<[1], [0], [0], [1], [0, 0, 1, 1], [], []>} : vector<128x512xbf16>, vector<512x128xbf16>, vector<128x128xf32> -> vector<128x128xf32>
    %407 = arith.addf %401, %406 : vector<128x128xf32>
    %c0_158 = arith.constant 0 : index
    %c0_159 = arith.constant 0 : index
    %408 = vector.load %arg15[%c0_158, %c0_159] : memref<128x128xf32, #tpu.memory_space<vmem>>, vector<128x128xf32>
    tpu.vector_store %arg15[%c0_158, %c0_159], %407 {strides = array<i32>} : memref<128x128xf32, #tpu.memory_space<vmem>>, vector<128x128xf32>,
    %c1_i32 = arith.constant 1 : i32
    %409 = arith.cmpi eq, %arg0, %c1_i32 : i32
    %410 = arith.extui %409 : i1 to i32
    %c0_i32_160 = arith.constant 0 : i32
    %411 = arith.cmpi ne, %410, %c0_i32_160 : i32
    scf.if %411 {
      %412 = arith.mulf %407, %407 : vector<128x128xf32>
      %cst_161 = arith.constant dense<0.000000e+00> : vector<128xf32>
      %413 = vector.multi_reduction <add>, %412, %cst_161 [1] : vector<128x128xf32> to vector<128xf32>
      %414 = vector.shape_cast %413 : vector<128xf32> to vector<128x1xf32>
      %cst_162 = arith.constant 1.280000e+02 : f32
      %415 = vector.broadcast %cst_162 : f32 to vector<128x1xf32>
      %416 = arith.divf %414, %415 : vector<128x1xf32>
      %cst_163 = arith.constant 1.1920929E-7 : f32
      %417 = vector.broadcast %cst_163 : f32 to vector<128x1xf32>
      %418 = arith.addf %416, %417 : vector<128x1xf32>
      %419 = math.rsqrt %418 : vector<128x1xf32>
      %420 = vector.broadcast %419 : vector<128x1xf32> to vector<128x128xf32>
      %421 = arith.mulf %407, %420 : vector<128x128xf32>
      %c0_164 = arith.constant 0 : index
      %c0_165 = arith.constant 0 : index
      %422 = vector.load %arg12[%c0_164, %c0_165] : memref<1x128xf32, #tpu.memory_space<vmem>>, vector<1x128xf32>
      %cst_166 = arith.constant dense<0.000000e+00> : vector<1x128xf32>
      %423 = tpu.matmul %422, %421, %cst_166 {dimension_numbers = #tpu.dot_dimension_numbers<[1], [1], [0], [0], [0, 0, 1, 0], [], []>} : vector<1x128xf32>, vector<128x128xf32>, vector<1x128xf32> -> vector<1x128xf32>
      %c0_167 = arith.constant 0 : index
      %c0_168 = arith.constant 0 : index
      %424 = memref.load %arg13[%c0_167, %c0_168] : memref<1x1xf32, #tpu.memory_space<smem>>
      %425 = vector.broadcast %424 : f32 to vector<1x128xf32>
      %426 = arith.addf %423, %425 : vector<1x128xf32>
      %c0_169 = arith.constant 0 : index
      %c0_170 = arith.constant 0 : index
      %427 = vector.load %arg14[%c0_169, %c0_170] : memref<1x128xf32, #tpu.memory_space<vmem>>, vector<1x128xf32>
      tpu.vector_store %arg14[%c0_169, %c0_170], %426 {strides = array<i32>} : memref<1x128xf32, #tpu.memory_space<vmem>>, vector<1x128xf32>,
    } else {
    }
    return
  }
  func.func @transform_0(%arg0: i32) -> (i32, i32) {
    %c0_i32 = arith.constant 0 : i32
    %c0_i32_0 = arith.constant 0 : i32
    %c0_i32_1 = arith.constant 0 : i32
    return %c0_i32, %c0_i32_0 : i32, i32
  }
  func.func @transform_1(%arg0: i32) -> (i32, i32, i32, i32) {
    %c0_i32 = arith.constant 0 : i32
    %c0_i32_0 = arith.constant 0 : i32
    %c0_i32_1 = arith.constant 0 : i32
    %c0_i32_2 = arith.constant 0 : i32
    return %arg0, %c0_i32, %c0_i32_0, %c0_i32_1 : i32, i32, i32, i32
  }
  func.func @transform_2(%arg0: i32) -> (i32, i32, i32, i32) {
    %c0_i32 = arith.constant 0 : i32
    %c0_i32_0 = arith.constant 0 : i32
    %c0_i32_1 = arith.constant 0 : i32
    %c0_i32_2 = arith.constant 0 : i32
    return %arg0, %c0_i32, %c0_i32_0, %c0_i32_1 : i32, i32, i32, i32
  }
  func.func @transform_3(%arg0: i32) -> (i32, i32) {
    %c0_i32 = arith.constant 0 : i32
    %c0_i32_0 = arith.constant 0 : i32
    %c0_i32_1 = arith.constant 0 : i32
    return %c0_i32, %c0_i32_0 : i32, i32
  }
  func.func @transform_4(%arg0: i32) -> (i32, i32) {
    %c0_i32 = arith.constant 0 : i32
    %c0_i32_0 = arith.constant 0 : i32
    %c0_i32_1 = arith.constant 0 : i32
    return %c0_i32, %c0_i32_0 : i32, i32
  }
  func.func @transform_5(%arg0: i32) -> (i32, i32) {
    %c0_i32 = arith.constant 0 : i32
    %c0_i32_0 = arith.constant 0 : i32
    %c0_i32_1 = arith.constant 0 : i32
    return %c0_i32, %c0_i32_0 : i32, i32
  }
  func.func @transform_6(%arg0: i32) -> (i32, i32) {
    %c0_i32 = arith.constant 0 : i32
    %c0_i32_0 = arith.constant 0 : i32
    %c0_i32_1 = arith.constant 0 : i32
    return %c0_i32, %c0_i32_0 : i32, i32
  }
  func.func @transform_7(%arg0: i32) -> (i32, i32, i32) {
    %c0_i32 = arith.constant 0 : i32
    %c0_i32_0 = arith.constant 0 : i32
    %c0_i32_1 = arith.constant 0 : i32
    return %arg0, %c0_i32, %c0_i32_0 : i32, i32, i32
  }
  func.func @transform_8(%arg0: i32) -> (i32, i32, i32) {
    %c0_i32 = arith.constant 0 : i32
    %c0_i32_0 = arith.constant 0 : i32
    %c0_i32_1 = arith.constant 0 : i32
    return %arg0, %c0_i32, %c0_i32_0 : i32, i32, i32
  }
  func.func @transform_9(%arg0: i32) -> (i32, i32, i32) {
    %c0_i32 = arith.constant 0 : i32
    %c0_i32_0 = arith.constant 0 : i32
    %c0_i32_1 = arith.constant 0 : i32
    return %arg0, %c0_i32, %c0_i32_0 : i32, i32, i32
  }
  func.func @transform_10(%arg0: i32) -> (i32, i32, i32) {
    %c0_i32 = arith.constant 0 : i32
    %c0_i32_0 = arith.constant 0 : i32
    %c0_i32_1 = arith.constant 0 : i32
    return %arg0, %c0_i32, %c0_i32_0 : i32, i32, i32
  }
  func.func @transform_11(%arg0: i32) -> (i32, i32) {
    %c0_i32 = arith.constant 0 : i32
    %c0_i32_0 = arith.constant 0 : i32
    %c0_i32_1 = arith.constant 0 : i32
    return %c0_i32, %c0_i32_0 : i32, i32
  }
  func.func @transform_12(%arg0: i32) -> (i32, i32) {
    %c0_i32 = arith.constant 0 : i32
    %c0_i32_0 = arith.constant 0 : i32
    %c0_i32_1 = arith.constant 0 : i32
    return %c0_i32, %c0_i32_0 : i32, i32
  }
  func.func @transform_13(%arg0: i32) -> (i32, i32) {
    %c0_i32 = arith.constant 0 : i32
    %c0_i32_0 = arith.constant 0 : i32
    %c0_i32_1 = arith.constant 0 : i32
    return %c0_i32, %c0_i32_0 : i32, i32
  }
}

</mosaic_0001>

<bundles_post_ra>
// kernel: tpu_custom_call.1
= control target key start
LH: loop header
LB: loop body
LE: loop exit
PB: predicated region body
PF: predicated region fallthrough
CT: control target
= control target key end

     0   :  { %s15681_s0 = inlined_call_operand.hbm [shape: f32[128,128], index: 0, kind: input, shape index: {}]   ;;  %s15682_s1 = inlined_call_operand.hbm [shape: bf16[2,2,4,128], index: 1, kind: input, shape index: {}]   ;;  %s15683_s2 = inlined_call_operand.hbm [shape: bf16[2,2,4,128], index: 2, kind: input, shape index: {}]   ;;  %s15684_s3 = inlined_call_operand.hbm [shape: bf16[128,128], index: 3, kind: input, shape index: {}]   ;;  %s15685_s4 = inlined_call_operand.hbm [shape: bf16[128,128], index: 4, kind: input, shape index: {}]   ;;  %s15686_s5 = inlined_call_operand.hbm [shape: bf16[128,128], index: 5, kind: input, shape index: {}]   ;;  %s15687_s6 = inlined_call_operand.hbm [shape: bf16[128,128], index: 6, kind: input, shape index: {}]   ;;  %s15688_s7 = inlined_call_operand.hbm [shape: bf16[2,128,1024], index: 7, kind: input, shape index: {}]   ;;  %s15689_s8 = inlined_call_operand.hbm [shape: bf16[2,128,128], index: 8, kind: input, shape index: {}]   ;;  %s15690_s9 = inlined_call_operand.hbm [shape: bf16[2,128,128], index: 9, kind: input, shape index: {}]   ;;  %s15691_s10 = inlined_call_operand.hbm [shape: bf16[2,512,128], index: 10, kind: input, shape index: {}]   ;;  %s15692_s11 = inlined_call_operand.vmem [shape: f32[1,128], index: 11, kind: input, shape index: {}]   ;;  %s15693_s12 = inlined_call_operand.<no memory space> [shape: f32[1,1], index: 12, kind: input, shape index: {}]   ;;  %s15694_s13 = inlined_call_operand.hbm [shape: f32[1,128], index: 13, kind: output, shape index: {}]  }
   0x1   :  { %15813 = sst [smem:[#allocation142_spill]] %s15682_s1 }
   0x2   :  { %15814 = sst [smem:[#allocation143_spill]] %s15684_s3 }
   0x3   :  { %15815 = sst [smem:[#allocation144_spill]] %s15686_s5 }
   0x4   :  { %15816 = sst [smem:[#allocation145_spill]] %s15688_s7 }
   0x5   :  { %15817 = sst [smem:[#allocation146_spill]] %s15691_s10 }
   0x6   :  { %15818 = sst [smem:[#allocation147_spill]] %s15692_s11 }
   0x7   :  { %15819 = sst [smem:[#allocation148_spill]] %s15694_s13 }
   0x8   :  { %18 = sst [smem:[#allocation4]] %s15693_s12 }
   0x9   :  { %19 = vsyncpa [#allocation6], 0 }
   0xa   :  { %20 = vsyncpa [#allocation9], 0 }
   0xb   :  { %22 = vsyncpa [#allocation9 + $0x1], 0 }
   0xc   :  { %23 = vsyncpa [#allocation12], 0 }
   0xd   :  { %24 = vsyncpa [#allocation15], 0 }
   0xe   :  { %25 = vsyncpa [#allocation18], 0 }
   0xf   :  { %27 = vsyncpa [#allocation18 + $0x1], 0 }
  0x10   :  { %28 = vsyncpa [#allocation21], 0 }
  0x11   :  { %30 = vsyncpa [#allocation21 + $0x1], 0 }
  0x12   :  { %31 = vsyncpa [#allocation7], 0  ;;  %s10770_s27 = smov 0   ;;  %s10772_s28 = smov 0  }
  0x13   :  { %s10774_s29 = smov 0   ;;  %s10776_s30 = smov 0  }
  0x14 LB: > { %15820 = sst [smem:[#allocation31_spill]] %s10670_s28  ;;  %s10789_s12 = sadd.s32 4294967295, %s10678_s30   ;;  %s10678_s30 = sphi %s10776_s30, %s16213_s30   ;;  %s10674_s29 = sphi %s10774_s29, %s16216_s29   ;;  %s10670_s28 = sphi %s10772_s28, %s16215_s28   ;;  %s10666_s27 = sphi %s10770_s27, %s16214_s27  }
  0x15   : > { %15821 = sst [smem:[#allocation32_spill]] %s10674_s29  ;;  %p78_p0 = scmp.ne.s32.totalorder %s10670_s28, %s10666_s27 }
  0x16   : > { %15822 = sst [smem:[#allocation33_spill]] %s10789_s12  ;;  %p79_p1 = scmp.eq.s32.totalorder %s10789_s12, 0 }
  0x17   : > { %p8520_p2 = scmp.ge.s32.totalorder %s10678_s30, 1  ;;  %p366_p3 = scmp.lt.s32.totalorder %s10678_s30, 3 }
  0x18   : > { %p8521_p4 = scmp.ne.s32.totalorder %s10789_s12, 0  ;;  %p10798_p5 = por %p79_p1, %p78_p0 }
  0x19   : > { %s15825_s3 = sld [smem:[#allocation143_spill]]  ;;  %p10805_p6 = pnand %p8520_p2, %p366_p3 }
  0x1a   : > { %s15823_s14 = scalar_select %p10798_p5, 1, 0 }
  0x1b   : > { %s15826_s18 = scalar_select %p10805_p6, 1, 0 }
  0x1c   : > { %15824 = sst [smem:[#allocation34_spill]] %s15823_s14  ;;  %p9467_p7 = pneg %p10805_p6 }
  0x1d   : > { %15827 = sst [smem:[#allocation35_spill]] %s15826_s18  ;;  %s10680_s19 = smov [#allocation11]  }
  0x1e   : > { %s393_s20 = sshll.u32 %s10680_s19, 4  ;;  %p10813_p8 = pnand %p9467_p7, %p79_p1  ;;  %s394_s20 = int_to_ptr.vmem [resolvable:$true] %s393_s20 }
  0x1f   : > { %s391_s17 = sshll.u32 %s15825_s3, 4  ;;  %s15829_s5 = sld [smem:[#allocation144_spill]]  ;;  %s392_s17 = int_to_ptr.hbm [resolvable:$true] %s391_s17 }
  0x20   : > { %s15695_s25 = smov 64   ;;  %s15697_s26 = smov 4  }
  0x21   : > { %9473 = dma.hbm_to_vmem [thread:$0]  (!%p10813_p8), %s392_s17, 1024, %s394_s20, [#allocation12], %s15695_s25, %s15695_s25, %s15697_s26  }
  0x22   : > { %s10683_s27 = smov [#allocation14]   ;;  %s10831_s16 = sadd.s32 1, %s10678_s30  }
  0x23   : > { %s421_s15 = sshll.u32 %s10683_s27, 4  ;;  %15830 = sst [smem:[#allocation36_spill]] %s10831_s16  ;;  %s422_s15 = int_to_ptr.vmem [resolvable:$true] %s421_s15 }
  0x24   : > { %s65_s19 = sadd.s32 1, %s10674_s29  ;;  %s62_s22 = ssub.s32 %s10678_s30, %s10831_s16 }
  0x25   : > { %s419_s24 = sshll.u32 %s15829_s5, 4  ;;  %p72_p9 = scmp.ne.s32.totalorder %s10674_s29, %s10670_s28  ;;  %s420_s24 = int_to_ptr.hbm [resolvable:$true] %s419_s24 }
  0x26   : > { %9479 = dma.hbm_to_vmem [thread:$0]  (!%p10813_p8), %s420_s24, 1024, %s422_s15, [#allocation15], %s15695_s25, %s15695_s25, %s15697_s26  }
  0x27   : > { %p63_p10 = scmp.eq.s32.totalorder %s62_s22, 0  ;;  %p73_p11 = scmp.eq.s32.totalorder %s10678_s30, 0 }
  0x28   : > { %p9507_p12 = scmp.lt.s32.totalorder %s10678_s30, 2  ;;  %s10841_s17 = sand.u32 1, %s10678_s30  }
  0x29   : > { %s10844_s20 = scalar_select %p63_p10, %s10674_s29, %s65_s19  }
  0x2a   : > { %p74_p13 = por %p73_p11, %p72_p9  ;;  %s10847_s23 = sand.u32 1, %s10674_s29  }
  0x2b   : > { %15831 = sst [smem:[#allocation37_spill]] %s10844_s20  ;;  %s15703_s24 = sshll.u32 %s10678_s30, 2 }
  0x2c   : > { %s15702_s27 = sshll.u32 %s10847_s23, 2  ;;  %s15832_s1 = sld [smem:[#allocation142_spill]] }
  0x2d   : > { %s459_s3 = scalar_lea.vmem [#allocation8], %s15702_s27  ;;  %p10860_p0 = pnand %p9507_p12, %p74_p13 }
  0x2e   : > { %s467_s5 = sshll.u32 %s459_s3, 4  ;;  %s468_s5 = int_to_ptr.vmem [resolvable:$true] %s467_s5 }
  0x2f   : > { %p10867_p3 = pneg %p10860_p0 }
  0x32   : > { %s464_s26 = scalar_lea.hbm %s15832_s1, %s15703_s24  ;;  %s10329_s15 = scalar_lea.hbm %s15832_s1, 8 }
  0x33   : > { %s465_s22 = sshll.u32 %s464_s26, 4  ;;  %s466_s22 = int_to_ptr.hbm [resolvable:$true] %s465_s22 }
  0x34   : > { %s10322_s29 = sshra.s32 %s466_s22, 4  ;;  %s10323_s29 = int_to_ptr.hbm [resolvable:$true] %s10322_s29 }
  0x35   : > { %s10324_s16 = scalar_lea.hbm %s10323_s29, 4  ;;  %p10330_p10 = scmp.lt.s32.totalorder %s10323_s29, %s15832_s1 }
  0x36   : > { %p10325_p2 = scmp.ne.s32.totalorder %s10323_s29, %s10324_s16  ;;  %p10331_p11 = scmp.lt.s32.totalorder %s10329_s15, %s10324_s16 }
  0x38   : > { %p10327_p7 = pnand %p10867_p3, %p10325_p2  ;;  %p10332_p12 = por %p10331_p11, %p10330_p10 }
  0x3a   : > { %p10328_p9 = pneg %p10327_p7 }
  0x3c   : > { %p10333_p13 = pnand %p10332_p12, %p10328_p9 }
  0x3e   : > { %10336 = shalt.err (!%p10333_p13)
}
  0x3f   : > { %s15711_s20 = smov 32   ;;  %s15710_s13 = smov 2  }
  0x40   : > { %s15835_s3 = scalar_lea.sflag [#allocation9], %s10841_s17  ;;  %s15836_s29 = sshll.u32 %s10678_s30, 2 }
  0x41   : > { %9486 = dma.hbm_to_vmem [thread:$0]  (!%p10860_p0), %s466_s22, 64, %s468_s5, %s15835_s3, %s15711_s20, %s15711_s20, %s15710_s13  }
  0x42   : > { %s486_s27 = scalar_lea.hbm %s15683_s2, %s15836_s29  ;;  %s15837_s26 = sshll.u32 %s10847_s23, 2 }
  0x43   : > { %s481_s15 = scalar_lea.vmem [#allocation10], %s15837_s26  ;;  %s487_s11 = sshll.u32 %s486_s27, 4  ;;  %s10895_s11 = int_to_ptr.hbm [resolvable:$true] %s487_s11 }
  0x44   : > { %s489_s1 = sshll.u32 %s481_s15, 4  ;;  %s8533_s14 = sshll.u32 %s10847_s23, 9  ;;  %s10893_s1 = int_to_ptr.vmem [resolvable:$true] %s489_s1 }
  0x45   : > { %15838 = sst [smem:[#allocation38_spill]] %s10893_s1  ;;  %s9205_s28 = sshll.u32 %s10678_s30, 9 }
  0x46   : > { %s15839_s7 = sld [smem:[#allocation145_spill]]  ;;  %s503_s3 = scalar_lea.vmem [#allocation17], %s8533_s14 }
  0x47   : > { %s511_s16 = sshll.u32 %s503_s3, 4  ;;  %s8536_s29 = sshll.u32 %s10847_s23, 6  ;;  %s512_s16 = int_to_ptr.vmem [resolvable:$true] %s511_s16 }
  0x48   : > { %s15714_s24 = scalar_lea.sflag [#allocation18], %s10841_s17 }
  0x4c   : > { %s508_s5 = scalar_lea.hbm %s15839_s7, %s9205_s28  ;;  %s10359_s20 = scalar_lea.hbm %s15839_s7, 1024 }
  0x4d   : > { %s509_s22 = sshll.u32 %s508_s5, 4  ;;  %s510_s22 = int_to_ptr.hbm [resolvable:$true] %s509_s22 }
  0x4e   : > { %s10352_s26 = sshra.s32 %s510_s22, 4  ;;  %s10353_s26 = int_to_ptr.hbm [resolvable:$true] %s10352_s26 }
  0x4f   : > { %s10354_s27 = scalar_lea.hbm %s10353_s26, 512  ;;  %p10360_p10 = scmp.lt.s32.totalorder %s10353_s26, %s15839_s7 }
  0x50   : > { %p10355_p2 = scmp.ne.s32.totalorder %s10353_s26, %s10354_s27  ;;  %p10361_p11 = scmp.lt.s32.totalorder %s10359_s20, %s10354_s27 }
  0x52   : > { %p10357_p7 = pnand %p10355_p2, %p10867_p3  ;;  %p10362_p12 = por %p10361_p11, %p10360_p10 }
  0x54   : > { %p10358_p9 = pneg %p10357_p7 }
  0x56   : > { %p10363_p13 = pnand %p10362_p12, %p10358_p9 }
  0x58   : > { %10366 = shalt.err (!%p10363_p13)
}
  0x59   : > { %s10686_s14 = smov 512   ;;  %s15840_s18 = smov 32  }
  0x5a   : > { %9492 = dma.hbm_to_vmem [thread:$0]  (!%p10860_p0), %s510_s22, 8192, %s512_s16, %s15714_s24, %s10686_s14, %s10686_s14, %s15840_s18  }
  0x5b   : > { %s9206_s5 = sshll.u32 %s10678_s30, 6  ;;  %s525_s12 = scalar_lea.vmem [#allocation19], %s8536_s29 }
  0x5c   : > { %s530_s15 = scalar_lea.hbm %s15689_s8, %s9206_s5  ;;  %s533_s20 = sshll.u32 %s525_s12, 4  ;;  %s10921_s20 = int_to_ptr.vmem [resolvable:$true] %s533_s20 }
  0x5d   : > { %s531_s26 = sshll.u32 %s530_s15, 4  ;;  %s552_s7 = scalar_lea.hbm %s15690_s9, %s9206_s5  ;;  %s10923_s26 = int_to_ptr.hbm [resolvable:$true] %s531_s26 }
  0x5e   : > { %s553_s10 = sshll.u32 %s552_s7, 4  ;;  %s547_s1 = scalar_lea.vmem [#allocation20], %s8536_s29  ;;  %s554_s10 = int_to_ptr.hbm [resolvable:$true] %s553_s10 }
  0x5f   : > { %s555_s22 = sshll.u32 %s547_s1, 4  ;;  %s15715_s16 = scalar_lea.sflag [#allocation21], %s10841_s17  ;;  %s556_s22 = int_to_ptr.vmem [resolvable:$true] %s555_s22 }
  0x60   : > { %s10382_s14 = sshra.s32 %s554_s10, 4  ;;  %s10389_s12 = scalar_lea.hbm %s15690_s9, 128  ;;  %s10383_s14 = int_to_ptr.hbm [resolvable:$true] %s10382_s14 }
  0x61   : > { %s10384_s13 = scalar_lea.hbm %s10383_s14, 64  ;;  %p10390_p10 = scmp.lt.s32.totalorder %s10383_s14, %s15690_s9 }
  0x62   : > { %p10385_p2 = scmp.ne.s32.totalorder %s10383_s14, %s10384_s13  ;;  %p10391_p11 = scmp.lt.s32.totalorder %s10389_s12, %s10384_s13 }
  0x64   : > { %p10387_p7 = pnand %p10385_p2, %p10867_p3  ;;  %p10392_p12 = por %p10391_p11, %p10390_p10 }
  0x66   : > { %p10388_p9 = pneg %p10387_p7 }
  0x68   : > { %p10393_p13 = pnand %p10392_p12, %p10388_p9 }
  0x6a   : > { %10396 = shalt.err (!%p10393_p13)
}
  0x6b   : > { %s15841_s1 = smov 4   ;;  %s15842_s7 = smov 64  }
  0x6c   : > { %9498 = dma.hbm_to_vmem [thread:$0]  (!%p10860_p0), %s554_s10, 1024, %s556_s22, %s15715_s16, %s15842_s7, %s15842_s7, %s15841_s1  }
  0x6d   : > { %s377_s28 = sshll.u32 %s15681_s0, 4  ;;  %s10687_s24 = smov [#allocation5]   ;;  %s378_s28 = int_to_ptr.hbm [resolvable:$true] %s377_s28 }
  0x6e   : > { %s379_s14 = sshll.u32 %s10687_s24, 4  ;;  %s405_s15 = sshll.u32 %s15685_s4, 4  ;;  %s380_s14 = int_to_ptr.vmem [resolvable:$true] %s379_s14  ;;  %s406_s15 = int_to_ptr.hbm [resolvable:$true] %s405_s15 }
  0x6f   : > { %s10688_s12 = smov 128   ;;  %s10689_s27 = smov 8  }
  0x70   : > { %9470 = dma.hbm_to_vmem [thread:$0]  (!%p10813_p8), %s378_s28, 2048, %s380_s14, [#allocation6], %s10688_s12, %s10688_s12, %s10689_s27  }
  0x71   : > { %s10690_s10 = smov [#allocation13]   ;;  %s433_s24 = sshll.u32 %s15687_s6, 4  ;;  %s434_s24 = int_to_ptr.hbm [resolvable:$true] %s433_s24 }
  0x72   : > { %s407_s22 = sshll.u32 %s10690_s10, 4  ;;  %s8542_s13 = sshll.u32 %s10847_s23, 8  ;;  %s408_s22 = int_to_ptr.vmem [resolvable:$true] %s407_s22 }
  0x73   : > { %9476 = dma.hbm_to_vmem [thread:$0]  (!%p10813_p8), %s406_s15, 1024, %s408_s22, [#allocation12], %s15842_s7, %s15842_s7, %s15841_s1  }
  0x74   : > { %s10691_s3 = smov [#allocation16]   ;;  %s9208_s28 = sshll.u32 %s10678_s30, 8 }
  0x75   : > { %s435_s16 = sshll.u32 %s10691_s3, 4  ;;  %s10502_s14 = sshra.s32 %s10895_s11, 4  ;;  %s436_s16 = int_to_ptr.vmem [resolvable:$true] %s435_s16  ;;  %s10503_s14 = int_to_ptr.hbm [resolvable:$true] %s10502_s14 }
  0x76   : > { %9482 = dma.hbm_to_vmem [thread:$0]  (!%p10813_p8), %s434_s24, 1024, %s436_s16, [#allocation15], %s15842_s7, %s15842_s7, %s15841_s1  }
  0x77   : > { %s10504_s12 = scalar_lea.hbm %s10503_s14, 4  ;;  %s10509_s15 = scalar_lea.hbm %s15683_s2, 8 }
  0x78   : > { %p10505_p2 = scmp.ne.s32.totalorder %s10503_s14, %s10504_s12  ;;  %p10510_p10 = scmp.lt.s32.totalorder %s10503_s14, %s15683_s2 }
  0x79   : > { %p10511_p11 = scmp.lt.s32.totalorder %s10509_s15, %s10504_s12 }
  0x7a   : > { %p10507_p7 = pnand %p10505_p2, %p10867_p3 }
  0x7b   : > { %p10512_p12 = por %p10511_p11, %p10510_p10 }
  0x7c   : > { %p10508_p9 = pneg %p10507_p7 }
  0x7e   : > { %p10513_p13 = pnand %p10512_p12, %p10508_p9 }
  0x80   : > { %10516 = shalt.err (!%p10513_p13)
}
  0x81   : > { %s15843_s21 = smov 2   ;;  %s15844_s16 = scalar_lea.sflag [#allocation9], %s10841_s17 }
  0x82   : > { %s15845_s5 = sld [smem:[#allocation38_spill]]  ;;  %s10532_s24 = sshra.s32 %s10923_s26, 4  ;;  %s10533_s24 = int_to_ptr.hbm [resolvable:$true] %s10532_s24 }
  0x83   : > { %s10534_s3 = scalar_lea.hbm %s10533_s24, 64  ;;  %s10539_s27 = scalar_lea.hbm %s15689_s8, 128 }
  0x84   : > { %p10535_p8 = scmp.ne.s32.totalorder %s10533_s24, %s10534_s3  ;;  %p10540_p9 = scmp.lt.s32.totalorder %s10533_s24, %s15689_s8 }
  0x85   : > { %p10541_p10 = scmp.lt.s32.totalorder %s10539_s27, %s10534_s3 }
  0x86   : > { %p10537_p2 = pnand %p10535_p8, %p10867_p3 }
  0x87   : > { %p10542_p11 = por %p10541_p10, %p10540_p9 }
  0x88   : > { %9489 = dma.hbm_to_vmem [thread:$0]  (!%p10860_p0), %s10895_s11, 64, %s15845_s5, %s15844_s16, %s15840_s18, %s15840_s18, %s15843_s21  }
  0x89   : > { %p10538_p7 = pneg %p10537_p2 }
  0x8b   : > { %p10543_p12 = pnand %p10542_p11, %p10538_p7 }
  0x8d   : > { %10546 = shalt.err (!%p10543_p12)
}
  0x8e   : > { %s15846_s11 = scalar_lea.sflag [#allocation18], %s10841_s17  ;;  %s15847_s29 = sld [smem:[#allocation146_spill]] }
  0x8f   : > { %9495 = dma.hbm_to_vmem [thread:$0]  (!%p10860_p0), %s10923_s26, 1024, %s10921_s20, %s15846_s11, %s15842_s7, %s15842_s7, %s15841_s1  }
  0x90   : > { %s569_s5 = scalar_lea.vmem [#allocation22], %s8542_s13 }
  0x91   : > { %s577_s24 = sshll.u32 %s569_s5, 4  ;;  %s578_s24 = int_to_ptr.vmem [resolvable:$true] %s577_s24 }
  0x94   : > { %s15848_s21 = smov %s15847_s29  ;;  %s574_s16 = scalar_lea.hbm %s15847_s29, %s9208_s28 }
  0x95   : > { %s575_s3 = sshll.u32 %s574_s16, 4  ;;  %s10569_s30 = scalar_lea.hbm %s15848_s21, 512  ;;  %s576_s3 = int_to_ptr.hbm [resolvable:$true] %s575_s3 }
  0x96   : > { %s10562_s14 = sshra.s32 %s576_s3, 4  ;;  %s10563_s14 = int_to_ptr.hbm [resolvable:$true] %s10562_s14 }
  0x97   : > { %s10564_s12 = scalar_lea.hbm %s10563_s14, 256  ;;  %p10570_p7 = scmp.lt.s32.totalorder %s10563_s14, %s15848_s21 }
  0x98   : > { %p10565_p13 = scmp.ne.s32.totalorder %s10563_s14, %s10564_s12  ;;  %p10571_p9 = scmp.lt.s32.totalorder %s10569_s30, %s10564_s12 }
  0x9a   : > { %p10567_p8 = pnand %p10565_p13, %p10867_p3  ;;  %p10572_p10 = por %p10571_p9, %p10570_p7 }
  0x9c   : > { %p10568_p2 = pneg %p10567_p8 }
  0x9e   : > { %p10573_p11 = pnand %p10572_p10, %p10568_p2 }
  0xa0   : > { %10576 = shalt.err (!%p10573_p11)
}
  0xa1   : > { %s15849_s23 = scalar_lea.sflag [#allocation21], %s10841_s17  ;;  %589 = sbr.rel (%p10805_p6) target bundleno = 3872 (0xf20), region = 72 }
  0xa2   : > { %9501 = dma.hbm_to_vmem [thread:$0]  (!%p10860_p0), %s576_s3, 4096, %s578_s24, %s15849_s23, %s15842_s7, %s15842_s7, %s15841_s1  }
  0xa6   : > { %s15851_s13 = sld [smem:[#allocation33_spill]] }
  0xa7   : > { %10637 = dma.done.wait (%p79_p1), [#allocation6], 2048  }
  0xa8   : > { %10639 = vsyncadd (%p79_p1), [#allocation6], 4294965248  ;;  %s15852_s28 = sld [smem:[#allocation31_spill]] }
  0xac   : > { %s596_s11 = sand.u32 1, %s15851_s13  }
  0xad   : > { %s597_s22 = scalar_lea.sflag [#allocation9], %s596_s11 }
  0xae   : > { %s598_s19 = sand.u32 1, %s15852_s28  }
  0xaf   : > { %s8547_s18 = sshll.u32 %s598_s19, 2 }
  0xb0   : > { %s11033_s29 = scalar_lea.vmem [#allocation8], %s8547_s18 }
  0xb1   : > { %10641 = dma.done.wait (%p10798_p5), %s597_s22, 128  }
  0xb2   : > { %10643 = vsyncadd (%p10798_p5), %s597_s22, 4294967168  ;;  %s11039_s17 = scalar_lea.vmem [#allocation10], %s8547_s18 }
  0xb3   : > { %10645 = dma.done.wait (%p79_p1), [#allocation12], 2048  }
  0xb4   : > { %10647 = vsyncadd (%p79_p1), [#allocation12], 4294965248 }
  0xb5   : > { %10649 = dma.done.wait (%p79_p1), [#allocation15], 2048  }
  0xb6   : > { %10651 = vsyncadd (%p79_p1), [#allocation15], 4294965248  ;;  %s8553_s1 = sshll.u32 %s598_s19, 9  ;;  %s637_s7 = scalar_lea.sflag [#allocation18], %s596_s11 }
  0xb7   : > { %s11049_s16 = scalar_lea.vmem [#allocation17], %s8553_s1 }
  0xb8   : > { %10653 = dma.done.wait (%p10798_p5), %s637_s7, 9216  }
  0xb9   : > { %10655 = vsyncadd (%p10798_p5), %s637_s7, 4294958080  ;;  %s8554_s5 = sshll.u32 %s598_s19, 6  ;;  %s657_s3 = scalar_lea.sflag [#allocation21], %s596_s11 }
  0xba   : > { %s11055_s24 = scalar_lea.vmem [#allocation19], %s8554_s5  ;;  %s11057_s14 = scalar_lea.vmem [#allocation20], %s8554_s5 }
  0xbb   : > { %10657 = dma.done.wait (%p10798_p5), %s657_s3, 5120  }
  0xbc   : > { %10659 = vsyncadd (%p10798_p5), %s657_s3, 4294962176  ;;  %s8556_s12 = sshll.u32 %s598_s19, 8  ;;  %738 = sbr.rel (%p8521_p4) target bundleno = 210 (0xd2), region = 120 }
  0xbd   : > { %s11063_s27 = scalar_lea.vmem [#allocation22], %s8556_s12 }
  0xc1   : > { %v739_v0 = vld [vmem:[#allocation5] sm:$0xff]  ;;  %v740_v1 = vld [vmem:[#allocation5 + $0x8] sm:$0xff]  ;;  %v741_v2 = vld [vmem:[#allocation5 + $0x10] sm:$0xff] }
  0xc2   : > { %755 = vst [vmem:[#allocation2 + $0x30] sm:$0xff] %v739_v0  ;;  %v742_v3 = vld [vmem:[#allocation5 + $0x18] sm:$0xff]  ;;  %v743_v4 = vld [vmem:[#allocation5 + $0x20] sm:$0xff]  ;;  %v744_v5 = vld [vmem:[#allocation5 + $0x28] sm:$0xff] }
  0xc3   : > { %756 = vst [vmem:[#allocation2] sm:$0xff] %v740_v1  ;;  %v745_v6 = vld [vmem:[#allocation5 + $0x30] sm:$0xff]  ;;  %v746_v7 = vld [vmem:[#allocation5 + $0x38] sm:$0xff]  ;;  %v747_v8 = vld [vmem:[#allocation5 + $0x40] sm:$0xff] }
  0xc4   : > { %757 = vst [vmem:[#allocation2 + $0x58] sm:$0xff] %v741_v2  ;;  %v748_v9 = vld [vmem:[#allocation5 + $0x48] sm:$0xff]  ;;  %v749_v10 = vld [vmem:[#allocation5 + $0x50] sm:$0xff]  ;;  %v750_v11 = vld [vmem:[#allocation5 + $0x58] sm:$0xff] }
  0xc5   : > { %758 = vst [vmem:[#allocation2 + $0x18] sm:$0xff] %v742_v3  ;;  %v751_v12 = vld [vmem:[#allocation5 + $0x60] sm:$0xff]  ;;  %v752_v13 = vld [vmem:[#allocation5 + $0x68] sm:$0xff]  ;;  %v753_v14 = vld [vmem:[#allocation5 + $0x70] sm:$0xff] }
  0xc6   : > { %759 = vst [vmem:[#allocation2 + $0x50] sm:$0xff] %v743_v4  ;;  %v754_v15 = vld [vmem:[#allocation5 + $0x78] sm:$0xff] }
  0xc7   : > { %760 = vst [vmem:[#allocation2 + $0x68] sm:$0xff] %v744_v5 }
  0xc8   : > { %761 = vst [vmem:[#allocation2 + $0x8] sm:$0xff] %v745_v6 }
  0xc9   : > { %762 = vst [vmem:[#allocation2 + $0x48] sm:$0xff] %v746_v7 }
  0xca   : > { %763 = vst [vmem:[#allocation2 + $0x40] sm:$0xff] %v747_v8 }
  0xcb   : > { %764 = vst [vmem:[#allocation2 + $0x20] sm:$0xff] %v748_v9 }
  0xcc   : > { %765 = vst [vmem:[#allocation2 + $0x10] sm:$0xff] %v749_v10 }
  0xcd   : > { %766 = vst [vmem:[#allocation2 + $0x38] sm:$0xff] %v750_v11 }
  0xce   : > { %767 = vst [vmem:[#allocation2 + $0x60] sm:$0xff] %v751_v12 }
  0xcf   : > { %768 = vst [vmem:[#allocation2 + $0x70] sm:$0xff] %v752_v13 }
  0xd0   : > { %769 = vst [vmem:[#allocation2 + $0x78] sm:$0xff] %v753_v14 }
  0xd1   : > { %770 = vst [vmem:[#allocation2 + $0x28] sm:$0xff] %v754_v15 }
  0xd2 PF: > { %v11071_v18 = vld [vmem:[#allocation2 + $0x30] sm:$0xff]  ;;  %v11083_v24 = vld [vmem:[#allocation2] sm:$0xff]  ;;  %v11091_v28 = vld [vmem:[#allocation2 + $0x18] sm:$0xff]  ;;  %v10692_v53 = vmov 128.0   ;;  %s10693_s20 = smov 32   ;;  %s10694_s30 = smov 96  }
  0xd3   : > { %v1043_v21 = vmul.f32 %v11071_v18, %v11071_v18  ;;  %v1044_v27 = vmul.f32 %v11083_v24, %v11083_v24  ;;  %v11093_v29 = vld [vmem:[#allocation2 + $0x58] sm:$0xff]  ;;  %v11095_v30 = vld [vmem:[#allocation2 + $0x50] sm:$0xff]  ;;  %v1046_v31 = vmul.f32 %v11091_v28, %v11091_v28  ;;  %v11103_v34 = vld [vmem:[#allocation2 + $0x68] sm:$0xff]  ;;  %9564 = vrcp.f32 %v10692_v53  ;;  %s10695_s26 = smov 64   ;;  %s16194_s10 = sld [smem:[#allocation33_spill]] }
  0xd4   : > { %v1045_v32 = vmul.f32 %v11093_v29, %v11093_v29  ;;  %v1047_v33 = vmul.f32 %v11095_v30, %v11095_v30  ;;  %v11105_v35 = vld [vmem:[#allocation2 + $0x8] sm:$0xff]  ;;  %v1048_v37 = vmul.f32 %v11103_v34, %v11103_v34  ;;  %v11115_v40 = vld [vmem:[#allocation2 + $0x20] sm:$0xff]  ;;  %v11119_v42 = vld [vmem:[#allocation2 + $0x10] sm:$0xff] }
  0xd5   : > { %v11069_v17 = vld [vmem:[#allocation2 + $0x60] sm:$0xff]  ;;  %1059 = vadd.xlane.f32.xlu2 %v1043_v21  ;;  %v11107_v36 = vld [vmem:[#allocation2 + $0x48] sm:$0xff]  ;;  %v1049_v38 = vmul.f32 %v11105_v35, %v11105_v35  ;;  %v1052_v43 = vmul.f32 %v11115_v40, %v11115_v40  ;;  %v1053_v45 = vmul.f32 %v11119_v42, %v11119_v42  ;;  %v11127_v46 = vld [vmem:[#allocation2 + $0x38] sm:$0xff] }
  0xd6   : > { %v1055_v20 = vmul.f32 %v11069_v17, %v11069_v17  ;;  %v11081_v23 = vld [vmem:[#allocation2 + $0x70] sm:$0xff]  ;;  %v1050_v39 = vmul.f32 %v11107_v36, %v11107_v36  ;;  %v11117_v41 = vld [vmem:[#allocation2 + $0x40] sm:$0xff]  ;;  %v1054_v47 = vmul.f32 %v11127_v46, %v11127_v46 }
  0xd7   : > { %v11067_v16 = vld [vmem:[#allocation2 + $0x78] sm:$0xff]  ;;  %v1056_v26 = vmul.f32 %v11081_v23, %v11081_v23  ;;  %v1051_v44 = vmul.f32 %v11117_v41, %v11117_v41  ;;  %v8784_v48 = vld [vmem:[%s11049_s16 + $0x1c0] sm:$0xf]  ;;  %v9281_v50 = vld [vmem:[%s11049_s16 + $0x1c4] sm:$0xf] }
  0xd8   : > { %v1057_v19 = vmul.f32 %v11067_v16, %v11067_v16  ;;  %1083 = vadd.xlane.f32.xlu0 %v1055_v20  ;;  %v11079_v22 = vld [vmem:[#allocation2 + $0x28] sm:$0xff]  ;;  %v9285_v49 = vld [vmem:[%s11049_s16 + $0x1dc] sm:$0xf0]  ;;  %v8786_v52 = vld [vmem:[%s11049_s16 + $0x1e0] sm:$0xf0] }
  0xd9   : > { %v1058_v25 = vmul.f32 %v11079_v22, %v11079_v22  ;;  %v8785_v51 = vor.u32 %v9285_v49, %v8784_v48  ;;  %v8789_v54 = vor.u32 %v9281_v50, %v8786_v52  ;;  %v8752_v55 = vld [vmem:[%s11049_s16 + $0x180] sm:$0xf]  ;;  %v9273_v57 = vld [vmem:[%s11049_s16 + $0x184] sm:$0xf]  ;;  %v9565_v61 = vpop.eup %9564  ;;  %p9198_p1 = scmp.ne.s32.totalorder %s16194_s10, 1 }
  0xda   : > { %1087 = vadd.xlane.f32.xlu1 %v1057_v19  ;;  %v9277_v56 = vld [vmem:[%s11049_s16 + $0x19c] sm:$0xf0]  ;;  %v8754_v59 = vld [vmem:[%s11049_s16 + $0x1a0] sm:$0xf0]  ;;  %v1092_v3 = vmul.f32 128.0, %v9565_v61  ;;  %vm1096_vm0 = vweird.f32 %v9565_v61  ;;  %s16210_s13 = sld [smem:[#allocation147_spill]] (!%p9198_p1) }
  0xdb   : > { %1634 = vmatpush.bf16.msra.mxu0 %v8785_v51  ;;  %9415 = vmatpush.bf16.msra.mxu2 %v8785_v51  ;;  %v8753_v58 = vor.u32 %v9277_v56, %v8752_v55  ;;  %v8757_v60 = vor.u32 %v9273_v57, %v8754_v59  ;;  %v8720_v62 = vld [vmem:[%s11049_s16 + $0x140] sm:$0xf]  ;;  %v9265_v0 = vld [vmem:[%s11049_s16 + $0x144] sm:$0xf]  ;;  %s8281_s28 = sld [smem:[#allocation4]] (!%p9198_p1) }
  0xdc   : > { %1683 = vmatpush.bf16.msra.mxu1 %v8789_v54  ;;  %9423 = vmatpush.bf16.msra.mxu3 %v8789_v54  ;;  %v9269_v63 = vld [vmem:[%s11049_s16 + $0x15c] sm:$0xf0]  ;;  %v8722_v2 = vld [vmem:[%s11049_s16 + $0x160] sm:$0xf0]  ;;  %v1093_v10 = vsub.f32 1.0, %v1092_v3 }
  0xdd   : > { %1061 = vadd.xlane.f32.xlu2 %v1044_v27  ;;  %v8721_v1 = vor.u32 %v9269_v63, %v8720_v62  ;;  %v8725_v4 = vor.u32 %v9265_v0, %v8722_v2  ;;  %v8688_v5 = vld [vmem:[%s11049_s16 + $0x100] sm:$0xf]  ;;  %v9257_v7 = vld [vmem:[%s11049_s16 + $0x104] sm:$0xf]  ;;  %v8792_v63 = vld [vmem:[%s11049_s16 + $0x1c8] sm:$0xf] }
  0xde   : > { %v9261_v6 = vld [vmem:[%s11049_s16 + $0x11c] sm:$0xf0]  ;;  %v8690_v9 = vld [vmem:[%s11049_s16 + $0x120] sm:$0xf0]  ;;  %v1094_v15 = vmul.f32 %v9565_v61, %v1093_v10  ;;  %v9286_v0 = vld [vmem:[%s11049_s16 + $0x1e4] sm:$0xf0] }
  0xdf   : > { %1635 = vmatpush.bf16.msra.mxu0 %v8753_v58  ;;  %9416 = vmatpush.bf16.msra.mxu2 %v8753_v58  ;;  %v8689_v8 = vor.u32 %v9261_v6, %v8688_v5  ;;  %v8693_v11 = vor.u32 %v9257_v7, %v8690_v9  ;;  %v8656_v12 = vld [vmem:[%s11049_s16 + $0xc0] sm:$0xf]  ;;  %v9249_v14 = vld [vmem:[%s11049_s16 + $0xc4] sm:$0xf]  ;;  %v8793_v2 = vor.u32 %v9286_v0, %v8792_v63  ;;  %v8794_v3 = vld [vmem:[%s11049_s16 + $0x1e8] sm:$0xf0] }
  0xe0   : > { %1085 = vadd.xlane.f32.xlu0 %v1056_v26  ;;  %1684 = vmatpush.bf16.msra.mxu1 %v8757_v60  ;;  %v9253_v13 = vld [vmem:[%s11049_s16 + $0xdc] sm:$0xf0]  ;;  %v8658_v20 = vld [vmem:[%s11049_s16 + $0xe0] sm:$0xf0]  ;;  %v8698_v63 = vld [vmem:[%s11049_s16 + $0x128] sm:$0xf0] }
  0xe1   : > { %9424 = vmatpush.bf16.msra.mxu3 %v8757_v60  ;;  %v8657_v19 = vor.u32 %v9253_v13, %v8656_v12  ;;  %v8661_v21 = vor.u32 %v9249_v14, %v8658_v20  ;;  %v9245_v26 = vld [vmem:[%s11049_s16 + $0x9c] sm:$0xf0]  ;;  %v9241_v27 = vld [vmem:[%s11049_s16 + $0x84] sm:$0xf]  ;;  %v9278_v12 = vld [vmem:[%s11049_s16 + $0x1a4] sm:$0xf0] }
  0xe2   : > { %1089 = vadd.xlane.f32.xlu1 %v1058_v25  ;;  %v8624_v25 = vld [vmem:[%s11049_s16 + $0x80] sm:$0xf]  ;;  %v9225_v55 = vld [vmem:[%s11049_s16 + $0x4] sm:$0xf]  ;;  %v9274_v13 = vld [vmem:[%s11049_s16 + $0x18c] sm:$0xf] }
  0xe3   : > { %1636 = vmatpush.bf16.msra.mxu0 %v8721_v1  ;;  %9417 = vmatpush.bf16.msra.mxu2 %v8721_v1  ;;  %v8560_v53 = vld [vmem:[%s11049_s16] sm:$0xf]  ;;  %v8562_v58 = vld [vmem:[%s11049_s16 + $0x20] sm:$0xf0]  ;;  %v9282_v1 = vld [vmem:[%s11049_s16 + $0x1cc] sm:$0xf] }
  0xe4   : > { %1685 = vmatpush.bf16.msra.mxu1 %v8725_v4  ;;  %v9229_v54 = vld [vmem:[%s11049_s16 + $0x1c] sm:$0xf0]  ;;  %v8565_v60 = vor.u32 %v9225_v55, %v8562_v58  ;;  %v8696_v55 = vld [vmem:[%s11049_s16 + $0x108] sm:$0xf] }
  0xe5   : > { %1067 = vadd.xlane.f32.xlu2 %v1047_v33  ;;  %9425 = vmatpush.bf16.msra.mxu3 %v8725_v4  ;;  %v8626_v33 = vld [vmem:[%s11049_s16 + $0xa0] sm:$0xf0]  ;;  %v8561_v57 = vor.u32 %v9229_v54, %v8560_v53  ;;  %v8797_v4 = vor.u32 %v9282_v1, %v8794_v3 }
  0xe7   : > { %1637 = vmatpush.bf16.msra.mxu0 %v8689_v8  ;;  %9418 = vmatpush.bf16.msra.mxu2 %v8689_v8 }
  0xe8   : > { %1063 = vadd.xlane.f32.xlu0 %v1045_v32  ;;  %1686 = vmatpush.bf16.msra.mxu1 %v8693_v11  ;;  %v8625_v32 = vor.u32 %v9245_v26, %v8624_v25 }
  0xe9   : > { %9426 = vmatpush.bf16.msra.mxu3 %v8693_v11  ;;  %v8760_v11 = vld [vmem:[%s11049_s16 + $0x188] sm:$0xf] }
  0xea   : > { %1065 = vadd.xlane.f32.xlu1 %v1046_v31  ;;  %v1095_v31 = vadd.f32 %v9565_v61, %v1094_v15  ;;  %v8761_v15 = vor.u32 %v9278_v12, %v8760_v11 }
  0xeb   : > { %1638 = vmatpush.bf16.msra.mxu0 %v8657_v19  ;;  %9419 = vmatpush.bf16.msra.mxu2 %v8657_v19  ;;  %v8762_v19 = vld [vmem:[%s11049_s16 + $0x1a8] sm:$0xf0] }
  0xec   : > { %1687 = vmatpush.bf16.msra.mxu1 %v8661_v21  ;;  %v8765_v25 = vor.u32 %v9274_v13, %v8762_v19 }
  0xed   : > { %1073 = vadd.xlane.f32.xlu2 %v1050_v39  ;;  %9427 = vmatpush.bf16.msra.mxu3 %v8661_v21  ;;  %v9237_v39 = vld [vmem:[%s11049_s16 + $0x5c] sm:$0xf0] }
  0xef   : > { %1639 = vmatpush.bf16.msra.mxu0 %v8625_v32  ;;  %9420 = vmatpush.bf16.msra.mxu2 %v8625_v32 }
  0xf0   : > { %1069 = vadd.xlane.f32.xlu0 %v1048_v37  ;;  %v8629_v37 = vor.u32 %v9241_v27, %v8626_v33  ;;  %v8728_v33 = vld [vmem:[%s11049_s16 + $0x148] sm:$0xf] }
  0xf2   : > { %1071 = vadd.xlane.f32.xlu1 %v1049_v38  ;;  %1688 = vmatpush.bf16.msra.mxu1 %v8629_v37  ;;  %v8592_v38 = vld [vmem:[%s11049_s16 + $0x40] sm:$0xf] }
  0xf3   : > { %9428 = vmatpush.bf16.msra.mxu3 %v8629_v37  ;;  %v9270_v37 = vld [vmem:[%s11049_s16 + $0x164] sm:$0xf0] }
  0xf5   : > { %1079 = vadd.xlane.f32.xlu2 %v1053_v45  ;;  %v8593_v45 = vor.u32 %v9237_v39, %v8592_v38  ;;  %v9266_v39 = vld [vmem:[%s11049_s16 + $0x14c] sm:$0xf] }
  0xf7   : > { %1640 = vmatpush.bf16.msra.mxu0 %v8593_v45  ;;  %9421 = vmatpush.bf16.msra.mxu2 %v8593_v45 }
  0xf8   : > { %1075 = vadd.xlane.f32.xlu0 %v1051_v44  ;;  %v11158_v44 = vsel %vm1096_vm0, %v9565_v61, %v1095_v31 }
  0xf9   : > { %15854 = vst [vmem:[#allocation39_spill] sm:$0xff] %v11158_v44 }
  0xfa   : > { %1077 = vadd.xlane.f32.xlu1 %v1052_v43  ;;  %v9233_v43 = vld [vmem:[%s11049_s16 + $0x44] sm:$0xf] }
  0xfb   : > { %1641 = vmatpush.bf16.msra.mxu0 %v8561_v57  ;;  %9422 = vmatpush.bf16.msra.mxu2 %v8561_v57 }
  0xff   : > { %1732 = vmatpush.bf16.msrb.mxu2 %v8793_v2 }
 0x100   : > { %1081 = vadd.xlane.f32.xlu0 %v1054_v47  ;;  %v8594_v47 = vld [vmem:[%s11049_s16 + $0x60] sm:$0xf0] }
 0x101   : > { %v8597_v48 = vor.u32 %v9233_v43, %v8594_v47  ;;  %v8730_v43 = vld [vmem:[%s11049_s16 + $0x168] sm:$0xf0] }
 0x103   : > { %1689 = vmatpush.bf16.msra.mxu1 %v8597_v48  ;;  %9429 = vmatpush.bf16.msra.mxu3 %v8597_v48 }
 0x104   : > { %1733 = vmatpush.bf16.msrb.mxu2 %v8761_v15 }
 0x107   : > { %1690 = vmatpush.bf16.msra.mxu1 %v8565_v60  ;;  %9430 = vmatpush.bf16.msra.mxu3 %v8565_v60 }
 0x10b   : > { %1781 = vmatpush.bf16.msrb.mxu3 %v8797_v4 }
 0x10f   : > { %1782 = vmatpush.bf16.msrb.mxu3 %v8765_v25 }
 0x148   : > { %v1060_v52 = vpop.xlane.xlu2 %1059 }
 0x149   : > { %v1098_v56 = vmul.f32 %v11158_v44, %v1060_v52 }
 0x14b   : > { %v1084_v50 = vpop.xlane.xlu0 %1083  ;;  %v11170_v62 = vadd.f32 1.1920929e-07, %v1098_v56  ;;  %v9262_v56 = vld [vmem:[%s11049_s16 + $0x124] sm:$0xf0] }
 0x14c   : > { %v1110_v51 = vmul.f32 %v11158_v44, %v1084_v50  ;;  %v8729_v50 = vor.u32 %v9270_v37, %v8728_v33  ;;  %v8697_v60 = vor.u32 %v9262_v56, %v8696_v55 }
 0x14d   : > { %v1088_v49 = vpop.xlane.xlu1 %1087  ;;  %vm1136_vm3 = vweird.f32 %v11170_v62 }
 0x14e   : > { %v11167_v59 = vadd.f32 1.1920929e-07, %v1110_v51  ;;  %v1112_v61 = vmul.f32 %v11158_v44, %v1088_v49  ;;  %v8733_v51 = vor.u32 %v9266_v39, %v8730_v43  ;;  %1734 = vmatpush.bf16.msrb.mxu2 %v8729_v50 }
 0x150   : > { %9566 = vrsqrt.f32 %v11167_v59  ;;  %v11178_v5 = vadd.f32 1.1920929e-07, %v1112_v61  ;;  %v1062_v10 = vpop.xlane.xlu2 %1061  ;;  %1783 = vmatpush.bf16.msrb.mxu3 %v8733_v51  ;;  %v9258_v61 = vld [vmem:[%s11049_s16 + $0x10c] sm:$0xf]  ;;  %vm1256_vm1 = vweird.f32 %v11167_v59 }
 0x151   : > { %9568 = vrsqrt.f32 %v11170_v62  ;;  %v1099_v14 = vmul.f32 %v11158_v44, %v1062_v10  ;;  %v8701_v2 = vor.u32 %v9258_v61, %v8698_v63  ;;  %v9254_v61 = vld [vmem:[%s11049_s16 + $0xe4] sm:$0xf0] }
 0x152   : > { %9570 = vrsqrt.f32 %v11178_v5  ;;  %1735 = vmatpush.bf16.msrb.mxu2 %v8697_v60 }
 0x153   : > { %v1086_v7 = vpop.xlane.xlu0 %1085  ;;  %v11194_v27 = vadd.f32 1.1920929e-07, %v1099_v14 }
 0x154   : > { %v1111_v9 = vmul.f32 %v11158_v44, %v1086_v7  ;;  %1784 = vmatpush.bf16.msrb.mxu3 %v8701_v2 }
 0x155   : > { %v1090_v6 = vpop.xlane.xlu1 %1089  ;;  %vm1146_vm10 = vweird.f32 %v11194_v27 }
 0x156   : > { %v1113_v8 = vmul.f32 %v11158_v44, %v1090_v6  ;;  %v11189_v21 = vadd.f32 1.1920929e-07, %v1111_v9  ;;  %v11191_v26 = vpop.eup %9566 }
 0x157   : > { %v11196_v31 = vpop.eup %9568  ;;  %v1251_v32 = vmul.f32 %v11191_v26, %v11167_v59  ;;  %vm1257_vm2 = vweird.f32 %v11191_v26 }
 0x158   : > { %v11187_v20 = vadd.f32 1.1920929e-07, %v1113_v8  ;;  %v1131_v38 = vmul.f32 %v11196_v31, %v11170_v62  ;;  %v11215_v57 = vpop.eup %9570  ;;  %v1068_v6 = vpop.xlane.xlu2 %1067  ;;  %vm1137_vm4 = vweird.f32 %v11196_v31  ;;  %vm11244_vm5 = vmor %vm1256_vm1, %vm1257_vm2  ;;  %vm1266_vm9 = vweird.f32 %v11189_v21 }
 0x159   : > { %v1252_v45 = vmul.f32 %v11191_v26, %v1251_v32  ;;  %v1271_v8 = vmul.f32 %v11215_v57, %v11178_v5  ;;  %v1102_v15 = vmul.f32 %v11158_v44, %v1068_v6  ;;  %vm11258_vm8 = vmor %vm1136_vm3, %vm1137_vm4  ;;  %vm1276_vm3 = vweird.f32 %v11178_v5 }
 0x15a   : > { %9572 = vrsqrt.f32 %v11187_v20  ;;  %v1132_v47 = vmul.f32 %v11196_v31, %v1131_v38  ;;  %vm1286_vm13 = vweird.f32 %v11187_v20  ;;  %vm1277_vm4 = vweird.f32 %v11215_v57 }
 0x15b   : > { %9574 = vrsqrt.f32 %v11189_v21  ;;  %v1064_v49 = vpop.xlane.xlu0 %1063  ;;  %v1253_v52 = vmul.f32 0.5, %v1252_v45  ;;  %v1272_v33 = vmul.f32 %v11215_v57, %v1271_v8  ;;  %v8666_v8 = vld [vmem:[%s11049_s16 + $0xe8] sm:$0xf0] }
 0x15c   : > { %9576 = vrsqrt.f32 %v11194_v27  ;;  %v1100_v54 = vmul.f32 %v11158_v44, %v1064_v49  ;;  %v1133_v58 = vmul.f32 0.5, %v1132_v47  ;;  %v11249_v49 = vadd.f32 1.1920929e-07, %v1102_v15 }
 0x15d   : > { %v1066_v48 = vpop.xlane.xlu1 %1065  ;;  %v1254_v4 = vsub.f32 1.5, %v1253_v52 }
 0x15e   : > { %v1101_v53 = vmul.f32 %v11158_v44, %v1066_v48  ;;  %v11227_v10 = vadd.f32 1.1920929e-07, %v1100_v54  ;;  %v1134_v11 = vsub.f32 1.5, %v1133_v58 }
 0x15f   : > { %v1255_v19 = vmul.f32 %v11191_v26, %v1254_v4 }
 0x160   : > { %v11219_v0 = vpop.eup %9572  ;;  %v11221_v1 = vadd.f32 1.1920929e-07, %v1101_v53  ;;  %v1135_v38 = vmul.f32 %v11196_v31, %v1134_v11  ;;  %vm1156_vm0 = vweird.f32 %v11227_v10 }
 0x161   : > { %v9575_v3 = vpop.eup %9574  ;;  %v1281_v13 = vmul.f32 %v11219_v0, %v11187_v20  ;;  %v1259_v50 = vsel %vm11244_vm5, %v11191_v26, %v1255_v19  ;;  %vm1287_vm14 = vweird.f32 %v11219_v0 }
 0x162   : > { %v9577_v7 = vpop.eup %9576  ;;  %v1261_v9 = vmul.f32 %v9575_v3, %v11189_v21  ;;  %9578 = vrsqrt.f32 %v11221_v1  ;;  %vm1267_vm6 = vweird.f32 %v9575_v3  ;;  %v1139_v26 = vsel %vm11258_vm8, %v11196_v31, %v1135_v38  ;;  %v8664_v31 = vld [vmem:[%s11049_s16 + $0xc8] sm:$0xf]  ;;  %v8634_v38 = vld [vmem:[%s11049_s16 + $0xa8] sm:$0xf0]  ;;  %vm11328_vm5 = vmor %vm1286_vm13, %vm1287_vm14 }
 0x163   : > { %v1141_v12 = vmul.f32 %v9577_v7, %v11194_v27  ;;  %v1070_v32 = vpop.xlane.xlu0 %1069  ;;  %9580 = vrsqrt.f32 %v11227_v10  ;;  %v1282_v47 = vmul.f32 %v11219_v0, %v1281_v13  ;;  %vm1147_vm7 = vweird.f32 %v9577_v7  ;;  %vm1268_vm11 = vmor %vm1266_vm9, %vm1267_vm6 }
 0x164   : > { %v1262_v14 = vmul.f32 %v9575_v3, %v1261_v9  ;;  %v1103_v43 = vmul.f32 %v11158_v44, %v1070_v32  ;;  %9582 = vrsqrt.f32 %v11249_v49  ;;  %v1302_v21 = vmul.f32 %v1259_v50, %v11069_v17  ;;  %vm1148_vm12 = vmor %vm1146_vm10, %vm1147_vm7  ;;  %v9250_v17 = vld [vmem:[%s11049_s16 + $0xcc] sm:$0xf] }
 0x165   : > { %v1142_v25 = vmul.f32 %v9577_v7, %v1141_v12  ;;  %v1283_v60 = vmul.f32 0.5, %v1282_v47  ;;  %v1290_v9 = vmul.f32 %v1139_v26, %v11071_v18  ;;  %v1072_v19 = vpop.xlane.xlu1 %1071  ;;  %v8669_v32 = vor.u32 %v9250_v17, %v8666_v8  ;;  %v9238_v26 = vld [vmem:[%s11049_s16 + $0x64] sm:$0xf0]  ;;  %vm1278_vm8 = vmor %vm1276_vm3, %vm1277_vm4 }
 0x166   : > { %v1263_v37 = vmul.f32 0.5, %v1262_v14  ;;  %v11264_v55 = vadd.f32 1.1920929e-07, %v1103_v43  ;;  %v8632_v14 = vld [vmem:[%s11049_s16 + $0x88] sm:$0xf]  ;;  %vm1166_vm15 = vweird.f32 %v11221_v1  ;;  %vm1176_vm9 = vweird.f32 %v11249_v49 }
 0x167   : > { %v1143_v39 = vmul.f32 0.5, %v1142_v25  ;;  %v8665_v25 = vor.u32 %v9254_v61, %v8664_v31  ;;  %1785 = vmatpush.bf16.msrb.mxu3 %v8669_v32  ;;  %v8568_v8 = vld [vmem:[%s11049_s16 + $0x8] sm:$0xf] }
 0x168   : > { %v11242_v45 = vpop.eup %9578  ;;  %v1264_v48 = vsub.f32 1.5, %v1263_v37  ;;  %9584 = vrsqrt.f32 %v11264_v55  ;;  %v9242_v37 = vld [vmem:[%s11049_s16 + $0x8c] sm:$0xf] }
 0x169   : > { %v1144_v51 = vsub.f32 1.5, %v1143_v39  ;;  %v1161_v52 = vmul.f32 %v11242_v45, %v11221_v1  ;;  %v11271_v58 = vpop.eup %9580  ;;  %1736 = vmatpush.bf16.msrb.mxu2 %v8665_v25  ;;  %vm1167_vm1 = vweird.f32 %v11242_v45  ;;  %v8768_v1 = vld [vmem:[%s11049_s16 + $0x190] sm:$0xf] }
 0x16a   : > { %v1265_v54 = vmul.f32 %v9575_v3, %v1264_v48  ;;  %v1151_v6 = vmul.f32 %v11271_v58, %v11227_v10  ;;  %v11294_v39 = vpop.eup %9582  ;;  %v1104_v48 = vmul.f32 %v11158_v44, %v1072_v19  ;;  %vm1157_vm2 = vweird.f32 %v11271_v58  ;;  %vm11334_vm6 = vmor %vm1166_vm15, %vm1167_vm1 }
 0x16b   : > { %v1145_v62 = vmul.f32 %v9577_v7, %v1144_v51  ;;  %v1162_v56 = vmul.f32 %v11242_v45, %v1161_v52  ;;  %v8637_v51 = vor.u32 %v9242_v37, %v8634_v38  ;;  %v8600_v52 = vld [vmem:[%s11049_s16 + $0x48] sm:$0xf]  ;;  %v1171_v31 = vmul.f32 %v11294_v39, %v11249_v49  ;;  %vm11349_vm7 = vmor %vm1156_vm0, %vm1157_vm2 }
 0x16c   : > { %v1269_v27 = vsel %vm1268_vm11, %v9575_v3, %v1265_v54  ;;  %v1273_v3 = vmul.f32 0.5, %v1272_v33  ;;  %v1152_v13 = vmul.f32 %v11271_v58, %v1151_v6  ;;  %v1074_v33 = vpop.xlane.xlu2 %1073  ;;  %v8601_v6 = vor.u32 %v9238_v26, %v8600_v52 }
 0x16d   : > { %v1303_v63 = vmul.f32 %v1269_v27, %v11081_v23  ;;  %v1149_v2 = vsel %vm1148_vm12, %v9577_v7, %v1145_v62  ;;  %v1163_v4 = vmul.f32 0.5, %v1162_v56  ;;  %v9246_v23 = vld [vmem:[%s11049_s16 + $0xa4] sm:$0xf0]  ;;  %v1284_v7 = vsub.f32 1.5, %v1283_v60  ;;  %v9234_v62 = vld [vmem:[%s11049_s16 + $0x4c] sm:$0xf]  ;;  %1786 = vmatpush.bf16.msrb.mxu3 %v8637_v51 }
 0x16e   : > { %v1291_v11 = vmul.f32 %v1149_v2, %v11083_v24  ;;  %v1153_v24 = vmul.f32 0.5, %v1152_v13  ;;  %v11299_v43 = vpop.eup %9584  ;;  %v1274_v59 = vsub.f32 1.5, %v1273_v3  ;;  %v8633_v50 = vor.u32 %v9246_v23, %v8632_v14  ;;  %v8602_v56 = vld [vmem:[%s11049_s16 + $0x68] sm:$0xf0]  ;;  %v9230_v3 = vld [vmem:[%s11049_s16 + $0x24] sm:$0xf0] }
 0x16f   : > { %v11285_v12 = vpack.c.bf16 %v1303_v63, %v1302_v21  ;;  %v1164_v18 = vsub.f32 1.5, %v1163_v4  ;;  %v1285_v53 = vmul.f32 %v11219_v0, %v1284_v7  ;;  %v1105_v54 = vmul.f32 %v11158_v44, %v1074_v33  ;;  %v8570_v13 = vld [vmem:[%s11049_s16 + $0x28] sm:$0xf0]  ;;  %v8800_v2 = vld [vmem:[%s11049_s16 + $0x1d0] sm:$0xf] }
 0x170   : > { %v11290_v15 = vpack.c.bf16 %v1291_v11, %v1290_v9  ;;  %v1154_v47 = vsub.f32 1.5, %v1153_v24  ;;  %v1181_v27 = vmul.f32 %v11299_v43, %v11264_v55  ;;  %v1275_v61 = vmul.f32 %v11215_v57, %v1274_v59  ;;  %1737 = vmatpush.bf16.msrb.mxu2 %v8633_v50  ;;  %v9226_v11 = vld [vmem:[%s11049_s16 + $0xc] sm:$0xf] }
 0x171   : > { %1672 = vmatmul.bf16.vlgmr.msra.gmra.mxu2 %v11285_v12  ;;  %1721 = vmatmul.bf16.vlgmr.msra.gmra.mxu3 %v11285_v12  ;;  %v1165_v21 = vmul.f32 %v11242_v45, %v1164_v18  ;;  %v11338_v4 = vadd.f32 1.1920929e-07, %v1104_v48  ;;  %v8605_v17 = vor.u32 %v9234_v62, %v8602_v56  ;;  %v1289_v20 = vsel %vm11328_vm5, %v11219_v0, %v1285_v53 }
 0x172   : > { %1642 = vmatmul.bf16.vlgmr.msra.gmra.mxu0 %v11290_v15  ;;  %1691 = vmatmul.bf16.vlgmr.msra.gmra.mxu1 %v11290_v15  ;;  %v1155_v60 = vmul.f32 %v11271_v58, %v1154_v47  ;;  %v11353_v9 = vadd.f32 1.1920929e-07, %v1105_v54  ;;  %v1182_v14 = vmul.f32 %v11299_v43, %v1181_v27  ;;  %v1172_v23 = vmul.f32 %v11294_v39, %v1171_v31 }
 0x173   : > { %v1169_v0 = vsel %vm11334_vm6, %v11242_v45, %v1165_v21  ;;  %v1279_v7 = vsel %vm1278_vm8, %v11215_v57, %v1275_v61  ;;  %v1305_v19 = vmul.f32 %v1289_v20, %v11079_v22  ;;  %9586 = vrsqrt.f32 %v11338_v4  ;;  %1787 = vmatpush.bf16.msrb.mxu3 %v8605_v17  ;;  %v1078_v57 = vpop.xlane.xlu1 %1077  ;;  %v9283_v17 = vld [vmem:[%s11049_s16 + $0x1d4] sm:$0xf] }
 0x174   : > { %v1159_v10 = vsel %vm11349_vm7, %v11271_v58, %v1155_v60  ;;  %1738 = vmatpush.bf16.msrb.mxu2 %v8601_v6  ;;  %v8569_v5 = vor.u32 %v9230_v3, %v8568_v8  ;;  %v8573_v25 = vor.u32 %v9226_v11, %v8570_v13  ;;  %v1293_v45 = vmul.f32 %v1169_v0, %v11091_v28  ;;  %v1076_v28 = vpop.xlane.xlu0 %1075  ;;  %v9287_v6 = vld [vmem:[%s11049_s16 + $0x1ec] sm:$0xf0]  ;;  %v8802_v20 = vld [vmem:[%s11049_s16 + $0x1f0] sm:$0xf0] }
 0x175   : > { %v1292_v32 = vmul.f32 %v1159_v10, %v11093_v29  ;;  %9588 = vrsqrt.f32 %v11353_v9  ;;  %v1304_v58 = vmul.f32 %v1279_v7, %v11067_v16  ;;  %v1183_v37 = vmul.f32 0.5, %v1182_v14  ;;  %v9279_v11 = vld [vmem:[%s11049_s16 + $0x1ac] sm:$0xf0]  ;;  %v9275_v14 = vld [vmem:[%s11049_s16 + $0x194] sm:$0xf] }
 0x176   : > { %v1173_v38 = vmul.f32 0.5, %v1172_v23  ;;  %vm1177_vm10 = vweird.f32 %v11294_v39  ;;  %vm1186_vm11 = vweird.f32 %v11264_v55  ;;  %vm1187_vm12 = vweird.f32 %v11299_v43  ;;  %v8770_v23 = vld [vmem:[%s11049_s16 + $0x1b0] sm:$0xf0] }
 0x177   : > { %v11376_v18 = vpack.c.bf16 %v1305_v19, %v1304_v58  ;;  %1788 = vmatpush.bf16.msrb.mxu3 %v8573_v25  ;;  %v11378_v22 = vpack.c.bf16 %v1293_v45, %v1292_v32  ;;  %v1184_v33 = vsub.f32 1.5, %v1183_v37  ;;  %v1107_v16 = vmul.f32 %v11158_v44, %v1078_v57  ;;  %vm1178_vm13 = vmor %vm1176_vm9, %vm1177_vm10  ;;  %v8736_v58 = vld [vmem:[%s11049_s16 + $0x150] sm:$0xf]  ;;  %v9267_v57 = vld [vmem:[%s11049_s16 + $0x154] sm:$0xf] }
 0x178   : > { %1739 = vmatpush.bf16.msrb.mxu2 %v8569_v5  ;;  %v1174_v59 = vsub.f32 1.5, %v1173_v38  ;;  %v1106_v48 = vmul.f32 %v11158_v44, %v1076_v28  ;;  %vm1188_vm14 = vmor %vm1186_vm11, %vm1187_vm12  ;;  %vm1196_vm15 = vweird.f32 %v11338_v4  ;;  %vm1206_vm1 = vweird.f32 %v11353_v9  ;;  %v9271_v37 = vld [vmem:[%s11049_s16 + $0x16c] sm:$0xf0] }
 0x179   : > { %v11380_v24 = vpop.eup %9586  ;;  %v1185_v50 = vmul.f32 %v11299_v43, %v1184_v33  ;;  %v11400_v52 = vadd.f32 1.1920929e-07, %v1107_v16  ;;  %v8801_v3 = vor.u32 %v9287_v6, %v8800_v2  ;;  %v8805_v10 = vor.u32 %v9283_v17, %v8802_v20  ;;  %v8738_v33 = vld [vmem:[%s11049_s16 + $0x170] sm:$0xf0]  ;;  %v8640_v17 = vld [vmem:[%s11049_s16 + $0x90] sm:$0xf] }
 0x17a   : > { %v1191_v47 = vmul.f32 %v11380_v24, %v11338_v4  ;;  %v1175_v49 = vmul.f32 %v11294_v39, %v1174_v59  ;;  %v11403_v53 = vadd.f32 1.1920929e-07, %v1106_v48  ;;  %vm1197_vm0 = vweird.f32 %v11380_v24  ;;  %v8674_v6 = vld [vmem:[%s11049_s16 + $0xf0] sm:$0xf0] }
 0x17b   : > { %v11384_v29 = vpop.eup %9588  ;;  %v1189_v54 = vsel %vm1188_vm14, %v11299_v43, %v1185_v50  ;;  %9590 = vrsqrt.f32 %v11400_v52  ;;  %vm11441_vm3 = vmor %vm1196_vm15, %vm1197_vm0  ;;  %1830 = vmatpush.bf16.msrb.mxu0 %v8801_v3  ;;  %v8769_v45 = vor.u32 %v9279_v11, %v8768_v1  ;;  %1879 = vmatpush.bf16.msrb.mxu1 %v8805_v10  ;;  %v8773_v32 = vor.u32 %v9275_v14, %v8770_v23  ;;  %v9247_v3 = vld [vmem:[%s11049_s16 + $0xac] sm:$0xf0]  ;;  %v9243_v20 = vld [vmem:[%s11049_s16 + $0x94] sm:$0xf] }
 0x17c   : > { %v1201_v51 = vmul.f32 %v11384_v29, %v11353_v9  ;;  %v1192_v55 = vmul.f32 %v11380_v24, %v1191_v47  ;;  %v1179_v26 = vsel %vm1178_vm13, %v11294_v39, %v1175_v49  ;;  %v1295_v56 = vmul.f32 %v1189_v54, %v11103_v34  ;;  %v1082_v61 = vpop.xlane.xlu0 %1081  ;;  %v8704_v49 = vld [vmem:[%s11049_s16 + $0x110] sm:$0xf]  ;;  %v9259_v54 = vld [vmem:[%s11049_s16 + $0x114] sm:$0xf]  ;;  %v8680_v23 = vld [vmem:[%s11049_s16 + $0xd8] sm:$0xf] }
 0x17d   : > { %v1294_v21 = vmul.f32 %v1179_v26, %v11095_v30  ;;  %9592 = vrsqrt.f32 %v11403_v53  ;;  %v1080_v30 = vpop.xlane.xlu2 %1079  ;;  %vm1207_vm2 = vweird.f32 %v11384_v29  ;;  %v1109_v8 = vmul.f32 %v11158_v44, %v1082_v61  ;;  %v8672_v61 = vld [vmem:[%s11049_s16 + $0xd0] sm:$0xf]  ;;  %v8642_v1 = vld [vmem:[%s11049_s16 + $0xb0] sm:$0xf0] }
 0x17e   : > { %v1202_v62 = vmul.f32 %v11384_v29, %v1201_v51  ;;  %v1193_v60 = vmul.f32 0.5, %v1192_v55  ;;  %v1108_v0 = vmul.f32 %v11158_v44, %v1080_v30  ;;  %vm11454_vm4 = vmor %vm1206_vm1, %vm1207_vm2  ;;  %v8737_v48 = vor.u32 %v9271_v37, %v8736_v58  ;;  %v9263_v55 = vld [vmem:[%s11049_s16 + $0x12c] sm:$0xf0]  ;;  %v9251_v30 = vld [vmem:[%s11049_s16 + $0xd4] sm:$0xf] }
 0x17f   : > { %v11412_v31 = vpack.c.bf16 %v1295_v56, %v1294_v21  ;;  %v11460_v38 = vadd.f32 1.1920929e-07, %v1109_v8  ;;  %1831 = vmatpush.bf16.msrb.mxu0 %v8769_v45  ;;  %1880 = vmatpush.bf16.msrb.mxu1 %v8773_v32  ;;  %v8741_v50 = vor.u32 %v9267_v57, %v8738_v33  ;;  %v8705_v56 = vor.u32 %v9263_v55, %v8704_v49  ;;  %v8610_v45 = vld [vmem:[%s11049_s16 + $0x70] sm:$0xf0]  ;;  %v8576_v33 = vld [vmem:[%s11049_s16 + $0x10] sm:$0xf] }
 0x180   : > { %v1203_v27 = vmul.f32 0.5, %v1202_v62  ;;  %v1194_v43 = vsub.f32 1.5, %v1193_v60  ;;  %v11467_v9 = vadd.f32 1.1920929e-07, %v1108_v0  ;;  %vm1226_vm5 = vweird.f32 %v11400_v52 }
 0x181   : > { %1677 = vmatmul.bf16.gmra.mxu2 %v11376_v18  ;;  %1726 = vmatmul.bf16.gmra.mxu3 %v11376_v18  ;;  %v11414_v39 = vpop.eup %9590  ;;  %9594 = vrsqrt.f32 %v11460_v38  ;;  %vm1216_vm7 = vweird.f32 %v11403_v53  ;;  %v8677_v8 = vor.u32 %v9251_v30, %v8674_v6  ;;  %v8645_v7 = vor.u32 %v9243_v20, %v8642_v1  ;;  %v9272_v6 = vld [vmem:[%s11049_s16 + $0x174] sm:$0xf0] }
 0x182   : > { %1647 = vmatmul.bf16.gmra.mxu0 %v11378_v22  ;;  %1696 = vmatmul.bf16.gmra.mxu1 %v11378_v22  ;;  %v1204_v63 = vsub.f32 1.5, %v1203_v27  ;;  %v1195_v13 = vmul.f32 %v11380_v24, %v1194_v43  ;;  %v1221_v5 = vmul.f32 %v11414_v39, %v11400_v52  ;;  %9596 = vrsqrt.f32 %v11467_v9  ;;  %v8712_v1 = vld [vmem:[%s11049_s16 + $0x118] sm:$0xf] }
 0x183   : > { %v11418_v34 = vpop.eup %9592  ;;  %1832 = vmatpush.bf16.msrb.mxu0 %v8737_v48  ;;  %1881 = vmatpush.bf16.msrb.mxu1 %v8741_v50  ;;  %vm1227_vm6 = vweird.f32 %v11414_v39  ;;  %v8641_v52 = vor.u32 %v9247_v3, %v8640_v17  ;;  %vm1246_vm11 = vweird.f32 %v11460_v38  ;;  %vm1236_vm13 = vweird.f32 %v11467_v9  ;;  %v9268_v17 = vld [vmem:[%s11049_s16 + $0x15c] sm:$0xf] }
 0x184   : > { %v1205_v19 = vmul.f32 %v11384_v29, %v1204_v63  ;;  %v1211_v25 = vmul.f32 %v11418_v34, %v11403_v53  ;;  %v1199_v59 = vsel %vm11441_vm3, %v11380_v24, %v1195_v13  ;;  %v1222_v16 = vmul.f32 %v11414_v39, %v1221_v5  ;;  %v9255_v63 = vld [vmem:[%s11049_s16 + $0xec] sm:$0xf0]  ;;  %vm11509_vm9 = vmor %vm1226_vm5, %vm1227_vm6  ;;  %v8746_v3 = vld [vmem:[%s11049_s16 + $0x178] sm:$0xf0] }
 0x185   : > { %v1296_v24 = vmul.f32 %v1199_v59, %v11105_v35  ;;  %vm1217_vm8 = vweird.f32 %v11418_v34  ;;  %v8673_v2 = vor.u32 %v9255_v63, %v8672_v61  ;;  %v9239_v5 = vld [vmem:[%s11049_s16 + $0x6c] sm:$0xf0]  ;;  %v8778_v63 = vld [vmem:[%s11049_s16 + $0x1b8] sm:$0xf0]  ;;  %v8749_v20 = vor.u32 %v9268_v17, %v8746_v3 }
 0x186   : > { %v1209_v28 = vsel %vm11454_vm4, %v11384_v29, %v1205_v19  ;;  %v1212_v47 = vmul.f32 %v11418_v34, %v1211_v25  ;;  %v8706_v29 = vld [vmem:[%s11049_s16 + $0x130] sm:$0xf0]  ;;  %v1223_v26 = vmul.f32 0.5, %v1222_v16  ;;  %vm11522_vm10 = vmor %vm1216_vm7, %vm1217_vm8  ;;  %v8608_v19 = vld [vmem:[%s11049_s16 + $0x50] sm:$0xf] }
 0x187   : > { %v1297_v51 = vmul.f32 %v1209_v28, %v11107_v36  ;;  %v8709_v21 = vor.u32 %v9259_v54, %v8706_v29  ;;  %v11484_v27 = vpop.eup %9594  ;;  %1833 = vmatpush.bf16.msrb.mxu0 %v8705_v56  ;;  %v9235_v25 = vld [vmem:[%s11049_s16 + $0x54] sm:$0xf]  ;;  %v8609_v37 = vor.u32 %v9239_v5, %v8608_v19  ;;  %v9231_v16 = vld [vmem:[%s11049_s16 + $0x2c] sm:$0xf0]  ;;  %v9260_v13 = vld [vmem:[%s11049_s16 + $0x11c] sm:$0xf] }
 0x188   : > { %v1213_v62 = vmul.f32 0.5, %v1212_v47  ;;  %v1224_v35 = vsub.f32 1.5, %v1223_v26  ;;  %v11488_v43 = vpop.eup %9596  ;;  %v1241_v10 = vmul.f32 %v11484_v27, %v11460_v38  ;;  %v8613_v57 = vor.u32 %v9235_v25, %v8610_v45  ;;  %v9227_v47 = vld [vmem:[%s11049_s16 + $0x14] sm:$0xf]  ;;  %v8682_v5 = vld [vmem:[%s11049_s16 + $0xf8] sm:$0xf0] }
 0x189   : > { %v11482_v60 = vpack.c.bf16 %v1297_v51, %v1296_v24  ;;  %1882 = vmatpush.bf16.msrb.mxu1 %v8709_v21  ;;  %v1231_v14 = vmul.f32 %v11488_v43, %v11467_v9  ;;  %vm1247_vm12 = vweird.f32 %v11484_v27  ;;  %vm1237_vm14 = vweird.f32 %v11488_v43  ;;  %v8810_v21 = vld [vmem:[%s11049_s16 + $0x1f8] sm:$0xf0]  ;;  %v8648_v45 = vld [vmem:[%s11049_s16 + $0x98] sm:$0xf] }
 0x18a   : > { %v1214_v36 = vsub.f32 1.5, %v1213_v62  ;;  %v1225_v11 = vmul.f32 %v11414_v39, %v1224_v35  ;;  %v1242_v32 = vmul.f32 %v11484_v27, %v1241_v10  ;;  %vm1248_vm15 = vmor %vm1246_vm11, %vm1247_vm12  ;;  %v9284_v62 = vld [vmem:[%s11049_s16 + $0x1dc] sm:$0xf]  ;;  %v8776_v35 = vld [vmem:[%s11049_s16 + $0x198] sm:$0xf] }
 0x18b   : > { %1834 = vmatpush.bf16.msrb.mxu0 %v8673_v2  ;;  %v1232_v58 = vmul.f32 %v11488_v43, %v1231_v14  ;;  %vm1238_vm0 = vmor %vm1236_vm13, %vm1237_vm14  ;;  %v8744_v2 = vld [vmem:[%s11049_s16 + $0x158] sm:$0xf]  ;;  %v8714_v10 = vld [vmem:[%s11049_s16 + $0x138] sm:$0xf0] }
 0x18c   : > { %v1215_v0 = vmul.f32 %v11418_v34, %v1214_v36  ;;  %v1229_v53 = vsel %vm11509_vm9, %v11414_v39, %v1225_v11  ;;  %v8578_v39 = vld [vmem:[%s11049_s16 + $0x30] sm:$0xf0]  ;;  %v1243_v48 = vmul.f32 0.5, %v1242_v32  ;;  %v9280_v36 = vld [vmem:[%s11049_s16 + $0x1b4] sm:$0xf0]  ;;  %v8717_v14 = vor.u32 %v9260_v13, %v8714_v10  ;;  %v9213_v10 = vld [vmem:[#allocation14 + $0x20] sm:$0xff] }
 0x18d   : > { %1883 = vmatpush.bf16.msrb.mxu1 %v8677_v8  ;;  %v1299_v59 = vmul.f32 %v1229_v53, %v11115_v40  ;;  %v1233_v50 = vmul.f32 0.5, %v1232_v58  ;;  %v8581_v49 = vor.u32 %v9227_v47, %v8578_v39  ;;  %v8777_v61 = vor.u32 %v9280_v36, %v8776_v35  ;;  %v9264_v11 = vld [vmem:[%s11049_s16 + $0x134] sm:$0xf0]  ;;  %v8650_v58 = vld [vmem:[%s11049_s16 + $0xb8] sm:$0xf0] }
 0x18e   : > { %v1219_v4 = vsel %vm11522_vm10, %v11418_v34, %v1215_v0  ;;  %v8577_v34 = vor.u32 %v9231_v16, %v8576_v33  ;;  %v1244_v51 = vsub.f32 1.5, %v1243_v48  ;;  %v8745_v8 = vor.u32 %v9272_v6, %v8744_v2  ;;  %v9248_v53 = vld [vmem:[%s11049_s16 + $0xb4] sm:$0xf0] }
 0x18f   : > { %1835 = vmatpush.bf16.msrb.mxu0 %v8641_v52  ;;  %v1298_v28 = vmul.f32 %v1219_v4, %v11117_v41  ;;  %v1234_v55 = vsub.f32 1.5, %v1233_v50  ;;  %v8713_v0 = vor.u32 %v9264_v11, %v8712_v1  ;;  %v9256_v52 = vld [vmem:[%s11049_s16 + $0xf4] sm:$0xf0]  ;;  %v9244_v4 = vld [vmem:[%s11049_s16 + $0x9c] sm:$0xf]  ;;  %v8649_v32 = vor.u32 %v9248_v53, %v8648_v45 }
 0x190   : > { %v1245_v40 = vmul.f32 %v11484_v27, %v1244_v51  ;;  %v8681_v19 = vor.u32 %v9256_v52, %v8680_v23  ;;  %v9240_v33 = vld [vmem:[%s11049_s16 + $0x74] sm:$0xf0]  ;;  %v9228_v50 = vld [vmem:[%s11049_s16 + $0x1c] sm:$0xf] }
 0x191   : > { %1740 = vmatmul.bf16.vlgmr.msrb.gmra.mxu2 %v11290_v15  ;;  %1789 = vmatmul.bf16.vlgmr.msrb.gmra.mxu3 %v11290_v15  ;;  %v11544_v24 = vpack.c.bf16 %v1299_v59, %v1298_v28  ;;  %v1235_v41 = vmul.f32 %v11488_v43, %v1234_v55  ;;  %v9236_v59 = vld [vmem:[%s11049_s16 + $0x5c] sm:$0xf]  ;;  %v8584_v39 = vld [vmem:[%s11049_s16 + $0x18] sm:$0xf] }
 0x192   : > { %1652 = vmatmul.bf16.gmra.mxu0 %v11412_v31  ;;  %1701 = vmatmul.bf16.gmra.mxu1 %v11412_v31  ;;  %v1249_v38 = vsel %vm1248_vm15, %v11484_v27, %v1245_v40  ;;  %v8813_v27 = vor.u32 %v9284_v62, %v8810_v21  ;;  %v8618_v28 = vld [vmem:[%s11049_s16 + $0x78] sm:$0xf0]  ;;  %v9232_v48 = vld [vmem:[%s11049_s16 + $0x34] sm:$0xf0] }
 0x193   : > { %1884 = vmatpush.bf16.msrb.mxu1 %v8645_v7  ;;  %1836 = vmatpush.bf16.msrb.mxu0 %v8609_v37  ;;  %v1239_v54 = vsel %vm1238_vm0, %v11488_v43, %v1235_v41  ;;  %v1301_v9 = vmul.f32 %v1249_v38, %v11127_v46  ;;  %v9288_v46 = vld [vmem:[%s11049_s16 + $0x1f4] sm:$0xf0]  ;;  %v9276_v43 = vld [vmem:[%s11049_s16 + $0x19c] sm:$0xf]  ;;  %v8653_v37 = vor.u32 %v9244_v4, %v8650_v58  ;;  %v9210_v58 = vld [vmem:[#allocation14 + $0x8] sm:$0xff] }
 0x194   : > { %v1300_v29 = vmul.f32 %v1239_v54, %v11119_v42  ;;  %v8808_v42 = vld [vmem:[%s11049_s16 + $0x1d8] sm:$0xf]  ;;  %1977 = vmatpush.bf16.msra.mxu3 %v8813_v27  ;;  %v8781_v30 = vor.u32 %v9276_v43, %v8778_v63  ;;  %v9252_v7 = vld [vmem:[%s11049_s16 + $0xdc] sm:$0xf]  ;;  %v8621_v47 = vor.u32 %v9236_v59, %v8618_v28  ;;  %v9215_v63 = vld [vmem:[#allocation14 + $0x30] sm:$0xff] }
 0x195   : > { %v8809_v56 = vor.u32 %v9288_v46, %v8808_v42  ;;  %v8685_v25 = vor.u32 %v9252_v7, %v8682_v5  ;;  %v8586_v51 = vld [vmem:[%s11049_s16 + $0x38] sm:$0xf0] }
 0x196   : > { %v11560_v26 = vpack.c.bf16 %v1301_v9, %v1300_v29  ;;  %v8589_v55 = vor.u32 %v9228_v50, %v8586_v51  ;;  %v9216_v35 = vld [vmem:[#allocation14 + $0x38] sm:$0xff] }
 0x197   : > { %1885 = vmatpush.bf16.msrb.mxu1 %v8613_v57  ;;  %1837 = vmatpush.bf16.msrb.mxu0 %v8577_v34  ;;  %v8616_v57 = vld [vmem:[%s11049_s16 + $0x58] sm:$0xf] }
 0x198   : > { %1928 = vmatpush.bf16.msra.mxu2 %v8809_v56  ;;  %1978 = vmatpush.bf16.msra.mxu3 %v8781_v30  ;;  %v8617_v16 = vor.u32 %v9240_v33, %v8616_v57  ;;  %v9214_v30 = vld [vmem:[#allocation14 + $0x28] sm:$0xff] }
 0x19b   : > { %1886 = vmatpush.bf16.msrb.mxu1 %v8581_v49  ;;  %v8585_v49 = vor.u32 %v9232_v48, %v8584_v39  ;;  %2098 = vmatpush.bf16.msra.mxu0 %v9216_v35  ;;  %v9209_v48 = vld [vmem:[#allocation14] sm:$0xff] }
 0x19c   : > { %1929 = vmatpush.bf16.msra.mxu2 %v8777_v61  ;;  %1979 = vmatpush.bf16.msra.mxu3 %v8749_v20 }
 0x19f   : > { %2099 = vmatpush.bf16.msra.mxu0 %v9215_v63 }
 0x1a0   : > { %1930 = vmatpush.bf16.msra.mxu2 %v8745_v8  ;;  %1980 = vmatpush.bf16.msra.mxu3 %v8717_v14 }
 0x1a1   : > { %1745 = vmatmul.bf16.gmra.mxu2 %v11378_v22  ;;  %1794 = vmatmul.bf16.gmra.mxu3 %v11378_v22 }
 0x1a2   : > { %1657 = vmatmul.bf16.gmra.mxu0 %v11482_v60  ;;  %1706 = vmatmul.bf16.gmra.mxu1 %v11482_v60 }
 0x1a3   : > { %2100 = vmatpush.bf16.msra.mxu0 %v9214_v30 }
 0x1a4   : > { %1931 = vmatpush.bf16.msra.mxu2 %v8713_v0  ;;  %1981 = vmatpush.bf16.msra.mxu3 %v8685_v25  ;;  %v9211_v25 = vld [vmem:[#allocation14 + $0x10] sm:$0xff] }
 0x1a7   : > { %2101 = vmatpush.bf16.msra.mxu0 %v9213_v10 }
 0x1a8   : > { %1932 = vmatpush.bf16.msra.mxu2 %v8681_v19  ;;  %1982 = vmatpush.bf16.msra.mxu3 %v8653_v37  ;;  %v9212_v19 = vld [vmem:[#allocation14 + $0x18] sm:$0xff] }
 0x1ab   : > { %2102 = vmatpush.bf16.msra.mxu0 %v9212_v19 }
 0x1ac   : > { %1933 = vmatpush.bf16.msra.mxu2 %v8649_v32  ;;  %1983 = vmatpush.bf16.msra.mxu3 %v8621_v47 }
 0x1af   : > { %2103 = vmatpush.bf16.msra.mxu0 %v9211_v25 }
 0x1b0   : > { %1934 = vmatpush.bf16.msra.mxu2 %v8617_v16  ;;  %1984 = vmatpush.bf16.msra.mxu3 %v8589_v55 }
 0x1b1   : > { %1750 = vmatmul.bf16.gmra.mxu2 %v11412_v31  ;;  %1799 = vmatmul.bf16.gmra.mxu3 %v11412_v31 }
 0x1b2   : > { %1662 = vmatmul.bf16.gmra.mxu0 %v11544_v24  ;;  %1711 = vmatmul.bf16.gmra.mxu1 %v11544_v24 }
 0x1b3   : > { %2104 = vmatpush.bf16.msra.mxu0 %v9210_v58 }
 0x1b4   : > { %1935 = vmatpush.bf16.msra.mxu2 %v8585_v49 }
 0x1b7   : > { %2105 = vmatpush.bf16.msra.mxu0 %v9209_v48 }
 0x1b8   : > { %2516 = vmatpush.bf16.msrb.mxu2 %v9216_v35 }
 0x1bc   : > { %2517 = vmatpush.bf16.msrb.mxu2 %v9215_v63 }
 0x1c0   : > { %2518 = vmatpush.bf16.msrb.mxu2 %v9214_v30 }
 0x1c1   : > { %1755 = vmatmul.bf16.gmra.mxu2 %v11482_v60  ;;  %1804 = vmatmul.bf16.gmra.mxu3 %v11482_v60 }
 0x1c2   : > { %1667 = vmatmul.bf16.gmra.mxu0 %v11560_v26  ;;  %1716 = vmatmul.bf16.gmra.mxu1 %v11560_v26 }
 0x1c4   : > { %2519 = vmatpush.bf16.msrb.mxu2 %v9213_v10 }
 0x1c8   : > { %2520 = vmatpush.bf16.msrb.mxu2 %v9212_v19 }
 0x1cc   : > { %2521 = vmatpush.bf16.msrb.mxu2 %v9211_v25 }
 0x1d0   : > { %2522 = vmatpush.bf16.msrb.mxu2 %v9210_v58 }
 0x1d1   : > { %1760 = vmatmul.bf16.gmra.mxu2 %v11544_v24  ;;  %1809 = vmatmul.bf16.gmra.mxu3 %v11544_v24 }
 0x1d2   : > { %1838 = vmatmul.bf16.vlgmr.msrb.gmra.mxu0 %v11290_v15  ;;  %1887 = vmatmul.bf16.vlgmr.msrb.gmra.mxu1 %v11290_v15 }
 0x1d4   : > { %2523 = vmatpush.bf16.msrb.mxu2 %v9209_v48 }
 0x1e1   : > { %1765 = vmatmul.bf16.gmra.mxu2 %v11560_v26  ;;  %1814 = vmatmul.bf16.gmra.mxu3 %v11560_v26 }
 0x1e2   : > { %1843 = vmatmul.bf16.gmra.mxu0 %v11378_v22  ;;  %1892 = vmatmul.bf16.gmra.mxu1 %v11378_v22 }
 0x1ef   : > { %v11605_v34 = vpop.f32.mrf.mxu0  ;;  %v11660_v52 = vpop.f32.mrf.mxu1 }
 0x1f1   : > { %1770 = vmatmul.bf16.gmra.mxu2 %v11285_v12  ;;  %1819 = vmatmul.bf16.gmra.mxu3 %v11285_v12 }
 0x1f2   : > { %1848 = vmatmul.bf16.gmra.mxu0 %v11412_v31  ;;  %1897 = vmatmul.bf16.gmra.mxu1 %v11412_v31 }
 0x1f4   : > { %v11612_v40 = vpop.f32.mrf.mxu2  ;;  %v11614_v41 = vpop.f32.mrf.mxu3 }
 0x1f7   : > { %v11616_v38 = vpop.f32.mrf.mxu0  ;;  %v11670_v33 = vpop.f32.mrf.mxu1 }
 0x1fc   : > { %v11618_v54 = vpop.f32.mrf.mxu2  ;;  %v11620_v9 = vpop.f32.mrf.mxu3 }
 0x1ff   : > { %v11622_v29 = vpop.f32.mrf.mxu0 }
 0x201   : > { %1775 = vmatmul.bf16.gmra.mxu2 %v11376_v18  ;;  %1824 = vmatmul.bf16.gmra.mxu3 %v11376_v18 }
 0x202   : > { %1853 = vmatmul.bf16.gmra.mxu0 %v11482_v60  ;;  %1902 = vmatmul.bf16.gmra.mxu1 %v11482_v60 }
 0x204   : > { %v11628_v42 = vpop.f32.mrf.mxu2  ;;  %v11630_v46 = vpop.f32.mrf.mxu3 }
 0x207   : > { %v11632_v62 = vpop.f32.mrf.mxu0 }
 0x20c   : > { %v11634_v56 = vpop.f32.mrf.mxu2  ;;  %v11636_v21 = vpop.f32.mrf.mxu3 }
 0x20f   : > { %v11638_v27 = vpop.f32.mrf.mxu0 }
 0x211   : > { %1936 = vmatmul.bf16.vlgmr.msra.gmra.mxu2 %v11290_v15  ;;  %1985 = vmatmul.bf16.vlgmr.msra.gmra.mxu3 %v11290_v15 }
 0x212   : > { %1858 = vmatmul.bf16.gmra.mxu0 %v11544_v24  ;;  %1907 = vmatmul.bf16.gmra.mxu1 %v11544_v24 }
 0x214   : > { %v1741_v36 = vpop.f32.mrf.mxu2  ;;  %v1790_v43 = vpop.f32.mrf.mxu3 }
 0x215   : > { %v2862_v2 = vpack.c.bf16 %v1741_v36, %v1741_v36  ;;  %v7440_v6 = vmax.f32 %v1790_v43, 0.0 }
 0x217   : > { %v11644_v61 = vpop.f32.mrf.mxu0  ;;  %v3081_v20 = vunpack.c.l.b16 %v2862_v2  ;;  %v11646_v1 = vmul.f32 %v7440_v6, %v7440_v6 }
 0x219   : > { %15873 = vst [vmem:[#allocation40_spill] sm:$0xff] %v11646_v1 }
 0x21c   : > { %v1743_v17 = vpop.f32.mrf.mxu2  ;;  %v1792_v8 = vpop.f32.mrf.mxu3 }
 0x21d   : > { %v2863_v15 = vpack.c.bf16 %v1743_v17, %v1743_v17  ;;  %v7444_v3 = vmax.f32 %v1792_v8, 0.0 }
 0x21f   : > { %v3082_v11 = vunpack.c.l.b16 %v2863_v15  ;;  %v11648_v13 = vmul.f32 %v7444_v3, %v7444_v3  ;;  %v11650_v0 = vpop.f32.mrf.mxu0 }
 0x221   : > { %15874 = vst [vmem:[#allocation41_spill] sm:$0xff] %v11648_v13  ;;  %v11652_v14 = vpack.c.b16 %v3082_v11, %v3081_v20  ;;  %1941 = vmatmul.bf16.gmra.mxu2 %v11378_v22  ;;  %1990 = vmatmul.bf16.gmra.mxu3 %v11378_v22 }
 0x222   : > { %1863 = vmatmul.bf16.gmra.mxu0 %v11560_v26  ;;  %1912 = vmatmul.bf16.gmra.mxu1 %v11560_v26 }
 0x223   : > { %3841 = vrot.lane.b32.xlu2 %v11652_v14, %s10693_s20  ;;  %3315 = vrot.lane.b32.xlu0 %v11652_v14, %s10694_s30 }
 0x224   : > { %3578 = vrot.lane.b32.xlu1 %v11652_v14, %s10695_s26  ;;  %v1746_v7 = vpop.f32.mrf.mxu2  ;;  %v1795_v22 = vpop.f32.mrf.mxu3 }
 0x225   : > { %v2864_v45 = vpack.c.bf16 %v1746_v7, %v1746_v7  ;;  %v7448_v53 = vmax.f32 %v1795_v22, 0.0 }
 0x227   : > { %v11668_v5 = vpop.f32.mrf.mxu0  ;;  %v3083_v59 = vunpack.c.l.b16 %v2864_v45  ;;  %v11672_v28 = vmul.f32 %v7448_v53, %v7448_v53  ;;  %v2027_v53 = vmul.f32 %v11616_v38, %v11616_v38 }
 0x229   : > { %15875 = vst [vmem:[#allocation42_spill] sm:$0xff] %v11672_v28 }
 0x22c   : > { %v1748_v4 = vpop.f32.mrf.mxu2  ;;  %v1797_v32 = vpop.f32.mrf.mxu3 }
 0x22d   : > { %v2865_v37 = vpack.c.bf16 %v1748_v4, %v1748_v4  ;;  %v7452_v57 = vmax.f32 %v1797_v32, 0.0 }
 0x22f   : > { %v3084_v16 = vunpack.c.l.b16 %v2865_v37  ;;  %v11674_v47 = vmul.f32 %v7452_v57, %v7452_v57  ;;  %v11676_v39 = vpop.f32.mrf.mxu0  ;;  %v2026_v57 = vmul.f32 %v11605_v34, %v11605_v34 }
 0x231   : > { %15876 = vst [vmem:[#allocation43_spill] sm:$0xff] %v11674_v47  ;;  %v11678_v50 = vpack.c.b16 %v3084_v16, %v3083_v59  ;;  %1946 = vmatmul.bf16.gmra.mxu2 %v11412_v31  ;;  %1995 = vmatmul.bf16.gmra.mxu3 %v11412_v31  ;;  %v11692_v31 = vpop.f32.mrf.mxu1 }
 0x232   : > { %1868 = vmatmul.bf16.gmra.mxu0 %v11285_v12  ;;  %1917 = vmatmul.bf16.gmra.mxu1 %v11285_v12 }
 0x233   : > { %3317 = vrot.lane.b32.xlu1 %v11678_v50, %s10694_s30  ;;  %3580 = vrot.lane.b32.xlu0 %v11678_v50, %s10695_s26 }
 0x234   : > { %v1751_v51 = vpop.f32.mrf.mxu2  ;;  %v1800_v55 = vpop.f32.mrf.mxu3 }
 0x235   : > { %v2866_v36 = vpack.c.bf16 %v1751_v51, %v1751_v51  ;;  %v7456_v43 = vmax.f32 %v1800_v55, 0.0 }
 0x237   : > { %v11690_v35 = vpop.f32.mrf.mxu0  ;;  %v3085_v17 = vunpack.c.l.b16 %v2866_v36  ;;  %v11696_v8 = vmul.f32 %v7456_v43, %v7456_v43  ;;  %v2042_v36 = vpack.c.bf16 %v2027_v53, %v2026_v57 }
 0x239   : > { %15877 = vst [vmem:[#allocation44_spill] sm:$0xff] %v11696_v8  ;;  %v11708_v7 = vpop.f32.mrf.mxu1 }
 0x23b   : > { %3843 = vrot.lane.b32.xlu0 %v11678_v50, %s10693_s20 }
 0x23c   : > { %v1753_v63 = vpop.f32.mrf.mxu2  ;;  %v1802_v30 = vpop.f32.mrf.mxu3 }
 0x23d   : > { %v2867_v2 = vpack.c.bf16 %v1753_v63, %v1753_v63  ;;  %v7460_v6 = vmax.f32 %v1802_v30, 0.0 }
 0x23f   : > { %v3086_v15 = vunpack.c.l.b16 %v2867_v2  ;;  %v11698_v3 = vmul.f32 %v7460_v6, %v7460_v6  ;;  %v11700_v20 = vpop.f32.mrf.mxu0 }
 0x241   : > { %15878 = vst [vmem:[#allocation45_spill] sm:$0xff] %v11698_v3  ;;  %v11702_v11 = vpack.c.b16 %v3086_v15, %v3085_v17  ;;  %1951 = vmatmul.bf16.gmra.mxu2 %v11482_v60  ;;  %2000 = vmatmul.bf16.gmra.mxu3 %v11482_v60 }
 0x242   : > { %1873 = vmatmul.bf16.gmra.mxu0 %v11376_v18  ;;  %1922 = vmatmul.bf16.gmra.mxu1 %v11376_v18 }
 0x243   : > { %3319 = vrot.lane.b32.xlu2 %v11702_v11, %s10694_s30  ;;  %3582 = vrot.lane.b32.xlu1 %v11702_v11, %s10695_s26 }
 0x244   : > { %v1756_v22 = vpop.f32.mrf.mxu2  ;;  %v1805_v19 = vpop.f32.mrf.mxu3 }
 0x245   : > { %v2868_v60 = vpack.c.bf16 %v1756_v22, %v1756_v22  ;;  %v7464_v45 = vmax.f32 %v1805_v19, 0.0 }
 0x247   : > { %v11716_v25 = vpop.f32.mrf.mxu0  ;;  %v3087_v59 = vunpack.c.l.b16 %v2868_v60  ;;  %v11724_v16 = vmul.f32 %v7464_v45, %v7464_v45 }
 0x249   : > { %15879 = vst [vmem:[#allocation46_spill] sm:$0xff] %v11724_v16  ;;  %v9222_v16 = vld [vmem:[#allocation16 + $0x28] sm:$0xff] }
 0x24b   : > { %3845 = vrot.lane.b32.xlu1 %v11702_v11, %s10693_s20 }
 0x24c   : > { %v1758_v4 = vpop.f32.mrf.mxu2  ;;  %v1807_v32 = vpop.f32.mrf.mxu3 }
 0x24d   : > { %v2869_v58 = vpack.c.bf16 %v1758_v4, %v1758_v4  ;;  %v7468_v37 = vmax.f32 %v1807_v32, 0.0  ;;  %v2028_v4 = vmul.f32 %v11622_v29, %v11622_v29 }
 0x24f   : > { %v3088_v48 = vunpack.c.l.b16 %v2869_v58  ;;  %v11726_v51 = vmul.f32 %v7468_v37, %v7468_v37  ;;  %v1839_v55 = vpop.f32.mrf.mxu0 }
 0x250   : > { %v7441_v2 = vmax.f32 %v1839_v55, 0.0 }
 0x251   : > { %15880 = vst [vmem:[#allocation47_spill] sm:$0xff] %v11726_v51  ;;  %v11728_v43 = vpack.c.b16 %v3088_v48, %v3087_v59  ;;  %1956 = vmatmul.bf16.gmra.mxu2 %v11544_v24  ;;  %2005 = vmatmul.bf16.gmra.mxu3 %v11544_v24  ;;  %v2029_v24 = vmul.f32 %v11632_v62, %v11632_v62 }
 0x252   : > { %2106 = vmatmul.bf16.vlgmr.msra.gmra.mxu0 %v2042_v36  ;;  %v11738_v15 = vmul.f32 %v7441_v2, %v7441_v2 }
 0x253   : > { %3321 = vrot.lane.b32.xlu0 %v11728_v43, %s10694_s30  ;;  %3584 = vrot.lane.b32.xlu2 %v11728_v43, %s10695_s26  ;;  %v2043_v57 = vpack.c.bf16 %v2029_v24, %v2028_v4 }
 0x254   : > { %v1761_v30 = vpop.f32.mrf.mxu2  ;;  %15881 = vst [vmem:[#allocation48_spill] sm:$0xff] %v11738_v15 }
 0x255   : > { %v2870_v19 = vpack.c.bf16 %v1761_v30, %v1761_v30 }
 0x257   : > { %v1841_v6 = vpop.f32.mrf.mxu0  ;;  %v4136_v32 = vunpack.c.l.b16 %v2870_v19  ;;  %v2031_v19 = vmul.f32 %v11644_v61, %v11644_v61 }
 0x258   : > { %v7445_v17 = vmax.f32 %v1841_v6, 0.0 }
 0x25a   : > { %v11740_v22 = vmul.f32 %v7445_v17, %v7445_v17 }
 0x25b   : > { %3847 = vrot.lane.b32.xlu2 %v11728_v43, %s10693_s20 }
 0x25c   : > { %15882 = vst [vmem:[#allocation49_spill] sm:$0xff] %v11740_v22  ;;  %v1763_v45 = vpop.f32.mrf.mxu2 }
 0x25d   : > { %v2871_v53 = vpack.c.bf16 %v1763_v45, %v1763_v45 }
 0x25f   : > { %v4137_v58 = vunpack.c.l.b16 %v2871_v53  ;;  %v1844_v37 = vpop.f32.mrf.mxu0  ;;  %v2030_v53 = vmul.f32 %v11638_v27, %v11638_v27 }
 0x260   : > { %v7449_v55 = vmax.f32 %v1844_v37, 0.0 }
 0x261   : > { %v11750_v59 = vpack.c.b16 %v4137_v58, %v4136_v32  ;;  %1961 = vmatmul.bf16.gmra.mxu2 %v11560_v26  ;;  %2010 = vmatmul.bf16.gmra.mxu3 %v11560_v26  ;;  %v2044_v37 = vpack.c.bf16 %v2031_v19, %v2030_v53  ;;  %v2033_v19 = vmul.f32 %v11668_v5, %v11668_v5 }
 0x262   : > { %2111 = vmatmul.bf16.gmra.mxu0 %v2043_v57  ;;  %v11756_v2 = vmul.f32 %v7449_v55, %v7449_v55 }
 0x263   : > { %15883 = vst [vmem:[#allocation50_spill] sm:$0xff] %v11750_v59  ;;  %4632 = vrot.lane.b32.xlu2 %v11750_v59, %s10695_s26 }
 0x264   : > { %v1766_v48 = vpop.f32.mrf.mxu2  ;;  %15884 = vst [vmem:[#allocation51_spill] sm:$0xff] %v11756_v2 }
 0x265   : > { %v2872_v17 = vpack.c.bf16 %v1766_v48, %v1766_v48 }
 0x267   : > { %v1846_v36 = vpop.f32.mrf.mxu0  ;;  %v4138_v4 = vunpack.c.l.b16 %v2872_v17 }
 0x268   : > { %v7453_v30 = vmax.f32 %v1846_v36, 0.0 }
 0x26a   : > { %v11758_v6 = vmul.f32 %v7453_v30, %v7453_v30 }
 0x26b   : > { %4370 = vrot.lane.b32.xlu2 %v11750_v59, %s10694_s30 }
 0x26c   : > { %15885 = vst [vmem:[#allocation52_spill] sm:$0xff] %v11758_v6  ;;  %v1768_v26 = vpop.f32.mrf.mxu2 }
 0x26d   : > { %v2873_v45 = vpack.c.bf16 %v1768_v26, %v1768_v26 }
 0x26f   : > { %v4139_v32 = vunpack.c.l.b16 %v2873_v45  ;;  %v1849_v58 = vpop.f32.mrf.mxu0 }
 0x270   : > { %v7457_v55 = vmax.f32 %v1849_v58, 0.0  ;;  %v2032_v58 = vmul.f32 %v11650_v0, %v11650_v0 }
 0x271   : > { %v11768_v57 = vpack.c.b16 %v4139_v32, %v4138_v4  ;;  %1966 = vmatmul.bf16.gmra.mxu2 %v11285_v12  ;;  %2015 = vmatmul.bf16.gmra.mxu3 %v11285_v12  ;;  %v11784_v32 = vpop.f32.mrf.mxu1 }
 0x272   : > { %2116 = vmatmul.bf16.gmra.mxu0 %v2044_v37  ;;  %v11774_v26 = vmul.f32 %v7457_v55, %v7457_v55 }
 0x273   : > { %15886 = vst [vmem:[#allocation53_spill] sm:$0xff] %v11768_v57  ;;  %4634 = vrot.lane.b32.xlu1 %v11768_v57, %s10695_s26 }
 0x274   : > { %v1771_v48 = vpop.f32.mrf.mxu2  ;;  %15887 = vst [vmem:[#allocation54_spill] sm:$0xff] %v11774_v26 }
 0x275   : > { %v2874_v45 = vpack.c.bf16 %v1771_v48, %v1771_v48  ;;  %v2045_v48 = vpack.c.bf16 %v2033_v19, %v2032_v58  ;;  %v9224_v19 = vld [vmem:[#allocation16 + $0x38] sm:$0xff]  ;;  %v2493_v58 = vmul.f32 %v11670_v33, %v11670_v33 }
 0x276   : > { %2749 = vmatpush.bf16.msrb.mxu3 %v9224_v19  ;;  %2379 = vmatpush.bf16.msra.mxu1 %v9224_v19 }
 0x277   : > { %v1851_v36 = vpop.f32.mrf.mxu0  ;;  %v4140_v37 = vunpack.c.l.b16 %v2874_v45 }
 0x278   : > { %v7461_v30 = vmax.f32 %v1851_v36, 0.0 }
 0x279   : > { %v11794_v49 = vpop.f32.mrf.mxu1 }
 0x27a   : > { %v11776_v17 = vmul.f32 %v7461_v30, %v7461_v30 }
 0x27b   : > { %4372 = vrot.lane.b32.xlu1 %v11768_v57, %s10694_s30 }
 0x27c   : > { %15888 = vst [vmem:[#allocation55_spill] sm:$0xff] %v11776_v17  ;;  %v1773_v12 = vpop.f32.mrf.mxu2 }
 0x27d   : > { %v2875_v4 = vpack.c.bf16 %v1773_v12, %v1773_v12 }
 0x27f   : > { %v4141_v55 = vunpack.c.l.b16 %v2875_v4  ;;  %v1854_v36 = vpop.f32.mrf.mxu0 }
 0x280   : > { %v7465_v63 = vmax.f32 %v1854_v36, 0.0  ;;  %v2034_v36 = vmul.f32 %v11676_v39, %v11676_v39 }
 0x281   : > { %v11788_v30 = vpack.c.b16 %v4141_v55, %v4140_v37  ;;  %1971 = vmatmul.bf16.gmra.mxu2 %v11376_v18  ;;  %2020 = vmatmul.bf16.gmra.mxu3 %v11376_v18  ;;  %v2035_v18 = vmul.f32 %v11690_v35, %v11690_v35 }
 0x282   : > { %2121 = vmatmul.bf16.gmra.mxu0 %v2045_v48  ;;  %v11796_v45 = vmul.f32 %v7465_v63, %v7465_v63  ;;  %v9223_v48 = vld [vmem:[#allocation16 + $0x30] sm:$0xff] }
 0x283   : > { %15889 = vst [vmem:[#allocation56_spill] sm:$0xff] %v11788_v30  ;;  %4636 = vrot.lane.b32.xlu0 %v11788_v30, %s10695_s26  ;;  %v2046_v44 = vpack.c.bf16 %v2035_v18, %v2034_v36  ;;  %2750 = vmatpush.bf16.msrb.mxu3 %v9223_v48  ;;  %v9220_v18 = vld [vmem:[#allocation16 + $0x18] sm:$0xff] }
 0x284   : > { %v1776_v12 = vpop.f32.mrf.mxu2  ;;  %15890 = vst [vmem:[#allocation57_spill] sm:$0xff] %v11796_v45  ;;  %2380 = vmatpush.bf16.msra.mxu1 %v9223_v48  ;;  %v2036_v48 = vmul.f32 %v11700_v20, %v11700_v20 }
 0x285   : > { %v2876_v37 = vpack.c.bf16 %v1776_v12, %v1776_v12 }
 0x287   : > { %v1856_v10 = vpop.f32.mrf.mxu0  ;;  %v4142_v53 = vunpack.c.l.b16 %v2876_v37  ;;  %2751 = vmatpush.bf16.msrb.mxu3 %v9222_v16 }
 0x288   : > { %v7469_v23 = vmax.f32 %v1856_v10, 0.0  ;;  %v11816_v10 = vpop.f32.mrf.mxu1  ;;  %2381 = vmatpush.bf16.msra.mxu1 %v9222_v16  ;;  %v2494_v16 = vmul.f32 %v11692_v31, %v11692_v31 }
 0x28a   : > { %v11798_v4 = vmul.f32 %v7469_v23, %v7469_v23  ;;  %v2492_v23 = vmul.f32 %v11660_v52, %v11660_v52 }
 0x28b   : > { %4374 = vrot.lane.b32.xlu0 %v11788_v30, %s10694_s30 }
 0x28c   : > { %15891 = vst [vmem:[#allocation58_spill] sm:$0xff] %v11798_v4  ;;  %v1778_v55 = vpop.f32.mrf.mxu2  ;;  %v2508_v12 = vpack.c.bf16 %v2493_v58, %v2492_v23  ;;  %v9221_v58 = vld [vmem:[#allocation16 + $0x20] sm:$0xff]  ;;  %v2037_v23 = vmul.f32 %v11716_v25, %v11716_v25 }
 0x28d   : > { %v2877_v63 = vpack.c.bf16 %v1778_v55, %v1778_v55  ;;  %2752 = vmatpush.bf16.msrb.mxu3 %v9221_v58  ;;  %2382 = vmatpush.bf16.msra.mxu1 %v9221_v58 }
 0x28e   : > { %v2047_v3 = vpack.c.bf16 %v2037_v23, %v2036_v48  ;;  %v2496_v48 = vmul.f32 %v11784_v32, %v11784_v32 }
 0x28f   : > { %v4143_v24 = vunpack.c.l.b16 %v2877_v63  ;;  %v11812_v60 = vpop.f32.mrf.mxu0 }
 0x290   : > { %15892 = vst [vmem:[#allocation59_spill] sm:$0xff] %v11812_v60  ;;  %v11886_v60 = vpop.permute.xlu2 %3841 }
 0x291   : > { %v11814_v19 = vpack.c.b16 %v4143_v24, %v4142_v53  ;;  %2524 = vmatmul.bf16.vlgmr.msrb.gmra.mxu2 %v2508_v12  ;;  %v2495_v24 = vmul.f32 %v11708_v7, %v11708_v7  ;;  %2753 = vmatpush.bf16.msrb.mxu3 %v9220_v18  ;;  %v9219_v12 = vld [vmem:[#allocation16 + $0x10] sm:$0xff] }
 0x292   : > { %2126 = vmatmul.bf16.gmra.mxu0 %v2046_v44  ;;  %v11826_v44 = vpop.f32.mrf.mxu1  ;;  %2383 = vmatpush.bf16.msra.mxu1 %v9220_v18 }
 0x293   : > { %15893 = vst [vmem:[#allocation60_spill] sm:$0xff] %v11814_v19  ;;  %4638 = vrot.lane.b32.xlu2 %v11814_v19, %s10695_s26  ;;  %v2509_v8 = vpack.c.bf16 %v2495_v24, %v2494_v16  ;;  %v2497_v24 = vmul.f32 %v11794_v49, %v11794_v49 }
 0x294   : > { %v1937_v55 = vpop.f32.mrf.mxu2 }
 0x295   : > { %v7443_v53 = vmax.f32 %v1937_v55, 0.0  ;;  %2754 = vmatpush.bf16.msrb.mxu3 %v9219_v12  ;;  %v3316_v23 = vpop.permute.xlu0 %3315 }
 0x296   : > { %2384 = vmatpush.bf16.msra.mxu1 %v9219_v12  ;;  %v11892_v4 = vpop.permute.xlu1 %3578 }
 0x297   : > { %v11820_v37 = vpop.f32.mrf.mxu0  ;;  %v11834_v55 = vmul.f32 %v7443_v53, %v7443_v53  ;;  %v9217_v53 = vld [vmem:[#allocation16] sm:$0xff]  ;;  %15907 = vst [vmem:[#allocation74_spill] sm:$0xff] %v11892_v4 }
 0x298   : > { %15894 = vst [vmem:[#allocation61_spill] sm:$0xff] %v11820_v37 }
 0x299   : > { %15895 = vst [vmem:[#allocation62_spill] sm:$0xff] %v11834_v55 }
 0x29a   : > { %v11842_v47 = vpop.f32.mrf.mxu1 }
 0x29b   : > { %4376 = vrot.lane.b32.xlu2 %v11814_v19, %s10694_s30 }
 0x29c   : > { %v1939_v63 = vpop.f32.mrf.mxu2 }
 0x29d   : > { %v7447_v36 = vmax.f32 %v1939_v63, 0.0  ;;  %v9218_v63 = vld [vmem:[#allocation16 + $0x8] sm:$0xff]  ;;  %v3320_v26 = vpop.permute.xlu2 %3319 }
 0x29e   : > { %2755 = vmatpush.bf16.msrb.mxu3 %v9218_v63  ;;  %2385 = vmatpush.bf16.msra.mxu1 %v9218_v63  ;;  %v2038_v63 = vmul.f32 %v11612_v40, %v11612_v40 }
 0x29f   : > { %v11836_v58 = vmul.f32 %v7447_v36, %v7447_v36  ;;  %v11838_v51 = vpop.f32.mrf.mxu0 }
 0x2a0   : > { %15897 = vst [vmem:[#allocation64_spill] sm:$0xff] %v11838_v51 }
 0x2a1   : > { %15896 = vst [vmem:[#allocation63_spill] sm:$0xff] %v11836_v58  ;;  %2529 = vmatmul.bf16.gmra.mxu2 %v2509_v8  ;;  %v2039_v8 = vmul.f32 %v11618_v54, %v11618_v54  ;;  %v2510_v58 = vpack.c.bf16 %v2497_v24, %v2496_v48  ;;  %v2041_v24 = vmul.f32 %v11634_v56, %v11634_v56 }
 0x2a2   : > { %2131 = vmatmul.bf16.gmra.mxu0 %v2047_v3  ;;  %2756 = vmatpush.bf16.msrb.mxu3 %v9217_v53  ;;  %v11860_v1 = vpop.f32.mrf.mxu1 }
 0x2a3   : > { %2386 = vmatpush.bf16.msra.mxu1 %v9217_v53 }
 0x2a4   : > { %v1942_v28 = vpop.f32.mrf.mxu2 }
 0x2a5   : > { %v7451_v16 = vmax.f32 %v1942_v28, 0.0  ;;  %v2048_v28 = vpack.c.bf16 %v2039_v8, %v2038_v63  ;;  %v11864_v51 = vpop.permute.xlu0 %3580 }
 0x2a6   : > { %15902 = vst [vmem:[#allocation69_spill] sm:$0xff] %v11864_v51 }
 0x2a7   : > { %v11844_v36 = vpop.f32.mrf.mxu0  ;;  %v11854_v18 = vmul.f32 %v7451_v16, %v7451_v16 }
 0x2a8   : > { %15898 = vst [vmem:[#allocation65_spill] sm:$0xff] %v11844_v36 }
 0x2a9   : > { %15899 = vst [vmem:[#allocation66_spill] sm:$0xff] %v11854_v18 }
 0x2aa   : > { %v11868_v16 = vpop.f32.mrf.mxu1 }
 0x2ac   : > { %v1944_v3 = vpop.f32.mrf.mxu2 }
 0x2ad   : > { %v7455_v12 = vmax.f32 %v1944_v3, 0.0  ;;  %v11876_v48 = vpop.permute.xlu0 %3843 }
 0x2af   : > { %v11856_v55 = vmul.f32 %v7455_v12, %v7455_v12  ;;  %v11858_v53 = vpop.f32.mrf.mxu0  ;;  %v2499_v12 = vmul.f32 %v11826_v44, %v11826_v44 }
 0x2b0   : > { %15901 = vst [vmem:[#allocation68_spill] sm:$0xff] %v11858_v53 }
 0x2b1   : > { %15900 = vst [vmem:[#allocation67_spill] sm:$0xff] %v11856_v55  ;;  %2534 = vmatmul.bf16.gmra.mxu2 %v2510_v58  ;;  %v2498_v58 = vmul.f32 %v11816_v10, %v11816_v10 }
 0x2b2   : > { %2136 = vmatmul.bf16.gmra.mxu0 %v2048_v28  ;;  %v2040_v28 = vmul.f32 %v11628_v42, %v11628_v42  ;;  %v11890_v45 = vpop.f32.mrf.mxu1 }
 0x2b4   : > { %v1947_v3 = vpop.f32.mrf.mxu2 }
 0x2b5   : > { %v7459_v53 = vmax.f32 %v1947_v3, 0.0  ;;  %v2511_v3 = vpack.c.bf16 %v2499_v12, %v2498_v58  ;;  %v2501_v12 = vmul.f32 %v11860_v1, %v11860_v1 }
 0x2b7   : > { %v11866_v36 = vpop.f32.mrf.mxu0  ;;  %v11880_v13 = vmul.f32 %v7459_v53, %v7459_v53 }
 0x2b8   : > { %15903 = vst [vmem:[#allocation70_spill] sm:$0xff] %v11866_v36  ;;  %v2049_v36 = vpack.c.bf16 %v2041_v24, %v2040_v28  ;;  %v3318_v28 = vpop.permute.xlu1 %3317 }
 0x2b9   : > { %15904 = vst [vmem:[#allocation71_spill] sm:$0xff] %v11880_v13 }
 0x2ba   : > { %v11902_v37 = vpop.f32.mrf.mxu1 }
 0x2bb   : > { %15910 = vst [vmem:[#allocation77_spill] sm:$0xff] %v11902_v37 }
 0x2bc   : > { %v1949_v8 = vpop.f32.mrf.mxu2 }
 0x2bd   : > { %v7463_v63 = vmax.f32 %v1949_v8, 0.0 }
 0x2bf   : > { %v11882_v18 = vmul.f32 %v7463_v63, %v7463_v63  ;;  %v11884_v55 = vpop.f32.mrf.mxu0 }
 0x2c0   : > { %15906 = vst [vmem:[#allocation73_spill] sm:$0xff] %v11884_v55  ;;  %v11896_v55 = vpop.f32.mrf.mxu3 }
 0x2c1   : > { %15905 = vst [vmem:[#allocation72_spill] sm:$0xff] %v11882_v18  ;;  %2539 = vmatmul.bf16.gmra.mxu2 %v2511_v3 }
 0x2c2   : > { %2141 = vmatmul.bf16.gmra.mxu0 %v2049_v36  ;;  %15909 = vst [vmem:[#allocation76_spill] sm:$0xff] %v11896_v55  ;;  %v2500_v36 = vmul.f32 %v11842_v47, %v11842_v47 }
 0x2c4   : > { %v1952_v8 = vpop.f32.mrf.mxu2  ;;  %v2512_v55 = vpack.c.bf16 %v2501_v12, %v2500_v36 }
 0x2c5   : > { %v3322_v53 = vpop.permute.xlu0 %3321  ;;  %v7467_v24 = vmax.f32 %v1952_v8, 0.0 }
 0x2c6   : > { %3343 = vmatpush.bf16.msra.mxu3 %v3322_v53 }
 0x2c7   : > { %v11894_v63 = vpop.f32.mrf.mxu0  ;;  %v11904_v53 = vmul.f32 %v7467_v24, %v7467_v24  ;;  %v11914_v24 = vpop.f32.mrf.mxu1 }
 0x2c8   : > { %15908 = vst [vmem:[#allocation75_spill] sm:$0xff] %v11894_v63  ;;  %v11910_v63 = vpop.f32.mrf.mxu3 }
 0x2c9   : > { %15911 = vst [vmem:[#allocation78_spill] sm:$0xff] %v11904_v53 }
 0x2ca   : > { %3344 = vmatpush.bf16.msra.mxu3 %v3320_v26  ;;  %15913 = vst [vmem:[#allocation80_spill] sm:$0xff] %v11910_v63 }
 0x2cb   : > { %15915 = vst [vmem:[#allocation82_spill] sm:$0xff] %v11914_v24 }
 0x2cc   : > { %v1954_v58 = vpop.f32.mrf.mxu2 }
 0x2cd   : > { %v7471_v3 = vmax.f32 %v1954_v58, 0.0 }
 0x2ce   : > { %3345 = vmatpush.bf16.msra.mxu3 %v3318_v28 }
 0x2cf   : > { %v11906_v13 = vmul.f32 %v7471_v3, %v7471_v3  ;;  %v2107_v18 = vpop.f32.mrf.mxu0  ;;  %v11924_v2 = vpop.f32.mrf.mxu1 }
 0x2d0   : > { %v2108_v26 = vadd.f32 1.1920929e-07, %v2107_v18  ;;  %v2503_v18 = vmul.f32 %v11890_v45, %v11890_v45  ;;  %v11922_v8 = vpop.f32.mrf.mxu3  ;;  %15918 = vst [vmem:[#allocation85_spill] sm:$0xff] %v11924_v2 }
 0x2d1   : > { %15912 = vst [vmem:[#allocation79_spill] sm:$0xff] %v11906_v13  ;;  %2544 = vmatmul.bf16.gmra.mxu2 %v2512_v55 }
 0x2d2   : > { %9598 = vrsqrt.f32 %v2108_v26  ;;  %3346 = vmatpush.bf16.msra.mxu3 %v3316_v23  ;;  %v2502_v23 = vmul.f32 %v11868_v16, %v11868_v16  ;;  %15917 = vst [vmem:[#allocation84_spill] sm:$0xff] %v11922_v8  ;;  %vm2153_vm2 = vweird.f32 %v2108_v26 }
 0x2d4   : > { %v11912_v17 = vpop.f32.mrf.mxu2  ;;  %v2513_v53 = vpack.c.bf16 %v2503_v18, %v2502_v23 }
 0x2d5   : > { %15914 = vst [vmem:[#allocation81_spill] sm:$0xff] %v11912_v17 }
 0x2d7   : > { %v2109_v58 = vpop.f32.mrf.mxu0 }
 0x2d8   : > { %v9599_v28 = vpop.eup %9598  ;;  %v2110_v37 = vadd.f32 1.1920929e-07, %v2109_v58  ;;  %v11928_v18 = vpop.f32.mrf.mxu3 }
 0x2d9   : > { %v2148_v3 = vmul.f32 %v9599_v28, %v2108_v26  ;;  %vm2154_vm1 = vweird.f32 %v9599_v28  ;;  %15920 = vst [vmem:[#allocation87_spill] sm:$0xff] %v11928_v18 }
 0x2da   : > { %9600 = vrsqrt.f32 %v2110_v37  ;;  %vm2155_vm4 = vmor %vm2153_vm2, %vm2154_vm1  ;;  %vm2163_vm5 = vweird.f32 %v2110_v37 }
 0x2db   : > { %v2149_v55 = vmul.f32 %v9599_v28, %v2148_v3 }
 0x2dc   : > { %v11918_v12 = vpop.f32.mrf.mxu2 }
 0x2dd   : > { %15916 = vst [vmem:[#allocation83_spill] sm:$0xff] %v11918_v12  ;;  %v2150_v36 = vmul.f32 0.5, %v2149_v55 }
 0x2df   : > { %v2112_v17 = vpop.f32.mrf.mxu0  ;;  %v2151_v63 = vsub.f32 1.5, %v2150_v36 }
 0x2e0   : > { %v9601_v13 = vpop.eup %9600  ;;  %v2113_v58 = vadd.f32 1.1920929e-07, %v2112_v17 }
 0x2e1   : > { %v2158_v24 = vmul.f32 %v9601_v13, %v2110_v37  ;;  %2549 = vmatmul.bf16.gmra.mxu2 %v2513_v53  ;;  %v2152_v12 = vmul.f32 %v9599_v28, %v2151_v63  ;;  %vm2164_vm3 = vweird.f32 %v9601_v13  ;;  %v2505_v63 = vmul.f32 %v11620_v9, %v11620_v9  ;;  %v11942_v37 = vpop.f32.mrf.mxu1 }
 0x2e2   : > { %9602 = vrsqrt.f32 %v2113_v58  ;;  %vm2165_vm6 = vmor %vm2163_vm5, %vm2164_vm3  ;;  %15922 = vst [vmem:[#allocation89_spill] sm:$0xff] %v11942_v37  ;;  %vm2173_vm8 = vweird.f32 %v2113_v58 }
 0x2e3   : > { %v2159_v6 = vmul.f32 %v9601_v13, %v2158_v24  ;;  %v2156_v23 = vsel %vm2155_vm4, %v9599_v28, %v2152_v12 }
 0x2e4   : > { %v11926_v3 = vpop.f32.mrf.mxu2 }
 0x2e5   : > { %15919 = vst [vmem:[#allocation86_spill] sm:$0xff] %v11926_v3  ;;  %v2160_v15 = vmul.f32 0.5, %v2159_v6 }
 0x2e7   : > { %v2161_v55 = vsub.f32 1.5, %v2160_v15  ;;  %v2114_v8 = vpop.f32.mrf.mxu0  ;;  %v11933_v15 = vmul.f32 %v2156_v23, %v11605_v34 }
 0x2e8   : > { %v9603_v22 = vpop.eup %9602  ;;  %v2115_v17 = vadd.f32 1.1920929e-07, %v2114_v8  ;;  %v2504_v8 = vmul.f32 %v11614_v41, %v11614_v41 }
 0x2e9   : > { %v2162_v53 = vmul.f32 %v9601_v13, %v2161_v55  ;;  %v2168_v36 = vmul.f32 %v9603_v22, %v2113_v58  ;;  %vm2174_vm7 = vweird.f32 %v9603_v22  ;;  %v11950_v2 = vpop.f32.mrf.mxu1 }
 0x2ea   : > { %9604 = vrsqrt.f32 %v2115_v17  ;;  %15925 = vst [vmem:[#allocation92_spill] sm:$0xff] %v11950_v2  ;;  %vm2175_vm10 = vmor %vm2173_vm8, %vm2174_vm7  ;;  %vm2183_vm11 = vweird.f32 %v2115_v17 }
 0x2eb   : > { %v2166_v24 = vsel %vm2165_vm6, %v9601_v13, %v2162_v53  ;;  %v2169_v6 = vmul.f32 %v9603_v22, %v2168_v36  ;;  %v2514_v13 = vpack.c.bf16 %v2505_v63, %v2504_v8 }
 0x2ec   : > { %v11936_v26 = vmul.f32 %v2166_v24, %v11616_v38  ;;  %v11938_v3 = vpop.f32.mrf.mxu2  ;;  %v11946_v38 = vpop.f32.mrf.mxu3 }
 0x2ed   : > { %15921 = vst [vmem:[#allocation88_spill] sm:$0xff] %v11938_v3  ;;  %v2170_v28 = vmul.f32 0.5, %v2169_v6 }
 0x2ee   : > { %v2323_v12 = vpack.c.bf16 %v11936_v26, %v11933_v15  ;;  %15923 = vst [vmem:[#allocation90_spill] sm:$0xff] %v11946_v38 }
 0x2ef   : > { %v2117_v55 = vpop.f32.mrf.mxu0  ;;  %v2171_v34 = vsub.f32 1.5, %v2170_v28 }
 0x2f0   : > { %v9605_v53 = vpop.eup %9604  ;;  %v2118_v36 = vadd.f32 1.1920929e-07, %v2117_v55  ;;  %2387 = vmatmul.bf16.vlgmr.msra.gmra.mxu1 %v2323_v12 }
 0x2f1   : > { %v2178_v23 = vmul.f32 %v9605_v53, %v2115_v17  ;;  %2554 = vmatmul.bf16.gmra.mxu2 %v2514_v13  ;;  %v2172_v18 = vmul.f32 %v9603_v22, %v2171_v34  ;;  %vm2184_vm9 = vweird.f32 %v9605_v53  ;;  %v2507_v34 = vmul.f32 %v11636_v21, %v11636_v21  ;;  %v11968_v38 = vpop.f32.mrf.mxu1 }
 0x2f2   : > { %9606 = vrsqrt.f32 %v2118_v36  ;;  %vm2185_vm12 = vmor %vm2183_vm11, %vm2184_vm9  ;;  %15928 = vst [vmem:[#allocation95_spill] sm:$0xff] %v11968_v38  ;;  %vm2193_vm14 = vweird.f32 %v2118_v36 }
 0x2f3   : > { %v2179_v24 = vmul.f32 %v9605_v53, %v2178_v23  ;;  %v2176_v13 = vsel %vm2175_vm10, %v9603_v22, %v2172_v18  ;;  %v2506_v22 = vmul.f32 %v11630_v46, %v11630_v46 }
 0x2f4   : > { %v11948_v3 = vpop.f32.mrf.mxu2 }
 0x2f5   : > { %15924 = vst [vmem:[#allocation91_spill] sm:$0xff] %v11948_v3  ;;  %v2180_v6 = vmul.f32 0.5, %v2179_v24  ;;  %v11954_v3 = vpop.f32.mrf.mxu3 }
 0x2f6   : > { %15926 = vst [vmem:[#allocation93_spill] sm:$0xff] %v11954_v3 }
 0x2f7   : > { %v2181_v37 = vsub.f32 1.5, %v2180_v6  ;;  %v2119_v63 = vpop.f32.mrf.mxu0  ;;  %v11959_v6 = vmul.f32 %v2176_v13, %v11622_v29 }
 0x2f8   : > { %v9607_v8 = vpop.eup %9606  ;;  %v2120_v28 = vadd.f32 1.1920929e-07, %v2119_v63 }
 0x2f9   : > { %v2182_v12 = vmul.f32 %v9605_v53, %v2181_v37  ;;  %v2188_v55 = vmul.f32 %v9607_v8, %v2118_v36  ;;  %vm2194_vm13 = vweird.f32 %v9607_v8 }
 0x2fa   : > { %9608 = vrsqrt.f32 %v2120_v28  ;;  %vm2195_vm0 = vmor %vm2193_vm14, %vm2194_vm13  ;;  %vm2203_vm1 = vweird.f32 %v2120_v28 }
 0x2fb   : > { %v2189_v23 = vmul.f32 %v9607_v8, %v2188_v55  ;;  %v2186_v24 = vsel %vm2185_vm12, %v9605_v53, %v2182_v12  ;;  %v2515_v55 = vpack.c.bf16 %v2507_v34, %v2506_v22 }
 0x2fc   : > { %v11956_v58 = vpop.f32.mrf.mxu2  ;;  %v11962_v63 = vmul.f32 %v2186_v24, %v11632_v62 }
 0x2fd   : > { %15927 = vst [vmem:[#allocation94_spill] sm:$0xff] %v11956_v58  ;;  %v2190_v18 = vmul.f32 0.5, %v2189_v23  ;;  %v11972_v3 = vpop.f32.mrf.mxu3 }
 0x2fe   : > { %v2324_v17 = vpack.c.bf16 %v11962_v63, %v11959_v6  ;;  %15930 = vst [vmem:[#allocation97_spill] sm:$0xff] %v11972_v3 }
 0x2ff   : > { %v2122_v37 = vpop.f32.mrf.mxu0  ;;  %v2191_v58 = vsub.f32 1.5, %v2190_v18 }
 0x300   : > { %v9609_v53 = vpop.eup %9608  ;;  %v2123_v12 = vadd.f32 1.1920929e-07, %v2122_v37  ;;  %2392 = vmatmul.bf16.gmra.mxu1 %v2324_v17 }
 0x301   : > { %v2198_v29 = vmul.f32 %v9609_v53, %v2120_v28  ;;  %2559 = vmatmul.bf16.gmra.mxu2 %v2515_v55  ;;  %v2192_v24 = vmul.f32 %v9607_v8, %v2191_v58  ;;  %vm2204_vm15 = vweird.f32 %v9609_v53 }
 0x302   : > { %9610 = vrsqrt.f32 %v2123_v12  ;;  %vm2205_vm2 = vmor %vm2203_vm1, %vm2204_vm15  ;;  %vm2213_vm4 = vweird.f32 %v2123_v12 }
 0x303   : > { %v2199_v62 = vmul.f32 %v9609_v53, %v2198_v29  ;;  %v2196_v55 = vsel %vm2195_vm0, %v9607_v8, %v2192_v24  ;;  %v11974_v29 = vpop.f32.mrf.mxu1 }
 0x304   : > { %v11970_v13 = vpop.f32.mrf.mxu2  ;;  %15931 = vst [vmem:[#allocation98_spill] sm:$0xff] %v11974_v29  ;;  %v11979_v36 = vmul.f32 %v2196_v55, %v11638_v27 }
 0x305   : > { %15929 = vst [vmem:[#allocation96_spill] sm:$0xff] %v11970_v13  ;;  %v2200_v23 = vmul.f32 0.5, %v2199_v62  ;;  %v11986_v24 = vpop.f32.mrf.mxu3 }
 0x306   : > { %15933 = vst [vmem:[#allocation100_spill] sm:$0xff] %v11986_v24 }
 0x307   : > { %v2201_v2 = vsub.f32 1.5, %v2200_v23  ;;  %v2124_v34 = vpop.f32.mrf.mxu0 }
 0x308   : > { %v9611_v22 = vpop.eup %9610  ;;  %v2125_v17 = vadd.f32 1.1920929e-07, %v2124_v34 }
 0x309   : > { %v2202_v37 = vmul.f32 %v9609_v53, %v2201_v2  ;;  %v2208_v18 = vmul.f32 %v9611_v22, %v2123_v12  ;;  %vm2214_vm3 = vweird.f32 %v9611_v22 }
 0x30a   : > { %9612 = vrsqrt.f32 %v2125_v17  ;;  %vm2215_vm6 = vmor %vm2213_vm4, %vm2214_vm3  ;;  %vm2223_vm7 = vweird.f32 %v2125_v17 }
 0x30b   : > { %v2209_v58 = vmul.f32 %v9611_v22, %v2208_v18  ;;  %v2206_v13 = vsel %vm2205_vm2, %v9609_v53, %v2202_v37  ;;  %v11991_v55 = vpop.f32.mrf.mxu1 }
 0x30c   : > { %v11976_v62 = vpop.f32.mrf.mxu2  ;;  %v11982_v23 = vmul.f32 %v2206_v13, %v11644_v61  ;;  %15934 = vst [vmem:[#allocation101_spill] sm:$0xff] %v11991_v55 }
 0x30d   : > { %15932 = vst [vmem:[#allocation99_spill] sm:$0xff] %v11976_v62  ;;  %v2210_v3 = vmul.f32 0.5, %v2209_v58  ;;  %v12000_v29 = vpop.f32.mrf.mxu3 }
 0x30e   : > { %v2325_v2 = vpack.c.bf16 %v11982_v23, %v11979_v36  ;;  %15935 = vst [vmem:[#allocation102_spill] sm:$0xff] %v12000_v29 }
 0x30f   : > { %v2127_v28 = vpop.f32.mrf.mxu0  ;;  %v2211_v53 = vsub.f32 1.5, %v2210_v3 }
 0x310   : > { %v9613_v8 = vpop.eup %9612  ;;  %v11988_v34 = vadd.f32 1.1920929e-07, %v2127_v28  ;;  %2397 = vmatmul.bf16.gmra.mxu1 %v2325_v2 }
 0x311   : > { %v2218_v37 = vmul.f32 %v9613_v8, %v2125_v17  ;;  %v2212_v61 = vmul.f32 %v9611_v22, %v2211_v53  ;;  %vm2224_vm5 = vweird.f32 %v9613_v8 }
 0x312   : > { %9614 = vrsqrt.f32 %v11988_v34  ;;  %vm2225_vm8 = vmor %vm2223_vm7, %vm2224_vm5  ;;  %vm2233_vm10 = vweird.f32 %v11988_v34 }
 0x313   : > { %v2219_v27 = vmul.f32 %v9613_v8, %v2218_v37  ;;  %v2216_v53 = vsel %vm2215_vm6, %v9611_v22, %v2212_v61 }
 0x314   : > { %v2525_v18 = vpop.f32.mrf.mxu2 }
 0x315   : > { %v2220_v13 = vmul.f32 0.5, %v2219_v27  ;;  %v11993_v58 = vadd.f32 1.1920929e-07, %v2525_v18  ;;  %v12024_v38 = vpop.f32.mrf.mxu3 }
 0x316   : > { %15937 = vst [vmem:[#allocation104_spill] sm:$0xff] %v12024_v38 }
 0x317   : > { %v2221_v62 = vsub.f32 1.5, %v2220_v13  ;;  %9616 = vrsqrt.f32 %v11993_v58  ;;  %v2129_v28 = vpop.f32.mrf.mxu0  ;;  %v12004_v13 = vmul.f32 %v2216_v53, %v11650_v0  ;;  %vm2571_vm0 = vweird.f32 %v11993_v58 }
 0x318   : > { %v11996_v2 = vpop.eup %9614  ;;  %v2130_v3 = vadd.f32 1.1920929e-07, %v2129_v28 }
 0x319   : > { %v2222_v24 = vmul.f32 %v9613_v8, %v2221_v62  ;;  %v2228_v37 = vmul.f32 %v11996_v2, %v11988_v34  ;;  %vm2234_vm9 = vweird.f32 %v11996_v2 }
 0x31a   : > { %9618 = vrsqrt.f32 %v2130_v3  ;;  %vm12035_vm12 = vmor %vm2233_vm10, %vm2234_vm9  ;;  %vm2243_vm13 = vweird.f32 %v2130_v3 }
 0x31b   : > { %v2229_v12 = vmul.f32 %v11996_v2, %v2228_v37  ;;  %v2226_v27 = vsel %vm2225_vm8, %v9613_v8, %v2222_v24  ;;  %v12017_v37 = vpop.f32.mrf.mxu1 }
 0x31c   : > { %v2527_v18 = vpop.f32.mrf.mxu2  ;;  %v12007_v55 = vmul.f32 %v2226_v27, %v11668_v5  ;;  %15936 = vst [vmem:[#allocation103_spill] sm:$0xff] %v12017_v37 }
 0x31d   : > { %v12009_v62 = vpop.eup %9616  ;;  %v2230_v17 = vmul.f32 0.5, %v2229_v12  ;;  %v12011_v28 = vadd.f32 1.1920929e-07, %v2527_v18 }
 0x31e   : > { %v2566_v22 = vmul.f32 %v12009_v62, %v11993_v58  ;;  %v2326_v61 = vpack.c.bf16 %v12007_v55, %v12004_v13  ;;  %vm2572_vm14 = vweird.f32 %v12009_v62 }
 0x31f   : > { %9620 = vrsqrt.f32 %v12011_v28  ;;  %v2132_v0 = vpop.f32.mrf.mxu0  ;;  %v2231_v53 = vsub.f32 1.5, %v2230_v17  ;;  %vm12063_vm2 = vmor %vm2571_vm0, %vm2572_vm14  ;;  %vm2581_vm3 = vweird.f32 %v12011_v28 }
 0x320   : > { %v9619_v8 = vpop.eup %9618  ;;  %v2567_v5 = vmul.f32 %v12009_v62, %v2566_v22  ;;  %v12021_v24 = vadd.f32 1.1920929e-07, %v2132_v0  ;;  %2402 = vmatmul.bf16.gmra.mxu1 %v2326_v61 }
 0x321   : > { %v2238_v12 = vmul.f32 %v9619_v8, %v2130_v3  ;;  %v2232_v37 = vmul.f32 %v11996_v2, %v2231_v53  ;;  %vm2244_vm11 = vweird.f32 %v9619_v8 }
 0x322   : > { %v2568_v27 = vmul.f32 0.5, %v2567_v5  ;;  %9622 = vrsqrt.f32 %v12021_v24  ;;  %vm2245_vm15 = vmor %vm2243_vm13, %vm2244_vm11  ;;  %vm2253_vm6 = vweird.f32 %v12021_v24 }
 0x323   : > { %v2239_v18 = vmul.f32 %v9619_v8, %v2238_v12  ;;  %v2236_v34 = vsel %vm12035_vm12, %v11996_v2, %v2232_v37 }
 0x324   : > { %v2530_v29 = vpop.f32.mrf.mxu2  ;;  %v2569_v22 = vsub.f32 1.5, %v2568_v27  ;;  %v12056_v2 = vmul.f32 %v2236_v34, %v11676_v39 }
 0x325   : > { %v9621_v59 = vpop.eup %9620  ;;  %v2240_v57 = vmul.f32 0.5, %v2239_v18  ;;  %v12028_v30 = vadd.f32 1.1920929e-07, %v2530_v29  ;;  %v12041_v29 = vpop.f32.mrf.mxu1 }
 0x326   : > { %v2576_v61 = vmul.f32 %v9621_v59, %v12011_v28  ;;  %15940 = vst [vmem:[#allocation105_spill] sm:$0xff] %v12041_v29  ;;  %v2570_v38 = vmul.f32 %v12009_v62, %v2569_v22  ;;  %vm2582_vm1 = vweird.f32 %v9621_v59 }
 0x327   : > { %v2241_v17 = vsub.f32 1.5, %v2240_v57  ;;  %9624 = vrsqrt.f32 %v12028_v30  ;;  %v2134_v0 = vpop.f32.mrf.mxu0  ;;  %vm2583_vm4 = vmor %vm2581_vm3, %vm2582_vm1  ;;  %vm2591_vm12 = vweird.f32 %v12028_v30 }
 0x328   : > { %v12033_v5 = vpop.eup %9622  ;;  %v2577_v53 = vmul.f32 %v9621_v59, %v2576_v61  ;;  %v12039_v18 = vadd.f32 1.1920929e-07, %v2134_v0  ;;  %v12051_v61 = vpop.permute.xlu2 %3584  ;;  %v2574_v39 = vsel %vm12063_vm2, %v12009_v62, %v2570_v38 }
 0x329   : > { %v2242_v27 = vmul.f32 %v9619_v8, %v2241_v17  ;;  %v2248_v57 = vmul.f32 %v12033_v5, %v12021_v24  ;;  %v12087_v38 = vmul.f32 %v2574_v39, %v11660_v52  ;;  %vm2254_vm5 = vweird.f32 %v12033_v5 }
 0x32a   : > { %v2578_v19 = vmul.f32 0.5, %v2577_v53  ;;  %9626 = vrsqrt.f32 %v12039_v18  ;;  %vm12109_vm8 = vmor %vm2253_vm6, %vm2254_vm5  ;;  %vm2263_vm9 = vweird.f32 %v12039_v18 }
 0x32b   : > { %v2249_v3 = vmul.f32 %v12033_v5, %v2248_v57  ;;  %v2246_v17 = vsel %vm2245_vm15, %v9619_v8, %v2242_v27  ;;  %v12079_v57 = vpop.permute.xlu1 %3582 }
 0x32c   : > { %v2579_v0 = vsub.f32 1.5, %v2578_v19  ;;  %v2532_v29 = vpop.f32.mrf.mxu2  ;;  %v12059_v37 = vmul.f32 %v2246_v17, %v11690_v35  ;;  %v12070_v19 = vpop.f32.mrf.mxu3 }
 0x32d   : > { %v12061_v22 = vpop.eup %9624  ;;  %v2250_v58 = vmul.f32 0.5, %v2249_v3  ;;  %v12068_v53 = vadd.f32 1.1920929e-07, %v2532_v29  ;;  %15943 = vst [vmem:[#allocation106_spill] sm:$0xff] %v12070_v19  ;;  %v12094_v4 = vpop.f32.mrf.mxu1 }
 0x32e   : > { %v2580_v8 = vmul.f32 %v9621_v59, %v2579_v0  ;;  %v2586_v35 = vmul.f32 %v12061_v22, %v12028_v30  ;;  %v2327_v27 = vpack.c.bf16 %v12059_v37, %v12056_v2  ;;  %15944 = vst [vmem:[#allocation107_spill] sm:$0xff] %v12094_v4  ;;  %vm2592_vm10 = vweird.f32 %v12061_v22 }
 0x32f   : > { %9628 = vrsqrt.f32 %v12068_v53  ;;  %v2137_v28 = vpop.f32.mrf.mxu0  ;;  %v2251_v0 = vsub.f32 1.5, %v2250_v58  ;;  %vm12139_vm14 = vmor %vm2591_vm12, %vm2592_vm10  ;;  %vm2601_vm15 = vweird.f32 %v12068_v53 }
 0x330   : > { %v9627_v29 = vpop.eup %9626  ;;  %v2584_v34 = vsel %vm2583_vm4, %v9621_v59, %v2580_v8  ;;  %v2587_v3 = vmul.f32 %v12061_v22, %v2586_v35  ;;  %v12084_v17 = vadd.f32 1.1920929e-07, %v2137_v28  ;;  %2407 = vmatmul.bf16.gmra.mxu1 %v2327_v27  ;;  %v3848_v28 = vpop.permute.xlu2 %3847 }
 0x331   : > { %v12090_v62 = vmul.f32 %v2584_v34, %v11670_v33  ;;  %v2258_v12 = vmul.f32 %v9627_v29, %v12039_v18  ;;  %v2252_v52 = vmul.f32 %v12033_v5, %v2251_v0  ;;  %vm2264_vm7 = vweird.f32 %v9627_v29 }
 0x332   : > { %v2588_v19 = vmul.f32 0.5, %v2587_v3  ;;  %9630 = vrsqrt.f32 %v12084_v17  ;;  %vm2265_vm11 = vmor %vm2263_vm9, %vm2264_vm7  ;;  %vm2273_vm2 = vweird.f32 %v12084_v17 }
 0x333   : > { %v2259_v59 = vmul.f32 %v9627_v29, %v2258_v12  ;;  %v2741_v8 = vpack.c.bf16 %v12090_v62, %v12087_v38 }
 0x334   : > { %v2535_v35 = vpop.f32.mrf.mxu2  ;;  %v2589_v39 = vsub.f32 1.5, %v2588_v19  ;;  %v12107_v0 = vpop.f32.mrf.mxu3 }
 0x335   : > { %v9629_v27 = vpop.eup %9628  ;;  %v2260_v33 = vmul.f32 0.5, %v2259_v59  ;;  %v12100_v58 = vadd.f32 1.1920929e-07, %v2535_v35  ;;  %2757 = vmatmul.bf16.vlgmr.msrb.gmra.mxu3 %v2741_v8  ;;  %15945 = vst [vmem:[#allocation108_spill] sm:$0xff] %v12107_v0  ;;  %v3846_v35 = vpop.permute.xlu1 %3845 }
 0x336   : > { %v2596_v34 = vmul.f32 %v9629_v27, %v12068_v53  ;;  %3869 = vmatpush.bf16.msrb.mxu3 %v3848_v28  ;;  %v2590_v0 = vmul.f32 %v12061_v22, %v2589_v39  ;;  %vm2602_vm13 = vweird.f32 %v9629_v27  ;;  %v12135_v59 = vpop.f32.mrf.mxu1 }
 0x337   : > { %v2261_v3 = vsub.f32 1.5, %v2260_v33  ;;  %9632 = vrsqrt.f32 %v12100_v58  ;;  %v2139_v12 = vpop.f32.mrf.mxu0  ;;  %v2256_v33 = vsel %vm12109_vm8, %v12033_v5, %v2252_v52  ;;  %15948 = vst [vmem:[#allocation109_spill] sm:$0xff] %v12135_v59  ;;  %vm2603_vm0 = vmor %vm2601_vm15, %vm2602_vm13  ;;  %vm2611_vm8 = vweird.f32 %v12100_v58 }
 0x338   : > { %v12105_v4 = vpop.eup %9630  ;;  %v2597_v8 = vmul.f32 %v9629_v27, %v2596_v34  ;;  %v12113_v19 = vadd.f32 1.1920929e-07, %v2139_v12  ;;  %v12128_v5 = vmul.f32 %v2256_v33, %v11700_v20 }
 0x339   : > { %v2262_v28 = vmul.f32 %v9627_v29, %v2261_v3  ;;  %v2268_v24 = vmul.f32 %v12105_v4, %v12084_v17  ;;  %vm2274_vm1 = vweird.f32 %v12105_v4 }
 0x33a   : > { %v2598_v34 = vmul.f32 0.5, %v2597_v8  ;;  %9634 = vrsqrt.f32 %v12113_v19  ;;  %3870 = vmatpush.bf16.msrb.mxu3 %v3846_v35  ;;  %vm12183_vm4 = vmor %vm2273_vm2, %vm2274_vm1  ;;  %vm2283_vm5 = vweird.f32 %v12113_v19 }
 0x33b   : > { %v2269_v18 = vmul.f32 %v12105_v4, %v2268_v24  ;;  %v2266_v3 = vsel %vm2265_vm11, %v9627_v29, %v2262_v28  ;;  %v2594_v28 = vsel %vm12139_vm14, %v12061_v22, %v2590_v0 }
 0x33c   : > { %v2599_v12 = vsub.f32 1.5, %v2598_v34  ;;  %v2537_v51 = vpop.f32.mrf.mxu2  ;;  %v12131_v52 = vmul.f32 %v2266_v3, %v11716_v25  ;;  %v12161_v3 = vmul.f32 %v2594_v28, %v11692_v31  ;;  %v12166_v0 = vpop.f32.mrf.mxu3 }
 0x33d   : > { %v12133_v39 = vpop.eup %9632  ;;  %v2270_v29 = vmul.f32 0.5, %v2269_v18  ;;  %v12144_v8 = vadd.f32 1.1920929e-07, %v2537_v51  ;;  %15951 = vst [vmem:[#allocation110_spill] sm:$0xff] %v12166_v0 }
 0x33e   : > { %v2600_v20 = vmul.f32 %v9629_v27, %v2599_v12  ;;  %v2606_v25 = vmul.f32 %v12133_v39, %v12100_v58  ;;  %3871 = vmatpush.bf16.msrb.mxu3 %v11876_v48  ;;  %v2328_v35 = vpack.c.bf16 %v12131_v52, %v12128_v5  ;;  %vm2612_vm6 = vweird.f32 %v12133_v39 }
 0x33f   : > { %9636 = vrsqrt.f32 %v12144_v8  ;;  %v2142_v53 = vpop.f32.mrf.mxu0  ;;  %v2271_v48 = vsub.f32 1.5, %v2270_v29  ;;  %vm12210_vm10 = vmor %vm2611_vm8, %vm2612_vm6  ;;  %vm2621_vm11 = vweird.f32 %v12144_v8 }
 0x340   : > { %v9635_v51 = vpop.eup %9634  ;;  %v2607_v24 = vmul.f32 %v12133_v39, %v2606_v25  ;;  %v12157_v33 = vadd.f32 1.1920929e-07, %v2142_v53  ;;  %2412 = vmatmul.bf16.gmra.mxu1 %v2328_v35  ;;  %v2604_v34 = vsel %vm2603_vm0, %v9629_v27, %v2600_v20  ;;  %v12177_v53 = vpop.f32.mrf.mxu1 }
 0x341   : > { %v2278_v18 = vmul.f32 %v9635_v51, %v12113_v19  ;;  %v12164_v22 = vmul.f32 %v2604_v34, %v11708_v7  ;;  %v2272_v25 = vmul.f32 %v12105_v4, %v2271_v48  ;;  %15952 = vst [vmem:[#allocation111_spill] sm:$0xff] %v12177_v53  ;;  %vm2284_vm3 = vweird.f32 %v9635_v51 }
 0x342   : > { %v2608_v12 = vmul.f32 0.5, %v2607_v24  ;;  %9638 = vrsqrt.f32 %v12157_v33  ;;  %3872 = vmatpush.bf16.msrb.mxu3 %v11886_v60  ;;  %vm2285_vm7 = vmor %vm2283_vm5, %vm2284_vm3  ;;  %vm2293_vm14 = vweird.f32 %v12157_v33 }
 0x343   : > { %v2279_v30 = vmul.f32 %v9635_v51, %v2278_v18  ;;  %v2742_v27 = vpack.c.bf16 %v12164_v22, %v12161_v3 }
 0x344   : > { %v2540_v29 = vpop.f32.mrf.mxu2  ;;  %v2609_v35 = vsub.f32 1.5, %v2608_v12 }
 0x345   : > { %v9637_v20 = vpop.eup %9636  ;;  %v2280_v31 = vmul.f32 0.5, %v2279_v30  ;;  %v12174_v7 = vadd.f32 1.1920929e-07, %v2540_v29  ;;  %2762 = vmatmul.bf16.gmra.mxu3 %v2742_v27  ;;  %v2276_v27 = vsel %vm12183_vm4, %v12105_v4, %v2272_v25 }
 0x346   : > { %v2616_v28 = vmul.f32 %v9637_v20, %v12144_v8  ;;  %v2610_v29 = vmul.f32 %v12133_v39, %v2609_v35  ;;  %vm2622_vm9 = vweird.f32 %v9637_v20  ;;  %v12203_v4 = vmul.f32 %v2276_v27, %v11612_v40 }
 0x347   : > { %v2281_v60 = vsub.f32 1.5, %v2280_v31  ;;  %9640 = vrsqrt.f32 %v12174_v7  ;;  %v2144_v24 = vpop.f32.mrf.mxu0  ;;  %vm2623_vm12 = vmor %vm2621_vm11, %vm2622_vm9  ;;  %vm2631_vm4 = vweird.f32 %v12174_v7 }
 0x348   : > { %v12181_v34 = vpop.eup %9638  ;;  %v2617_v18 = vmul.f32 %v9637_v20, %v2616_v28  ;;  %v12187_v30 = vadd.f32 1.1920929e-07, %v2144_v24 }
 0x349   : > { %v2282_v12 = vmul.f32 %v9635_v51, %v2281_v60  ;;  %v2288_v17 = vmul.f32 %v12181_v34, %v12157_v33  ;;  %v12200_v60 = vpop.f32.mrf.mxu3  ;;  %vm2294_vm13 = vweird.f32 %v12181_v34 }
 0x34a   : > { %v2618_v31 = vmul.f32 0.5, %v2617_v18  ;;  %9642 = vrsqrt.f32 %v12187_v30  ;;  %15955 = vst [vmem:[#allocation112_spill] sm:$0xff] %v12200_v60  ;;  %vm2295_vm0 = vmor %vm2293_vm14, %vm2294_vm13  ;;  %vm2303_vm1 = vweird.f32 %v12187_v30 }
 0x34b   : > { %v2289_v28 = vmul.f32 %v12181_v34, %v2288_v17  ;;  %v2286_v19 = vsel %vm2285_vm7, %v9635_v51, %v2282_v12 }
 0x34c   : > { %v2619_v24 = vsub.f32 1.5, %v2618_v31  ;;  %v2542_v53 = vpop.f32.mrf.mxu2  ;;  %v12206_v25 = vmul.f32 %v2286_v19, %v11618_v54  ;;  %v2614_v54 = vsel %vm12210_vm10, %v12133_v39, %v2610_v29  ;;  %v12223_v31 = vpop.f32.mrf.mxu1 }
 0x34d   : > { %v12208_v35 = vpop.eup %9640  ;;  %v2290_v58 = vmul.f32 0.5, %v2289_v28  ;;  %v2543_v51 = vadd.f32 1.1920929e-07, %v2542_v53  ;;  %15958 = vst [vmem:[#allocation113_spill] sm:$0xff] %v12223_v31  ;;  %v12227_v19 = vmul.f32 %v2614_v54, %v11784_v32 }
 0x34e   : > { %v2620_v18 = vmul.f32 %v9637_v20, %v2619_v24  ;;  %v2626_v12 = vmul.f32 %v12208_v35, %v12174_v7  ;;  %v2329_v40 = vpack.c.bf16 %v12206_v25, %v12203_v4  ;;  %vm2632_vm2 = vweird.f32 %v12208_v35 }
 0x34f   : > { %9644 = vrsqrt.f32 %v2543_v51  ;;  %v2291_v53 = vsub.f32 1.5, %v2290_v58  ;;  %vm2633_vm6 = vmor %vm2631_vm4, %vm2632_vm2  ;;  %vm2641_vm7 = vweird.f32 %v2543_v51 }
 0x350   : > { %v9643_v17 = vpop.eup %9642  ;;  %v2627_v27 = vmul.f32 %v12208_v35, %v2626_v12  ;;  %2417 = vmatmul.bf16.gmra.mxu1 %v2329_v40  ;;  %v2624_v8 = vsel %vm2623_vm12, %v9637_v20, %v2620_v18 }
 0x351   : > { %v2298_v28 = vmul.f32 %v9643_v17, %v12187_v30  ;;  %v12230_v24 = vmul.f32 %v2624_v8, %v11794_v49  ;;  %v2292_v20 = vmul.f32 %v12181_v34, %v2291_v53  ;;  %v12238_v32 = vpop.f32.mrf.mxu3  ;;  %vm2304_vm15 = vweird.f32 %v9643_v17 }
 0x352   : > { %v2628_v48 = vmul.f32 0.5, %v2627_v27  ;;  %15959 = vst [vmem:[#allocation114_spill] sm:$0xff] %v12238_v32  ;;  %vm2305_vm3 = vmor %vm2303_vm1, %vm2304_vm15 }
 0x353   : > { %v2299_v39 = vmul.f32 %v9643_v17, %v2298_v28  ;;  %v2743_v29 = vpack.c.bf16 %v12230_v24, %v12227_v19  ;;  %v2296_v53 = vsel %vm2295_vm0, %v12181_v34, %v2292_v20 }
 0x354   : > { %v2545_v59 = vpop.f32.mrf.mxu2  ;;  %v2629_v40 = vsub.f32 1.5, %v2628_v48  ;;  %v12246_v48 = vpop.f32.mrf.mxu1 }
 0x355   : > { %v9645_v12 = vpop.eup %9644  ;;  %v2300_v58 = vmul.f32 0.5, %v2299_v39  ;;  %v12236_v18 = vadd.f32 1.1920929e-07, %v2545_v59  ;;  %2767 = vmatmul.bf16.gmra.mxu3 %v2743_v29  ;;  %15960 = vst [vmem:[#allocation115_spill] sm:$0xff] %v12246_v48 }
 0x356   : > { %v2636_v49 = vmul.f32 %v9645_v12, %v2543_v51  ;;  %v2630_v59 = vmul.f32 %v12208_v35, %v2629_v40  ;;  %vm2642_vm5 = vweird.f32 %v9645_v12 }
 0x357   : > { %v2301_v54 = vsub.f32 1.5, %v2300_v58  ;;  %9646 = vrsqrt.f32 %v12236_v18  ;;  %v12250_v58 = vmul.f32 %v2296_v53, %v11628_v42  ;;  %vm2643_vm8 = vmor %vm2641_vm7, %vm2642_vm5  ;;  %vm2651_vm10 = vweird.f32 %v12236_v18 }
 0x358   : > { %v2637_v27 = vmul.f32 %v9645_v12, %v2636_v49 }
 0x359   : > { %v2302_v8 = vmul.f32 %v9643_v17, %v2301_v54  ;;  %v12259_v54 = vpop.f32.mrf.mxu3 }
 0x35a   : > { %v2638_v28 = vmul.f32 0.5, %v2637_v27  ;;  %15961 = vst [vmem:[#allocation116_spill] sm:$0xff] %v12259_v54 }
 0x35b   : > { %v2306_v33 = vsel %vm2305_vm3, %v9643_v17, %v2302_v8  ;;  %v2634_v17 = vsel %vm2633_vm6, %v12208_v35, %v2630_v59 }
 0x35c   : > { %v2639_v39 = vsub.f32 1.5, %v2638_v28  ;;  %v2547_v29 = vpop.f32.mrf.mxu2  ;;  %v12253_v30 = vmul.f32 %v2306_v33, %v11634_v56  ;;  %v12262_v27 = vmul.f32 %v2634_v17, %v11816_v10  ;;  %v12269_v35 = vpop.f32.mrf.mxu1 }
 0x35d   : > { %v9647_v34 = vpop.eup %9646  ;;  %v2548_v20 = vadd.f32 1.1920929e-07, %v2547_v29  ;;  %15962 = vst [vmem:[#allocation117_spill] sm:$0xff] %v12269_v35 }
 0x35e   : > { %v2640_v40 = vmul.f32 %v9645_v12, %v2639_v39  ;;  %v2646_v49 = vmul.f32 %v9647_v34, %v12236_v18  ;;  %v2330_v7 = vpack.c.bf16 %v12253_v30, %v12250_v58  ;;  %vm2652_vm9 = vweird.f32 %v9647_v34 }
 0x35f   : > { %9648 = vrsqrt.f32 %v2548_v20  ;;  %vm2653_vm12 = vmor %vm2651_vm10, %vm2652_vm9  ;;  %vm2661_vm13 = vweird.f32 %v2548_v20 }
 0x360   : > { %v2647_v42 = vmul.f32 %v9647_v34, %v2646_v49  ;;  %2422 = vmatmul.bf16.gmra.mxu1 %v2330_v7  ;;  %v2644_v56 = vsel %vm2643_vm8, %v9645_v12, %v2640_v40  ;;  %v12274_v12 = vld [vmem:[#allocation13] sm:$0xff]  }
 0x361   : > { %v12265_v51 = vmul.f32 %v2644_v56, %v11826_v44  ;;  %v12276_v44 = vpop.f32.mrf.mxu3  ;;  %v12278_v7 = vld [vmem:[#allocation11] sm:$0xff]  }
 0x362   : > { %v2648_v8 = vmul.f32 0.5, %v2647_v42  ;;  %15963 = vst [vmem:[#allocation118_spill] sm:$0xff] %v12276_v44  ;;  %v15754_v42 = vunpack.c.l.bf16 %v12274_v12 }
 0x363   : > { %v2744_v53 = vpack.c.bf16 %v12265_v51, %v12262_v27 }
 0x364   : > { %v2550_v28 = vpop.f32.mrf.mxu2  ;;  %v2649_v39 = vsub.f32 1.5, %v2648_v8 }
 0x365   : > { %v9649_v33 = vpop.eup %9648  ;;  %v12271_v59 = vadd.f32 1.1920929e-07, %v2550_v28  ;;  %2772 = vmatmul.bf16.gmra.mxu3 %v2744_v53 }
 0x366   : > { %v2656_v29 = vmul.f32 %v9649_v33, %v2548_v20  ;;  %v2650_v40 = vmul.f32 %v9647_v34, %v2649_v39  ;;  %vm2662_vm11 = vweird.f32 %v9649_v33  ;;  %v15964_v20 = vunpack.c.l.bf16 %v12278_v7 }
 0x367   : > { %9650 = vrsqrt.f32 %v12271_v59  ;;  %vm2663_vm14 = vmor %vm2661_vm13, %vm2662_vm11  ;;  %vm2671_vm0 = vweird.f32 %v12271_v59 }
 0x368   : > { %v2657_v10 = vmul.f32 %v9649_v33, %v2656_v29 }
 0x36a   : > { %v2658_v49 = vmul.f32 0.5, %v2657_v10  ;;  %v2654_v10 = vsel %vm2653_vm12, %v9647_v34, %v2650_v40  ;;  %v15758_v34 = vunpack.c.h.bf16 %v12278_v7  ;;  %v15757_v40 = vunpack.c.h.bf16 %v12274_v12 }
 0x36b   : > { %v12291_v31 = vmul.f32 %v2654_v10, %v11842_v47 }
 0x36c   : > { %v2659_v17 = vsub.f32 1.5, %v2658_v49  ;;  %v2552_v56 = vpop.f32.mrf.mxu2 }
 0x36d   : > { %v12282_v8 = vpop.eup %9650  ;;  %v2388_v28 = vpop.f32.mrf.mxu1  ;;  %v2553_v29 = vadd.f32 1.1920929e-07, %v2552_v56  ;;  %v2428_v56 = vmul.f32 %v15964_v20, %v11933_v15  ;;  %v2429_v15 = vmul.f32 %v15758_v34, %v11936_v26 }
 0x36e   : > { %v2660_v48 = vmul.f32 %v9649_v33, %v2659_v17  ;;  %v2666_v39 = vmul.f32 %v12282_v8, %v12271_v59  ;;  %v2444_v49 = vmul.f32 %v15754_v42, %v2388_v28  ;;  %v12303_v28 = vpop.f32.mrf.mxu3  ;;  %vm2672_vm15 = vweird.f32 %v12282_v8 }
 0x36f   : > { %9652 = vrsqrt.f32 %v2553_v29  ;;  %15965 = vst [vmem:[#allocation119_spill] sm:$0xff] %v12303_v28  ;;  %v12317_v28 = vld [vmem:[#allocation11 + $0x8] sm:$0xff]   ;;  %vm12323_vm2 = vmor %vm2671_vm0, %vm2672_vm15  ;;  %vm2681_vm3 = vweird.f32 %v2553_v29 }
 0x370   : > { %v2667_v18 = vmul.f32 %v12282_v8, %v2666_v39  ;;  %v2664_v35 = vsel %vm2663_vm14, %v9649_v33, %v2660_v48  ;;  %v2460_v48 = vadd.f32 %v2444_v49, %v2428_v56  ;;  %v12313_v56 = vld [vmem:[#allocation13 + $0x8] sm:$0xff]  }
 0x371   : > { %v12294_v53 = vmul.f32 %v2664_v35, %v11860_v1 }
 0x372   : > { %v2668_v17 = vmul.f32 0.5, %v2667_v18  ;;  %v2476_v42 = vpack.c.bf16 %v2460_v48, %v2460_v48 }
 0x373   : > { %v2745_v39 = vpack.c.bf16 %v12294_v53, %v12291_v31 }
 0x374   : > { %v2555_v47 = vpop.f32.mrf.mxu2  ;;  %v2669_v35 = vsub.f32 1.5, %v2668_v17 }
 0x375   : > { %v9653_v33 = vpop.eup %9652  ;;  %v2390_v10 = vpop.f32.mrf.mxu1  ;;  %v12305_v1 = vadd.f32 1.1920929e-07, %v2555_v47  ;;  %2777 = vmatmul.bf16.gmra.mxu3 %v2745_v39 }
 0x376   : > { %v2676_v18 = vmul.f32 %v9653_v33, %v2553_v29  ;;  %v2445_v20 = vmul.f32 %v15757_v40, %v2390_v10  ;;  %v2670_v47 = vmul.f32 %v12282_v8, %v2669_v35  ;;  %v2886_v10 = vunpack.c.l.b16 %v2476_v42  ;;  %v12328_v34 = vpop.f32.mrf.mxu3 }
 0x377   : > { %9654 = vrsqrt.f32 %v12305_v1  ;;  %vm2682_vm1 = vweird.f32 %v9653_v33  ;;  %15968 = vst [vmem:[#allocation120_spill] sm:$0xff] %v12328_v34  ;;  %vm2691_vm6 = vweird.f32 %v12305_v1 }
 0x378   : > { %v2677_v44 = vmul.f32 %v9653_v33, %v2676_v18  ;;  %v2461_v49 = vadd.f32 %v2445_v20, %v2429_v15  ;;  %vm2683_vm4 = vmor %vm2681_vm3, %vm2682_vm1  ;;  %v15760_v20 = vunpack.c.h.bf16 %v12317_v28  ;;  %vm2918_vm1 = vcmask 261120  }
 0x379   : > { %vm5570_vm3 = vcmask 1041408  }
 0x37a   : > { %v2678_v17 = vmul.f32 0.5, %v2677_v44  ;;  %v2477_v39 = vpack.c.bf16 %v2461_v49, %v2461_v49 }
 0x37c   : > { %v2679_v40 = vsub.f32 1.5, %v2678_v17  ;;  %v2887_v48 = vunpack.c.l.b16 %v2477_v39  ;;  %v2557_v18 = vpop.f32.mrf.mxu2  ;;  %v2674_v17 = vsel %vm12323_vm2, %v12282_v8, %v2670_v47  ;;  %v15969_v39 = vunpack.c.l.bf16 %v12313_v56 }
 0x37d   : > { %v12321_v15 = vpop.eup %9654  ;;  %v2393_v35 = vpop.f32.mrf.mxu1  ;;  %v2558_v49 = vadd.f32 1.1920929e-07, %v2557_v18  ;;  %v15970_v47 = vunpack.c.l.bf16 %v12317_v28  ;;  %vm2980_vm2 = vcmask 523264  }
 0x37e   : > { %v2680_v59 = vmul.f32 %v9653_v33, %v2679_v40  ;;  %v12330_v26 = vpack.c.b16 %v2887_v48, %v2886_v10  ;;  %v2686_v42 = vmul.f32 %v12321_v15, %v12305_v1  ;;  %v2446_v44 = vmul.f32 %v15969_v39, %v2393_v35 }
 0x37f   : > { %9656 = vrsqrt.f32 %v2558_v49  ;;  %v12345_v10 = vmul.f32 %v2674_v17, %v11868_v16  ;;  %v2430_v18 = vmul.f32 %v15970_v47, %v11959_v6  ;;  %v15761_v35 = vunpack.c.h.bf16 %v12313_v56  ;;  %v12365_v47 = vpop.f32.mrf.mxu3 }
 0x380   : > { %v2687_v29 = vmul.f32 %v12321_v15, %v2686_v42  ;;  %3146 = vrot.lane.b32.xlu0 %v12330_v26, %s10694_s30  ;;  %3409 = vrot.lane.b32.xlu1 %v12330_v26, %s10695_s26  ;;  %v2684_v40 = vsel %vm2683_vm4, %v9653_v33, %v2680_v59  ;;  %v2431_v6 = vmul.f32 %v15760_v20, %v11962_v63  ;;  %vm2692_vm5 = vweird.f32 %v12321_v15  ;;  %v12373_v20 = vld [vmem:[#allocation11 + $0x10] sm:$0xff]  }
 0x381   : > { %v12348_v48 = vmul.f32 %v2684_v40, %v11890_v45  ;;  %v2462_v39 = vadd.f32 %v2446_v44, %v2430_v18  ;;  %15971 = vst [vmem:[#allocation121_spill] sm:$0xff] %v12365_v47  ;;  %vm12379_vm8 = vmor %vm2691_vm6, %vm2692_vm5  ;;  %vm2701_vm9 = vweird.f32 %v2558_v49  ;;  %vm3400_vm4 = vcmask 523520  }
 0x382   : > { %v2688_v8 = vmul.f32 0.5, %v2687_v29  ;;  %vm3663_vm5 = vcmask 785920   ;;  %vm3926_vm6 = vcmask 1048320  }
 0x383   : > { %v2746_v42 = vpack.c.bf16 %v12348_v48, %v12345_v10  ;;  %v2478_v44 = vpack.c.bf16 %v2462_v39, %v2462_v39 }
 0x384   : > { %v2560_v33 = vpop.f32.mrf.mxu2  ;;  %v2689_v45 = vsub.f32 1.5, %v2688_v8 }
 0x385   : > { %v9657_v59 = vpop.eup %9656  ;;  %v2395_v16 = vpop.f32.mrf.mxu1  ;;  %v12357_v17 = vadd.f32 1.1920929e-07, %v2560_v33  ;;  %2782 = vmatmul.bf16.gmra.mxu3 %v2746_v42  ;;  %v12369_v42 = vld [vmem:[#allocation13 + $0x10] sm:$0xff]   ;;  %v2888_v39 = vunpack.c.l.b16 %v2478_v44 }
 0x386   : > { %v2696_v29 = vmul.f32 %v9657_v59, %v2558_v49  ;;  %v2447_v40 = vmul.f32 %v15761_v35, %v2395_v16  ;;  %v2690_v8 = vmul.f32 %v12321_v15, %v2689_v45  ;;  %v15765_v16 = vunpack.c.l.bf16 %v12369_v42 }
 0x387   : > { %9658 = vrsqrt.f32 %v12357_v17  ;;  %vm2702_vm7 = vweird.f32 %v9657_v59  ;;  %vm2711_vm12 = vweird.f32 %v12357_v17 }
 0x388   : > { %v2697_v18 = vmul.f32 %v9657_v59, %v2696_v29  ;;  %v2463_v34 = vadd.f32 %v2447_v40, %v2431_v6  ;;  %3672 = vrot.lane.b32.xlu0 %v12330_v26, %s10693_s20  ;;  %vm2703_vm10 = vmor %vm2701_vm9, %vm2702_vm7 }
 0x38a   : > { %v2698_v63 = vmul.f32 0.5, %v2697_v18  ;;  %v2479_v33 = vpack.c.bf16 %v2463_v34, %v2463_v34  ;;  %v15764_v34 = vunpack.c.l.bf16 %v12373_v20 }
 0x38c   : > { %v2699_v29 = vsub.f32 1.5, %v2698_v63  ;;  %v2889_v6 = vunpack.c.l.b16 %v2479_v33  ;;  %v2562_v40 = vpop.f32.mrf.mxu2  ;;  %v2694_v63 = vsel %vm12379_vm8, %v12321_v15, %v2690_v8  ;;  %v12406_v8 = vpop.f32.mrf.mxu3 }
 0x38d   : > { %v12377_v35 = vpop.eup %9658  ;;  %v2398_v45 = vpop.f32.mrf.mxu1  ;;  %v2563_v18 = vadd.f32 1.1920929e-07, %v2562_v40  ;;  %v12401_v47 = vmul.f32 %v2694_v63, %v11614_v41  ;;  %15974 = vst [vmem:[#allocation122_spill] sm:$0xff] %v12406_v8  ;;  %v15775_v40 = vunpack.c.h.bf16 %v12373_v20  ;;  %v12420_v8 = vld [vmem:[#allocation13 + $0x18] sm:$0xff]  }
 0x38e   : > { %v2700_v32 = vmul.f32 %v9657_v59, %v2699_v29  ;;  %v12384_v1 = vpack.c.b16 %v2889_v6, %v2888_v39  ;;  %v2706_v44 = vmul.f32 %v12377_v35, %v12357_v17  ;;  %v2448_v49 = vmul.f32 %v15765_v16, %v2398_v45 }
 0x38f   : > { %9660 = vrsqrt.f32 %v2563_v18  ;;  %v2432_v6 = vmul.f32 %v15764_v34, %v11979_v36  ;;  %vm2712_vm11 = vweird.f32 %v12377_v35  ;;  %vm2721_vm15 = vweird.f32 %v2563_v18 }
 0x390   : > { %v2707_v33 = vmul.f32 %v12377_v35, %v2706_v44  ;;  %3674 = vrot.lane.b32.xlu0 %v12384_v1, %s10693_s20  ;;  %3148 = vrot.lane.b32.xlu1 %v12384_v1, %s10694_s30  ;;  %v2704_v39 = vsel %vm2703_vm10, %v9657_v59, %v2700_v32  ;;  %v15774_v32 = vunpack.c.h.bf16 %v12369_v42  ;;  %vm2713_vm14 = vmor %vm2711_vm12, %vm2712_vm11 }
 0x391   : > { %3411 = vrot.lane.b32.xlu2 %v12384_v1, %s10695_s26  ;;  %v12404_v15 = vmul.f32 %v2704_v39, %v11620_v9  ;;  %v2464_v45 = vadd.f32 %v2448_v49, %v2432_v6 }
 0x392   : > { %v2708_v29 = vmul.f32 0.5, %v2707_v33  ;;  %v2433_v33 = vmul.f32 %v15775_v40, %v11982_v23  ;;  %v15769_v23 = vunpack.c.l.bf16 %v12420_v8 }
 0x393   : > { %v2747_v59 = vpack.c.bf16 %v12404_v15, %v12401_v47  ;;  %v2480_v39 = vpack.c.bf16 %v2464_v45, %v2464_v45 }
 0x394   : > { %v2709_v9 = vsub.f32 1.5, %v2708_v29  ;;  %v12424_v29 = vld [vmem:[#allocation11 + $0x18] sm:$0xff]  }
 0x395   : > { %v9661_v41 = vpop.eup %9660  ;;  %v2400_v44 = vpop.f32.mrf.mxu1  ;;  %2787 = vmatmul.bf16.gmra.mxu3 %v2747_v59 }
 0x396   : > { %v2716_v63 = vmul.f32 %v9661_v41, %v2563_v18  ;;  %v2449_v36 = vmul.f32 %v15774_v32, %v2400_v44  ;;  %v2710_v54 = vmul.f32 %v12377_v35, %v2709_v9  ;;  %v12428_v59 = vpop.f32.mrf.mxu3  ;;  %v2890_v44 = vunpack.c.l.b16 %v2480_v39 }
 0x397   : > { %15975 = vst [vmem:[#allocation123_spill] sm:$0xff] %v12428_v59  ;;  %vm2722_vm13 = vweird.f32 %v9661_v41 }
 0x398   : > { %v2717_v34 = vmul.f32 %v9661_v41, %v2716_v63  ;;  %v2465_v16 = vadd.f32 %v2449_v36, %v2433_v33  ;;  %v15768_v33 = vunpack.c.l.bf16 %v12424_v29  ;;  %vm2723_vm0 = vmor %vm2721_vm15, %vm2722_vm13 }
 0x39a   : > { %v2718_v49 = vmul.f32 0.5, %v2717_v34  ;;  %v2481_v6 = vpack.c.bf16 %v2465_v16, %v2465_v16  ;;  %v2714_v16 = vsel %vm2713_vm14, %v12377_v35, %v2710_v54  ;;  %v2434_v54 = vmul.f32 %v15768_v33, %v12004_v13 }
 0x39b   : > { %v15773_v35 = vunpack.c.h.bf16 %v12424_v29 }
 0x39c   : > { %v2719_v45 = vsub.f32 1.5, %v2718_v49  ;;  %v2891_v63 = vunpack.c.l.b16 %v2481_v6  ;;  %v12441_v49 = vmul.f32 %v2714_v16, %v11630_v46  ;;  %v15771_v6 = vunpack.c.h.bf16 %v12420_v8 }
 0x39d   : > { %v2403_v9 = vpop.f32.mrf.mxu1  ;;  %v2435_v46 = vmul.f32 %v15773_v35, %v12007_v55  ;;  %v15978_v35 = vunpack.c.l.bf16 %v12274_v12 }
 0x39e   : > { %v2720_v36 = vmul.f32 %v9661_v41, %v2719_v45  ;;  %v12431_v34 = vpack.c.b16 %v2891_v63, %v2890_v44  ;;  %v2450_v17 = vmul.f32 %v15769_v23, %v2403_v9 }
 0x3a0   : > { %3150 = vrot.lane.b32.xlu0 %v12431_v34, %s10694_s30  ;;  %3413 = vrot.lane.b32.xlu2 %v12431_v34, %s10695_s26  ;;  %v2724_v39 = vsel %vm2723_vm0, %v9661_v41, %v2720_v36  ;;  %v2466_v45 = vadd.f32 %v2450_v17, %v2434_v54  ;;  %v12453_v41 = vpop.f32.mrf.mxu3  ;;  %v12462_v36 = vld [vmem:[#allocation13 + $0x20] sm:$0xff]  }
 0x3a1   : > { %v12444_v18 = vmul.f32 %v2724_v39, %v11636_v21  ;;  %15976 = vst [vmem:[#allocation124_spill] sm:$0xff] %v12453_v41  ;;  %v12464_v17 = vld [vmem:[#allocation11 + $0x20] sm:$0xff]  }
 0x3a2   : > { %v2482_v13 = vpack.c.bf16 %v2466_v45, %v2466_v45  ;;  %v15772_v55 = vunpack.c.l.bf16 %v12464_v17 }
 0x3a3   : > { %v2748_v44 = vpack.c.bf16 %v12444_v18, %v12441_v49 }
 0x3a4   : > { %v2892_v39 = vunpack.c.l.b16 %v2482_v13  ;;  %v15776_v13 = vunpack.c.h.bf16 %v12462_v36 }
 0x3a5   : > { %v2405_v63 = vpop.f32.mrf.mxu1  ;;  %2792 = vmatmul.bf16.gmra.mxu3 %v2748_v44  ;;  %v15770_v44 = vunpack.c.l.bf16 %v12462_v36 }
 0x3a6   : > { %v2451_v21 = vmul.f32 %v15771_v6, %v2405_v63 }
 0x3a8   : > { %v2467_v9 = vadd.f32 %v2451_v21, %v2435_v46  ;;  %3676 = vrot.lane.b32.xlu0 %v12431_v34, %s10693_s20  ;;  %v12470_v63 = vpop.f32.mrf.mxu3  ;;  %v2436_v46 = vmul.f32 %v15772_v55, %v12056_v2  ;;  %v15777_v21 = vunpack.c.h.bf16 %v12464_v17  ;;  %v12490_v2 = vld [vmem:[#allocation13 + $0x28] sm:$0xff]  }
 0x3a9   : > { %15977 = vst [vmem:[#allocation125_spill] sm:$0xff] %v12470_v63 }
 0x3aa   : > { %v2483_v16 = vpack.c.bf16 %v2467_v9, %v2467_v9 }
 0x3ac   : > { %v2893_v54 = vunpack.c.l.b16 %v2483_v16 }
 0x3ad   : > { %v2408_v33 = vpop.f32.mrf.mxu1 }
 0x3ae   : > { %v12467_v23 = vpack.c.b16 %v2893_v54, %v2892_v39  ;;  %v2452_v45 = vmul.f32 %v15770_v44, %v2408_v33  ;;  %v2437_v33 = vmul.f32 %v15777_v21, %v12059_v37  ;;  %v15778_v37 = vunpack.c.l.bf16 %v12490_v2 }
 0x3b0   : > { %3678 = vrot.lane.b32.xlu0 %v12467_v23, %s10693_s20  ;;  %3415 = vrot.lane.b32.xlu2 %v12467_v23, %s10695_s26  ;;  %v2468_v9 = vadd.f32 %v2452_v45, %v2436_v46  ;;  %v12494_v46 = vld [vmem:[#allocation11 + $0x28] sm:$0xff]  }
 0x3b2   : > { %v2484_v54 = vpack.c.bf16 %v2468_v9, %v2468_v9  ;;  %v15979_v9 = vunpack.c.l.bf16 %v12278_v7 }
 0x3b4   : > { %v3943_v32 = vunpack.c.l.b16 %v2484_v54  ;;  %v9360_v54 = vunpack.c.h.bf16 %v12494_v46 }
 0x3b5   : > { %v2410_v16 = vpop.f32.mrf.mxu1 }
 0x3b6   : > { %v2453_v39 = vmul.f32 %v15776_v13, %v2410_v16  ;;  %v2798_v16 = vmul.f32 %v15979_v9, %v12087_v38  ;;  %v9359_v13 = vunpack.c.l.bf16 %v12494_v46 }
 0x3b8   : > { %v2469_v44 = vadd.f32 %v2453_v39, %v2437_v33  ;;  %3152 = vrot.lane.b32.xlu2 %v12467_v23, %s10694_s30  ;;  %v2758_v6 = vpop.f32.mrf.mxu3 }
 0x3b9   : > { %v2814_v45 = vmul.f32 %v15978_v35, %v2758_v6  ;;  %v15980_v6 = vunpack.c.h.bf16 %v12278_v7 }
 0x3ba   : > { %v2485_v55 = vpack.c.bf16 %v2469_v44, %v2469_v44 }
 0x3bb   : > { %v2830_v21 = vadd.f32 %v2814_v45, %v2798_v16  ;;  %v2799_v38 = vmul.f32 %v15980_v6, %v12090_v62  ;;  %v9392_v45 = vunpack.c.h.bf16 %v12490_v2  ;;  %v2439_v62 = vmul.f32 %v9360_v54, %v12131_v52  ;;  %v12536_v52 = vld [vmem:[#allocation11 + $0x30] sm:$0xff]  }
 0x3bc   : > { %v3944_v40 = vunpack.c.l.b16 %v2485_v55  ;;  %v2438_v55 = vmul.f32 %v9359_v13, %v12128_v5 }
 0x3bd   : > { %v2413_v33 = vpop.f32.mrf.mxu1  ;;  %v2846_v9 = vpack.c.bf16 %v2830_v21, %v2830_v21 }
 0x3be   : > { %v12500_v39 = vpack.c.b16 %v3944_v40, %v3943_v32  ;;  %v2454_v44 = vmul.f32 %v15778_v37, %v2413_v33  ;;  %v15981_v40 = vunpack.c.h.bf16 %v12274_v12 }
 0x3bf   : > { %v2906_v7 = vunpack.c.l.b16 %v2846_v9 }
 0x3c0   : > { %4201 = vrot.lane.b32.xlu1 %v12500_v39, %s10694_s30  ;;  %4463 = vrot.lane.b32.xlu2 %v12500_v39, %s10695_s26  ;;  %v2760_v35 = vpop.f32.mrf.mxu3  ;;  %v2470_v33 = vadd.f32 %v2454_v44, %v2438_v55  ;;  %v12528_v44 = vld [vmem:[#allocation13 + $0x30] sm:$0xff]  }
 0x3c1   : > { %v2815_v32 = vmul.f32 %v15981_v40, %v2760_v35  ;;  %v15780_v9 = vunpack.c.l.bf16 %v12528_v44 }
 0x3c2   : > { %v2486_v6 = vpack.c.bf16 %v2470_v33, %v2470_v33 }
 0x3c3   : > { %v2831_v16 = vadd.f32 %v2815_v32, %v2799_v38  ;;  %v15982_v32 = vunpack.c.l.bf16 %v12313_v56 }
 0x3c5   : > { %v2847_v37 = vpack.c.bf16 %v2831_v16, %v2831_v16  ;;  %v2415_v41 = vpop.f32.mrf.mxu1  ;;  %v15983_v16 = vunpack.c.l.bf16 %v12317_v28 }
 0x3c6   : > { %v2455_v12 = vmul.f32 %v9392_v45, %v2415_v41  ;;  %v3945_v41 = vunpack.c.l.b16 %v2486_v6 }
 0x3c7   : > { %v2907_v35 = vunpack.c.l.b16 %v2847_v37  ;;  %v2800_v33 = vmul.f32 %v15983_v16, %v12161_v3 }
 0x3c8   : > { %v2471_v5 = vadd.f32 %v2455_v12, %v2439_v62  ;;  %4725 = vrot.lane.b32.xlu1 %v12500_v39, %s10693_s20  ;;  %v2763_v40 = vpop.f32.mrf.mxu3 }
 0x3c9   : > { %v12526_v21 = vpack.c.b16 %v2907_v35, %v2906_v7  ;;  %v2816_v55 = vmul.f32 %v15982_v32, %v2763_v40  ;;  %v9363_v7 = vunpack.c.l.bf16 %v12536_v52  ;;  %v15984_v40 = vunpack.c.h.bf16 %v12317_v28 }
 0x3ca   : > { %v2487_v38 = vpack.c.bf16 %v2471_v5, %v2471_v5  ;;  %v15985_v32 = vunpack.c.h.bf16 %v12313_v56 }
 0x3cb   : > { %3680 = vrot.lane.b32.xlu0 %v12526_v21, %s10693_s20  ;;  %3417 = vrot.lane.b32.xlu2 %v12526_v21, %s10695_s26  ;;  %v2832_v35 = vadd.f32 %v2816_v55, %v2800_v33  ;;  %v9364_v55 = vunpack.c.h.bf16 %v12536_v52 }
 0x3cc   : > { %v3946_v37 = vunpack.c.l.b16 %v2487_v38  ;;  %v2801_v38 = vmul.f32 %v15984_v40, %v12164_v22 }
 0x3cd   : > { %v2418_v62 = vpop.f32.mrf.mxu1  ;;  %v2848_v16 = vpack.c.bf16 %v2832_v35, %v2832_v35  ;;  %v2441_v22 = vmul.f32 %v9364_v55, %v12206_v25  ;;  %v12576_v25 = vld [vmem:[#allocation11 + $0x38] sm:$0xff]  }
 0x3ce   : > { %v12542_v12 = vpack.c.b16 %v3946_v37, %v3945_v41  ;;  %v2456_v5 = vmul.f32 %v15780_v9, %v2418_v62  ;;  %v2440_v41 = vmul.f32 %v9363_v7, %v12203_v4  ;;  %v15782_v37 = vunpack.c.h.bf16 %v12528_v44 }
 0x3cf   : > { %v2908_v4 = vunpack.c.l.b16 %v2848_v16 }
 0x3d0   : > { %3154 = vrot.lane.b32.xlu1 %v12526_v21, %s10694_s30  ;;  %v2765_v6 = vpop.f32.mrf.mxu3  ;;  %v2472_v62 = vadd.f32 %v2456_v5, %v2440_v41  ;;  %v12570_v5 = vld [vmem:[#allocation13 + $0x38] sm:$0xff]   ;;  %v15986_v41 = vunpack.c.l.bf16 %v12369_v42 }
 0x3d1   : > { %v2817_v3 = vmul.f32 %v15985_v32, %v2765_v6 }
 0x3d2   : > { %v2488_v40 = vpack.c.bf16 %v2472_v62, %v2472_v62  ;;  %v15781_v62 = vunpack.c.l.bf16 %v12570_v5 }
 0x3d3   : > { %v2833_v33 = vadd.f32 %v2817_v3, %v2801_v38  ;;  %4465 = vrot.lane.b32.xlu0 %v12542_v12, %s10695_s26 }
 0x3d5   : > { %v2849_v9 = vpack.c.bf16 %v2833_v33, %v2833_v33  ;;  %v2420_v28 = vpop.f32.mrf.mxu1 }
 0x3d6   : > { %v2457_v56 = vmul.f32 %v15782_v37, %v2420_v28  ;;  %v15987_v28 = vunpack.c.l.bf16 %v12373_v20 }
 0x3d7   : > { %v2909_v6 = vunpack.c.l.b16 %v2849_v9  ;;  %v3947_v9 = vunpack.c.l.b16 %v2488_v40 }
 0x3d8   : > { %v2473_v32 = vadd.f32 %v2457_v56, %v2441_v22  ;;  %4727 = vrot.lane.b32.xlu1 %v12542_v12, %s10693_s20  ;;  %v2768_v35 = vpop.f32.mrf.mxu3  ;;  %v2802_v22 = vmul.f32 %v15987_v28, %v12227_v19  ;;  %v9400_v28 = vunpack.c.h.bf16 %v12570_v5 }
 0x3d9   : > { %v12568_v38 = vpack.c.b16 %v2909_v6, %v2908_v4  ;;  %v2818_v33 = vmul.f32 %v15986_v41, %v2768_v35  ;;  %v9367_v6 = vunpack.c.l.bf16 %v12576_v25  ;;  %v15989_v41 = vunpack.c.h.bf16 %v12369_v42 }
 0x3da   : > { %v2489_v3 = vpack.c.bf16 %v2473_v32, %v2473_v32 }
 0x3db   : > { %4203 = vrot.lane.b32.xlu0 %v12542_v12, %s10694_s30  ;;  %v2834_v32 = vadd.f32 %v2818_v33, %v2802_v22  ;;  %v2442_v33 = vmul.f32 %v9367_v6, %v12250_v58 }
 0x3dc   : > { %v3948_v16 = vunpack.c.l.b16 %v2489_v3  ;;  %v15988_v3 = vunpack.c.h.bf16 %v12373_v20 }
 0x3dd   : > { %v2423_v56 = vpop.f32.mrf.mxu1  ;;  %v2850_v22 = vpack.c.bf16 %v2834_v32, %v2834_v32 }
 0x3de   : > { %v12582_v4 = vpack.c.b16 %v3948_v16, %v3947_v9  ;;  %v2458_v35 = vmul.f32 %v15781_v62, %v2423_v56  ;;  %v2803_v19 = vmul.f32 %v15988_v3, %v12230_v24  ;;  %v9368_v16 = vunpack.c.h.bf16 %v12576_v25 }
 0x3df   : > { %v2910_v58 = vunpack.c.l.b16 %v2850_v22 }
 0x3e0   : > { %4729 = vrot.lane.b32.xlu1 %v12582_v4, %s10693_s20  ;;  %4467 = vrot.lane.b32.xlu2 %v12582_v4, %s10695_s26  ;;  %v2770_v40 = vpop.f32.mrf.mxu3  ;;  %v2474_v62 = vadd.f32 %v2458_v35, %v2442_v33  ;;  %v2443_v24 = vmul.f32 %v9368_v16, %v12253_v30  ;;  %v15990_v35 = vunpack.c.l.bf16 %v12420_v8 }
 0x3e1   : > { %v2819_v9 = vmul.f32 %v15989_v41, %v2770_v40 }
 0x3e2   : > { %v2490_v3 = vpack.c.bf16 %v2474_v62, %v2474_v62 }
 0x3e3   : > { %v2835_v56 = vadd.f32 %v2819_v9, %v2803_v19  ;;  %3419 = vrot.lane.b32.xlu0 %v12568_v38, %s10695_s26 }
 0x3e4   : > { %v3949_v30 = vunpack.c.l.b16 %v2490_v3 }
 0x3e5   : > { %v2851_v37 = vpack.c.bf16 %v2835_v56, %v2835_v56  ;;  %v2425_v20 = vpop.f32.mrf.mxu1 }
 0x3e6   : > { %v2459_v42 = vmul.f32 %v9400_v28, %v2425_v20 }
 0x3e7   : > { %v2911_v40 = vunpack.c.l.b16 %v2851_v37  ;;  %v15991_v37 = vunpack.c.l.bf16 %v12424_v29 }
 0x3e8   : > { %v2475_v41 = vadd.f32 %v2459_v42, %v2443_v24  ;;  %4205 = vrot.lane.b32.xlu2 %v12582_v4, %s10694_s30  ;;  %v2773_v32 = vpop.f32.mrf.mxu3  ;;  %v15992_v42 = vunpack.c.h.bf16 %v12424_v29 }
 0x3e9   : > { %v2916_v19 = vpack.c.b16 %v2911_v40, %v2910_v58  ;;  %v2820_v33 = vmul.f32 %v15990_v35, %v2773_v32  ;;  %v2804_v62 = vmul.f32 %v15991_v37, %v12262_v27  ;;  %v15993_v40 = vunpack.c.h.bf16 %v12420_v8  ;;  %v12626_v32 = vpop.permute.xlu0 %4636 }
 0x3ea   : > { %v2491_v9 = vpack.c.bf16 %v2475_v41, %v2475_v41  ;;  %v2805_v58 = vmul.f32 %v15992_v42, %v12265_v51  ;;  %v15994_v51 = vunpack.c.l.bf16 %v12462_v36 }
 0x3eb   : > { %3156 = vrot.lane.b32.xlu0 %v12568_v38, %s10694_s30  ;;  %3158 = vrot.lane.b32.xlu1 %v2916_v19, %s10694_s30  ;;  %v2836_v20 = vadd.f32 %v2820_v33, %v2804_v62  ;;  %v15996_v62 = vunpack.c.l.bf16 %v12464_v17 }
 0x3ec   : > { %v3950_v56 = vunpack.c.l.b16 %v2491_v9 }
 0x3ed   : > { %v2852_v3 = vpack.c.bf16 %v2836_v20, %v2836_v20  ;;  %v2806_v20 = vmul.f32 %v15996_v62, %v12291_v31  ;;  %v2808_v62 = vmul.f32 %v9359_v13, %v12345_v10  ;;  %v2932_v10 = vsel %vm2918_vm1, %v12526_v21, 0 }
 0x3ee   : > { %v12618_v22 = vpack.c.b16 %v3950_v56, %v3949_v30 }
 0x3ef   : > { %v2912_v35 = vunpack.c.l.b16 %v2852_v3 }
 0x3f0   : > { %3421 = vrot.lane.b32.xlu2 %v2916_v19, %s10695_s26  ;;  %v2775_v24 = vpop.f32.mrf.mxu3 }
 0x3f1   : > { %v2821_v41 = vmul.f32 %v15993_v40, %v2775_v24  ;;  %v12637_v37 = vpop.permute.xlu0 %4374 }
 0x3f2   : > { %15995 = vst [vmem:[#allocation126_spill] sm:$0xff] %v12637_v37 }
 0x3f3   : > { %v2837_v9 = vadd.f32 %v2821_v41, %v2805_v58  ;;  %3682 = vrot.lane.b32.xlu0 %v12568_v38, %s10693_s20  ;;  %v15997_v58 = vunpack.c.h.bf16 %v12464_v17  ;;  %v15998_v41 = vunpack.c.h.bf16 %v12462_v36  ;;  %v15999_v36 = vunpack.c.l.bf16 %v12490_v2 }
 0x3f5   : > { %v2853_v27 = vpack.c.bf16 %v2837_v9, %v2837_v9  ;;  %v2807_v40 = vmul.f32 %v15997_v58, %v12294_v53 }
 0x3f7   : > { %v2913_v33 = vunpack.c.l.b16 %v2853_v27 }
 0x3f8   : > { %4731 = vrot.lane.b32.xlu2 %v12618_v22, %s10693_s20  ;;  %v2778_v30 = vpop.f32.mrf.mxu3 }
 0x3f9   : > { %v2917_v56 = vpack.c.b16 %v2913_v33, %v2912_v35  ;;  %v2822_v8 = vmul.f32 %v15994_v51, %v2778_v30  ;;  %v2938_v35 = vsel %vm2918_vm1, %v2916_v19, 0  ;;  %v12651_v33 = vpop.permute.xlu2 %4632  ;;  %v12653_v31 = vpop.permute.xlu0 %3146 }
 0x3fb   : > { %3684 = vrot.lane.b32.xlu0 %v2916_v19, %s10693_s20  ;;  %3423 = vrot.lane.b32.xlu1 %v2917_v56, %s10695_s26  ;;  %v2941_v29 = vsel %vm2918_vm1, %v2917_v56, 0  ;;  %v2838_v24 = vadd.f32 %v2822_v8, %v2806_v20  ;;  %v2935_v19 = vsel %vm2918_vm1, %v12568_v38, 0 }
 0x3fc   : > { %2947 = vmatpush.bf16.xpose.msrb.mxu1 %v2941_v29 }
 0x3fd   : > { %v2854_v9 = vpack.c.bf16 %v2838_v24, %v2838_v24 }
 0x3ff   : > { %v3963_v51 = vunpack.c.l.b16 %v2854_v9 }
 0x400   : > { %3686 = vrot.lane.b32.xlu2 %v2917_v56, %s10693_s20  ;;  %v2780_v42 = vpop.f32.mrf.mxu3 }
 0x401   : > { %v2823_v3 = vmul.f32 %v15998_v41, %v2780_v42  ;;  %v12670_v20 = vpop.permute.xlu2 %4370  ;;  %v12672_v24 = vpop.permute.xlu0 %3672 }
 0x402   : > { %16000 = vst [vmem:[#allocation127_spill] sm:$0xff] %v12670_v20  ;;  %v12679_v41 = vpop.permute.xlu1 %4634 }
 0x403   : > { %v2839_v27 = vadd.f32 %v2823_v3, %v2807_v40  ;;  %4469 = vrot.lane.b32.xlu0 %v12618_v22, %s10695_s26  ;;  %v2809_v40 = vmul.f32 %v9360_v54, %v12348_v48 }
 0x404   : > { %2948 = vmatpush.bf16.xpose.msrb.mxu1 %v2938_v35  ;;  %v16001_v35 = vunpack.c.l.bf16 %v12528_v44 }
 0x405   : > { %v2855_v30 = vpack.c.bf16 %v2839_v27, %v2839_v27 }
 0x407   : > { %v3964_v8 = vunpack.c.l.b16 %v2855_v30 }
 0x408   : > { %v2783_v17 = vpop.f32.mrf.mxu3 }
 0x409   : > { %v12655_v53 = vpack.c.b16 %v3964_v8, %v3963_v51  ;;  %v2824_v29 = vmul.f32 %v15999_v36, %v2783_v17  ;;  %v12687_v48 = vpop.permute.xlu2 %4638  ;;  %v16003_v17 = vunpack.c.h.bf16 %v12528_v44 }
 0x40b   : > { %4471 = vrot.lane.b32.xlu1 %v12655_v53, %s10695_s26  ;;  %4209 = vrot.lane.b32.xlu2 %v12655_v53, %s10694_s30  ;;  %v2840_v42 = vadd.f32 %v2824_v29, %v2808_v62  ;;  %v16005_v62 = vunpack.c.l.bf16 %v12570_v5 }
 0x40c   : > { %4207 = vrot.lane.b32.xlu0 %v12618_v22, %s10694_s30  ;;  %2949 = vmatpush.bf16.xpose.msrb.mxu1 %v2935_v19 }
 0x40d   : > { %v2856_v3 = vpack.c.bf16 %v2840_v42, %v2840_v42 }
 0x40f   : > { %v3965_v2 = vunpack.c.l.b16 %v2856_v3 }
 0x410   : > { %v2785_v58 = vpop.f32.mrf.mxu3 }
 0x411   : > { %v2825_v38 = vmul.f32 %v9392_v45, %v2785_v58  ;;  %v12689_v45 = vpop.permute.xlu0 %3674  ;;  %v12706_v51 = vpop.permute.xlu2 %4376  ;;  %v2812_v58 = vmul.f32 %v9367_v6, %v12441_v49 }
 0x413   : > { %v2841_v9 = vadd.f32 %v2825_v38, %v2809_v40  ;;  %4733 = vrot.lane.b32.xlu1 %v12655_v53, %s10693_s20  ;;  %v16006_v40 = vld [vmem:[#allocation74_spill] sm:$0xff] }
 0x414   : > { %3160 = vrot.lane.b32.xlu0 %v2917_v56, %s10694_s30  ;;  %2950 = vmatpush.bf16.xpose.msrb.mxu1 %v2932_v10  ;;  %v2810_v56 = vmul.f32 %v9363_v7, %v12401_v47 }
 0x415   : > { %v2857_v13 = vpack.c.bf16 %v2841_v9, %v2841_v9  ;;  %v2813_v9 = vmul.f32 %v9368_v16, %v12444_v18 }
 0x417   : > { %v3966_v46 = vunpack.c.l.b16 %v2857_v13 }
 0x418   : > { %v2788_v54 = vpop.f32.mrf.mxu3 }
 0x419   : > { %v12691_v27 = vpack.c.b16 %v3966_v46, %v3965_v2  ;;  %v2826_v21 = vmul.f32 %v16001_v35, %v2788_v54  ;;  %v12708_v8 = vpop.permute.xlu0 %3150 }
 0x41b   : > { %8878 = vmatmul.msk.bf16.vlgmr.msrb.gmra.mxu1 %vm2918_vm1, %v12330_v26  ;;  %v2842_v30 = vadd.f32 %v2826_v21, %v2810_v56  ;;  %v2811_v26 = vmul.f32 %v9364_v55, %v12404_v15  ;;  %v12722_v15 = vpop.permute.xlu2 %3411 }
 0x41c   : > { %3113 = vmatpush.bf16.msra.mxu1 %v11728_v43  ;;  %4473 = vrot.lane.b32.xlu0 %v12691_v27, %s10695_s26  ;;  %v12700_v43 = vpop.permute.xlu1 %4372 }
 0x41d   : > { %16002 = vst [vmem:[#allocation128_spill] sm:$0xff] %v12700_v43  ;;  %v2858_v47 = vpack.c.bf16 %v2842_v30, %v2842_v30 }
 0x41f   : > { %v3967_v19 = vunpack.c.l.b16 %v2858_v47 }
 0x420   : > { %3114 = vmatpush.bf16.msra.mxu1 %v11702_v11  ;;  %v2790_v11 = vpop.f32.mrf.mxu3 }
 0x421   : > { %v2827_v36 = vmul.f32 %v16003_v17, %v2790_v11 }
 0x423   : > { %v2843_v7 = vadd.f32 %v2827_v36, %v2811_v26  ;;  %v12745_v3 = vpop.permute.xlu2 %3413 }
 0x424   : > { %3115 = vmatpush.bf16.msra.mxu1 %v11678_v50  ;;  %4211 = vrot.lane.b32.xlu0 %v12691_v27, %s10694_s30  ;;  %v12719_v50 = vpop.permute.xlu1 %3409 }
 0x425   : > { %v2859_v29 = vpack.c.bf16 %v2843_v7, %v2843_v7 }
 0x427   : > { %v3968_v52 = vunpack.c.l.b16 %v2859_v29 }
 0x428   : > { %3116 = vmatpush.bf16.msra.mxu1 %v11652_v14  ;;  %v2793_v44 = vpop.f32.mrf.mxu3  ;;  %v16004_v14 = vld [vmem:[#allocation69_spill] sm:$0xff] }
 0x429   : > { %v12724_v55 = vpack.c.b16 %v3968_v52, %v3967_v19  ;;  %v2828_v42 = vmul.f32 %v16005_v62, %v2793_v44 }
 0x42b   : > { %8879 = vmatmul.msk.bf16.gmra.mxu1 %vm2918_vm1, %v12384_v1  ;;  %4213 = vrot.lane.b32.xlu1 %v12724_v55, %s10694_s30  ;;  %v2844_v38 = vadd.f32 %v2828_v42, %v2812_v58  ;;  %v12758_v21 = vpop.permute.xlu2 %3415 }
 0x42c   : > { %3606 = vmatpush.bf16.msrb.mxu1 %v12051_v61  ;;  %v12727_v61 = vpop.permute.xlu0 %3676  ;;  %4475 = vrot.lane.b32.xlu2 %v12724_v55, %s10695_s26 }
 0x42d   : > { %4735 = vrot.lane.b32.xlu0 %v12691_v27, %s10693_s20  ;;  %v2860_v13 = vpack.c.bf16 %v2844_v38, %v2844_v38 }
 0x42f   : > { %v3969_v54 = vunpack.c.l.b16 %v2860_v13 }
 0x430   : > { %3607 = vmatpush.bf16.msrb.mxu1 %v12079_v57  ;;  %v12739_v57 = vpop.permute.xlu1 %3148  ;;  %v2795_v1 = vpop.f32.mrf.mxu3 }
 0x431   : > { %v2829_v10 = vmul.f32 %v9400_v28, %v2795_v1 }
 0x433   : > { %v2845_v2 = vadd.f32 %v2829_v10, %v2813_v9  ;;  %4737 = vrot.lane.b32.xlu1 %v12724_v55, %s10693_s20  ;;  %v12768_v25 = vpop.permute.xlu2 %3152 }
 0x434   : > { %3608 = vmatpush.bf16.msrb.mxu1 %v16004_v14  ;;  %v12754_v46 = vpop.permute.xlu0 %3678 }
 0x435   : > { %v2861_v49 = vpack.c.bf16 %v2845_v2, %v2845_v2 }
 0x437   : > { %v3970_v35 = vunpack.c.l.b16 %v2861_v49 }
 0x438   : > { %3609 = vmatpush.bf16.msrb.mxu1 %v16006_v40  ;;  %v12756_v6 = vpop.permute.xlu1 %4201 }
 0x439   : > { %v3974_v56 = vpack.c.b16 %v3970_v35, %v3969_v54 }
 0x43b   : > { %8880 = vmatmul.msk.bf16.gmra.mxu1 %vm2918_vm1, %v12431_v34  ;;  %4739 = vrot.lane.b32.xlu1 %v3974_v56, %s10693_s20  ;;  %v12775_v30 = vpop.permute.xlu2 %4463  ;;  %v3997_v49 = vsel %vm2918_vm1, %v3974_v56, 0 }
 0x43c   : > { %4477 = vrot.lane.b32.xlu2 %v3974_v56, %s10695_s26 }
 0x43d   : > { %v12764_v18 = vpop.permute.xlu0 %3680 }
 0x440   : > { %v12766_v5 = vpop.permute.xlu1 %4725 }
 0x443   : > { %v3418_v26 = vpop.permute.xlu2 %3417 }
 0x444   : > { %4215 = vrot.lane.b32.xlu2 %v3974_v56, %s10694_s30  ;;  %v3438_v13 = vsel %vm2918_vm1, %v3418_v26, 0  ;;  %v3991_v56 = vsel %vm2918_vm1, %v12691_v27, 0 }
 0x445   : > { %v12771_v16 = vpop.permute.xlu0 %4465 }
 0x448   : > { %v3155_v28 = vpop.permute.xlu1 %3154 }
 0x44b   : > { %8881 = vmatmul.msk.bf16.gmra.mxu1 %vm2918_vm1, %v12467_v23  ;;  %v12781_v36 = vpop.permute.xlu2 %4467 }
 0x44d   : > { %v12777_v34 = vpop.permute.xlu0 %4203 }
 0x450   : > { %v12779_v11 = vpop.permute.xlu1 %4727 }
 0x453   : > { %v12787_v52 = vpop.permute.xlu2 %4205 }
 0x455   : > { %v3420_v17 = vpop.permute.xlu0 %3419 }
 0x456   : > { %v3441_v1 = vsel %vm2918_vm1, %v3420_v17, 0  ;;  %v3994_v17 = vsel %vm2918_vm1, %v12724_v55, 0  ;;  %v3175_v55 = vsel %vm2918_vm1, %v3155_v28, 0 }
 0x458   : > { %v12783_v47 = vpop.permute.xlu1 %4729 }
 0x45b   : > { %v3422_v62 = vpop.permute.xlu2 %3421 }
 0x45c   : > { %v3444_v58 = vsel %vm2918_vm1, %v3422_v62, 0 }
 0x45d   : > { %v3157_v7 = vpop.permute.xlu0 %3156 }
 0x460   : > { %v3159_v29 = vpop.permute.xlu1 %3158 }
 0x461   : > { %v3181_v35 = vsel %vm2918_vm1, %v3159_v29, 0 }
 0x463   : > { %v12793_v40 = vpop.permute.xlu2 %4731 }
 0x465   : > { %v12785_v19 = vpop.permute.xlu0 %3682 }
 0x46b   : > { %v3687_v9 = vpop.permute.xlu2 %3686 }
 0x46c   : > { %v3710_v27 = vsel %vm2918_vm1, %v3687_v9, 0 }
 0x46d   : > { %v3685_v44 = vpop.permute.xlu0 %3684  ;;  %v3424_v23 = vpop.permute.xlu1 %3423 }
 0x46e   : > { %v3447_v14 = vsel %vm2918_vm1, %v3424_v23, 0  ;;  %v3178_v23 = vsel %vm2918_vm1, %v3157_v7, 0  ;;  %v3988_v7 = vsel %vm2918_vm1, %v12655_v53, 0  ;;  %v3707_v53 = vsel %vm2918_vm1, %v3685_v44, 0 }
 0x46f   : > { %3453 = vmatpush.bf16.xpose.msrb.mxu0 %v3447_v14 }
 0x473   : > { %v12801_v54 = vpop.permute.xlu2 %4209 }
 0x475   : > { %v12790_v42 = vpop.permute.xlu0 %4469 }
 0x477   : > { %3454 = vmatpush.bf16.xpose.msrb.mxu0 %v3444_v58 }
 0x47e   : > { %v12795_v38 = vpop.permute.xlu0 %4207 }
 0x47f   : > { %3455 = vmatpush.bf16.xpose.msrb.mxu0 %v3441_v1 }
 0x486   : > { %v3161_v10 = vpop.permute.xlu0 %3160  ;;  %v4476_v26 = vpop.permute.xlu2 %4475 }
 0x487   : > { %v3184_v2 = vsel %vm2918_vm1, %v3161_v10, 0  ;;  %3456 = vmatpush.bf16.xpose.msrb.mxu0 %v3438_v13  ;;  %v4498_v28 = vsel %vm2918_vm1, %v4476_v26, 0 }
 0x488   : > { %3190 = vmatpush.bf16.xpose.msra.mxu2 %v3184_v2 }
 0x48e   : > { %8894 = vmatmul.msk.bf16.vlgmr.msrb.gmra.mxu0 %vm2918_vm1, %v12719_v50 }
 0x48f   : > { %4003 = vmatpush.bf16.xpose.msra.mxu0 %v3997_v49  ;;  %v4472_v49 = vpop.permute.xlu1 %4471 }
 0x490   : > { %3191 = vmatpush.bf16.xpose.msra.mxu2 %v3181_v35  ;;  %v4474_v35 = vpop.permute.xlu0 %4473 }
 0x491   : > { %v4495_v44 = vsel %vm2918_vm1, %v4474_v35, 0  ;;  %v4230_v35 = vsel %vm2918_vm1, %v12801_v54, 0 }
 0x496   : > { %v4478_v29 = vpop.permute.xlu2 %4477 }
 0x497   : > { %4004 = vmatpush.bf16.xpose.msra.mxu0 %v3994_v17  ;;  %v4501_v58 = vsel %vm2918_vm1, %v4478_v29, 0 }
 0x498   : > { %3192 = vmatpush.bf16.xpose.msra.mxu2 %v3178_v23  ;;  %v2952_v14 = vpop.f32.mrf.mxu1 }
 0x499   : > { %v12811_v62 = vmul.f32 0.17677669, %v2952_v14 }
 0x49b   : > { %v2981_v50 = vsel %vm2980_vm2, %v12811_v62, -inf }
 0x49c   : > { %2982 = vmax.xlane.f32.xlu1 %v2981_v50  ;;  %v3701_v50 = vsel %vm2918_vm1, %v12764_v18, 0 }
 0x49e   : > { %8895 = vmatmul.msk.bf16.gmra.mxu0 %vm2918_vm1, %v12722_v15  ;;  %v4216_v14 = vpop.permute.xlu2 %4215 }
 0x49f   : > { %4005 = vmatpush.bf16.xpose.msra.mxu0 %v3991_v56  ;;  %v4734_v56 = vpop.permute.xlu1 %4733  ;;  %v4239_v29 = vsel %vm2918_vm1, %v4216_v14, 0 }
 0x4a0   : > { %3193 = vmatpush.bf16.xpose.msra.mxu2 %v3175_v55  ;;  %v2954_v1 = vpop.f32.mrf.mxu1 }
 0x4a1   : > { %v12822_v10 = vmul.f32 0.17677669, %v2954_v1 }
 0x4a3   : > { %v2984_v13 = vsel %vm2980_vm2, %v12822_v10, -inf }
 0x4a4   : > { %2985 = vmax.xlane.f32.xlu2 %v2984_v13  ;;  %v4212_v13 = vpop.permute.xlu0 %4211 }
 0x4a7   : > { %4006 = vmatpush.bf16.xpose.msra.mxu0 %v3988_v7  ;;  %8886 = vmatmul.msk.bf16.vlgmr.msra.gmra.mxu2 %vm2918_vm1, %v12653_v31  ;;  %v3704_v31 = vsel %vm2918_vm1, %v12785_v19, 0  ;;  %v4492_v19 = vsel %vm2918_vm1, %v4472_v49, 0 }
 0x4a8   : > { %3716 = vmatpush.bf16.xpose.msrb.mxu2 %v3710_v27  ;;  %v2957_v15 = vpop.f32.mrf.mxu1  ;;  %v4214_v27 = vpop.permute.xlu1 %4213 }
 0x4a9   : > { %v12830_v9 = vmul.f32 0.17677669, %v2957_v15  ;;  %v4236_v18 = vsel %vm2918_vm1, %v4214_v27, 0 }
 0x4ab   : > { %v2987_v2 = vsel %vm2980_vm2, %v12830_v9, -inf }
 0x4ac   : > { %2988 = vmax.xlane.f32.xlu0 %v2987_v2 }
 0x4ae   : > { %8896 = vmatmul.msk.bf16.gmra.mxu0 %vm2918_vm1, %v12745_v3 }
 0x4af   : > { %4507 = vmatpush.bf16.xpose.msrb.mxu0 %v4501_v58 }
 0x4b0   : > { %3717 = vmatpush.bf16.xpose.msrb.mxu2 %v3707_v53  ;;  %v2959_v17 = vpop.f32.mrf.mxu1 }
 0x4b1   : > { %v12839_v26 = vmul.f32 0.17677669, %v2959_v17  ;;  %v4738_v17 = vpop.permute.xlu1 %4737 }
 0x4b2   : > { %v4760_v54 = vsel %vm2918_vm1, %v4738_v17, 0 }
 0x4b3   : > { %v2990_v23 = vsel %vm2980_vm2, %v12839_v26, -inf }
 0x4b4   : > { %2991 = vmax.xlane.f32.xlu1 %v2990_v23 }
 0x4b7   : > { %4508 = vmatpush.bf16.xpose.msrb.mxu0 %v4498_v28  ;;  %8887 = vmatmul.msk.bf16.gmra.mxu2 %vm2918_vm1, %v12739_v57  ;;  %v4233_v28 = vsel %vm2918_vm1, %v4212_v13, 0 }
 0x4b8   : > { %3718 = vmatpush.bf16.xpose.msrb.mxu2 %v3704_v31  ;;  %v2962_v3 = vpop.f32.mrf.mxu1 }
 0x4b9   : > { %v12849_v55 = vmul.f32 0.17677669, %v2962_v3  ;;  %v4740_v31 = vpop.permute.xlu1 %4739 }
 0x4bb   : > { %v2993_v7 = vsel %vm2980_vm2, %v12849_v55, -inf }
 0x4bc   : > { %2994 = vmax.xlane.f32.xlu2 %v2993_v7 }
 0x4be   : > { %8897 = vmatmul.msk.bf16.gmra.mxu0 %vm2918_vm1, %v12758_v21 }
 0x4bf   : > { %4509 = vmatpush.bf16.xpose.msrb.mxu0 %v4495_v44  ;;  %v4736_v44 = vpop.permute.xlu0 %4735 }
 0x4c0   : > { %3719 = vmatpush.bf16.xpose.msrb.mxu2 %v3701_v50  ;;  %v2964_v57 = vpop.f32.mrf.mxu1 }
 0x4c1   : > { %v12855_v58 = vmul.f32 0.17677669, %v2964_v57 }
 0x4c3   : > { %v2996_v1 = vsel %vm2980_vm2, %v12855_v58, -inf }
 0x4c4   : > { %2997 = vmax.xlane.f32.xlu1 %v2996_v1 }
 0x4c7   : > { %4510 = vmatpush.bf16.xpose.msrb.mxu0 %v4492_v19  ;;  %8888 = vmatmul.msk.bf16.gmra.mxu2 %vm2918_vm1, %v12708_v8 }
 0x4c8   : > { %4245 = vmatpush.bf16.xpose.msra.mxu2 %v4239_v29  ;;  %v2967_v15 = vpop.f32.mrf.mxu1 }
 0x4c9   : > { %v12862_v53 = vmul.f32 0.17677669, %v2967_v15 }
 0x4cb   : > { %v2999_v21 = vsel %vm2980_vm2, %v12862_v53, -inf }
 0x4cc   : > { %3000 = vmax.xlane.f32.xlu0 %v2999_v21 }
 0x4ce   : > { %8910 = vmatmul.msk.bf16.vlgmr.msra.gmra.mxu0 %vm2918_vm1, %v12500_v39  ;;  %v4763_v39 = vsel %vm2918_vm1, %v4740_v31, 0 }
 0x4d0   : > { %4246 = vmatpush.bf16.xpose.msra.mxu2 %v4236_v18  ;;  %v2969_v2 = vpop.f32.mrf.mxu1 }
 0x4d1   : > { %v12869_v49 = vmul.f32 0.17677669, %v2969_v2 }
 0x4d3   : > { %v3002_v8 = vsel %vm2980_vm2, %v12869_v49, -inf }
 0x4d4   : > { %3003 = vmax.xlane.f32.xlu1 %v3002_v8 }
 0x4d7   : > { %8889 = vmatmul.msk.bf16.gmra.mxu2 %vm2918_vm1, %v12768_v25  ;;  %v4757_v25 = vsel %vm2918_vm1, %v4736_v44, 0 }
 0x4d8   : > { %4247 = vmatpush.bf16.xpose.msra.mxu2 %v4233_v28 }
 0x4de   : > { %8911 = vmatmul.msk.bf16.gmra.mxu0 %vm2918_vm1, %v12542_v12  ;;  %v4754_v12 = vsel %vm2918_vm1, %v4734_v56, 0 }
 0x4e0   : > { %4248 = vmatpush.bf16.xpose.msra.mxu2 %v4230_v35 }
 0x4e7   : > { %8902 = vmatmul.msk.bf16.vlgmr.msrb.gmra.mxu2 %vm2918_vm1, %v12672_v24 }
 0x4e8   : > { %4769 = vmatpush.bf16.xpose.msrb.mxu2 %v4763_v39 }
 0x4ee   : > { %8912 = vmatmul.msk.bf16.gmra.mxu0 %vm2918_vm1, %v12582_v4 }
 0x4f0   : > { %4770 = vmatpush.bf16.xpose.msrb.mxu2 %v4760_v54 }
 0x4f7   : > { %8903 = vmatmul.msk.bf16.gmra.mxu2 %vm2918_vm1, %v12689_v45 }
 0x4f8   : > { %4771 = vmatpush.bf16.xpose.msrb.mxu2 %v4757_v25 }
 0x4fe   : > { %8913 = vmatmul.msk.bf16.gmra.mxu0 %vm2918_vm1, %v12618_v22 }
 0x500   : > { %4772 = vmatpush.bf16.xpose.msrb.mxu2 %v4754_v12 }
 0x507   : > { %8904 = vmatmul.msk.bf16.gmra.mxu2 %vm2918_vm1, %v12727_v61 }
 0x50b   : > { %v3458_v4 = vpop.f32.mrf.mxu0 }
 0x50c   : > { %v12893_v24 = vmul.f32 0.17677669, %v3458_v4 }
 0x50e   : > { %8926 = vmatmul.msk.bf16.vlgmr.msrb.gmra.mxu0 %vm2918_vm1, %v12775_v30  ;;  %v3486_v45 = vsel %vm2980_vm2, %v12893_v24, -inf }
 0x50f   : > { %3487 = vmax.xlane.f32.xlu0 %v3486_v45  ;;  %v2983_v56 = vpop.xlane.xlu1 %2982 }
 0x510   : > { %v3005_v3 = vsub.f32 %v12811_v62, %v2983_v56 }
 0x512   : > { %v3013_v50 = vmul.f32 1.442695, %v3005_v3 }
 0x513   : > { %v3460_v23 = vpop.f32.mrf.mxu0 }
 0x514   : > { %v12899_v14 = vmul.f32 0.17677669, %v3460_v23  ;;  %9662 = vpow2.f32 %v3013_v50 }
 0x516   : > { %v3489_v22 = vsel %vm2980_vm2, %v12899_v14, -inf }
 0x517   : > { %8905 = vmatmul.msk.bf16.gmra.mxu2 %vm2918_vm1, %v12754_v46  ;;  %3490 = vmax.xlane.f32.xlu0 %v3489_v22  ;;  %v2986_v19 = vpop.xlane.xlu2 %2985 }
 0x518   : > { %v3006_v46 = vsub.f32 %v12822_v10, %v2986_v19 }
 0x51a   : > { %v3015_v57 = vmul.f32 1.442695, %v3006_v46  ;;  %v12919_v18 = vpop.eup %9662 }
 0x51b   : > { %v3463_v61 = vpop.f32.mrf.mxu0  ;;  %v3029_v21 = vsel %vm2980_vm2, %v12919_v18, 0.0 }
 0x51c   : > { %9664 = vpow2.f32 %v3015_v57 }
 0x51e   : > { %8927 = vmatmul.msk.bf16.gmra.mxu0 %vm2918_vm1, %v12771_v16 }
 0x51f   : > { %v2989_v62 = vpop.xlane.xlu0 %2988 }
 0x520   : > { %v3007_v13 = vsub.f32 %v12830_v9, %v2989_v62  ;;  %v12931_v9 = vmul.f32 0.17677669, %v3463_v61 }
 0x522   : > { %v3017_v2 = vmul.f32 1.442695, %v3007_v13  ;;  %v12933_v17 = vpop.eup %9664  ;;  %v3492_v54 = vsel %vm2980_vm2, %v12931_v9, -inf }
 0x523   : > { %v3465_v30 = vpop.f32.mrf.mxu0 }
 0x524   : > { %9666 = vpow2.f32 %v3017_v2  ;;  %v12951_v4 = vmul.f32 0.17677669, %v3465_v30 }
 0x526   : > { %v3495_v56 = vsel %vm2980_vm2, %v12951_v4, -inf }
 0x527   : > { %8918 = vmatmul.msk.bf16.vlgmr.msra.gmra.mxu2 %vm2918_vm1, %v12756_v6  ;;  %v2992_v6 = vpop.xlane.xlu1 %2991 }
 0x528   : > { %v3008_v10 = vsub.f32 %v12839_v26, %v2992_v6 }
 0x52a   : > { %v3195_v29 = vpop.f32.mrf.mxu2  ;;  %v3019_v35 = vmul.f32 1.442695, %v3008_v10  ;;  %v12947_v25 = vpop.eup %9666 }
 0x52b   : > { %v12910_v7 = vmul.f32 0.17677669, %v3195_v29  ;;  %v12912_v27 = vpop.f32.mrf.mxu0  ;;  %v3035_v22 = vsel %vm2980_vm2, %v12947_v25, 0.0 }
 0x52c   : > { %9668 = vpow2.f32 %v3019_v35 }
 0x52d   : > { %v3223_v16 = vsel %vm2980_vm2, %v12910_v7, -inf }
 0x52e   : > { %3224 = vmax.xlane.f32.xlu2 %v3223_v16  ;;  %8928 = vmatmul.msk.bf16.gmra.mxu0 %vm2918_vm1, %v12781_v36 }
 0x52f   : > { %v2995_v3 = vpop.xlane.xlu2 %2994 }
 0x530   : > { %v3009_v57 = vsub.f32 %v12849_v55, %v2995_v3  ;;  %v12982_v55 = vmul.f32 0.17677669, %v12912_v27 }
 0x532   : > { %v3197_v1 = vpop.f32.mrf.mxu2  ;;  %v12949_v12 = vpop.eup %9668 }
 0x533   : > { %v12922_v15 = vmul.f32 0.17677669, %v3197_v1  ;;  %v3470_v28 = vpop.f32.mrf.mxu0  ;;  %v3038_v61 = vsel %vm2980_vm2, %v12949_v12, 0.0  ;;  %v3021_v1 = vmul.f32 1.442695, %v3009_v57 }
 0x534   : > { %v12977_v13 = vmul.f32 0.17677669, %v3470_v28  ;;  %v3498_v28 = vsel %vm2980_vm2, %v12982_v55, -inf }
 0x535   : > { %v3226_v36 = vsel %vm2980_vm2, %v12922_v15, -inf }
 0x536   : > { %3030 = vadd.xlane.f32.xlu2 %v3029_v21  ;;  %3227 = vmax.xlane.f32.xlu0 %v3226_v36 }
 0x537   : > { %8919 = vmatmul.msk.bf16.gmra.mxu2 %vm2918_vm1, %v12777_v34  ;;  %v3032_v34 = vsel %vm2980_vm2, %v12933_v17, 0.0  ;;  %v2998_v44 = vpop.xlane.xlu1 %2997 }
 0x53a   : > { %v3200_v8 = vpop.f32.mrf.mxu2 }
 0x53b   : > { %v12935_v26 = vmul.f32 0.17677669, %v3200_v8  ;;  %v12937_v31 = vpop.f32.mrf.mxu0 }
 0x53d   : > { %v3229_v39 = vsel %vm2980_vm2, %v12935_v26, -inf }
 0x53e   : > { %3230 = vmax.xlane.f32.xlu1 %v3229_v39  ;;  %3493 = vmax.xlane.f32.xlu2 %v3492_v54  ;;  %v3501_v39 = vsel %vm2980_vm2, %v12977_v13, -inf }
 0x53f   : > { %3033 = vadd.xlane.f32.xlu0 %v3032_v34  ;;  %8929 = vmatmul.msk.bf16.gmra.mxu0 %vm2918_vm1, %v12790_v42  ;;  %v3001_v21 = vpop.xlane.xlu0 %3000 }
 0x540   : > { %v3011_v8 = vsub.f32 %v12862_v53, %v3001_v21  ;;  %v3010_v53 = vsub.f32 %v12855_v58, %v2998_v44 }
 0x542   : > { %v3202_v45 = vpop.f32.mrf.mxu2  ;;  %v3025_v27 = vmul.f32 1.442695, %v3011_v8 }
 0x543   : > { %v3475_v23 = vpop.f32.mrf.mxu0  ;;  %v12964_v19 = vmul.f32 0.17677669, %v3202_v45 }
 0x544   : > { %v12962_v50 = vmul.f32 0.17677669, %v3475_v23 }
 0x545   : > { %v3232_v6 = vsel %vm2980_vm2, %v12964_v19, -inf }
 0x546   : > { %3036 = vadd.xlane.f32.xlu1 %v3035_v22  ;;  %3039 = vadd.xlane.f32.xlu2 %v3038_v61 }
 0x547   : > { %3496 = vmax.xlane.f32.xlu0 %v3495_v56  ;;  %8920 = vmatmul.msk.bf16.gmra.mxu2 %vm2918_vm1, %v12787_v52  ;;  %v3004_v42 = vpop.xlane.xlu1 %3003  ;;  %v13007_v56 = vmul.f32 0.17677669, %v12937_v31 }
 0x548   : > { %v3012_v30 = vsub.f32 %v12869_v49, %v3004_v42  ;;  %v3507_v49 = vsel %vm2980_vm2, %v12962_v50, -inf }
 0x549   : > { %v3504_v58 = vsel %vm2980_vm2, %v13007_v56, -inf }
 0x54a   : > { %v3027_v29 = vmul.f32 1.442695, %v3012_v30  ;;  %v3205_v46 = vpop.f32.mrf.mxu2 }
 0x54b   : > { %v12966_v16 = vmul.f32 0.17677669, %v3205_v46  ;;  %v12968_v62 = vpop.f32.mrf.mxu0 }
 0x54c   : > { %9670 = vpow2.f32 %v3027_v29 }
 0x54d   : > { %v3235_v52 = vsel %vm2980_vm2, %v12966_v16, -inf  ;;  %9672 = vpow2.f32 %v3021_v1 }
 0x54e   : > { %3236 = vmax.xlane.f32.xlu2 %v3235_v52  ;;  %3508 = vmax.xlane.f32.xlu1 %v3507_v49  ;;  %9674 = vpow2.f32 %v3025_v27 }
 0x54f   : > { %3233 = vmax.xlane.f32.xlu0 %v3232_v6 }
 0x552   : > { %v12979_v10 = vpop.eup %9670  ;;  %v3207_v36 = vpop.f32.mrf.mxu2 }
 0x553   : > { %v12984_v2 = vpop.f32.mrf.mxu0  ;;  %v3050_v35 = vsel %vm2980_vm2, %v12979_v10, 0.0  ;;  %v12995_v54 = vpop.eup %9672  ;;  %v12997_v34 = vmul.f32 0.17677669, %v3207_v36 }
 0x554   : > { %v3041_v22 = vsel %vm2980_vm2, %v12995_v54, 0.0  ;;  %v13009_v30 = vpop.eup %9674 }
 0x555   : > { %v3238_v61 = vsel %vm2980_vm2, %v12997_v34, -inf  ;;  %v3047_v44 = vsel %vm2980_vm2, %v13009_v30, 0.0 }
 0x556   : > { %3502 = vmax.xlane.f32.xlu2 %v3501_v39  ;;  %3051 = vadd.xlane.f32.xlu1 %v3050_v35 }
 0x557   : > { %3499 = vmax.xlane.f32.xlu0 %v3498_v28  ;;  %8921 = vmatmul.msk.bf16.gmra.mxu2 %vm2918_vm1, %v12795_v38  ;;  %v3023_v38 = vmul.f32 1.442695, %v3010_v53  ;;  %v13040_v28 = vmul.f32 0.17677669, %v12968_v62 }
 0x559   : > { %9676 = vpow2.f32 %v3023_v38 }
 0x55a   : > { %v3210_v45 = vpop.f32.mrf.mxu2 }
 0x55b   : > { %v12999_v23 = vpop.f32.mrf.mxu0  ;;  %v13025_v6 = vmul.f32 0.17677669, %v3210_v45 }
 0x55d   : > { %v3241_v8 = vsel %vm2980_vm2, %v13025_v6, -inf }
 0x55e   : > { %3042 = vadd.xlane.f32.xlu2 %v3041_v22 }
 0x55f   : > { %3239 = vmax.xlane.f32.xlu0 %v3238_v61  ;;  %v13017_v29 = vpop.eup %9676  ;;  %v4036_v61 = vsel %vm2980_vm2, %v13040_v28, -inf }
 0x560   : > { %v3044_v52 = vsel %vm2980_vm2, %v13017_v29, 0.0 }
 0x562   : > { %v3212_v42 = vpop.f32.mrf.mxu2 }
 0x563   : > { %v4015_v3 = vpop.f32.mrf.mxu0  ;;  %v13019_v31 = vmul.f32 0.17677669, %v3212_v42 }
 0x564   : > { %v13027_v1 = vmul.f32 0.17677669, %v4015_v3 }
 0x565   : > { %v3244_v49 = vsel %vm2980_vm2, %v13019_v31, -inf }
 0x566   : > { %3505 = vmax.xlane.f32.xlu2 %v3504_v58  ;;  %v4045_v39 = vsel %vm2980_vm2, %v13027_v1, -inf }
 0x567   : > { %3048 = vadd.xlane.f32.xlu0 %v3047_v44  ;;  %8934 = vmatmul.msk.bf16.vlgmr.msrb.gmra.mxu2 %vm2918_vm1, %v12766_v5 }
 0x56a   : > { %v3721_v46 = vpop.f32.mrf.mxu2 }
 0x56b   : > { %v4018_v57 = vpop.f32.mrf.mxu0  ;;  %v13050_v42 = vmul.f32 0.17677669, %v3721_v46 }
 0x56c   : > { %v13048_v38 = vmul.f32 0.17677669, %v4018_v57  ;;  %v13065_v57 = vmul.f32 0.17677669, %v12984_v2 }
 0x56e   : > { %3045 = vadd.xlane.f32.xlu2 %v3044_v52  ;;  %v4048_v58 = vsel %vm2980_vm2, %v13048_v38, -inf  ;;  %v3749_v52 = vsel %vm2980_vm2, %v13050_v42, -inf }
 0x56f   : > { %3245 = vmax.xlane.f32.xlu0 %v3244_v49 }
 0x572   : > { %v3723_v21 = vpop.f32.mrf.mxu2 }
 0x573   : > { %v13029_v5 = vmul.f32 0.17677669, %v3723_v21  ;;  %v4020_v36 = vpop.f32.mrf.mxu0 }
 0x575   : > { %v3752_v35 = vsel %vm2980_vm2, %v13029_v5, -inf }
 0x576   : > { %3753 = vmax.xlane.f32.xlu1 %v3752_v35  ;;  %3242 = vmax.xlane.f32.xlu2 %v3241_v8 }
 0x577   : > { %4046 = vmax.xlane.f32.xlu0 %v4045_v39  ;;  %8935 = vmatmul.msk.bf16.gmra.mxu2 %vm2918_vm1, %v12779_v11  ;;  %v4039_v39 = vsel %vm2980_vm2, %v13065_v57, -inf }
 0x57a   : > { %v3726_v27 = vpop.f32.mrf.mxu2 }
 0x57b   : > { %v13042_v45 = vmul.f32 0.17677669, %v3726_v27  ;;  %v4023_v53 = vpop.f32.mrf.mxu0 }
 0x57c   : > { %v13062_v46 = vmul.f32 0.17677669, %v4023_v53 }
 0x57d   : > { %v3755_v22 = vsel %vm2980_vm2, %v13042_v45, -inf }
 0x57e   : > { %3756 = vmax.xlane.f32.xlu1 %v3755_v22  ;;  %4037 = vmax.xlane.f32.xlu2 %v4036_v61  ;;  %16007 = vst [vmem:[#allocation69_spill] sm:$0xff] %v13062_v46  ;;  %v4054_v8 = vsel %vm2980_vm2, %v13062_v46, -inf  ;;  %v13074_v22 = vmul.f32 0.17677669, %v12999_v23 }
 0x582   : > { %v3728_v11 = vpop.f32.mrf.mxu2  ;;  %v3488_v49 = vpop.xlane.xlu0 %3487 }
 0x583   : > { %v13052_v3 = vmul.f32 0.17677669, %v3728_v11  ;;  %v4025_v62 = vpop.f32.mrf.mxu0 }
 0x585   : > { %v3758_v44 = vsel %vm2980_vm2, %v13052_v3, -inf }
 0x586   : > { %4049 = vmax.xlane.f32.xlu1 %v4048_v58  ;;  %3759 = vmax.xlane.f32.xlu0 %v3758_v44  ;;  %v4042_v58 = vsel %vm2980_vm2, %v13074_v22, -inf }
 0x587   : > { %3750 = vmax.xlane.f32.xlu2 %v3749_v52  ;;  %8936 = vmatmul.msk.bf16.gmra.mxu2 %vm2918_vm1, %v12783_v47 }
 0x58a   : > { %v3731_v21 = vpop.f32.mrf.mxu2  ;;  %v3491_v27 = vpop.xlane.xlu0 %3490 }
 0x58b   : > { %v13067_v35 = vpop.f32.mrf.mxu0  ;;  %v3511_v2 = vsub.f32 %v12899_v14, %v3491_v27  ;;  %v13087_v52 = vmul.f32 0.17677669, %v3731_v21  ;;  %v13099_v21 = vmul.f32 0.17677669, %v4020_v36  ;;  %v3510_v36 = vsub.f32 %v12893_v24, %v3488_v49 }
 0x58d   : > { %v3520_v44 = vmul.f32 1.442695, %v3511_v2  ;;  %v3518_v59 = vmul.f32 1.442695, %v3510_v36 }
 0x58e   : > { %4055 = vmax.xlane.f32.xlu0 %v4054_v8 }
 0x58f   : > { %4040 = vmax.xlane.f32.xlu2 %v4039_v39  ;;  %9678 = vpow2.f32 %v3520_v44 }
 0x592   : > { %v3733_v47 = vpop.f32.mrf.mxu2 }
 0x593   : > { %v13076_v53 = vmul.f32 0.17677669, %v3733_v47  ;;  %v4514_v11 = vpop.f32.mrf.mxu0 }
 0x594   : > { %v13085_v23 = vmul.f32 0.17677669, %v4514_v11 }
 0x595   : > { %v3764_v61 = vsel %vm2980_vm2, %v13076_v53, -inf  ;;  %v13097_v2 = vpop.eup %9678 }
 0x596   : > { %3765 = vmax.xlane.f32.xlu1 %v3764_v61  ;;  %16008 = vst [vmem:[#allocation74_spill] sm:$0xff] %v13085_v23  ;;  %v4543_v14 = vsel %vm2980_vm2, %v13085_v23, -inf  ;;  %v3537_v11 = vsel %vm2980_vm2, %v13097_v2, 0.0 }
 0x597   : > { %4043 = vmax.xlane.f32.xlu2 %v4042_v58  ;;  %8937 = vmatmul.msk.bf16.gmra.mxu2 %vm2918_vm1, %v12793_v40  ;;  %v3761_v40 = vsel %vm2980_vm2, %v13087_v52, -inf  ;;  %v4051_v58 = vsel %vm2980_vm2, %v13099_v21, -inf }
 0x59a   : > { %v3736_v8 = vpop.f32.mrf.mxu2 }
 0x59b   : > { %v13089_v39 = vmul.f32 0.17677669, %v3736_v8 }
 0x59d   : > { %v3767_v27 = vsel %vm2980_vm2, %v13089_v39, -inf }
 0x59e   : > { %4544 = vmax.xlane.f32.xlu1 %v4543_v14  ;;  %3768 = vmax.xlane.f32.xlu0 %v3767_v27  ;;  %v13107_v14 = vmul.f32 0.17677669, %v4025_v62  ;;  %v4517_v27 = vpop.f32.mrf.mxu0 }
 0x59f   : > { %3762 = vmax.xlane.f32.xlu2 %v3761_v40  ;;  %v13127_v36 = vmul.f32 0.17677669, %v4517_v27 }
 0x5a0   : > { %v4057_v63 = vsel %vm2980_vm2, %v13107_v14, -inf }
 0x5a1   : > { %v3225_v47 = vpop.xlane.xlu2 %3224  ;;  %16010 = vst [vmem:[#allocation130_spill] sm:$0xff] %v13127_v36 }
 0x5a2   : > { %v3738_v61 = vpop.f32.mrf.mxu2  ;;  %v3247_v27 = vsub.f32 %v12910_v7, %v3225_v47 }
 0x5a4   : > { %v3255_v7 = vmul.f32 1.442695, %v3247_v27 }
 0x5a6   : > { %3538 = vadd.xlane.f32.xlu0 %v3537_v11  ;;  %v13121_v46 = vpop.f32.mrf.mxu0 }
 0x5a7   : > { %4052 = vmax.xlane.f32.xlu2 %v4051_v58  ;;  %v13116_v58 = vmul.f32 0.17677669, %v3738_v61 }
 0x5a9   : > { %v13105_v44 = vpop.xlane.xlu0 %3227  ;;  %v3031_v8 = vpop.xlane.xlu2 %3030  ;;  %v3770_v49 = vsel %vm2980_vm2, %v13116_v58, -inf }
 0x5aa   : > { %v13109_v40 = vpop.f32.mrf.mxu2  ;;  %9680 = vrcp.f32 %v3031_v8 }
 0x5ae   : > { %v4522_v43 = vpop.f32.mrf.mxu0 }
 0x5af   : > { %4058 = vmax.xlane.f32.xlu2 %v4057_v63 }
 0x5b0   : > { %v9681_v61 = vpop.eup %9680 }
 0x5b1   : > { %v3231_v11 = vpop.xlane.xlu1 %3230  ;;  %v13114_v0 = vpop.xlane.xlu2 %3493 }
 0x5b2   : > { %v3249_v60 = vsub.f32 %v12935_v26, %v3231_v11  ;;  %v3034_v62 = vpop.xlane.xlu0 %3033  ;;  %v4252_v23 = vpop.f32.mrf.mxu2 }
 0x5b3   : > { %9682 = vrcp.f32 %v3034_v62  ;;  %v13119_v20 = vmul.f32 0.17677669, %v4252_v23  ;;  %v3061_v23 = vmul.f32 %v9681_v61, %v12919_v18  ;;  %v4546_v18 = vsel %vm2980_vm2, %v13127_v36, -inf }
 0x5b4   : > { %v3259_v24 = vmul.f32 1.442695, %v3249_v60  ;;  %9684 = vpow2.f32 %v3518_v59 }
 0x5b5   : > { %16009 = vst [vmem:[#allocation129_spill] sm:$0xff] %v13119_v20  ;;  %v4281_v63 = vsel %vm2980_vm2, %v13119_v20, -inf }
 0x5b6   : > { %9686 = vpow2.f32 %v3259_v24  ;;  %4282 = vmax.xlane.f32.xlu0 %v4281_v63 }
 0x5b7   : > { %3771 = vmax.xlane.f32.xlu2 %v3770_v49 }
 0x5b9   : > { %v9683_v26 = vpop.eup %9682  ;;  %v3040_v8 = vpop.xlane.xlu2 %3039 }
 0x5ba   : > { %v3062_v11 = vmul.f32 %v9683_v26, %v12933_v17  ;;  %v13131_v60 = vpop.xlane.xlu0 %3496  ;;  %v13133_v59 = vpop.f32.mrf.mxu2  ;;  %v16012_v17 = vld [vmem:[#allocation60_spill] sm:$0xff]  ;;  %v13148_v26 = vmul.f32 0.17677669, %v4522_v43 }
 0x5bb   : > { %v13135_v62 = vpop.eup %9684  ;;  %v3037_v24 = vpop.xlane.xlu1 %3036 }
 0x5bc   : > { %v13137_v63 = vpop.eup %9686  ;;  %v3069_v20 = vpack.c.bf16 %v3062_v11, %v3061_v23  ;;  %9688 = vrcp.f32 %v3037_v24  ;;  %v3534_v61 = vsel %vm2980_vm2, %v13135_v62, 0.0  ;;  %16013 = vst [vmem:[#allocation60_spill] sm:$0xff] %v13148_v26  ;;  %v4552_v43 = vsel %vm2980_vm2, %v13148_v26, -inf  ;;  %v16017_v26 = vld [vmem:[#allocation50_spill] sm:$0xff] }
 0x5bd   : > { %16011 = vst [vmem:[#allocation131_spill] sm:$0xff] %v13137_v63  ;;  %v3277_v49 = vsel %vm2980_vm2, %v13137_v63, 0.0  ;;  %9690 = vrcp.f32 %v3040_v8  ;;  %v16014_v8 = vld [vmem:[#allocation56_spill] sm:$0xff] }
 0x5be   : > { %8882 = vmatmul.msk.bf16.vlgmr.msra.gmra.mxu1 %vm2980_vm2, %v3069_v20  ;;  %3278 = vadd.xlane.f32.xlu1 %v3277_v49  ;;  %v13152_v20 = vmul.f32 0.17677669, %v13067_v35  ;;  %9692 = vpow2.f32 %v3255_v7  ;;  %v4524_v7 = vpop.f32.mrf.mxu0 }
 0x5bf   : > { %4168 = vmatpush.bf16.msra.mxu1 %v16012_v17  ;;  %4547 = vmax.xlane.f32.xlu0 %v4546_v18 }
 0x5c0   : > { %3535 = vadd.xlane.f32.xlu2 %v3534_v61  ;;  %v4540_v35 = vsel %vm2980_vm2, %v13152_v20, -inf }
 0x5c1   : > { %v3237_v23 = vpop.xlane.xlu2 %3236 }
 0x5c2   : > { %v3251_v47 = vsub.f32 %v12966_v16, %v3237_v23  ;;  %v4257_v11 = vpop.f32.mrf.mxu2  ;;  %v13154_v24 = vpop.xlane.xlu0 %3233  ;;  %v16016_v16 = vld [vmem:[#allocation53_spill] sm:$0xff] }
 0x5c3   : > { %4169 = vmatpush.bf16.msra.mxu1 %v16014_v8  ;;  %v13157_v49 = vmul.f32 0.17677669, %v4257_v11  ;;  %v9689_v18 = vpop.eup %9688 }
 0x5c4   : > { %v3263_v63 = vmul.f32 1.442695, %v3251_v47  ;;  %v9691_v36 = vpop.eup %9690  ;;  %v3063_v61 = vmul.f32 %v9689_v18, %v12947_v25 }
 0x5c5   : > { %16015 = vst [vmem:[#allocation56_spill] sm:$0xff] %v13157_v49  ;;  %v4287_v27 = vsel %vm2980_vm2, %v13157_v49, -inf  ;;  %v3064_v23 = vmul.f32 %v9691_v36, %v12949_v12  ;;  %v13169_v37 = vpop.eup %9692 }
 0x5c6   : > { %4553 = vmax.xlane.f32.xlu1 %v4552_v43  ;;  %9694 = vpow2.f32 %v3263_v63  ;;  %v3271_v12 = vsel %vm2980_vm2, %v13169_v37, 0.0 }
 0x5c7   : > { %4170 = vmatpush.bf16.msra.mxu1 %v16016_v16  ;;  %4288 = vmax.xlane.f32.xlu0 %v4287_v27  ;;  %v3070_v43 = vpack.c.bf16 %v3064_v23, %v3063_v61  ;;  %v3248_v27 = vsub.f32 %v12922_v15, %v13105_v44  ;;  %v13184_v44 = vmul.f32 0.17677669, %v13109_v40 }
 0x5c8   : > { %4541 = vmax.xlane.f32.xlu2 %v4540_v35 }
 0x5c9   : > { %v3503_v47 = vpop.xlane.xlu2 %3502  ;;  %v3257_v63 = vmul.f32 1.442695, %v3248_v27  ;;  %v4278_v40 = vsel %vm2980_vm2, %v13184_v44, -inf }
 0x5ca   : > { %v4260_v11 = vpop.f32.mrf.mxu2  ;;  %v13173_v16 = vpop.xlane.xlu0 %3499  ;;  %v3515_v25 = vsub.f32 %v12977_v13, %v3503_v47  ;;  %v3512_v47 = vsub.f32 %v12931_v9, %v13114_v0 }
 0x5cb   : > { %4171 = vmatpush.bf16.msra.mxu1 %v16017_v26  ;;  %v13186_v61 = vmul.f32 0.17677669, %v4260_v11  ;;  %9696 = vpow2.f32 %v3257_v63 }
 0x5cc   : > { %v13175_v49 = vpop.eup %9694  ;;  %v3528_v35 = vmul.f32 1.442695, %v3515_v25 }
 0x5cd   : > { %16018 = vst [vmem:[#allocation132_spill] sm:$0xff] %v13175_v49  ;;  %v3283_v36 = vsel %vm2980_vm2, %v13175_v49, 0.0  ;;  %v4290_v11 = vsel %vm2980_vm2, %v13186_v61, -inf }
 0x5ce   : > { %8883 = vmatmul.msk.bf16.gmra.mxu1 %vm2980_vm2, %v3070_v43  ;;  %16019 = vst [vmem:[#allocation133_spill] sm:$0xff] %v13186_v61  ;;  %v4527_v43 = vpop.f32.mrf.mxu0  ;;  %9698 = vpow2.f32 %v3528_v35 }
 0x5cf   : > { %3284 = vadd.xlane.f32.xlu0 %v3283_v36  ;;  %v13200_v25 = vmul.f32 0.17677669, %v4527_v43  ;;  %v3522_v36 = vmul.f32 1.442695, %v3512_v47 }
 0x5d0   : > { %3272 = vadd.xlane.f32.xlu2 %v3271_v12 }
 0x5d1   : > { %v3043_v18 = vpop.xlane.xlu2 %3042  ;;  %16021 = vst [vmem:[#allocation135_spill] sm:$0xff] %v13200_v25  ;;  %v13202_v63 = vpop.eup %9696  ;;  %v4558_v9 = vsel %vm2980_vm2, %v13200_v25, -inf  ;;  %9700 = vpow2.f32 %v3522_v36 }
 0x5d2   : > { %v4262_v15 = vpop.f32.mrf.mxu2  ;;  %v13194_v27 = vpop.xlane.xlu0 %3239  ;;  %9702 = vrcp.f32 %v3043_v18 }
 0x5d3   : > { %v13188_v13 = vmul.f32 0.17677669, %v4262_v15  ;;  %v3274_v15 = vsel %vm2980_vm2, %v13202_v63, 0.0 }
 0x5d4   : > { %v13204_v0 = vpop.eup %9698 }
 0x5d5   : > { %16020 = vst [vmem:[#allocation134_spill] sm:$0xff] %v13188_v13  ;;  %v4293_v23 = vsel %vm2980_vm2, %v13188_v13, -inf  ;;  %v13215_v13 = vmul.f32 0.17677669, %v4524_v7 }
 0x5d6   : > { %4294 = vmax.xlane.f32.xlu1 %v4293_v23  ;;  %v3549_v23 = vsel %vm2980_vm2, %v13204_v0, 0.0 }
 0x5d7   : > { %4291 = vmax.xlane.f32.xlu0 %v4290_v11  ;;  %v13217_v36 = vpop.eup %9700 }
 0x5d8   : > { %4279 = vmax.xlane.f32.xlu2 %v4278_v40  ;;  %v13213_v40 = vpop.xlane.xlu1 %3508  ;;  %v3540_v18 = vsel %vm2980_vm2, %v13217_v36, 0.0 }
 0x5d9   : > { %v3506_v12 = vpop.xlane.xlu2 %3505 }
 0x5da   : > { %v3516_v35 = vsub.f32 %v13007_v56, %v3506_v12  ;;  %v3049_v47 = vpop.xlane.xlu0 %3048  ;;  %v3513_v56 = vsub.f32 %v12951_v4, %v13131_v60  ;;  %v9703_v12 = vpop.eup %9702  ;;  %v13229_v4 = vmul.f32 0.17677669, %v13133_v59 }
 0x5db   : > { %v3065_v7 = vmul.f32 %v9703_v12, %v12995_v54 }
 0x5dc   : > { %v3530_v11 = vmul.f32 1.442695, %v3516_v35  ;;  %v3524_v35 = vmul.f32 1.442695, %v3513_v56 }
 0x5de   : > { %4559 = vmax.xlane.f32.xlu1 %v4558_v9  ;;  %v4555_v9 = vsel %vm2980_vm2, %v13215_v13, -inf }
 0x5df   : > { %3550 = vadd.xlane.f32.xlu0 %v3549_v23 }
 0x5e0   : > { %3275 = vadd.xlane.f32.xlu2 %v3274_v15  ;;  %v3052_v61 = vpop.xlane.xlu1 %3051 }
 0x5e1   : > { %v3046_v43 = vpop.xlane.xlu2 %3045 }
 0x5e2   : > { %9704 = vrcp.f32 %v3046_v43  ;;  %v3246_v60 = vpop.xlane.xlu0 %3245 }
 0x5e3   : > { %9706 = vpow2.f32 %v3530_v11  ;;  %v3254_v54 = vsub.f32 %v13019_v31, %v3246_v60 }
 0x5e4   : > { %9708 = vpow2.f32 %v3524_v35 }
 0x5e5   : > { %9710 = vrcp.f32 %v3049_v47  ;;  %v3269_v12 = vmul.f32 1.442695, %v3254_v54 }
 0x5e6   : > { %9712 = vrcp.f32 %v3052_v61  ;;  %v3250_v61 = vsub.f32 %v12964_v19, %v13154_v24 }
 0x5e7   : > { %4556 = vmax.xlane.f32.xlu0 %v4555_v9 }
 0x5e8   : > { %v9705_v15 = vpop.eup %9704  ;;  %3541 = vadd.xlane.f32.xlu2 %v3540_v18  ;;  %v3261_v19 = vmul.f32 1.442695, %v3250_v61 }
 0x5e9   : > { %v3066_v23 = vmul.f32 %v9705_v15, %v13017_v29  ;;  %v3243_v43 = vpop.xlane.xlu2 %3242  ;;  %v13231_v26 = vpop.eup %9706 }
 0x5ea   : > { %v3253_v25 = vsub.f32 %v13025_v6, %v3243_v43  ;;  %v4265_v29 = vpop.f32.mrf.mxu2  ;;  %v4284_v6 = vsel %vm2980_vm2, %v13229_v4, -inf  ;;  %v3552_v59 = vsel %vm2980_vm2, %v13231_v26, 0.0 }
 0x5eb   : > { %v3071_v11 = vpack.c.bf16 %v3066_v23, %v3065_v7  ;;  %v13241_v18 = vmul.f32 0.17677669, %v4265_v29 }
 0x5ec   : > { %v3267_v49 = vmul.f32 1.442695, %v3253_v25  ;;  %v13239_v25 = vpop.eup %9708 }
 0x5ed   : > { %8884 = vmatmul.msk.bf16.gmra.mxu1 %vm2980_vm2, %v3071_v11  ;;  %16022 = vst [vmem:[#allocation136_spill] sm:$0xff] %v13241_v18  ;;  %v9711_v47 = vpop.eup %9710  ;;  %v3543_v15 = vsel %vm2980_vm2, %v13239_v25, 0.0  ;;  %v4296_v7 = vsel %vm2980_vm2, %v13241_v18, -inf  ;;  %v13257_v11 = vmul.f32 0.17677669, %v13121_v46 }
 0x5ee   : > { %9714 = vpow2.f32 %v3267_v49  ;;  %v9713_v9 = vpop.eup %9712  ;;  %v3067_v49 = vmul.f32 %v9711_v47, %v13009_v30 }
 0x5ef   : > { %3553 = vadd.xlane.f32.xlu0 %v3552_v59  ;;  %9716 = vpow2.f32 %v3269_v12  ;;  %v3068_v43 = vmul.f32 %v9713_v9, %v12979_v10  ;;  %v4549_v59 = vsel %vm2980_vm2, %v13257_v11, -inf }
 0x5f0   : > { %4285 = vmax.xlane.f32.xlu2 %v4284_v6  ;;  %9718 = vpow2.f32 %v3261_v19  ;;  %v3514_v6 = vsub.f32 %v12982_v55, %v13173_v16 }
 0x5f1   : > { %v4038_v56 = vpop.xlane.xlu2 %4037  ;;  %v3072_v54 = vpack.c.bf16 %v3068_v43, %v3067_v49 }
 0x5f2   : > { %v4060_v35 = vsub.f32 %v13040_v28, %v4038_v56  ;;  %v4267_v60 = vpop.f32.mrf.mxu2  ;;  %v3526_v12 = vmul.f32 1.442695, %v3514_v6 }
 0x5f3   : > { %v13261_v29 = vmul.f32 0.17677669, %v4267_v60 }
 0x5f4   : > { %v13243_v31 = vpop.eup %9714  ;;  %v4068_v30 = vmul.f32 1.442695, %v4060_v35 }
 0x5f5   : > { %v3289_v23 = vsel %vm2980_vm2, %v13243_v31, 0.0  ;;  %v13259_v28 = vpop.eup %9716  ;;  %16023 = vst [vmem:[#allocation137_spill] sm:$0xff] %v13261_v29  ;;  %v4299_v56 = vsel %vm2980_vm2, %v13261_v29, -inf }
 0x5f6   : > { %3290 = vadd.xlane.f32.xlu1 %v3289_v23  ;;  %9720 = vpow2.f32 %v4068_v30  ;;  %v3292_v46 = vsel %vm2980_vm2, %v13259_v28, 0.0  ;;  %v13273_v61 = vpop.eup %9718 }
 0x5f7   : > { %4297 = vmax.xlane.f32.xlu0 %v4296_v7  ;;  %9722 = vpow2.f32 %v3526_v12  ;;  %v3280_v16 = vsel %vm2980_vm2, %v13273_v61, 0.0  ;;  %v13285_v7 = vpop.xlane.xlu0 %4046 }
 0x5f8   : > { %3544 = vadd.xlane.f32.xlu2 %v3543_v15 }
 0x5fa   : > { %v3751_v24 = vpop.xlane.xlu2 %3750  ;;  %v4774_v19 = vpop.f32.mrf.mxu2 }
 0x5fb   : > { %v3773_v10 = vsub.f32 %v13050_v42, %v3751_v24  ;;  %v3252_v42 = vsub.f32 %v12997_v34, %v13194_v27  ;;  %v3517_v34 = vsub.f32 %v12962_v50, %v13213_v40 }
 0x5fc   : > { %v13275_v55 = vpop.eup %9720 }
 0x5fd   : > { %8885 = vmatmul.msk.bf16.gmra.mxu1 %vm2980_vm2, %v3072_v54  ;;  %v3781_v9 = vmul.f32 1.442695, %v3773_v10  ;;  %v4084_v15 = vsel %vm2980_vm2, %v13275_v55, 0.0  ;;  %v3265_v49 = vmul.f32 1.442695, %v3252_v42  ;;  %v13287_v23 = vpop.eup %9722  ;;  %v4529_v42 = vpop.f32.mrf.mxu0 }
 0x5fe   : > { %4300 = vmax.xlane.f32.xlu1 %v4299_v56  ;;  %v3546_v27 = vsel %vm2980_vm2, %v13287_v23, 0.0  ;;  %v3532_v24 = vmul.f32 1.442695, %v3517_v34  ;;  %v3754_v56 = vpop.xlane.xlu1 %3753 }
 0x5ff   : > { %3293 = vadd.xlane.f32.xlu0 %v3292_v46  ;;  %9724 = vpow2.f32 %v3781_v9  ;;  %v13299_v54 = vpop.xlane.xlu0 %3759 }
 0x600   : > { %4550 = vmax.xlane.f32.xlu2 %v4549_v59  ;;  %9726 = vpow2.f32 %v3265_v49 }
 0x601   : > { %9728 = vpow2.f32 %v3532_v24 }
 0x602   : > { %v4041_v47 = vpop.xlane.xlu2 %4040  ;;  %v4776_v10 = vpop.f32.mrf.mxu2 }
 0x603   : > { %v4061_v12 = vsub.f32 %v13065_v57, %v4041_v47  ;;  %v3774_v47 = vsub.f32 %v13029_v5, %v3754_v56 }
 0x605   : > { %v13289_v43 = vpop.eup %9724 }
 0x606   : > { %4085 = vadd.xlane.f32.xlu1 %v4084_v15  ;;  %16024 = vst [vmem:[#allocation138_spill] sm:$0xff] %v13289_v43  ;;  %v3797_v60 = vsel %vm2980_vm2, %v13289_v43, 0.0  ;;  %v13301_v6 = vpop.eup %9726  ;;  %v13318_v15 = vmul.f32 0.17677669, %v4529_v42 }
 0x607   : > { %v3286_v50 = vsel %vm2980_vm2, %v13301_v6, 0.0  ;;  %v13309_v59 = vpop.eup %9728  ;;  %v13311_v46 = vpop.xlane.xlu0 %4055 }
 0x608   : > { %3281 = vadd.xlane.f32.xlu2 %v3280_v16  ;;  %v3555_v9 = vsel %vm2980_vm2, %v13309_v59, 0.0  ;;  %16025 = vst [vmem:[#allocation139_spill] sm:$0xff] %v13318_v15 }
 0x60a   : > { %v13283_v35 = vpop.xlane.xlu2 %4043  ;;  %v4779_v49 = vpop.f32.mrf.mxu2 }
 0x60e   : > { %3798 = vadd.xlane.f32.xlu1 %v3797_v60  ;;  %v3757_v60 = vpop.xlane.xlu1 %3756 }
 0x610   : > { %3547 = vadd.xlane.f32.xlu2 %v3546_v27  ;;  %v4561_v27 = vsel %vm2980_vm2, %v13318_v15, -inf }
 0x611   : > { %v13320_v34 = vpop.xlane.xlu0 %3768 }
 0x612   : > { %v13297_v30 = vpop.xlane.xlu2 %3762 }
 0x613   : > { %4900 = vrot.lane.b32.xlu0 %v16012_v17, %s10693_s20  ;;  %v4070_v17 = vmul.f32 1.442695, %v4061_v12  ;;  %v13331_v12 = vpop.f32.mrf.mxu2 }
 0x615   : > { %9730 = vpow2.f32 %v4070_v17 }
 0x616   : > { %v4050_v17 = vpop.xlane.xlu1 %4049 }
 0x617   : > { %v4064_v15 = vsub.f32 %v13048_v38, %v4050_v17 }
 0x618   : > { %3287 = vadd.xlane.f32.xlu2 %v3286_v50  ;;  %v3783_v50 = vmul.f32 1.442695, %v3774_v47 }
 0x61a   : > { %v13307_v40 = vpop.xlane.xlu2 %4052 }
 0x61b   : > { %v13329_v24 = vpop.eup %9730  ;;  %v13342_v18 = vpop.f32.mrf.mxu2 }
 0x61c   : > { %16026 = vst [vmem:[#allocation140_spill] sm:$0xff] %v13329_v24  ;;  %v4087_v42 = vsel %vm2980_vm2, %v13329_v24, 0.0 }
 0x61e   : > { %v3766_v43 = vpop.xlane.xlu1 %3765 }
 0x61f   : > { %v3778_v24 = vsub.f32 %v13076_v53, %v3766_v43  ;;  %v4063_v43 = vsub.f32 %v13027_v1, %v13285_v7 }
 0x620   : > { %3556 = vadd.xlane.f32.xlu2 %v3555_v9  ;;  %v3539_v9 = vpop.xlane.xlu0 %3538 }
 0x621   : > { %9732 = vrcp.f32 %v3539_v9  ;;  %v4074_v7 = vmul.f32 1.442695, %v4063_v43 }
 0x622   : > { %v13316_v16 = vpop.xlane.xlu2 %4058  ;;  %9734 = vpow2.f32 %v3783_v50 }
 0x627   : > { %4898 = vrot.lane.b32.xlu1 %v16014_v8, %s10693_s20  ;;  %v9733_v56 = vpop.eup %9732 }
 0x628   : > { %4562 = vmax.xlane.f32.xlu2 %v4561_v27  ;;  %v13335_v27 = vmul.f32 0.17677669, %v4774_v19  ;;  %v13340_v47 = vpop.eup %9734  ;;  %v13346_v19 = vmul.f32 0.17677669, %v4779_v49  ;;  %v3567_v50 = vmul.f32 %v9733_v56, %v13097_v2  ;;  %v4062_v49 = vsub.f32 %v13074_v22, %v13283_v35 }
 0x629   : > { %v13344_v9 = vpop.xlane.xlu0 %4282  ;;  %v3779_v35 = vsub.f32 %v13089_v39, %v13320_v34 }
 0x62a   : > { %v13326_v57 = vpop.xlane.xlu2 %3771  ;;  %16027 = vst [vmem:[#allocation141_spill] sm:$0xff] %v13335_v27  ;;  %v4802_v5 = vsel %vm2980_vm2, %v13335_v27, -inf  ;;  %v4808_v2 = vsel %vm2980_vm2, %v13346_v19, -inf  ;;  %v4072_v22 = vmul.f32 1.442695, %v4062_v49 }
 0x630   : > { %4088 = vadd.xlane.f32.xlu2 %v4087_v42  ;;  %v4076_v42 = vmul.f32 1.442695, %v4064_v15  ;;  %v3800_v15 = vsel %vm2980_vm2, %v13340_v47, 0.0 }
 0x633   : > { %v3536_v8 = vpop.xlane.xlu2 %3535 }
 0x634   : > { %9736 = vrcp.f32 %v3536_v8 }
 0x635   : > { %9738 = vpow2.f32 %v4076_v42  ;;  %v3793_v42 = vmul.f32 1.442695, %v3779_v35  ;;  %v13420_v35 = vmul.f32 0.17677669, %v13331_v12 }
 0x637   : > { %v4811_v12 = vsel %vm2980_vm2, %v13420_v35, -inf }
 0x638   : > { %4803 = vmax.xlane.f32.xlu2 %v4802_v5  ;;  %v3775_v5 = vsub.f32 %v13042_v45, %v3757_v60  ;;  %v13361_v45 = vmul.f32 0.17677669, %v4776_v10  ;;  %v13365_v60 = vpop.f32.mrf.mxu2 }
 0x63a   : > { %v9737_v29 = vpop.eup %9736  ;;  %v4805_v10 = vsel %vm2980_vm2, %v13361_v45, -inf }
 0x63b   : > { %v3566_v38 = vmul.f32 %v9737_v29, %v13135_v62  ;;  %v13350_v17 = vpop.xlane.xlu2 %4541  ;;  %v3118_v8 = vpop.f32.mrf.mxu1  ;;  %v3785_v62 = vmul.f32 1.442695, %v3775_v5  ;;  %v3791_v29 = vmul.f32 1.442695, %v3778_v24  ;;  %v3776_v24 = vsub.f32 %v13052_v3, %v13299_v54 }
 0x63c   : > { %3138 = vst.msk [vmem:[#allocation3] sm:$0xff] %vm2918_vm1, %v3118_v8  ;;  %v13367_v53 = vpop.eup %9738 }
 0x63d   : > { %v3574_v27 = vpack.c.bf16 %v3567_v50, %v3566_v38  ;;  %3801 = vadd.xlane.f32.xlu0 %v3800_v15  ;;  %9740 = vpow2.f32 %v3785_v62  ;;  %v4096_v1 = vsel %vm2980_vm2, %v13367_v53, 0.0  ;;  %v3787_v34 = vmul.f32 1.442695, %v3776_v24 }
 0x63e   : > { %9742 = vpow2.f32 %v3791_v29  ;;  %v3777_v15 = vsub.f32 %v13087_v52, %v13297_v30 }
 0x63f   : > { %8898 = vmatmul.msk.bf16.vlgmr.msrb.gmra.mxu1 %vm2980_vm2, %v3574_v27  ;;  %v13371_v27 = vpop.xlane.xlu0 %4547  ;;  %9744 = vpow2.f32 %v4072_v22 }
 0x640   : > { %4660 = vmatpush.bf16.msrb.mxu1 %v12687_v48  ;;  %4809 = vmax.xlane.f32.xlu2 %v4808_v2  ;;  %9746 = vpow2.f32 %v4074_v7  ;;  %v13394_v8 = vpop.f32.mrf.mxu2 }
 0x641   : > { %9748 = vpow2.f32 %v3793_v42 }
 0x642   : > { %9750 = vpow2.f32 %v3787_v34 }
 0x643   : > { %v3273_v56 = vpop.xlane.xlu2 %3272  ;;  %v3120_v48 = vpop.f32.mrf.mxu1 }
 0x644   : > { %4661 = vmatpush.bf16.msrb.mxu1 %v12626_v32  ;;  %3139 = vst.msk [vmem:[#allocation3 + $0x8] sm:$0xff] %vm2918_vm1, %v3120_v48  ;;  %v13382_v32 = vpop.eup %9740  ;;  %9752 = vrcp.f32 %v3273_v56  ;;  %v3789_v48 = vmul.f32 1.442695, %v3777_v15 }
 0x645   : > { %4806 = vmax.xlane.f32.xlu0 %v4805_v10  ;;  %v13388_v38 = vpop.eup %9742 }
 0x646   : > { %v3812_v54 = vsel %vm2980_vm2, %v13388_v38, 0.0  ;;  %v13400_v5 = vpop.eup %9744 }
 0x647   : > { %v13396_v3 = vpop.xlane.xlu0 %4288  ;;  %v4090_v2 = vsel %vm2980_vm2, %v13400_v5, 0.0 }
 0x648   : > { %4662 = vmatpush.bf16.msrb.mxu1 %v12679_v41  ;;  %4097 = vadd.xlane.f32.xlu2 %v4096_v1  ;;  %v3803_v41 = vsel %vm2980_vm2, %v13382_v32, 0.0  ;;  %v4791_v56 = vpop.f32.mrf.mxu2  ;;  %v4065_v1 = vsub.f32 %v13099_v21, %v13307_v40  ;;  %v13434_v40 = vpop.xlane.xlu1 %4544 }
 0x649   : > { %v13424_v24 = vmul.f32 0.17677669, %v4791_v56 }
 0x64a   : > { %v4078_v15 = vmul.f32 1.442695, %v4065_v1 }
 0x64b   : > { %v13386_v50 = vpop.xlane.xlu2 %4279  ;;  %v3123_v39 = vpop.f32.mrf.mxu1 }
 0x64c   : > { %4663 = vmatpush.bf16.msrb.mxu1 %v12651_v33  ;;  %3140 = vst.msk [vmem:[#allocation3 + $0x10] sm:$0xff] %vm2918_vm1, %v3123_v39  ;;  %v13402_v33 = vpop.eup %9746 }
 0x64d   : > { %3804 = vadd.xlane.f32.xlu0 %v3803_v41  ;;  %v13408_v29 = vpop.eup %9748  ;;  %v4093_v43 = vsel %vm2980_vm2, %v13402_v33, 0.0  ;;  %v4067_v41 = vsub.f32 %v13107_v14, %v13316_v16 }
 0x64e   : > { %v3815_v52 = vsel %vm2980_vm2, %v13408_v29, 0.0  ;;  %v13415_v30 = vpop.eup %9750 }
 0x64f   : > { %v13417_v10 = vpop.xlane.xlu0 %3284  ;;  %v9753_v22 = vpop.eup %9752  ;;  %v3806_v42 = vsel %vm2980_vm2, %v13415_v30, 0.0 }
 0x650   : > { %3813 = vadd.xlane.f32.xlu2 %v3812_v54  ;;  %v3303_v34 = vmul.f32 %v9753_v22, %v13169_v37  ;;  %v13442_v37 = vmul.f32 0.17677669, %v13342_v18  ;;  %v16029_v22 = vld [vmem:[#allocation128_spill] sm:$0xff] }
 0x651   : > { %4091 = vadd.xlane.f32.xlu1 %v4090_v2  ;;  %v4823_v2 = vsel %vm2980_vm2, %v13424_v24, -inf }
 0x652   : > { %v4814_v18 = vsel %vm2980_vm2, %v13442_v37, -inf }
 0x653   : > { %v3276_v62 = vpop.xlane.xlu2 %3275  ;;  %v3125_v49 = vpop.f32.mrf.mxu1 }
 0x654   : > { %9754 = vrcp.f32 %v3276_v62  ;;  %3141 = vst.msk [vmem:[#allocation3 + $0x18] sm:$0xff] %vm2918_vm1, %v3125_v49  ;;  %v4082_v49 = vmul.f32 1.442695, %v4067_v41 }
 0x655   : > { %4094 = vadd.xlane.f32.xlu0 %v4093_v43  ;;  %9756 = vpow2.f32 %v3789_v48  ;;  %v16028_v48 = vld [vmem:[#allocation126_spill] sm:$0xff] }
 0x656   : > { %9758 = vpow2.f32 %v4078_v15  ;;  %v13472_v15 = vmul.f32 0.17677669, %v13365_v60 }
 0x657   : > { %v13445_v14 = vpop.xlane.xlu0 %4291  ;;  %9760 = vpow2.f32 %v4082_v49 }
 0x658   : > { %3816 = vadd.xlane.f32.xlu2 %v3815_v52  ;;  %v3279_v52 = vpop.xlane.xlu1 %3278  ;;  %v4817_v60 = vsel %vm2980_vm2, %v13472_v15, -inf }
 0x659   : > { %3807 = vadd.xlane.f32.xlu1 %v3806_v42 }
 0x65a   : > { %v9755_v7 = vpop.eup %9754 }
 0x65b   : > { %v3542_v39 = vpop.xlane.xlu2 %3541  ;;  %v3304_v54 = vmul.f32 %v9755_v7, %v13202_v63  ;;  %v13438_v62 = vpop.eup %9756  ;;  %v3780_v63 = vsub.f32 %v13116_v58, %v13326_v57  ;;  %v16030_v57 = vld [vmem:[#allocation69_spill] sm:$0xff] }
 0x65c   : > { %v3809_v16 = vsel %vm2980_vm2, %v13438_v62, 0.0  ;;  %v13456_v56 = vpop.eup %9758  ;;  %v4066_v1 = vsub.f32 %v16030_v57, %v13311_v46  ;;  %9762 = vrcp.f32 %v3542_v39 }
 0x65d   : > { %v3311_v21 = vpack.c.bf16 %v3304_v54, %v3303_v34  ;;  %4812 = vmax.xlane.f32.xlu0 %v4811_v12  ;;  %v13459_v58 = vpop.eup %9760  ;;  %v4099_v42 = vsel %vm2980_vm2, %v13456_v56, 0.0  ;;  %v4564_v34 = vsub.f32 %v13152_v20, %v13350_v17  ;;  %v16031_v12 = vld [vmem:[#allocation127_spill] sm:$0xff] }
 0x65e   : > { %v4105_v46 = vsel %vm2980_vm2, %v13459_v58, 0.0  ;;  %v4080_v39 = vmul.f32 1.442695, %v4066_v1 }
 0x65f   : > { %8890 = vmatmul.msk.bf16.vlgmr.msra.gmra.mxu3 %vm2980_vm2, %v3311_v21  ;;  %v3551_v54 = vpop.xlane.xlu0 %3550 }
 0x660   : > { %4824 = vmax.xlane.f32.xlu2 %v4823_v2  ;;  %4398 = vmatpush.bf16.msra.mxu3 %v12706_v51  ;;  %v3795_v51 = vmul.f32 1.442695, %v3780_v63  ;;  %v4572_v2 = vmul.f32 1.442695, %v4564_v34  ;;  %v13476_v63 = vpop.xlane.xlu1 %4553 }
 0x661   : > { %3810 = vadd.xlane.f32.xlu1 %v3809_v16  ;;  %v4302_v16 = vsub.f32 %v13184_v44, %v13386_v50  ;;  %v16032_v44 = vld [vmem:[#allocation56_spill] sm:$0xff] }
 0x662   : > { %9764 = vpow2.f32 %v3795_v51  ;;  %v9763_v21 = vpop.eup %9762  ;;  %v4305_v50 = vsub.f32 %v16032_v44, %v13396_v3  ;;  %v16034_v3 = vld [vmem:[#allocation130_spill] sm:$0xff] }
 0x663   : > { %v13451_v43 = vpop.xlane.xlu2 %4285 }
 0x664   : > { %4399 = vmatpush.bf16.msra.mxu3 %v16028_v48  ;;  %v3568_v48 = vmul.f32 %v9763_v21, %v13217_v36  ;;  %v4566_v21 = vsub.f32 %v16034_v3, %v13371_v27  ;;  %v13510_v27 = vmul.f32 0.17677669, %v13394_v8 }
 0x665   : > { %4815 = vmax.xlane.f32.xlu0 %v4814_v18 }
 0x667   : > { %v4557_v36 = vpop.xlane.xlu0 %4556 }
 0x668   : > { %4400 = vmatpush.bf16.msra.mxu3 %v16029_v22  ;;  %v13474_v49 = vpop.eup %9764 }
 0x669   : > { %4100 = vadd.xlane.f32.xlu1 %v4099_v42  ;;  %v3818_v57 = vsel %vm2980_vm2, %v13474_v49, 0.0 }
 0x66a   : > { %v3128_v7 = vpop.f32.mrf.mxu1 }
 0x66b   : > { %v3545_v41 = vpop.xlane.xlu2 %3544  ;;  %3142 = vst.msk [vmem:[#allocation3 + $0x20] sm:$0xff] %vm2918_vm1, %v3128_v7 }
 0x66c   : > { %9766 = vrcp.f32 %v3545_v41  ;;  %4401 = vmatpush.bf16.msra.mxu3 %v16031_v12  ;;  %v16033_v41 = vld [vmem:[#allocation74_spill] sm:$0xff] }
 0x66d   : > { %4106 = vadd.xlane.f32.xlu0 %v4105_v46  ;;  %9768 = vpow2.f32 %v4080_v39  ;;  %v4565_v34 = vsub.f32 %v16033_v41, %v13434_v40  ;;  %v4316_v46 = vmul.f32 1.442695, %v4305_v50  ;;  %v4820_v41 = vsel %vm2980_vm2, %v13510_v27, -inf }
 0x66e   : > { %9770 = vpow2.f32 %v4572_v2 }
 0x66f   : > { %v4574_v40 = vmul.f32 1.442695, %v4565_v34 }
 0x671   : > { %4818 = vmax.xlane.f32.xlu1 %v4817_v60 }
 0x672   : > { %v9767_v20 = vpop.eup %9766  ;;  %v3130_v17 = vpop.f32.mrf.mxu1 }
 0x673   : > { %v3569_v18 = vmul.f32 %v9767_v20, %v13239_v25  ;;  %v4551_v51 = vpop.xlane.xlu2 %4550  ;;  %3143 = vst.msk [vmem:[#allocation3 + $0x28] sm:$0xff] %vm2918_vm1, %v3130_v17  ;;  %v4310_v25 = vmul.f32 1.442695, %v4302_v16  ;;  %v13491_v42 = vpop.eup %9768 }
 0x674   : > { %v4567_v22 = vsub.f32 %v13257_v11, %v4551_v51  ;;  %v13495_v11 = vpop.xlane.xlu1 %4294  ;;  %v13497_v12 = vpop.eup %9770  ;;  %v4102_v2 = vsel %vm2980_vm2, %v13491_v42, 0.0 }
 0x675   : > { %v3575_v1 = vpack.c.bf16 %v3569_v18, %v3568_v48  ;;  %3819 = vadd.xlane.f32.xlu0 %v3818_v57  ;;  %v4588_v17 = vsel %vm2980_vm2, %v13497_v12, 0.0  ;;  %v4576_v48 = vmul.f32 1.442695, %v4566_v21  ;;  %v3554_v51 = vpop.xlane.xlu0 %3553  ;;  %v16035_v57 = vld [vmem:[#allocation129_spill] sm:$0xff] }
 0x676   : > { %v4578_v7 = vmul.f32 1.442695, %v4567_v22 }
 0x677   : > { %8899 = vmatmul.msk.bf16.gmra.mxu1 %vm2980_vm2, %v3575_v1  ;;  %v4303_v1 = vsub.f32 %v16035_v57, %v13344_v9 }
 0x678   : > { %9772 = vpow2.f32 %v4578_v7 }
 0x679   : > { %9774 = vrcp.f32 %v3279_v52  ;;  %4103 = vadd.xlane.f32.xlu1 %v4102_v2  ;;  %v4569_v52 = vsub.f32 %v13215_v13, %v4557_v36  ;;  %v16036_v36 = vld [vmem:[#allocation131_spill] sm:$0xff]  ;;  %v4312_v9 = vmul.f32 1.442695, %v4303_v1 }
 0x67a   : > { %v3133_v39 = vpop.f32.mrf.mxu1  ;;  %9776 = vpow2.f32 %v4310_v25 }
 0x67b   : > { %v3282_v20 = vpop.xlane.xlu2 %3281  ;;  %3144 = vst.msk [vmem:[#allocation3 + $0x30] sm:$0xff] %vm2918_vm1, %v3133_v39  ;;  %v4582_v13 = vmul.f32 1.442695, %v4569_v52 }
 0x67c   : > { %9778 = vrcp.f32 %v3282_v20  ;;  %v13519_v7 = vpop.xlane.xlu1 %4559  ;;  %v13537_v20 = vld [vmem:[%s11033_s29] sm:$0x3] }
 0x67d   : > { %9780 = vpow2.f32 %v4316_v46  ;;  %4589 = vadd.xlane.f32.xlu0 %v4588_v17  ;;  %v4304_v17 = vsub.f32 %v13229_v4, %v13451_v43  ;;  %v13542_v52 = vpop.xlane.xlu0 %4297  ;;  %5619 = vst [vmem:[#allocation1] ss:$4 sm:$0xff] %v13537_v20 }
 0x67e   : > { %v13506_v16 = vpop.eup %9772  ;;  %9782 = vpow2.f32 %v4574_v40 }
 0x67f   : > { %v4597_v18 = vsel %vm2980_vm2, %v13506_v16, 0.0  ;;  %v9775_v60 = vpop.eup %9774  ;;  %9784 = vrcp.f32 %v3551_v54  ;;  %v4314_v43 = vmul.f32 1.442695, %v4304_v17 }
 0x680   : > { %4598 = vadd.xlane.f32.xlu2 %v4597_v18  ;;  %v13514_v22 = vpop.eup %9776  ;;  %v3305_v8 = vmul.f32 %v9775_v60, %v16036_v36  ;;  %9786 = vpow2.f32 %v4576_v48 }
 0x681   : > { %4821 = vmax.xlane.f32.xlu1 %v4820_v41  ;;  %v4326_v54 = vsel %vm2980_vm2, %v13514_v22, 0.0 }
 0x682   : > { %v9779_v44 = vpop.eup %9778  ;;  %v3135_v50 = vpop.f32.mrf.mxu1 }
 0x683   : > { %v3306_v25 = vmul.f32 %v9779_v44, %v13273_v61  ;;  %v3548_v34 = vpop.xlane.xlu2 %3547  ;;  %3145 = vst.msk [vmem:[#allocation3 + $0x38] sm:$0xff] %vm2918_vm1, %v3135_v50  ;;  %v13525_v46 = vpop.eup %9780  ;;  %v16037_v50 = vld [vmem:[#allocation60_spill] sm:$0xff] }
 0x684   : > { %9788 = vrcp.f32 %v3548_v34  ;;  %v13529_v3 = vpop.eup %9782  ;;  %v4335_v61 = vsel %vm2980_vm2, %v13525_v46, 0.0  ;;  %v3291_v18 = vpop.xlane.xlu1 %3290  ;;  %v4568_v36 = vsub.f32 %v16037_v50, %v13476_v63  ;;  %v16038_v34 = vld [vmem:[#allocation132_spill] sm:$0xff] }
 0x685   : > { %v3312_v39 = vpack.c.bf16 %v3306_v25, %v3305_v8  ;;  %9790 = vpow2.f32 %v4582_v13  ;;  %4327 = vadd.xlane.f32.xlu0 %v4326_v54  ;;  %v9785_v21 = vpop.eup %9784  ;;  %v4591_v57 = vsel %vm2980_vm2, %v13529_v3, 0.0  ;;  %v13560_v8 = vld.sshfl [vmem:[#allocation1] sm:$0xff pattern:$0x73625140]  ;;  %v13563_v25 = vld [vmem:[%s11039_s17] sm:$0x3] }
 0x686   : > { %v13534_v2 = vpop.eup %9786  ;;  %9792 = vpow2.f32 %v4312_v9  ;;  %v3571_v48 = vmul.f32 %v9785_v21, %v13204_v0  ;;  %5768 = vst [vmem:[#allocation1] ss:$4 sm:$0xff] %v13563_v25  ;;  %v4580_v63 = vmul.f32 1.442695, %v4568_v36 }
 0x687   : > { %8891 = vmatmul.msk.bf16.gmra.mxu3 %vm2980_vm2, %v3312_v39  ;;  %9794 = vrcp.f32 %v13417_v10  ;;  %v4594_v4 = vsel %vm2980_vm2, %v13534_v2, 0.0 }
 0x688   : > { %4336 = vadd.xlane.f32.xlu2 %v4335_v61 }
 0x689   : > { %4592 = vadd.xlane.f32.xlu1 %v4591_v57 }
 0x68a   : > { %v9789_v40 = vpop.eup %9788 }
 0x68b   : > { %v3570_v60 = vmul.f32 %v9789_v40, %v13287_v23  ;;  %v3288_v1 = vpop.xlane.xlu2 %3287  ;;  %v13549_v44 = vpop.eup %9790 }
 0x68c   : > { %9796 = vrcp.f32 %v3288_v1  ;;  %v13553_v13 = vpop.eup %9792  ;;  %v4603_v0 = vsel %vm2980_vm2, %v13549_v44, 0.0  ;;  %v13570_v21 = vpop.xlane.xlu1 %4300 }
 0x68d   : > { %v3576_v10 = vpack.c.bf16 %v3571_v48, %v3570_v60  ;;  %4595 = vadd.xlane.f32.xlu0 %v4594_v4  ;;  %v9795_v23 = vpop.eup %9794  ;;  %9798 = vrcp.f32 %v3554_v51  ;;  %v4329_v39 = vsel %vm2980_vm2, %v13553_v13, 0.0  ;;  %v3294_v51 = vpop.xlane.xlu0 %3293  ;;  %v13577_v57 = vld.sshfl [vmem:[#allocation1] sm:$0xff pattern:$0x73625140] }
 0x68e   : > { %9800 = vpow2.f32 %v4314_v43  ;;  %v3307_v9 = vmul.f32 %v9795_v23, %v16038_v34  ;;  %5865 = vst [vmem:[#allocation1] ss:$4 sm:$0xff] %v13537_v20 }
 0x68f   : > { %8900 = vmatmul.msk.bf16.gmra.mxu1 %vm2980_vm2, %v3576_v10 }
 0x690   : > { %4604 = vadd.xlane.f32.xlu2 %v4603_v0 }
 0x691   : > { %4330 = vadd.xlane.f32.xlu1 %v4329_v39 }
 0x692   : > { %v9797_v41 = vpop.eup %9796 }
 0x693   : > { %v3308_v54 = vmul.f32 %v9797_v41, %v13301_v6  ;;  %v3557_v61 = vpop.xlane.xlu2 %3556  ;;  %v9799_v17 = vpop.eup %9798  ;;  %v16039_v6 = vld [vmem:[#allocation133_spill] sm:$0xff] }
 0x694   : > { %9802 = vrcp.f32 %v3557_v61  ;;  %v13573_v48 = vpop.eup %9800  ;;  %v4306_v60 = vsub.f32 %v16039_v6, %v13445_v14  ;;  %v3572_v4 = vmul.f32 %v9799_v17, %v13231_v26  ;;  %v4086_v41 = vpop.xlane.xlu1 %4085 }
 0x695   : > { %v3313_v40 = vpack.c.bf16 %v3308_v54, %v3307_v9  ;;  %9804 = vrcp.f32 %v3294_v51  ;;  %v4332_v43 = vsel %vm2980_vm2, %v13573_v48, 0.0  ;;  %v13590_v34 = vld.sshfl [vmem:[#allocation1] sm:$0xff pattern:$0x73625140]  ;;  %v16041_v51 = vld [vmem:[#allocation53_spill] sm:$0xff] }
 0x696   : > { %9806 = vpow2.f32 %v4580_v63  ;;  %v4318_v23 = vmul.f32 1.442695, %v4306_v60  ;;  %6014 = vst [vmem:[#allocation1] ss:$4 sm:$0xff] %v13563_v25  ;;  %v16042_v60 = vld [vmem:[#allocation140_spill] sm:$0xff] }
 0x697   : > { %8892 = vmatmul.msk.bf16.gmra.mxu3 %vm2980_vm2, %v3313_v40  ;;  %9808 = vrcp.f32 %v3291_v18  ;;  %v4901_v40 = vpop.permute.xlu0 %4900 }
 0x698   : > { %9810 = vpow2.f32 %v4318_v23  ;;  %v10206_v23 = vld [vmem:[#allocation14 + $0x38] sm:$0xff] }
 0x699   : > { %4333 = vadd.xlane.f32.xlu1 %v4332_v43  ;;  %9812 = vrcp.f32 %v4086_v41 }
 0x69a   : > { %v9803_v1 = vpop.eup %9802 }
 0x69b   : > { %v3573_v10 = vmul.f32 %v9803_v1, %v13309_v59  ;;  %v13584_v0 = vpop.xlane.xlu2 %4562  ;;  %v9805_v36 = vpop.eup %9804  ;;  %v16040_v59 = vld [vmem:[#allocation50_spill] sm:$0xff] }
 0x69c   : > { %v13586_v14 = vpop.eup %9806  ;;  %v3310_v26 = vmul.f32 %v9805_v36, %v13259_v28 }
 0x69d   : > { %v3577_v50 = vpack.c.bf16 %v3573_v10, %v3572_v4  ;;  %v9809_v18 = vpop.eup %9808  ;;  %v4600_v54 = vsel %vm2980_vm2, %v13586_v14, 0.0  ;;  %v13603_v17 = vld.sshfl [vmem:[#allocation1] sm:$0xff pattern:$0x73625140]  ;;  %v3799_v10 = vpop.xlane.xlu1 %3798 }
 0x69e   : > { %v3309_v9 = vmul.f32 %v9809_v18, %v13243_v31  ;;  %v13598_v63 = vpop.eup %9810  ;;  %6111 = vst [vmem:[#allocation1] ss:$4 sm:$0xff] %v13537_v20 }
 0x69f   : > { %8901 = vmatmul.msk.bf16.gmra.mxu1 %vm2980_vm2, %v3577_v50  ;;  %v9813_v28 = vpop.eup %9812  ;;  %v4338_v4 = vsel %vm2980_vm2, %v13598_v63, 0.0 }
 0x6a0   : > { %v3314_v61 = vpack.c.bf16 %v3310_v26, %v3309_v9  ;;  %v4116_v31 = vmul.f32 %v9813_v28, %v13275_v55  ;;  %v10207_v55 = vld [vmem:[#allocation14 + $0x30] sm:$0xff]  ;;  %v10208_v26 = vld [vmem:[#allocation14 + $0x28] sm:$0xff] }
 0x6a1   : > { %4894 = vrot.lane.b32.xlu0 %v16040_v59, %s10693_s20  ;;  %4601 = vadd.xlane.f32.xlu1 %v4600_v54  ;;  %v16043_v59 = vld [vmem:[#allocation138_spill] sm:$0xff]  ;;  %v13621_v28 = vld [vmem:[%s11033_s29 + $0x2] sm:$0x3] }
 0x6a3   : > { %v4089_v39 = vpop.xlane.xlu2 %4088 }
 0x6a4   : > { %9814 = vrcp.f32 %v4089_v39 }
 0x6a5   : > { %9816 = vrcp.f32 %v3799_v10  ;;  %v13611_v36 = vld.sshfl [vmem:[#allocation1] sm:$0xff pattern:$0x73625140] }
 0x6a6   : > { %6260 = vst [vmem:[#allocation1] ss:$4 sm:$0xff] %v13563_v25 }
 0x6a7   : > { %8893 = vmatmul.msk.bf16.gmra.mxu3 %vm2980_vm2, %v3314_v61 }
 0x6a8   : > { %4896 = vrot.lane.b32.xlu2 %v16041_v51, %s10693_s20 }
 0x6a9   : > { %4339 = vadd.xlane.f32.xlu1 %v4338_v4 }
 0x6aa   : > { %v9815_v6 = vpop.eup %9814 }
 0x6ab   : > { %v4117_v1 = vmul.f32 %v9815_v6, %v16042_v60  ;;  %v9817_v41 = vpop.eup %9816  ;;  %v13615_v54 = vpop.xlane.xlu2 %4803  ;;  %v16044_v6 = vld [vmem:[#allocation135_spill] sm:$0xff] }
 0x6ac   : > { %v3829_v9 = vmul.f32 %v9817_v41, %v16043_v59  ;;  %v10211_v59 = vld [vmem:[#allocation14 + $0x10] sm:$0xff] }
 0x6ad   : > { %v4124_v43 = vpack.c.bf16 %v4117_v1, %v4116_v31  ;;  %v13623_v51 = vld.sshfl [vmem:[#allocation1] sm:$0xff pattern:$0x73625140]  ;;  %v4570_v31 = vsub.f32 %v16044_v6, %v13519_v7  ;;  %v10209_v1 = vld [vmem:[#allocation14 + $0x20] sm:$0xff]  ;;  %v13634_v7 = vld [vmem:[%s11039_s17 + $0x2] sm:$0x3] }
 0x6ae   : > { %6573 = vst [vmem:[#allocation1] ss:$4 sm:$0xff] %v13621_v28 }
 0x6af   : > { %8914 = vmatmul.msk.bf16.vlgmr.msra.gmra.mxu1 %vm2980_vm2, %v4124_v43  ;;  %v4584_v4 = vmul.f32 1.442695, %v4570_v31  ;;  %v4899_v43 = vpop.permute.xlu1 %4898  ;;  %16047 = vst [vmem:[#allocation126_spill] sm:$0xff] %v13634_v7  ;;  %v10212_v31 = vld [vmem:[#allocation14 + $0x8] sm:$0xff] }
 0x6b0   : > { %5148 = vmatpush.bf16.msra.mxu1 %v10206_v23  ;;  %v3802_v50 = vpop.xlane.xlu0 %3801  ;;  %v10210_v23 = vld [vmem:[#allocation14 + $0x18] sm:$0xff] }
 0x6b1   : > { %9818 = vrcp.f32 %v3802_v50  ;;  %v16046_v50 = vld [vmem:[#allocation137_spill] sm:$0xff] }
 0x6b2   : > { %9820 = vpow2.f32 %v4584_v4 }
 0x6b4   : > { %5149 = vmatpush.bf16.msra.mxu1 %v10207_v55  ;;  %v4309_v55 = vsub.f32 %v16046_v50, %v13570_v21  ;;  %v16048_v21 = vld [vmem:[#allocation136_spill] sm:$0xff] }
 0x6b7   : > { %v9819_v18 = vpop.eup %9818 }
 0x6b8   : > { %5150 = vmatpush.bf16.msra.mxu1 %v10208_v26  ;;  %v3830_v39 = vmul.f32 %v9819_v18, %v13340_v47  ;;  %v13618_v61 = vpop.xlane.xlu0 %4806  ;;  %v16045_v47 = vld [vmem:[#allocation134_spill] sm:$0xff]  ;;  %v13636_v18 = vld.sshfl [vmem:[#allocation1] sm:$0xff pattern:$0x73625140]  ;;  %v13643_v6 = vpop.eup %9820 }
 0x6b9   : > { %v4307_v10 = vsub.f32 %v16045_v47, %v13495_v11  ;;  %6722 = vst [vmem:[#allocation1] ss:$4 sm:$0xff] %v13634_v7  ;;  %v4324_v11 = vmul.f32 1.442695, %v4309_v55  ;;  %v4606_v47 = vsel %vm2980_vm2, %v13643_v6, 0.0 }
 0x6ba   : > { %v3837_v60 = vpack.c.bf16 %v3830_v39, %v3829_v9  ;;  %v4308_v9 = vsub.f32 %v16048_v21, %v13542_v52  ;;  %v10213_v52 = vld [vmem:[#allocation14] sm:$0xff] }
 0x6bb   : > { %v4320_v26 = vmul.f32 1.442695, %v4307_v10 }
 0x6bc   : > { %5151 = vmatpush.bf16.msra.mxu1 %v10209_v1  ;;  %8906 = vmatmul.msk.bf16.vlgmr.msrb.gmra.mxu3 %vm2980_vm2, %v3837_v60 }
 0x6bd   : > { %4922 = vmatpush.bf16.msrb.mxu3 %v4901_v40  ;;  %v4810_v40 = vpop.xlane.xlu2 %4809  ;;  %9822 = vpow2.f32 %v4320_v26 }
 0x6be   : > { %v4828_v4 = vsub.f32 %v13346_v19, %v4810_v40  ;;  %v4827_v19 = vsub.f32 %v13361_v45, %v13618_v61 }
 0x6c0   : > { %5152 = vmatpush.bf16.msra.mxu1 %v10210_v23  ;;  %v3805_v41 = vpop.xlane.xlu0 %3804  ;;  %v13645_v1 = vld.sshfl [vmem:[#allocation1] sm:$0xff pattern:$0x73625140]  ;;  %v4838_v50 = vmul.f32 1.442695, %v4828_v4 }
 0x6c1   : > { %4923 = vmatpush.bf16.msrb.mxu3 %v4899_v43  ;;  %6819 = vst [vmem:[#allocation1] ss:$4 sm:$0xff] %v13621_v28 }
 0x6c2   : > { %5622 = vrot.lane.b32.xlu1 %v13560_v8, %s10694_s30  ;;  %v4322_v8 = vmul.f32 1.442695, %v4308_v9 }
 0x6c3   : > { %v13651_v10 = vpop.eup %9822 }
 0x6c4   : > { %5153 = vmatpush.bf16.msra.mxu1 %v10211_v59  ;;  %v4092_v39 = vpop.xlane.xlu1 %4091  ;;  %v4341_v59 = vsel %vm2980_vm2, %v13651_v10, 0.0 }
 0x6c5   : > { %9824 = vrcp.f32 %v4092_v39  ;;  %v4098_v43 = vpop.xlane.xlu2 %4097 }
 0x6c6   : > { %9826 = vpow2.f32 %v4324_v11 }
 0x6c8   : > { %5154 = vmatpush.bf16.msra.mxu1 %v10212_v31  ;;  %v4095_v60 = vpop.xlane.xlu0 %4094  ;;  %v13661_v39 = vld.sshfl [vmem:[#allocation1] sm:$0xff pattern:$0x73625140] }
 0x6c9   : > { %9828 = vrcp.f32 %v4095_v60  ;;  %6968 = vst [vmem:[#allocation1] ss:$4 sm:$0xff] %v13634_v7 }
 0x6ca   : > { %9830 = vrcp.f32 %v3805_v41  ;;  %v4836_v41 = vmul.f32 1.442695, %v4827_v19 }
 0x6cb   : > { %4607 = vadd.xlane.f32.xlu0 %v4606_v47  ;;  %v9825_v23 = vpop.eup %9824  ;;  %9832 = vpow2.f32 %v4322_v8 }
 0x6cc   : > { %5155 = vmatpush.bf16.msra.mxu1 %v10213_v52  ;;  %v13653_v55 = vpop.eup %9826  ;;  %v3808_v26 = vpop.xlane.xlu1 %3807  ;;  %v4118_v11 = vmul.f32 %v9825_v23, %v13400_v5 }
 0x6cd   : > { %9834 = vrcp.f32 %v3808_v26  ;;  %v4347_v45 = vsel %vm2980_vm2, %v13653_v55, 0.0  ;;  %v3814_v4 = vpop.xlane.xlu2 %3813 }
 0x6ce   : > { %9836 = vpow2.f32 %v4838_v50 }
 0x6cf   : > { %v9829_v40 = vpop.eup %9828  ;;  %9838 = vpow2.f32 %v4836_v41 }
 0x6d0   : > { %v4119_v21 = vmul.f32 %v9829_v40, %v13402_v33  ;;  %v4813_v9 = vpop.xlane.xlu0 %4812  ;;  %v9831_v31 = vpop.eup %9830  ;;  %v13678_v40 = vld.sshfl [vmem:[#allocation1] sm:$0xff pattern:$0x73625140] }
 0x6d1   : > { %4342 = vadd.xlane.f32.xlu2 %v4341_v59  ;;  %v13666_v60 = vpop.eup %9832  ;;  %v3831_v33 = vmul.f32 %v9831_v31, %v13382_v32  ;;  %v4829_v47 = vsub.f32 %v13420_v35, %v4813_v9  ;;  %16049 = vst [vmem:[#allocation128_spill] sm:$0xff] %v13678_v40  ;;  %v16050_v59 = vld [vmem:[#allocation139_spill] sm:$0xff] }
 0x6d2   : > { %v4125_v61 = vpack.c.bf16 %v4119_v21, %v4118_v11  ;;  %v4344_v50 = vsel %vm2980_vm2, %v13666_v60, 0.0  ;;  %7065 = vst [vmem:[#allocation1] ss:$4 sm:$0xff] %v13621_v28  ;;  %v4571_v11 = vsub.f32 %v16050_v59, %v13584_v0 }
 0x6d3   : > { %4348 = vadd.xlane.f32.xlu0 %v4347_v45  ;;  %v9835_v5 = vpop.eup %9834  ;;  %v4840_v32 = vmul.f32 1.442695, %v4829_v47 }
 0x6d4   : > { %8915 = vmatmul.msk.bf16.gmra.mxu1 %vm2980_vm2, %v4125_v61  ;;  %v3832_v8 = vmul.f32 %v9835_v5, %v13415_v30  ;;  %v3811_v52 = vpop.xlane.xlu1 %3810  ;;  %v13672_v23 = vpop.eup %9836  ;;  %v4586_v41 = vmul.f32 1.442695, %v4571_v11 }
 0x6d5   : > { %v4856_v30 = vsel %vm2980_vm2, %v13672_v23, 0.0  ;;  %9840 = vrcp.f32 %v3811_v52  ;;  %v13684_v35 = vpop.eup %9838  ;;  %v3817_v45 = vpop.xlane.xlu2 %3816 }
 0x6d6   : > { %v3838_v26 = vpack.c.bf16 %v3832_v8, %v3831_v33  ;;  %9842 = vrcp.f32 %v4098_v43  ;;  %v4853_v9 = vsel %vm2980_vm2, %v13684_v35, 0.0  ;;  %v16051_v8 = vld [vmem:[#allocation141_spill] sm:$0xff]  ;;  %v13701_v11 = vpop.f32.mrf.mxu1 }
 0x6d7   : > { %9844 = vrcp.f32 %v3814_v4  ;;  %v4826_v0 = vsub.f32 %v16051_v8, %v13615_v54 }
 0x6d8   : > { %v13676_v19 = vpop.xlane.xlu0 %4815  ;;  %8907 = vmatmul.msk.bf16.gmra.mxu3 %vm2980_vm2, %v3838_v26  ;;  %9846 = vpow2.f32 %v4840_v32 }
 0x6d9   : > { %4345 = vadd.xlane.f32.xlu2 %v4344_v50  ;;  %v7066_v31 = vld.sshfl [vmem:[#allocation1] sm:$0xff pattern:$0x73625140]  ;;  %v4834_v50 = vmul.f32 1.442695, %v4826_v0 }
 0x6da   : > { %7214 = vst [vmem:[#allocation1] ss:$4 sm:$0xff] %v13634_v7 }
 0x6db   : > { %4857 = vadd.xlane.f32.xlu0 %v4856_v30  ;;  %v9841_v5 = vpop.eup %9840 }
 0x6dc   : > { %v4101_v21 = vpop.xlane.xlu1 %4100  ;;  %v9843_v33 = vpop.eup %9842  ;;  %v3833_v47 = vmul.f32 %v9841_v5, %v13438_v62 }
 0x6dd   : > { %9848 = vrcp.f32 %v4101_v21  ;;  %v9845_v43 = vpop.eup %9844  ;;  %v4120_v26 = vmul.f32 %v9843_v33, %v13367_v53  ;;  %v13707_v5 = vpop.xlane.xlu2 %4824 }
 0x6de   : > { %v13693_v4 = vpop.eup %9846  ;;  %9850 = vpow2.f32 %v4586_v41  ;;  %v3834_v32 = vmul.f32 %v9845_v43, %v13388_v38  ;;  %v13717_v8 = vpop.f32.mrf.mxu1 }
 0x6df   : > { %v4859_v54 = vsel %vm2980_vm2, %v13693_v4, 0.0  ;;  %9852 = vpow2.f32 %v4834_v50 }
 0x6e0   : > { %v4107_v61 = vpop.xlane.xlu0 %4106 }
 0x6e1   : > { %4854 = vadd.xlane.f32.xlu2 %v4853_v9  ;;  %v3839_v9 = vpack.c.bf16 %v3834_v32, %v3833_v47 }
 0x6e3   : > { %v9849_v52 = vpop.eup %9848 }
 0x6e4   : > { %v4121_v30 = vmul.f32 %v9849_v52, %v13456_v56  ;;  %v13699_v59 = vpop.xlane.xlu1 %4818  ;;  %v13705_v62 = vpop.eup %9850 }
 0x6e5   : > { %v4609_v53 = vsel %vm2980_vm2, %v13705_v62, 0.0  ;;  %v13715_v56 = vpop.eup %9852 }
 0x6e6   : > { %v4126_v41 = vpack.c.bf16 %v4121_v30, %v4120_v26  ;;  %v4850_v50 = vsel %vm2980_vm2, %v13715_v56, 0.0 }
 0x6e8   : > { %v3820_v21 = vpop.xlane.xlu0 %3819  ;;  %8908 = vmatmul.msk.bf16.gmra.mxu3 %vm2980_vm2, %v3839_v9  ;;  %8916 = vmatmul.msk.bf16.gmra.mxu1 %vm2980_vm2, %v4126_v41  ;;  %v13733_v41 = vpop.f32.mrf.mxu3 }
 0x6e9   : > { %4860 = vadd.xlane.f32.xlu2 %v4859_v54  ;;  %9854 = vrcp.f32 %v3820_v21 }
 0x6ea   : > { %9856 = vrcp.f32 %v3817_v45 }
 0x6eb   : > { %9858 = vrcp.f32 %v4107_v61 }
 0x6ec   : > { %v4104_v38 = vpop.xlane.xlu1 %4103  ;;  %4610 = vadd.xlane.f32.xlu1 %v4609_v53 }
 0x6ed   : > { %9860 = vrcp.f32 %v4104_v38 }
 0x6ef   : > { %5868 = vrot.lane.b32.xlu0 %v13590_v34, %s10695_s26  ;;  %v9855_v33 = vpop.eup %9854 }
 0x6f0   : > { %v9857_v0 = vpop.eup %9856  ;;  %v3836_v45 = vmul.f32 %v9855_v33, %v13474_v49  ;;  %v4590_v61 = vpop.xlane.xlu0 %4589 }
 0x6f1   : > { %v9859_v47 = vpop.eup %9858  ;;  %v3835_v26 = vmul.f32 %v9857_v0, %v13408_v29  ;;  %9862 = vrcp.f32 %v4590_v61  ;;  %v13744_v61 = vpop.f32.mrf.mxu3 }
 0x6f2   : > { %v4123_v32 = vmul.f32 %v9859_v47, %v13459_v58 }
 0x6f3   : > { %v4599_v43 = vpop.xlane.xlu2 %4598  ;;  %v9861_v52 = vpop.eup %9860  ;;  %v3840_v54 = vpack.c.bf16 %v3836_v45, %v3835_v26 }
 0x6f4   : > { %v4122_v34 = vmul.f32 %v9861_v52, %v13491_v42  ;;  %v13725_v30 = vpop.xlane.xlu1 %4821  ;;  %4851 = vadd.xlane.f32.xlu1 %v4850_v50  ;;  %v13729_v49 = vpop.f32.mrf.mxu1 }
 0x6f6   : > { %v4127_v21 = vpack.c.bf16 %v4123_v32, %v4122_v34 }
 0x6f7   : > { %6576 = vrot.lane.b32.xlu0 %v13636_v18, %s10694_s30  ;;  %v9863_v18 = vpop.eup %9862 }
 0x6f8   : > { %8909 = vmatmul.msk.bf16.gmra.mxu3 %vm2980_vm2, %v3840_v54  ;;  %8917 = vmatmul.msk.bf16.gmra.mxu1 %vm2980_vm2, %v4127_v21  ;;  %v4328_v29 = vpop.xlane.xlu0 %4327  ;;  %v4620_v33 = vmul.f32 %v9863_v18, %v13497_v12 }
 0x6fb   : > { %v4337_v9 = vpop.xlane.xlu2 %4336 }
 0x6fc   : > { %v4593_v58 = vpop.xlane.xlu1 %4592  ;;  %v13738_v53 = vpop.f32.mrf.mxu1 }
 0x6fd   : > { %9864 = vrcp.f32 %v4593_v58 }
 0x6fe   : > { %9866 = vrcp.f32 %v4328_v29 }
 0x6ff   : > { %7068 = vrot.lane.b32.xlu0 %v7066_v31, %s10693_s20 }
 0x700   : > { %v4596_v31 = vpop.xlane.xlu0 %4595 }
 0x701   : > { %6114 = vrot.lane.b32.xlu2 %v13611_v36, %s10693_s20 }
 0x703   : > { %v4605_v42 = vpop.xlane.xlu2 %4604  ;;  %v9865_v38 = vpop.eup %9864 }
 0x704   : > { %v4621_v0 = vmul.f32 %v9865_v38, %v13529_v3  ;;  %v4331_v47 = vpop.xlane.xlu1 %4330  ;;  %v9867_v52 = vpop.eup %9866 }
 0x705   : > { %9868 = vrcp.f32 %v4331_v47  ;;  %v4358_v3 = vmul.f32 %v9867_v52, %v13514_v22 }
 0x706   : > { %v4628_v45 = vpack.c.bf16 %v4621_v0, %v4620_v33  ;;  %9870 = vrcp.f32 %v4596_v31 }
 0x707   : > { %5771 = vrot.lane.b32.xlu0 %v13577_v57, %s10694_s30  ;;  %9872 = vrcp.f32 %v4599_v43 }
 0x708   : > { %8930 = vmatmul.msk.bf16.vlgmr.msrb.gmra.mxu1 %vm2980_vm2, %v4628_v45 }
 0x70a   : > { %v13753_v54 = vpop.f32.mrf.mxu3 }
 0x70b   : > { %v4897_v36 = vpop.permute.xlu2 %4896  ;;  %v9869_v12 = vpop.eup %9868 }
 0x70c   : > { %v13747_v50 = vpop.f32.mrf.mxu1  ;;  %4924 = vmatpush.bf16.msrb.mxu3 %v4897_v36  ;;  %v4359_v26 = vmul.f32 %v9869_v12, %v13553_v13  ;;  %v4334_v32 = vpop.xlane.xlu1 %4333  ;;  %v4833_v13 = vsub.f32 %v13424_v24, %v13707_v5 }
 0x70d   : > { %6822 = vrot.lane.b32.xlu1 %v13661_v39, %s10695_s26  ;;  %v9871_v34 = vpop.eup %9870  ;;  %9874 = vrcp.f32 %v4334_v32  ;;  %v5426_v39 = vsel %vm2918_vm1, %v13537_v20, 0  ;;  %v4831_v20 = vsub.f32 %v13472_v15, %v13699_v59  ;;  %v4832_v59 = vsub.f32 %v13510_v27, %v13725_v30 }
 0x70e   : > { %v4366_v57 = vpack.c.bf16 %v4359_v26, %v4358_v3  ;;  %v9873_v21 = vpop.eup %9872  ;;  %v4622_v43 = vmul.f32 %v9871_v34, %v13534_v2  ;;  %9876 = vrcp.f32 %v4337_v9  ;;  %5435 = vmatpush.bf16.xpose.msra.mxu2 %v5426_v39  ;;  %v4848_v47 = vmul.f32 1.442695, %v4833_v13  ;;  %v9295_v34 = vld [vmem:[%s11055_s24 + $0x30] sm:$0xff] }
 0x70f   : > { %v4623_v22 = vmul.f32 %v9873_v21, %v13506_v16  ;;  %v4844_v36 = vmul.f32 1.442695, %v4831_v20  ;;  %v4846_v32 = vmul.f32 1.442695, %v4832_v59 }
 0x710   : > { %8922 = vmatmul.msk.bf16.vlgmr.msra.gmra.mxu3 %vm2980_vm2, %v4366_v57 }
 0x711   : > { %v4629_v38 = vpack.c.bf16 %v4623_v22, %v4622_v43  ;;  %v9294_v22 = vld [vmem:[%s11055_s24 + $0x28] sm:$0xff] }
 0x712   : > { %v13765_v45 = vpop.f32.mrf.mxu3 }
 0x713   : > { %v4895_v29 = vpop.permute.xlu0 %4894  ;;  %v9875_v33 = vpop.eup %9874 }
 0x714   : > { %v13756_v58 = vpop.f32.mrf.mxu1  ;;  %4925 = vmatpush.bf16.msrb.mxu3 %v4895_v29  ;;  %v4602_v18 = vpop.xlane.xlu1 %4601  ;;  %v4360_v16 = vmul.f32 %v9875_v33, %v13573_v48 }
 0x715   : > { %v9877_v0 = vpop.eup %9876  ;;  %9878 = vrcp.f32 %v4602_v18 }
 0x716   : > { %9880 = vrcp.f32 %v4605_v42  ;;  %v4361_v24 = vmul.f32 %v9877_v0, %v13525_v46  ;;  %v4830_v46 = vsub.f32 %v13442_v37, %v13676_v19  ;;  %v9293_v0 = vld [vmem:[%s11055_s24 + $0x20] sm:$0xff] }
 0x717   : > { %9882 = vpow2.f32 %v4848_v47  ;;  %v9292_v47 = vld [vmem:[%s11055_s24 + $0x18] sm:$0xff] }
 0x718   : > { %8931 = vmatmul.msk.bf16.gmra.mxu1 %vm2980_vm2, %v4629_v38  ;;  %v4367_v5 = vpack.c.bf16 %v4361_v24, %v4360_v16  ;;  %9884 = vpow2.f32 %v4844_v36  ;;  %v9291_v16 = vld [vmem:[%s11055_s24 + $0x10] sm:$0xff]  ;;  %v9289_v36 = vld [vmem:[%s11055_s24] sm:$0xff] }
 0x71a   : > { %v13779_v48 = vpop.f32.mrf.mxu3 }
 0x71b   : > { %v9879_v9 = vpop.eup %9878 }
 0x71c   : > { %v13767_v2 = vpop.f32.mrf.mxu1  ;;  %v9881_v31 = vpop.eup %9880  ;;  %v4624_v12 = vmul.f32 %v9879_v9, %v13586_v14  ;;  %v4842_v14 = vmul.f32 1.442695, %v4830_v46  ;;  %v9290_v9 = vld [vmem:[%s11055_s24 + $0x8] sm:$0xff] }
 0x71d   : > { %v13777_v3 = vpop.eup %9882  ;;  %v4625_v15 = vmul.f32 %v9881_v31, %v13549_v44  ;;  %v9296_v44 = vld [vmem:[%s11055_s24 + $0x38] sm:$0xff]  ;;  %v4340_v19 = vpop.xlane.xlu1 %4339 }
 0x71e   : > { %v4871_v42 = vsel %vm2980_vm2, %v13777_v3, 0.0  ;;  %v13790_v37 = vpop.eup %9884  ;;  %9886 = vpow2.f32 %v4842_v14  ;;  %5059 = vmatpush.bf16.msra.mxu0 %v9296_v44 }
 0x71f   : > { %v4630_v26 = vpack.c.bf16 %v4625_v15, %v4624_v12  ;;  %9888 = vpow2.f32 %v4846_v32  ;;  %v4865_v30 = vsel %vm2980_vm2, %v13790_v37, 0.0 }
 0x720   : > { %8923 = vmatmul.msk.bf16.gmra.mxu3 %vm2980_vm2, %v4367_v5  ;;  %9890 = vrcp.f32 %v4340_v19 }
 0x722   : > { %v13793_v27 = vpop.f32.mrf.mxu3  ;;  %5060 = vmatpush.bf16.msra.mxu0 %v9295_v34 }
 0x724   : > { %v13774_v52 = vpop.f32.mrf.mxu1  ;;  %v13798_v29 = vpop.eup %9886 }
 0x725   : > { %v13801_v43 = vpop.eup %9888  ;;  %v4862_v18 = vsel %vm2980_vm2, %v13798_v29, 0.0 }
 0x726   : > { %5061 = vmatpush.bf16.msra.mxu0 %v9294_v22  ;;  %v4868_v38 = vsel %vm2980_vm2, %v13801_v43, 0.0  ;;  %v9891_v31 = vpop.eup %9890 }
 0x727   : > { %v4362_v46 = vmul.f32 %v9891_v31, %v13598_v63 }
 0x728   : > { %8932 = vmatmul.msk.bf16.gmra.mxu1 %vm2980_vm2, %v4630_v26 }
 0x72a   : > { %4872 = vadd.xlane.f32.xlu2 %v4871_v42  ;;  %v13809_v33 = vpop.f32.mrf.mxu3  ;;  %5062 = vmatpush.bf16.msra.mxu0 %v9293_v0 }
 0x72c   : > { %v4173_v57 = vpop.f32.mrf.mxu1 }
 0x72d   : > { %4193 = vst.msk [vmem:[#allocation3 + $0x40] sm:$0xff] %vm2918_vm1, %v4173_v57 }
 0x72e   : > { %5063 = vmatpush.bf16.msra.mxu0 %v9292_v47 }
 0x731   : > { %4866 = vadd.xlane.f32.xlu0 %v4865_v30 }
 0x732   : > { %v3365_v24 = vpop.f32.mrf.mxu3  ;;  %5064 = vmatpush.bf16.msra.mxu0 %v9291_v16 }
 0x734   : > { %v4175_v21 = vpop.f32.mrf.mxu1  ;;  %v5623_v13 = vpop.permute.xlu1 %5622 }
 0x735   : > { %4194 = vst.msk [vmem:[#allocation3 + $0x48] sm:$0xff] %vm2918_vm1, %v4175_v21  ;;  %v5637_v39 = vsel %vm2918_vm1, %v5623_v13, 0 }
 0x736   : > { %5646 = vmatpush.bf16.xpose.msrb.mxu2 %v5637_v39  ;;  %5065 = vmatpush.bf16.msra.mxu0 %v9290_v9 }
 0x737   : > { %4863 = vadd.xlane.f32.xlu1 %v4862_v18 }
 0x739   : > { %4869 = vadd.xlane.f32.xlu0 %v4868_v38 }
 0x73a   : > { %5066 = vmatpush.bf16.msra.mxu0 %v9289_v36 }
 0x73e   : > { %v4608_v5 = vpop.xlane.xlu0 %4607 }
 0x73f   : > { %v3874_v15 = vpop.f32.mrf.mxu3 }
 0x742   : > { %3639 = vrot.lane.b32.xlu2 %v13701_v11, %s10695_s26 }
 0x744   : > { %v4343_v20 = vpop.xlane.xlu2 %4342 }
 0x745   : > { %9892 = vrcp.f32 %v4343_v20  ;;  %v16052_v20 = vld [vmem:[#allocation104_spill] sm:$0xff] }
 0x746   : > { %v4349_v26 = vpop.xlane.xlu0 %4348 }
 0x747   : > { %v3876_v63 = vpop.f32.mrf.mxu3 }
 0x74a   : > { %3643 = vrot.lane.b32.xlu2 %v13729_v49, %s10695_s26 }
 0x74b   : > { %v9893_v12 = vpop.eup %9892 }
 0x74c   : > { %v4363_v11 = vmul.f32 %v9893_v12, %v13651_v10  ;;  %v4346_v59 = vpop.xlane.xlu2 %4345 }
 0x74d   : > { %3378 = vrot.lane.b32.xlu0 %v13744_v61, %s10693_s20  ;;  %9894 = vrcp.f32 %v4346_v59 }
 0x74e   : > { %v4368_v42 = vpack.c.bf16 %v4363_v11, %v4362_v46  ;;  %9896 = vrcp.f32 %v4349_v26  ;;  %v4858_v32 = vpop.xlane.xlu0 %4857 }
 0x74f   : > { %9898 = vrcp.f32 %v4608_v5 }
 0x750   : > { %8924 = vmatmul.msk.bf16.gmra.mxu3 %vm2980_vm2, %v4368_v42  ;;  %3641 = vrot.lane.b32.xlu1 %v13717_v8, %s10695_s26 }
 0x751   : > { %v4178_v14 = vpop.f32.mrf.mxu1 }
 0x752   : > { %3647 = vrot.lane.b32.xlu2 %v13747_v50, %s10695_s26  ;;  %4195 = vst.msk [vmem:[#allocation3 + $0x50] sm:$0xff] %vm2918_vm1, %v4178_v14  ;;  %v16054_v14 = vld [vmem:[#allocation108_spill] sm:$0xff] }
 0x753   : > { %v9895_v10 = vpop.eup %9894 }
 0x754   : > { %v9897_v49 = vpop.eup %9896  ;;  %v4364_v61 = vmul.f32 %v9895_v10, %v13666_v60  ;;  %v16055_v10 = vld [vmem:[#allocation106_spill] sm:$0xff] }
 0x755   : > { %3382 = vrot.lane.b32.xlu0 %v13765_v45, %s10693_s20  ;;  %v4365_v8 = vmul.f32 %v9897_v49, %v13653_v55  ;;  %v5572_v55 = vsel %vm5570_vm3, %v13563_v25, 0  ;;  %v5126_v49 = vmul.f32 %v16055_v10, %v16055_v10 }
 0x756   : > { %5581 = vmatpush.bf16.msra.mxu3 %v5572_v55 }
 0x757   : > { %v4369_v45 = vpack.c.bf16 %v4365_v8, %v4364_v61 }
 0x758   : > { %3376 = vrot.lane.b32.xlu1 %v13733_v41, %s10693_s20 }
 0x759   : > { %v4180_v57 = vpop.f32.mrf.mxu1 }
 0x75a   : > { %3651 = vrot.lane.b32.xlu2 %v13767_v2, %s10695_s26  ;;  %4196 = vst.msk [vmem:[#allocation3 + $0x58] sm:$0xff] %vm2918_vm1, %v4180_v57  ;;  %v4855_v2 = vpop.xlane.xlu2 %4854  ;;  %v16056_v57 = vld [vmem:[#allocation112_spill] sm:$0xff] }
 0x75b   : > { %v3879_v50 = vpop.f32.mrf.mxu3  ;;  %v5129_v8 = vmul.f32 %v16056_v57, %v16056_v57 }
 0x75d   : > { %3386 = vrot.lane.b32.xlu0 %v13793_v27, %s10693_s20  ;;  %v9899_v27 = vpop.eup %9898 }
 0x75e   : > { %v4626_v21 = vmul.f32 %v9899_v27, %v13643_v6 }
 0x75f   : > { %v4611_v60 = vpop.xlane.xlu1 %4610 }
 0x760   : > { %8925 = vmatmul.msk.bf16.gmra.mxu3 %vm2980_vm2, %v4369_v45  ;;  %9900 = vrcp.f32 %v4611_v60  ;;  %3645 = vrot.lane.b32.xlu1 %v13738_v53, %s10695_s26  ;;  %v16057_v45 = vld [vmem:[#allocation110_spill] sm:$0xff] }
 0x761   : > { %v5869_v44 = vpop.permute.xlu0 %5868  ;;  %9902 = vrcp.f32 %v4855_v2  ;;  %v5128_v60 = vmul.f32 %v16057_v45, %v16057_v45 }
 0x762   : > { %3904 = vrot.lane.b32.xlu2 %v3876_v63, %s10694_s30  ;;  %v5883_v41 = vsel %vm2918_vm1, %v5869_v44, 0  ;;  %v5127_v63 = vmul.f32 %v16054_v14, %v16054_v14 }
 0x763   : > { %5892 = vmatpush.bf16.xpose.msrb.mxu0 %v5883_v41  ;;  %v3881_v19 = vpop.f32.mrf.mxu3 }
 0x765   : > { %3390 = vrot.lane.b32.xlu0 %v3365_v24, %s10693_s20  ;;  %v4183_v30 = vpop.f32.mrf.mxu1 }
 0x766   : > { %v9901_v34 = vpop.eup %9900  ;;  %4197 = vst.msk [vmem:[#allocation3 + $0x60] sm:$0xff] %vm2918_vm1, %v4183_v30  ;;  %v16058_v30 = vld [vmem:[#allocation116_spill] sm:$0xff] }
 0x767   : > { %v4627_v53 = vmul.f32 %v9901_v34, %v13705_v62  ;;  %v4852_v22 = vpop.xlane.xlu1 %4851  ;;  %v9903_v18 = vpop.eup %9902  ;;  %v5131_v34 = vmul.f32 %v16058_v30, %v16058_v30 }
 0x768   : > { %9904 = vrcp.f32 %v4852_v22  ;;  %3380 = vrot.lane.b32.xlu1 %v13753_v54, %s10693_s20  ;;  %v4883_v62 = vmul.f32 %v9903_v18, %v13684_v35  ;;  %v4861_v54 = vpop.xlane.xlu2 %4860  ;;  %v5125_v35 = vmul.f32 %v16052_v20, %v16052_v20 }
 0x769   : > { %v13853_v25 = vpop.permute.xlu0 %6576  ;;  %v4631_v13 = vpack.c.bf16 %v4627_v53, %v4626_v21  ;;  %9906 = vrcp.f32 %v4861_v54  ;;  %v16059_v53 = vld [vmem:[#allocation114_spill] sm:$0xff] }
 0x76a   : > { %3908 = vrot.lane.b32.xlu2 %v3881_v19, %s10694_s30  ;;  %9908 = vrcp.f32 %v4858_v32  ;;  %v5130_v22 = vmul.f32 %v16059_v53, %v16059_v53 }
 0x76b   : > { %v3884_v39 = vpop.f32.mrf.mxu3  ;;  %8933 = vmatmul.msk.bf16.gmra.mxu1 %vm2980_vm2, %v4631_v13 }
 0x76d   : > { %3902 = vrot.lane.b32.xlu0 %v3874_v15, %s10694_s30  ;;  %v4185_v38 = vpop.f32.mrf.mxu1 }
 0x76e   : > { %v9905_v6 = vpop.eup %9904  ;;  %4198 = vst.msk [vmem:[#allocation3 + $0x68] sm:$0xff] %vm2918_vm1, %v4185_v38 }
 0x76f   : > { %v4882_v0 = vmul.f32 %v9905_v6, %v13715_v56  ;;  %v16053_v56 = vld [vmem:[#allocation102_spill] sm:$0xff]  ;;  %v9907_v12 = vpop.eup %9906 }
 0x770   : > { %3649 = vrot.lane.b32.xlu1 %v13756_v58, %s10695_s26  ;;  %v5124_v58 = vmul.f32 %v16053_v56, %v16053_v56  ;;  %v9909_v15 = vpop.eup %9908  ;;  %v4885_v11 = vmul.f32 %v9907_v12, %v13693_v4  ;;  %v13894_v61 = vpop.permute.xlu2 %6114 }
 0x771   : > { %v13862_v47 = vpop.permute.xlu0 %7068  ;;  %v4890_v16 = vpack.c.bf16 %v4883_v62, %v4882_v0  ;;  %v4884_v42 = vmul.f32 %v9909_v15, %v13672_v23  ;;  %v5141_v23 = vpack.c.bf16 %v5127_v63, %v5126_v49 }
 0x772   : > { %v5140_v36 = vpack.c.bf16 %v5125_v35, %v5124_v58 }
 0x773   : > { %v3886_v24 = vpop.f32.mrf.mxu3  ;;  %8938 = vmatmul.msk.bf16.vlgmr.msrb.gmra.mxu3 %vm2980_vm2, %v4890_v16 }
 0x774   : > { %3912 = vrot.lane.b32.xlu2 %v3886_v24, %s10694_s30 }
 0x775   : > { %3906 = vrot.lane.b32.xlu0 %v3879_v50, %s10694_s30  ;;  %v4188_v5 = vpop.f32.mrf.mxu1 }
 0x776   : > { %4199 = vst.msk [vmem:[#allocation3 + $0x70] sm:$0xff] %vm2918_vm1, %v4188_v5 }
 0x778   : > { %3384 = vrot.lane.b32.xlu1 %v13779_v48, %s10693_s20  ;;  %v4891_v48 = vpack.c.bf16 %v4885_v11, %v4884_v42 }
 0x779   : > { %v5772_v9 = vpop.permute.xlu0 %5771 }
 0x77a   : > { %v5786_v31 = vsel %vm5570_vm3, %v5772_v9, 0  ;;  %v16060_v9 = vld [vmem:[#allocation119_spill] sm:$0xff] }
 0x77b   : > { %5795 = vmatpush.bf16.msrb.mxu3 %v5786_v31  ;;  %v3889_v46 = vpop.f32.mrf.mxu3  ;;  %5156 = vmatmul.bf16.vlgmr.msra.gmra.mxu1 %v5140_v36  ;;  %v5133_v31 = vmul.f32 %v16060_v9, %v16060_v9  ;;  %v16061_v36 = vld [vmem:[#allocation118_spill] sm:$0xff] }
 0x77c   : > { %v5132_v12 = vmul.f32 %v16061_v36, %v16061_v36 }
 0x77d   : > { %3910 = vrot.lane.b32.xlu0 %v3884_v39, %s10694_s30  ;;  %v4190_v59 = vpop.f32.mrf.mxu1  ;;  %v5143_v39 = vpack.c.bf16 %v5131_v34, %v5130_v22 }
 0x77e   : > { %4200 = vst.msk [vmem:[#allocation3 + $0x78] sm:$0xff] %vm2918_vm1, %v4190_v59 }
 0x77f   : > { %v13903_v2 = vpop.permute.xlu1 %6822 }
 0x780   : > { %3653 = vrot.lane.b32.xlu1 %v13774_v52, %s10695_s26 }
 0x783   : > { %v3891_v26 = vpop.f32.mrf.mxu3  ;;  %8939 = vmatmul.msk.bf16.gmra.mxu3 %vm2980_vm2, %v4891_v48 }
 0x784   : > { %3916 = vrot.lane.b32.xlu2 %v3891_v26, %s10694_s30 }
 0x785   : > { %3914 = vrot.lane.b32.xlu0 %v3889_v46, %s10694_s30  ;;  %v4665_v4 = vpop.f32.mrf.mxu1 }
 0x788   : > { %3388 = vrot.lane.b32.xlu1 %v13809_v33, %s10693_s20  ;;  %v5142_v33 = vpack.c.bf16 %v5129_v8, %v5128_v60 }
 0x78b   : > { %5161 = vmatmul.bf16.gmra.mxu1 %v5141_v23 }
 0x78d   : > { %v4667_v52 = vpop.f32.mrf.mxu1 }
 0x78e   : > { %4695 = vrot.lane.b32.xlu0 %v4667_v52, %s10695_s26 }
 0x790   : > { %4693 = vrot.lane.b32.xlu1 %v4665_v4, %s10695_s26  ;;  %v16062_v4 = vld [vmem:[#allocation121_spill] sm:$0xff] }
 0x791   : > { %v5135_v49 = vmul.f32 %v16062_v4, %v16062_v4 }
 0x793   : > { %v4403_v32 = vpop.f32.mrf.mxu3 }
 0x795   : > { %v4670_v50 = vpop.f32.mrf.mxu1 }
 0x796   : > { %4431 = vrot.lane.b32.xlu0 %v4403_v32, %s10693_s20 }
 0x79b   : > { %v4405_v41 = vpop.f32.mrf.mxu3  ;;  %5166 = vmatmul.bf16.gmra.mxu1 %v5142_v33 }
 0x79c   : > { %4433 = vrot.lane.b32.xlu2 %v4405_v41, %s10693_s20 }
 0x79d   : > { %v4873_v44 = vpop.xlane.xlu2 %4872  ;;  %v4672_v55 = vpop.f32.mrf.mxu1 }
 0x79e   : > { %4697 = vrot.lane.b32.xlu0 %v4670_v50, %s10695_s26 }
 0x7a3   : > { %v4408_v27 = vpop.f32.mrf.mxu3 }
 0x7a4   : > { %4699 = vrot.lane.b32.xlu2 %v4672_v55, %s10695_s26  ;;  %v4867_v21 = vpop.xlane.xlu0 %4866 }
 0x7a5   : > { %v3640_v19 = vpop.permute.xlu2 %3639  ;;  %9910 = vrcp.f32 %v4867_v21  ;;  %v4675_v13 = vpop.f32.mrf.mxu1 }
 0x7aa   : > { %v4864_v18 = vpop.xlane.xlu1 %4863 }
 0x7ab   : > { %9912 = vrcp.f32 %v4864_v18  ;;  %v4410_v38 = vpop.f32.mrf.mxu3  ;;  %5171 = vmatmul.bf16.gmra.mxu1 %v5143_v39  ;;  %v9911_v62 = vpop.eup %9910 }
 0x7ac   : > { %4435 = vrot.lane.b32.xlu2 %v4408_v27, %s10693_s20  ;;  %4437 = vrot.lane.b32.xlu1 %v4410_v38, %s10693_s20  ;;  %v4887_v54 = vmul.f32 %v9911_v62, %v13790_v37  ;;  %v4870_v5 = vpop.xlane.xlu0 %4869  ;;  %v5144_v37 = vpack.c.bf16 %v5133_v31, %v5132_v12  ;;  %v16065_v27 = vld [vmem:[#allocation122_spill] sm:$0xff]  ;;  %v16066_v62 = vld [vmem:[#allocation125_spill] sm:$0xff] }
 0x7ad   : > { %v13910_v6 = vpop.permute.xlu2 %3643  ;;  %v4677_v24 = vpop.f32.mrf.mxu1  ;;  %9914 = vrcp.f32 %v4870_v5 }
 0x7ae   : > { %9916 = vrcp.f32 %v4873_v44  ;;  %v16064_v44 = vld [vmem:[#allocation123_spill] sm:$0xff] }
 0x7af   : > { %v5137_v41 = vmul.f32 %v16064_v44, %v16064_v44 }
 0x7b1   : > { %v9913_v0 = vpop.eup %9912 }
 0x7b2   : > { %v4886_v16 = vmul.f32 %v9913_v0, %v13798_v29  ;;  %v5139_v0 = vmul.f32 %v16066_v62, %v16066_v62 }
 0x7b3   : > { %v9915_v46 = vpop.eup %9914 }
 0x7b4   : > { %4701 = vrot.lane.b32.xlu2 %v4675_v13, %s10695_s26  ;;  %4703 = vrot.lane.b32.xlu1 %v4677_v24, %s10695_s26  ;;  %v4892_v58 = vpack.c.bf16 %v4887_v54, %v4886_v16  ;;  %v9917_v11 = vpop.eup %9916  ;;  %v4888_v59 = vmul.f32 %v9915_v46, %v13801_v43  ;;  %v16063_v43 = vld [vmem:[#allocation120_spill] sm:$0xff] }
 0x7b5   : > { %v13916_v35 = vpop.permute.xlu2 %3647  ;;  %v4889_v42 = vmul.f32 %v9917_v11, %v13777_v3  ;;  %v5134_v52 = vmul.f32 %v16063_v43, %v16063_v43 }
 0x7b6   : > { %8940 = vmatmul.msk.bf16.gmra.mxu3 %vm2980_vm2, %v4892_v58 }
 0x7b7   : > { %v4893_v63 = vpack.c.bf16 %v4889_v42, %v4888_v59  ;;  %v5145_v32 = vpack.c.bf16 %v5135_v49, %v5134_v52 }
 0x7bb   : > { %5176 = vmatmul.bf16.gmra.mxu1 %v5144_v37 }
 0x7bd   : > { %v13925_v29 = vpop.permute.xlu2 %3651 }
 0x7bf   : > { %v3379_v15 = vpop.permute.xlu0 %3378 }
 0x7c0   : > { %3402 = vst.msk [vmem:[#allocation3 + $0x8] sm:$0xff] %vm3400_vm4, %v3379_v15 }
 0x7c2   : > { %v3642_v48 = vpop.permute.xlu1 %3641 }
 0x7c3   : > { %3665 = vst.msk [vmem:[#allocation3 + $0x8] sm:$0xff] %vm3663_vm5, %v3642_v48 }
 0x7c5   : > { %v3905_v26 = vpop.permute.xlu2 %3904 }
 0x7c6   : > { %3928 = vst.msk [vmem:[#allocation3 + $0x8] sm:$0xff] %vm3926_vm6, %v3905_v26  ;;  %8941 = vmatmul.msk.bf16.gmra.mxu3 %vm2980_vm2, %v4893_v63 }
 0x7c7   : > { %v3383_v23 = vpop.permute.xlu0 %3382 }
 0x7c8   : > { %3404 = vst.msk [vmem:[#allocation3 + $0x18] sm:$0xff] %vm3400_vm4, %v3383_v23 }
 0x7ca   : > { %v3377_v3 = vpop.permute.xlu1 %3376 }
 0x7cb   : > { %3401 = vst.msk [vmem:[#allocation3] sm:$0xff] %vm3400_vm4, %v3377_v3  ;;  %5181 = vmatmul.bf16.gmra.mxu1 %v5145_v32 }
 0x7cc   : > { %3664 = vst.msk [vmem:[#allocation3] sm:$0xff] %vm3663_vm5, %v3640_v19  ;;  %v5136_v19 = vmul.f32 %v16065_v27, %v16065_v27 }
 0x7cd   : > { %v3909_v33 = vpop.permute.xlu2 %3908  ;;  %v4988_v24 = vld [vmem:[#allocation3 + $0x8] sm:$0xff] }
 0x7ce   : > { %v5146_v21 = vpack.c.bf16 %v5137_v41, %v5136_v19 }
 0x7cf   : > { %v3387_v8 = vpop.permute.xlu0 %3386 }
 0x7d0   : > { %3406 = vst.msk [vmem:[#allocation3 + $0x28] sm:$0xff] %vm3400_vm4, %v3387_v8 }
 0x7d2   : > { %v3646_v60 = vpop.permute.xlu1 %3645 }
 0x7d3   : > { %v4413_v50 = vpop.f32.mrf.mxu3  ;;  %3667 = vst.msk [vmem:[#allocation3 + $0x18] sm:$0xff] %vm3663_vm5, %v3646_v60 }
 0x7d4   : > { %4439 = vrot.lane.b32.xlu1 %v4413_v50, %s10693_s20  ;;  %3930 = vst.msk [vmem:[#allocation3 + $0x18] sm:$0xff] %vm3926_vm6, %v3909_v33 }
 0x7d5   : > { %v3913_v38 = vpop.permute.xlu2 %3912 }
 0x7d7   : > { %v3391_v55 = vpop.permute.xlu0 %3390 }
 0x7d8   : > { %3408 = vst.msk [vmem:[#allocation3 + $0x38] sm:$0xff] %vm3400_vm4, %v3391_v55 }
 0x7da   : > { %v3381_v22 = vpop.permute.xlu1 %3380 }
 0x7db   : > { %v4415_v34 = vpop.f32.mrf.mxu3  ;;  %3403 = vst.msk [vmem:[#allocation3 + $0x10] sm:$0xff] %vm3400_vm4, %v3381_v22  ;;  %5186 = vmatmul.bf16.gmra.mxu1 %v5146_v21  ;;  %v4990_v26 = vld [vmem:[#allocation3 + $0x18] sm:$0xff] }
 0x7dc   : > { %4441 = vrot.lane.b32.xlu0 %v4415_v34, %s10693_s20  ;;  %3666 = vst.msk [vmem:[#allocation3 + $0x10] sm:$0xff] %vm3663_vm5, %v13910_v6  ;;  %v16067_v6 = vld [vmem:[#allocation124_spill] sm:$0xff] }
 0x7dd   : > { %v5138_v58 = vmul.f32 %v16067_v6, %v16067_v6 }
 0x7de   : > { %v3917_v11 = vpop.permute.xlu2 %3916 }
 0x7df   : > { %v3903_v13 = vpop.permute.xlu0 %3902  ;;  %v5147_v37 = vpack.c.bf16 %v5139_v0, %v5138_v58 }
 0x7e0   : > { %3927 = vst.msk [vmem:[#allocation3] sm:$0xff] %vm3926_vm6, %v3903_v13 }
 0x7e2   : > { %v3650_v18 = vpop.permute.xlu1 %3649 }
 0x7e3   : > { %v4418_v39 = vpop.f32.mrf.mxu3  ;;  %3669 = vst.msk [vmem:[#allocation3 + $0x28] sm:$0xff] %vm3663_vm5, %v3650_v18 }
 0x7e4   : > { %3932 = vst.msk [vmem:[#allocation3 + $0x28] sm:$0xff] %vm3926_vm6, %v3913_v38 }
 0x7e7   : > { %v3907_v54 = vpop.permute.xlu0 %3906  ;;  %v4987_v16 = vld [vmem:[#allocation3] sm:$0xff] }
 0x7e8   : > { %3929 = vst.msk [vmem:[#allocation3 + $0x10] sm:$0xff] %vm3926_vm6, %v3907_v54  ;;  %v5003_v5 = vpack.c.bf16 %v4988_v24, %v4987_v16  ;;  %v4680_v31 = vpop.f32.mrf.mxu1 }
 0x7e9   : > { %4705 = vrot.lane.b32.xlu1 %v4680_v31, %s10695_s26 }
 0x7ea   : > { %5067 = vmatmul.bf16.vlgmr.msra.gmra.mxu0 %v5003_v5  ;;  %v3385_v46 = vpop.permute.xlu1 %3384 }
 0x7eb   : > { %v4420_v12 = vpop.f32.mrf.mxu3  ;;  %3405 = vst.msk [vmem:[#allocation3 + $0x20] sm:$0xff] %vm3400_vm4, %v3385_v46  ;;  %5191 = vmatmul.bf16.gmra.mxu1 %v5147_v37  ;;  %v4992_v21 = vld [vmem:[#allocation3 + $0x28] sm:$0xff] }
 0x7ec   : > { %4445 = vrot.lane.b32.xlu2 %v4420_v12, %s10693_s20  ;;  %3668 = vst.msk [vmem:[#allocation3 + $0x20] sm:$0xff] %vm3663_vm5, %v13916_v35 }
 0x7ef   : > { %v3911_v15 = vpop.permute.xlu0 %3910  ;;  %v4989_v48 = vld [vmem:[#allocation3 + $0x10] sm:$0xff] }
 0x7f0   : > { %3931 = vst.msk [vmem:[#allocation3 + $0x20] sm:$0xff] %vm3926_vm6, %v3911_v15  ;;  %v4682_v59 = vpop.f32.mrf.mxu1  ;;  %v5004_v23 = vpack.c.bf16 %v4990_v26, %v4989_v48 }
 0x7f1   : > { %4707 = vrot.lane.b32.xlu0 %v4682_v59, %s10695_s26 }
 0x7f2   : > { %v3654_v42 = vpop.permute.xlu1 %3653 }
 0x7f3   : > { %3671 = vst.msk [vmem:[#allocation3 + $0x38] sm:$0xff] %vm3663_vm5, %v3654_v42 }
 0x7f4   : > { %3934 = vst.msk [vmem:[#allocation3 + $0x38] sm:$0xff] %vm3926_vm6, %v3917_v11 }
 0x7f6   : > { %v4927_v63 = vpop.f32.mrf.mxu3  ;;  %v4434_v49 = vpop.permute.xlu2 %4433 }
 0x7f7   : > { %4456 = vst.msk [vmem:[#allocation3 + $0x48] sm:$0xff] %vm3400_vm4, %v4434_v49  ;;  %4955 = vrot.lane.b32.xlu1 %v4927_v63, %s10694_s30  ;;  %v3915_v35 = vpop.permute.xlu0 %3914  ;;  %v4991_v34 = vld [vmem:[#allocation3 + $0x20] sm:$0xff] }
 0x7f8   : > { %v5157_v52 = vpop.f32.mrf.mxu1 }
 0x7f9   : > { %v5158_v32 = vadd.f32 1.1920929e-07, %v5157_v52  ;;  %4443 = vrot.lane.b32.xlu0 %v4418_v39, %s10693_s20  ;;  %v5005_v39 = vpack.c.bf16 %v4992_v21, %v4991_v34 }
 0x7fa   : > { %5072 = vmatmul.bf16.gmra.mxu0 %v5004_v23  ;;  %v3389_v3 = vpop.permute.xlu1 %3388 }
 0x7fb   : > { %9918 = vrsqrt.f32 %v5158_v32  ;;  %3407 = vst.msk [vmem:[#allocation3 + $0x30] sm:$0xff] %vm3400_vm4, %v3389_v3  ;;  %vm5203_vm8 = vweird.f32 %v5158_v32  ;;  %v4994_v3 = vld [vmem:[#allocation3 + $0x38] sm:$0xff] }
 0x7fc   : > { %3670 = vst.msk [vmem:[#allocation3 + $0x30] sm:$0xff] %vm3663_vm5, %v13925_v29 }
 0x7fd   : > { %3933 = vst.msk [vmem:[#allocation3 + $0x30] sm:$0xff] %vm3926_vm6, %v3915_v35 }
 0x7fe   : > { %v4929_v8 = vpop.f32.mrf.mxu3  ;;  %v13977_v50 = vpop.permute.xlu2 %4699 }
 0x7ff   : > { %6017 = vrot.lane.b32.xlu1 %v13603_v17, %s10695_s26 }
 0x800   : > { %v4696_v60 = vpop.permute.xlu0 %4695  ;;  %v5159_v33 = vpop.f32.mrf.mxu1 }
 0x801   : > { %v9919_v41 = vpop.eup %9918  ;;  %4718 = vst.msk [vmem:[#allocation3 + $0x48] sm:$0xff] %vm3663_vm5, %v4696_v60  ;;  %v5160_v55 = vadd.f32 1.1920929e-07, %v5159_v33  ;;  %4957 = vrot.lane.b32.xlu0 %v4929_v8, %s10694_s30 }
 0x802   : > { %v5198_v19 = vmul.f32 %v9919_v41, %v5158_v32  ;;  %v4694_v16 = vpop.permute.xlu1 %4693  ;;  %vm5204_vm7 = vweird.f32 %v9919_v41 }
 0x803   : > { %9920 = vrsqrt.f32 %v5160_v55  ;;  %vm5205_vm9 = vmor %vm5203_vm8, %vm5204_vm7  ;;  %vm5213_vm11 = vweird.f32 %v5160_v55 }
 0x804   : > { %v5199_v29 = vmul.f32 %v9919_v41, %v5198_v19  ;;  %v4993_v49 = vld [vmem:[#allocation3 + $0x30] sm:$0xff] }
 0x805   : > { %v5006_v60 = vpack.c.bf16 %v4994_v3, %v4993_v49 }
 0x806   : > { %v5200_v22 = vmul.f32 0.5, %v5199_v29  ;;  %v4436_v13 = vpop.permute.xlu2 %4435  ;;  %v4932_v18 = vpop.f32.mrf.mxu3 }
 0x807   : > { %4457 = vst.msk [vmem:[#allocation3 + $0x50] sm:$0xff] %vm3400_vm4, %v4436_v13 }
 0x808   : > { %v5201_v17 = vsub.f32 1.5, %v5200_v22  ;;  %v4432_v38 = vpop.permute.xlu0 %4431  ;;  %v5162_v0 = vpop.f32.mrf.mxu1 }
 0x809   : > { %v9921_v54 = vpop.eup %9920  ;;  %4455 = vst.msk [vmem:[#allocation3 + $0x40] sm:$0xff] %vm3400_vm4, %v4432_v38  ;;  %v5163_v24 = vadd.f32 1.1920929e-07, %v5162_v0  ;;  %4959 = vrot.lane.b32.xlu0 %v4932_v18, %s10694_s30 }
 0x80a   : > { %5077 = vmatmul.bf16.gmra.mxu0 %v5005_v39  ;;  %v5202_v5 = vmul.f32 %v9919_v41, %v5201_v17  ;;  %v5208_v58 = vmul.f32 %v9921_v54, %v5160_v55  ;;  %4717 = vst.msk [vmem:[#allocation3 + $0x40] sm:$0xff] %vm3663_vm5, %v4694_v16  ;;  %vm5214_vm10 = vweird.f32 %v9921_v54 }
 0x80b   : > { %9922 = vrsqrt.f32 %v5163_v24  ;;  %vm5215_vm12 = vmor %vm5213_vm11, %vm5214_vm10  ;;  %vm5223_vm14 = vweird.f32 %v5163_v24 }
 0x80c   : > { %v5209_v31 = vmul.f32 %v9921_v54, %v5208_v58  ;;  %v5206_v12 = vsel %vm5205_vm9, %v9919_v41, %v5202_v5 }
 0x80d   : > { %v5357_v42 = vmul.f32 %v5206_v12, %v16053_v56 }
 0x80e   : > { %v5210_v37 = vmul.f32 0.5, %v5209_v31 }
 0x80f   : > { %v5373_v52 = vpack.c.bf16 %v5357_v42, %v5357_v42 }
 0x810   : > { %v5211_v46 = vsub.f32 1.5, %v5210_v37  ;;  %v4698_v15 = vpop.permute.xlu0 %4697  ;;  %v5164_v11 = vpop.f32.mrf.mxu1 }
 0x811   : > { %v9923_v59 = vpop.eup %9922  ;;  %4719 = vst.msk [vmem:[#allocation3 + $0x50] sm:$0xff] %vm3663_vm5, %v4698_v15  ;;  %v5165_v48 = vadd.f32 1.1920929e-07, %v5164_v11  ;;  %v5401_v34 = vunpack.c.l.b16 %v5373_v52  ;;  %v4934_v52 = vpop.f32.mrf.mxu3 }
 0x812   : > { %v5212_v26 = vmul.f32 %v9921_v54, %v5211_v46  ;;  %v5218_v63 = vmul.f32 %v9923_v59, %v5163_v24  ;;  %vm5224_vm13 = vweird.f32 %v9923_v59 }
 0x813   : > { %9924 = vrsqrt.f32 %v5165_v48  ;;  %vm5225_vm15 = vmor %vm5223_vm14, %vm5224_vm13  ;;  %vm5233_vm2 = vweird.f32 %v5165_v48 }
 0x814   : > { %v5216_v23 = vsel %vm5215_vm12, %v9921_v54, %v5212_v26  ;;  %v5219_v35 = vmul.f32 %v9923_v59, %v5218_v63 }
 0x815   : > { %v5358_v32 = vmul.f32 %v5216_v23, %v16052_v20  ;;  %v6129_v20 = vsel %vm2918_vm1, %v13894_v61, 0 }
 0x816   : > { %v5220_v8 = vmul.f32 0.5, %v5219_v35 }
 0x817   : > { %v5374_v33 = vpack.c.bf16 %v5358_v32, %v5358_v32 }
 0x818   : > { %v5221_v41 = vsub.f32 1.5, %v5220_v8  ;;  %v5167_v56 = vpop.f32.mrf.mxu1 }
 0x819   : > { %v9925_v19 = vpop.eup %9924  ;;  %v5402_v29 = vunpack.c.l.b16 %v5374_v33  ;;  %v5168_v55 = vadd.f32 1.1920929e-07, %v5167_v56 }
 0x81a   : > { %5082 = vmatmul.bf16.gmra.mxu0 %v5006_v60  ;;  %v5222_v21 = vmul.f32 %v9923_v59, %v5221_v41  ;;  %v5228_v22 = vmul.f32 %v9925_v19, %v5165_v48  ;;  %vm5234_vm0 = vweird.f32 %v9925_v19 }
 0x81b   : > { %v13990_v13 = vpack.c.b16 %v5402_v29, %v5401_v34  ;;  %9926 = vrsqrt.f32 %v5168_v55  ;;  %vm5235_vm7 = vmor %vm5233_vm2, %vm5234_vm0  ;;  %vm5243_vm9 = vweird.f32 %v5168_v55 }
 0x81c   : > { %v5229_v39 = vmul.f32 %v9925_v19, %v5228_v22  ;;  %v5226_v18 = vsel %vm5225_vm15, %v9923_v59, %v5222_v21 }
 0x81d   : > { %8974 = vmatmul.msk.bf16.vlgmr.msra.gmra.mxu2 %vm2918_vm1, %v13990_v13  ;;  %5611 = vrot.lane.b32.xlu2 %v13990_v13, %s10694_s30  ;;  %v5359_v16 = vmul.f32 %v5226_v18, %v16055_v10 }
 0x81e   : > { %v5230_v17 = vmul.f32 0.5, %v5229_v39  ;;  %6103 = vrot.lane.b32.xlu1 %v13990_v13, %s10693_s20  ;;  %6138 = vmatpush.bf16.xpose.msra.mxu2 %v6129_v20  ;;  %v4438_v38 = vpop.permute.xlu1 %4437 }
 0x81f   : > { %4458 = vst.msk [vmem:[#allocation3 + $0x58] sm:$0xff] %vm3400_vm4, %v4438_v38  ;;  %v5375_v37 = vpack.c.bf16 %v5359_v16, %v5359_v16  ;;  %v4702_v16 = vpop.permute.xlu2 %4701 }
 0x820   : > { %v5231_v0 = vsub.f32 1.5, %v5230_v17  ;;  %4720 = vst.msk [vmem:[#allocation3 + $0x58] sm:$0xff] %vm3663_vm5, %v13977_v50  ;;  %v5169_v61 = vpop.f32.mrf.mxu1 }
 0x821   : > { %v9927_v54 = vpop.eup %9926  ;;  %v5170_v24 = vadd.f32 1.1920929e-07, %v5169_v61  ;;  %v5403_v26 = vunpack.c.l.b16 %v5375_v37 }
 0x822   : > { %v5232_v5 = vmul.f32 %v9925_v19, %v5231_v0  ;;  %v5238_v58 = vmul.f32 %v9927_v54, %v5168_v55  ;;  %vm5244_vm8 = vweird.f32 %v9927_v54 }
 0x823   : > { %9928 = vrsqrt.f32 %v5170_v24  ;;  %vm5245_vm10 = vmor %vm5243_vm9, %vm5244_vm8  ;;  %vm5253_vm12 = vweird.f32 %v5170_v24 }
 0x824   : > { %v5236_v31 = vsel %vm5235_vm7, %v9925_v19, %v5232_v5  ;;  %v5239_v12 = vmul.f32 %v9927_v54, %v5238_v58 }
 0x825   : > { %6263 = vrot.lane.b32.xlu2 %v13623_v51, %s10693_s20  ;;  %v5360_v46 = vmul.f32 %v5236_v31, %v16054_v14 }
 0x826   : > { %v5240_v15 = vmul.f32 0.5, %v5239_v12 }
 0x827   : > { %v5376_v50 = vpack.c.bf16 %v5360_v46, %v5360_v46 }
 0x828   : > { %v5241_v11 = vsub.f32 1.5, %v5240_v15  ;;  %v5172_v59 = vpop.f32.mrf.mxu1 }
 0x829   : > { %v9929_v42 = vpop.eup %9928  ;;  %v5173_v10 = vadd.f32 1.1920929e-07, %v5172_v59  ;;  %v5404_v63 = vunpack.c.l.b16 %v5376_v50 }
 0x82a   : > { %v5242_v48 = vmul.f32 %v9927_v54, %v5241_v11  ;;  %v5248_v49 = vmul.f32 %v9929_v42, %v5170_v24  ;;  %vm5254_vm11 = vweird.f32 %v9929_v42  ;;  %v4704_v24 = vpop.permute.xlu1 %4703 }
 0x82b   : > { %9930 = vrsqrt.f32 %v5173_v10  ;;  %v14007_v23 = vpack.c.b16 %v5404_v63, %v5403_v26  ;;  %vm5255_vm13 = vmor %vm5253_vm12, %vm5254_vm11  ;;  %vm5263_vm15 = vweird.f32 %v5173_v10 }
 0x82c   : > { %v5249_v35 = vmul.f32 %v9929_v42, %v5248_v49  ;;  %v5246_v51 = vsel %vm5245_vm10, %v9927_v54, %v5242_v48 }
 0x82d   : > { %8975 = vmatmul.msk.bf16.gmra.mxu2 %vm2918_vm1, %v14007_v23  ;;  %5613 = vrot.lane.b32.xlu1 %v14007_v23, %s10694_s30  ;;  %v5361_v60 = vmul.f32 %v5246_v51, %v16057_v45 }
 0x82e   : > { %v5250_v14 = vmul.f32 0.5, %v5249_v35  ;;  %5859 = vrot.lane.b32.xlu0 %v14007_v23, %s10695_s26  ;;  %4961 = vrot.lane.b32.xlu2 %v4934_v52, %s10694_s30 }
 0x82f   : > { %v5377_v29 = vpack.c.bf16 %v5361_v60, %v5361_v60 }
 0x830   : > { %v5251_v32 = vsub.f32 1.5, %v5250_v14  ;;  %v5174_v3 = vpop.f32.mrf.mxu1 }
 0x831   : > { %v9931_v8 = vpop.eup %9930  ;;  %v5175_v33 = vadd.f32 1.1920929e-07, %v5174_v3  ;;  %v5405_v38 = vunpack.c.l.b16 %v5377_v29 }
 0x832   : > { %v5252_v41 = vmul.f32 %v9929_v42, %v5251_v32  ;;  %v5258_v56 = vmul.f32 %v9931_v8, %v5173_v10  ;;  %vm5264_vm14 = vweird.f32 %v9931_v8 }
 0x833   : > { %9932 = vrsqrt.f32 %v5175_v33  ;;  %vm5265_vm0 = vmor %vm5263_vm15, %vm5264_vm14  ;;  %vm5273_vm7 = vweird.f32 %v5175_v33 }
 0x834   : > { %v5256_v19 = vsel %vm5255_vm13, %v9929_v42, %v5252_v41  ;;  %v5259_v34 = vmul.f32 %v9931_v8, %v5258_v56 }
 0x835   : > { %v5362_v55 = vmul.f32 %v5256_v19, %v16056_v57 }
 0x836   : > { %v5260_v21 = vmul.f32 0.5, %v5259_v34  ;;  %5857 = vrot.lane.b32.xlu2 %v13990_v13, %s10695_s26 }
 0x837   : > { %v5378_v22 = vpack.c.bf16 %v5362_v55, %v5362_v55 }
 0x838   : > { %v5261_v39 = vsub.f32 1.5, %v5260_v21  ;;  %v5177_v20 = vpop.f32.mrf.mxu1 }
 0x839   : > { %v9933_v18 = vpop.eup %9932  ;;  %v5178_v45 = vadd.f32 1.1920929e-07, %v5177_v20  ;;  %v4937_v17 = vpop.f32.mrf.mxu3  ;;  %v5406_v0 = vunpack.c.l.b16 %v5378_v22 }
 0x83a   : > { %v5262_v61 = vmul.f32 %v9931_v8, %v5261_v39  ;;  %v5268_v54 = vmul.f32 %v9933_v18, %v5175_v33  ;;  %vm5274_vm2 = vweird.f32 %v9933_v18 }
 0x83b   : > { %9934 = vrsqrt.f32 %v5178_v45  ;;  %v14020_v5 = vpack.c.b16 %v5406_v0, %v5405_v38  ;;  %vm5275_vm8 = vmor %vm5273_vm7, %vm5274_vm2  ;;  %vm5283_vm10 = vweird.f32 %v5178_v45 }
 0x83c   : > { %v5269_v57 = vmul.f32 %v9933_v18, %v5268_v54  ;;  %v5266_v13 = vsel %vm5265_vm0, %v9931_v8, %v5262_v61 }
 0x83d   : > { %8976 = vmatmul.msk.bf16.gmra.mxu2 %vm2918_vm1, %v14020_v5  ;;  %5615 = vrot.lane.b32.xlu0 %v14020_v5, %s10694_s30  ;;  %v5363_v46 = vmul.f32 %v5266_v13, %v16059_v53 }
 0x83e   : > { %v5270_v58 = vmul.f32 0.5, %v5269_v57  ;;  %4963 = vrot.lane.b32.xlu2 %v4937_v17, %s10694_s30 }
 0x83f   : > { %v5379_v48 = vpack.c.bf16 %v5363_v46, %v5363_v46 }
 0x840   : > { %v5271_v31 = vsub.f32 1.5, %v5270_v58  ;;  %v5179_v12 = vpop.f32.mrf.mxu1 }
 0x841   : > { %v9935_v37 = vpop.eup %9934  ;;  %v5180_v15 = vadd.f32 1.1920929e-07, %v5179_v12  ;;  %v4939_v50 = vpop.f32.mrf.mxu3  ;;  %v5407_v8 = vunpack.c.l.b16 %v5379_v48 }
 0x842   : > { %v5272_v11 = vmul.f32 %v9933_v18, %v5271_v31  ;;  %v5278_v59 = vmul.f32 %v9935_v37, %v5178_v45  ;;  %4965 = vrot.lane.b32.xlu1 %v4939_v50, %s10694_s30  ;;  %vm5284_vm9 = vweird.f32 %v9935_v37 }
 0x843   : > { %9936 = vrsqrt.f32 %v5180_v15  ;;  %vm5285_vm11 = vmor %vm5283_vm10, %vm5284_vm9  ;;  %vm5293_vm13 = vweird.f32 %v5180_v15 }
 0x844   : > { %v5276_v26 = vsel %vm5275_vm8, %v9933_v18, %v5272_v11  ;;  %v5279_v63 = vmul.f32 %v9935_v37, %v5278_v59 }
 0x845   : > { %v5364_v53 = vmul.f32 %v5276_v26, %v16058_v30 }
 0x846   : > { %v4440_v42 = vpop.permute.xlu1 %4439  ;;  %v4446_v10 = vpop.permute.xlu2 %4445  ;;  %v5280_v49 = vmul.f32 0.5, %v5279_v63  ;;  %6107 = vrot.lane.b32.xlu2 %v14020_v5, %s10693_s20 }
 0x847   : > { %4459 = vst.msk [vmem:[#allocation3 + $0x60] sm:$0xff] %vm3400_vm4, %v4440_v42  ;;  %v5380_v35 = vpack.c.bf16 %v5364_v53, %v5364_v53 }
 0x848   : > { %4721 = vst.msk [vmem:[#allocation3 + $0x60] sm:$0xff] %vm3663_vm5, %v4702_v16  ;;  %v5281_v52 = vsub.f32 1.5, %v5280_v49  ;;  %v5182_v51 = vpop.f32.mrf.mxu1 }
 0x849   : > { %4462 = vst.msk [vmem:[#allocation3 + $0x78] sm:$0xff] %vm3400_vm4, %v4446_v10  ;;  %v9937_v14 = vpop.eup %9936  ;;  %v5183_v32 = vadd.f32 1.1920929e-07, %v5182_v51  ;;  %v4942_v3 = vpop.f32.mrf.mxu3  ;;  %v5408_v60 = vunpack.c.l.b16 %v5380_v35 }
 0x84a   : > { %v5282_v33 = vmul.f32 %v9935_v37, %v5281_v52  ;;  %v5288_v41 = vmul.f32 %v9937_v14, %v5180_v15  ;;  %6105 = vrot.lane.b32.xlu1 %v14007_v23, %s10693_s20  ;;  %vm5294_vm12 = vweird.f32 %v9937_v14 }
 0x84b   : > { %9938 = vrsqrt.f32 %v5183_v32  ;;  %v5412_v56 = vpack.c.b16 %v5408_v60, %v5407_v8  ;;  %vm5295_vm14 = vmor %vm5293_vm13, %vm5294_vm12  ;;  %vm5303_vm0 = vweird.f32 %v5183_v32 }
 0x84c   : > { %v5289_v19 = vmul.f32 %v9937_v14, %v5288_v41  ;;  %v5286_v34 = vsel %vm5285_vm11, %v9935_v37, %v5282_v33 }
 0x84d   : > { %8977 = vmatmul.msk.bf16.gmra.mxu2 %vm2918_vm1, %v5412_v56  ;;  %v5365_v22 = vmul.f32 %v5286_v34, %v16061_v36 }
 0x84e   : > { %v4442_v30 = vpop.permute.xlu0 %4441  ;;  %v5290_v29 = vmul.f32 0.5, %v5289_v19  ;;  %5617 = vrot.lane.b32.xlu2 %v5412_v56, %s10694_s30 }
 0x84f   : > { %4460 = vst.msk [vmem:[#allocation3 + $0x68] sm:$0xff] %vm3400_vm4, %v4442_v30  ;;  %v5381_v0 = vpack.c.bf16 %v5365_v22, %v5365_v22 }
 0x850   : > { %4722 = vst.msk [vmem:[#allocation3 + $0x68] sm:$0xff] %vm3663_vm5, %v4704_v24  ;;  %v5291_v55 = vsub.f32 1.5, %v5290_v29  ;;  %v5184_v21 = vpop.f32.mrf.mxu1 }
 0x851   : > { %v9939_v23 = vpop.eup %9938  ;;  %v5185_v39 = vadd.f32 1.1920929e-07, %v5184_v21  ;;  %v4944_v20 = vpop.f32.mrf.mxu3  ;;  %v6357_v58 = vunpack.c.l.b16 %v5381_v0 }
 0x852   : > { %v5292_v18 = vmul.f32 %v9937_v14, %v5291_v55  ;;  %v5298_v45 = vmul.f32 %v9939_v23, %v5183_v32  ;;  %4967 = vrot.lane.b32.xlu1 %v4942_v3, %s10694_s30  ;;  %4969 = vrot.lane.b32.xlu0 %v4944_v20, %s10694_s30  ;;  %vm5304_vm15 = vweird.f32 %v9939_v23 }
 0x853   : > { %9940 = vrsqrt.f32 %v5185_v39  ;;  %vm5305_vm2 = vmor %vm5303_vm0, %vm5304_vm15  ;;  %vm5313_vm8 = vweird.f32 %v5185_v39 }
 0x854   : > { %v5296_v17 = vsel %vm5295_vm14, %v9937_v14, %v5292_v18  ;;  %v5299_v38 = vmul.f32 %v9939_v23, %v5298_v45 }
 0x855   : > { %v5366_v61 = vmul.f32 %v5296_v17, %v16060_v9 }
 0x856   : > { %v5300_v54 = vmul.f32 0.5, %v5299_v38 }
 0x857   : > { %v5382_v16 = vpack.c.bf16 %v5366_v61, %v5366_v61 }
 0x858   : > { %v5301_v24 = vsub.f32 1.5, %v5300_v54  ;;  %v5187_v36 = vpop.f32.mrf.mxu1 }
 0x859   : > { %v9941_v57 = vpop.eup %9940  ;;  %v5188_v13 = vadd.f32 1.1920929e-07, %v5187_v36  ;;  %v6358_v31 = vunpack.c.l.b16 %v5382_v16 }
 0x85a   : > { %v5302_v12 = vmul.f32 %v9939_v23, %v5301_v24  ;;  %v5308_v37 = vmul.f32 %v9941_v57, %v5185_v39  ;;  %5861 = vrot.lane.b32.xlu1 %v14020_v5, %s10695_s26  ;;  %6109 = vrot.lane.b32.xlu0 %v5412_v56, %s10693_s20  ;;  %vm5314_vm7 = vweird.f32 %v9941_v57 }
 0x85b   : > { %9942 = vrsqrt.f32 %v5188_v13  ;;  %v14048_v46 = vpack.c.b16 %v6358_v31, %v6357_v58  ;;  %v4706_v5 = vpop.permute.xlu1 %4705  ;;  %vm5315_vm9 = vmor %vm5313_vm8, %vm5314_vm7  ;;  %vm5323_vm11 = vweird.f32 %v5188_v13  ;;  %v6591_v58 = vsel %vm2918_vm1, %v13853_v25, 0 }
 0x85c   : > { %v5309_v9 = vmul.f32 %v9941_v57, %v5308_v37  ;;  %v5306_v15 = vsel %vm5305_vm2, %v9939_v23, %v5302_v12 }
 0x85d   : > { %6811 = vrot.lane.b32.xlu2 %v14048_v46, %s10695_s26  ;;  %v5367_v10 = vmul.f32 %v5306_v15, %v16063_v43 }
 0x85e   : > { %v5310_v50 = vmul.f32 0.5, %v5309_v9 }
 0x85f   : > { %v5383_v52 = vpack.c.bf16 %v5367_v10, %v5367_v10 }
 0x860   : > { %v5311_v11 = vsub.f32 1.5, %v5310_v50  ;;  %v5189_v59 = vpop.f32.mrf.mxu1 }
 0x861   : > { %v9943_v42 = vpop.eup %9942  ;;  %v5190_v26 = vadd.f32 1.1920929e-07, %v5189_v59  ;;  %v6359_v41 = vunpack.c.l.b16 %v5383_v52 }
 0x862   : > { %v5312_v63 = vmul.f32 %v9941_v57, %v5311_v11  ;;  %v5318_v48 = vmul.f32 %v9943_v42, %v5188_v13  ;;  %5863 = vrot.lane.b32.xlu0 %v5412_v56, %s10695_s26  ;;  %vm5324_vm10 = vweird.f32 %v9943_v42 }
 0x863   : > { %9944 = vrsqrt.f32 %v5190_v26  ;;  %v4708_v53 = vpop.permute.xlu0 %4707  ;;  %vm5325_vm12 = vmor %vm5323_vm11, %vm5324_vm10  ;;  %vm5333_vm14 = vweird.f32 %v5190_v26  ;;  %vm5465_vm11 = vcmask 31744  }
 0x864   : > { %v5316_v49 = vsel %vm5315_vm9, %v9941_v57, %v5312_v63  ;;  %v5319_v35 = vmul.f32 %v9943_v42, %v5318_v48  ;;  %4724 = vst.msk [vmem:[#allocation3 + $0x78] sm:$0xff] %vm3663_vm5, %v4708_v53 }
 0x865   : > { %v5368_v51 = vmul.f32 %v5316_v49, %v16062_v4 }
 0x866   : > { %v5320_v14 = vmul.f32 0.5, %v5319_v35 }
 0x867   : > { %v5384_v32 = vpack.c.bf16 %v5368_v51, %v5368_v51 }
 0x868   : > { %v5321_v43 = vsub.f32 1.5, %v5320_v14  ;;  %v5192_v3 = vpop.f32.mrf.mxu1 }
 0x869   : > { %v9945_v8 = vpop.eup %9944  ;;  %v14056_v60 = vadd.f32 1.1920929e-07, %v5192_v3  ;;  %v4956_v33 = vpop.permute.xlu1 %4955  ;;  %v6360_v30 = vunpack.c.l.b16 %v5384_v32 }
 0x86a   : > { %v5322_v56 = vmul.f32 %v9943_v42, %v5321_v43  ;;  %v5328_v19 = vmul.f32 %v9945_v8, %v5190_v26  ;;  %4979 = vst.msk [vmem:[#allocation3 + $0x40] sm:$0xff] %vm3926_vm6, %v4956_v33  ;;  %6565 = vrot.lane.b32.xlu0 %v14048_v46, %s10694_s30  ;;  %vm5334_vm13 = vweird.f32 %v9945_v8 }
 0x86b   : > { %9946 = vrsqrt.f32 %v14056_v60  ;;  %v4444_v4 = vpop.permute.xlu0 %4443  ;;  %v14062_v34 = vpack.c.b16 %v6360_v30, %v6359_v41  ;;  %vm5335_vm15 = vmor %vm5333_vm14, %vm5334_vm13  ;;  %vm5343_vm2 = vweird.f32 %v14056_v60 }
 0x86c   : > { %v5329_v29 = vmul.f32 %v9945_v8, %v5328_v19  ;;  %4461 = vst.msk [vmem:[#allocation3 + $0x70] sm:$0xff] %vm3400_vm4, %v4444_v4  ;;  %v5326_v55 = vsel %vm5325_vm12, %v9943_v42, %v5322_v56 }
 0x86d   : > { %4723 = vst.msk [vmem:[#allocation3 + $0x70] sm:$0xff] %vm3663_vm5, %v4706_v5  ;;  %6567 = vrot.lane.b32.xlu1 %v14062_v34, %s10694_s30  ;;  %v5369_v20 = vmul.f32 %v5326_v55, %v16065_v27 }
 0x86e   : > { %v5330_v21 = vmul.f32 0.5, %v5329_v29 }
 0x86f   : > { %v5385_v27 = vpack.c.bf16 %v5369_v20, %v5369_v20 }
 0x870   : > { %v5331_v23 = vsub.f32 1.5, %v5330_v21  ;;  %v5194_v22 = vpop.f32.mrf.mxu1 }
 0x871   : > { %v9947_v39 = vpop.eup %9946  ;;  %v5195_v18 = vadd.f32 1.1920929e-07, %v5194_v22  ;;  %v6018_v45 = vpop.permute.xlu1 %6017  ;;  %v6361_v37 = vunpack.c.l.b16 %v5385_v27  ;;  %v4995_v59 = vld [vmem:[#allocation3 + $0x40] sm:$0xff] }
 0x872   : > { %v5332_v17 = vmul.f32 %v9945_v8, %v5331_v23  ;;  %v5338_v38 = vmul.f32 %v9947_v39, %v14056_v60  ;;  %7057 = vrot.lane.b32.xlu0 %v14048_v46, %s10693_s20  ;;  %v6032_v0 = vsel %vm5570_vm3, %v6018_v45, 0  ;;  %vm5344_vm0 = vweird.f32 %v9947_v39 }
 0x873   : > { %9948 = vrsqrt.f32 %v5195_v18  ;;  %v4958_v61 = vpop.permute.xlu0 %4957  ;;  %6041 = vmatpush.bf16.msrb.mxu1 %v6032_v0  ;;  %vm5345_vm7 = vmor %vm5343_vm2, %vm5344_vm0  ;;  %vm5353_vm9 = vweird.f32 %v5195_v18 }
 0x874   : > { %v5336_v54 = vsel %vm5335_vm15, %v9945_v8, %v5332_v17  ;;  %v5339_v16 = vmul.f32 %v9947_v39, %v5338_v38  ;;  %4980 = vst.msk [vmem:[#allocation3 + $0x48] sm:$0xff] %vm3926_vm6, %v4958_v61 }
 0x875   : > { %6813 = vrot.lane.b32.xlu1 %v14062_v34, %s10695_s26  ;;  %v5370_v24 = vmul.f32 %v5336_v54, %v16064_v44 }
 0x876   : > { %v5340_v36 = vmul.f32 0.5, %v5339_v16 }
 0x877   : > { %v5612_v57 = vpop.permute.xlu2 %5611  ;;  %v5386_v13 = vpack.c.bf16 %v5370_v24, %v5370_v24  ;;  %v6382_v24 = vsel %vm2918_vm1, %v13621_v28, 0 }
 0x878   : > { %v5341_v31 = vsub.f32 1.5, %v5340_v36  ;;  %8982 = vmatmul.msk.bf16.vlgmr.msrb.gmra.mxu2 %vm2918_vm1, %v5612_v57  ;;  %6391 = vmatpush.bf16.xpose.msra.mxu0 %v6382_v24 }
 0x879   : > { %v9949_v12 = vpop.eup %9948  ;;  %6600 = vmatpush.bf16.xpose.msrb.mxu2 %v6591_v58  ;;  %v6362_v9 = vunpack.c.l.b16 %v5386_v13 }
 0x87a   : > { %v5342_v15 = vmul.f32 %v9947_v39, %v5341_v31  ;;  %v5348_v50 = vmul.f32 %v9949_v12, %v5195_v18  ;;  %7059 = vrot.lane.b32.xlu0 %v14062_v34, %s10693_s20  ;;  %vm5354_vm8 = vweird.f32 %v9949_v12 }
 0x87b   : > { %v4960_v44 = vpop.permute.xlu0 %4959  ;;  %v14082_v11 = vpack.c.b16 %v6362_v9, %v6361_v37  ;;  %v4996_v42 = vld [vmem:[#allocation3 + $0x48] sm:$0xff]  ;;  %vm5355_vm10 = vmor %vm5353_vm9, %vm5354_vm8  ;;  %v14136_v9 = vpop.f32.mrf.mxu0 }
 0x87c   : > { %v5349_v25 = vmul.f32 %v9949_v12, %v5348_v50  ;;  %4981 = vst.msk [vmem:[#allocation3 + $0x50] sm:$0xff] %vm3926_vm6, %v4960_v44  ;;  %v5007_v10 = vpack.c.bf16 %v4996_v42, %v4995_v59  ;;  %v5346_v5 = vsel %vm5345_vm7, %v9947_v39, %v5342_v15  ;;  %v7083_v42 = vsel %vm2918_vm1, %v13862_v47, 0 }
 0x87d   : > { %6569 = vrot.lane.b32.xlu2 %v14082_v11, %s10694_s30  ;;  %v5371_v53 = vmul.f32 %v5346_v5, %v16067_v6  ;;  %16068 = vst [vmem:[#allocation69_spill] sm:$0xff] %v14136_v9 }
 0x87e   : > { %v5350_v26 = vmul.f32 0.5, %v5349_v25  ;;  %5087 = vmatmul.bf16.gmra.mxu0 %v5007_v10 }
 0x87f   : > { %v14088_v63 = vpop.permute.xlu2 %6263  ;;  %v5387_v52 = vpack.c.bf16 %v5371_v53, %v5371_v53 }
 0x880   : > { %v5351_v48 = vsub.f32 1.5, %v5350_v26  ;;  %v6278_v40 = vsel %vm5570_vm3, %v14088_v63, 0 }
 0x881   : > { %v6363_v43 = vunpack.c.l.b16 %v5387_v52 }
 0x882   : > { %v5352_v49 = vmul.f32 %v9949_v12, %v5351_v48  ;;  %6815 = vrot.lane.b32.xlu0 %v14082_v11, %s10695_s26 }
 0x883   : > { %v4997_v60 = vld [vmem:[#allocation3 + $0x50] sm:$0xff]  ;;  %v14147_v26 = vpop.f32.mrf.mxu0 }
 0x884   : > { %v5356_v35 = vsel %vm5355_vm10, %v9949_v12, %v5352_v49  ;;  %16069 = vst [vmem:[#allocation127_spill] sm:$0xff] %v14147_v26 }
 0x885   : > { %7061 = vrot.lane.b32.xlu2 %v14082_v11, %s10693_s20  ;;  %v5372_v51 = vmul.f32 %v5356_v35, %v16066_v62 }
 0x887   : > { %v5388_v14 = vpack.c.bf16 %v5372_v51, %v5372_v51  ;;  %v6837_v51 = vsel %vm2918_vm1, %v13903_v2, 0 }
 0x888   : > { %v4962_v32 = vpop.permute.xlu2 %4961 }
 0x889   : > { %4982 = vst.msk [vmem:[#allocation3 + $0x58] sm:$0xff] %vm3926_vm6, %v4962_v32  ;;  %v6364_v3 = vunpack.c.l.b16 %v5388_v14 }
 0x88b   : > { %v14097_v6 = vpack.c.b16 %v6364_v3, %v6363_v43  ;;  %v14157_v52 = vpop.f32.mrf.mxu0 }
 0x88c   : > { %16070 = vst [vmem:[#allocation56_spill] sm:$0xff] %v14157_v52 }
 0x88d   : > { %6571 = vrot.lane.b32.xlu2 %v14097_v6, %s10694_s30  ;;  %7063 = vrot.lane.b32.xlu0 %v14097_v6, %s10693_s20 }
 0x890   : > { %v14103_v8 = vpop.permute.xlu2 %5857  ;;  %v4998_v33 = vld [vmem:[#allocation3 + $0x58] sm:$0xff]  ;;  %v6104_v62 = vpop.permute.xlu1 %6103 }
 0x891   : > { %v5008_v41 = vpack.c.bf16 %v4998_v33, %v4997_v60 }
 0x893   : > { %5092 = vmatmul.bf16.gmra.mxu0 %v5008_v41  ;;  %v14164_v14 = vpop.f32.mrf.mxu0 }
 0x894   : > { %16071 = vst [vmem:[#allocation74_spill] sm:$0xff] %v14164_v14 }
 0x895   : > { %6817 = vrot.lane.b32.xlu2 %v14097_v6, %s10695_s26 }
 0x898   : > { %v4964_v30 = vpop.permute.xlu2 %4963 }
 0x899   : > { %4983 = vst.msk [vmem:[#allocation3 + $0x60] sm:$0xff] %vm3926_vm6, %v4964_v30 }
 0x89b   : > { %v14169_v43 = vpop.f32.mrf.mxu0 }
 0x89c   : > { %16072 = vst [vmem:[#allocation130_spill] sm:$0xff] %v14169_v43 }
 0x89f   : > { %v5614_v56 = vpop.permute.xlu1 %5613 }
 0x8a0   : > { %8983 = vmatmul.msk.bf16.gmra.mxu2 %vm2918_vm1, %v5614_v56  ;;  %v5437_v19 = vpop.f32.mrf.mxu2  ;;  %v14109_v4 = vpop.permute.xlu0 %5859  ;;  %v4999_v61 = vld [vmem:[#allocation3 + $0x60] sm:$0xff] }
 0x8a1   : > { %v6108_v18 = vpop.permute.xlu2 %6107  ;;  %v14121_v17 = vmul.f32 0.17677669, %v5437_v19 }
 0x8a3   : > { %v5466_v16 = vsel %vm5465_vm11, %v14121_v17, -inf  ;;  %v14171_v33 = vpop.f32.mrf.mxu0 }
 0x8a4   : > { %16073 = vst [vmem:[#allocation129_spill] sm:$0xff] %v14171_v33 }
 0x8a8   : > { %v5439_v29 = vpop.f32.mrf.mxu2 }
 0x8a9   : > { %v14111_v55 = vmul.f32 0.17677669, %v5439_v29  ;;  %v5618_v36 = vpop.permute.xlu2 %5617 }
 0x8ab   : > { %v5469_v21 = vsel %vm5465_vm11, %v14111_v55, -inf }
 0x8ac   : > { %5470 = vmax.xlane.f32.xlu1 %v5469_v21 }
 0x8af   : > { %v5616_v23 = vpop.permute.xlu0 %5615 }
 0x8b0   : > { %8984 = vmatmul.msk.bf16.gmra.mxu2 %vm2918_vm1, %v5616_v23  ;;  %v5442_v22 = vpop.f32.mrf.mxu2 }
 0x8b1   : > { %v14116_v39 = vmul.f32 0.17677669, %v5442_v22 }
 0x8b3   : > { %v5472_v45 = vsel %vm5465_vm11, %v14116_v39, -inf }
 0x8b4   : > { %v4966_v20 = vpop.permute.xlu1 %4965 }
 0x8b5   : > { %4984 = vst.msk [vmem:[#allocation3 + $0x68] sm:$0xff] %vm3926_vm6, %v4966_v20 }
 0x8b7   : > { %5473 = vmax.xlane.f32.xlu0 %v5472_v45  ;;  %v14179_v30 = vpop.permute.xlu2 %6811 }
 0x8b8   : > { %v5444_v38 = vpop.f32.mrf.mxu2 }
 0x8b9   : > { %v14128_v57 = vmul.f32 0.17677669, %v5444_v38 }
 0x8bb   : > { %v5475_v12 = vsel %vm5465_vm11, %v14128_v57, -inf }
 0x8bc   : > { %v6106_v0 = vpop.permute.xlu1 %6105  ;;  %v5000_v54 = vld [vmem:[#allocation3 + $0x68] sm:$0xff] }
 0x8bd   : > { %v5009_v27 = vpack.c.bf16 %v5000_v54, %v4999_v61 }
 0x8be   : > { %5467 = vmax.xlane.f32.xlu2 %v5466_v16 }
 0x8bf   : > { %5097 = vmatmul.bf16.gmra.mxu0 %v5009_v27 }
 0x8c0   : > { %8985 = vmatmul.msk.bf16.gmra.mxu2 %vm2918_vm1, %v5618_v36  ;;  %v5447_v13 = vpop.f32.mrf.mxu2 }
 0x8c1   : > { %v14134_v28 = vmul.f32 0.17677669, %v5447_v13 }
 0x8c3   : > { %v5478_v50 = vsel %vm5465_vm11, %v14134_v28, -inf }
 0x8c4   : > { %v4968_v58 = vpop.permute.xlu1 %4967  ;;  %v4970_v31 = vpop.permute.xlu0 %4969 }
 0x8c5   : > { %4985 = vst.msk [vmem:[#allocation3 + $0x70] sm:$0xff] %vm3926_vm6, %v4968_v58 }
 0x8c6   : > { %4986 = vst.msk [vmem:[#allocation3 + $0x78] sm:$0xff] %vm3926_vm6, %v4970_v31  ;;  %5476 = vmax.xlane.f32.xlu2 %v5475_v12 }
 0x8c8   : > { %v5449_v37 = vpop.f32.mrf.mxu2 }
 0x8c9   : > { %v14143_v25 = vmul.f32 0.17677669, %v5449_v37 }
 0x8cb   : > { %v5481_v53 = vsel %vm5465_vm11, %v14143_v25, -inf }
 0x8cc   : > { %v5001_v15 = vld [vmem:[#allocation3 + $0x70] sm:$0xff]  ;;  %v6110_v32 = vpop.permute.xlu0 %6109 }
 0x8cd   : > { %v5002_v44 = vld [vmem:[#allocation3 + $0x78] sm:$0xff] }
 0x8ce   : > { %5479 = vmax.xlane.f32.xlu2 %v5478_v50  ;;  %v5010_v59 = vpack.c.bf16 %v5002_v44, %v5001_v15 }
 0x8d0   : > { %5102 = vmatmul.bf16.gmra.mxu0 %v5010_v59  ;;  %8998 = vmatmul.msk.bf16.vlgmr.msra.gmra.mxu2 %vm2918_vm1, %v6104_v62  ;;  %v5452_v10 = vpop.f32.mrf.mxu2  ;;  %v5862_v62 = vpop.permute.xlu1 %5861 }
 0x8d1   : > { %7092 = vmatpush.bf16.xpose.msra.mxu2 %v7083_v42  ;;  %v14145_v5 = vmul.f32 0.17677669, %v5452_v10 }
 0x8d3   : > { %v5484_v48 = vsel %vm5465_vm11, %v14145_v5, -inf }
 0x8d4   : > { %5485 = vmax.xlane.f32.xlu0 %v5484_v48  ;;  %v5864_v3 = vpop.permute.xlu0 %5863 }
 0x8d6   : > { %5482 = vmax.xlane.f32.xlu2 %v5481_v53 }
 0x8d7   : > { %v6570_v23 = vpop.permute.xlu2 %6569 }
 0x8d8   : > { %v5454_v47 = vpop.f32.mrf.mxu2 }
 0x8d9   : > { %v14153_v49 = vmul.f32 0.17677669, %v5454_v47 }
 0x8db   : > { %v5487_v35 = vsel %vm5465_vm11, %v14153_v49, -inf }
 0x8dc   : > { %5488 = vmax.xlane.f32.xlu1 %v5487_v35  ;;  %v6566_v2 = vpop.permute.xlu0 %6565 }
 0x8e0   : > { %8990 = vmatmul.msk.bf16.vlgmr.msrb.gmra.mxu0 %vm2918_vm1, %v14103_v8  ;;  %8999 = vmatmul.msk.bf16.gmra.mxu2 %vm2918_vm1, %v6106_v0  ;;  %v6568_v0 = vpop.permute.xlu1 %6567 }
 0x8e1   : > { %6846 = vmatpush.bf16.xpose.msrb.mxu0 %v6837_v51 }
 0x8e4   : > { %v14185_v29 = vpop.permute.xlu0 %7057 }
 0x8e8   : > { %v14220_v15 = vpop.permute.xlu1 %6813 }
 0x8ec   : > { %v14191_v20 = vpop.permute.xlu0 %7059 }
 0x8f0   : > { %8991 = vmatmul.msk.bf16.gmra.mxu0 %vm2918_vm1, %v14109_v4  ;;  %9000 = vmatmul.msk.bf16.gmra.mxu2 %vm2918_vm1, %v6108_v18  ;;  %v14183_v4 = vpop.f32.mrf.mxu0  ;;  %v14195_v18 = vpop.permute.xlu2 %7061 }
 0x8f1   : > { %16074 = vst [vmem:[#allocation131_spill] sm:$0xff] %v14183_v4 }
 0x8f4   : > { %v14199_v38 = vpop.permute.xlu0 %6815 }
 0x8f8   : > { %v14189_v22 = vpop.f32.mrf.mxu0  ;;  %v6572_v61 = vpop.permute.xlu2 %6571 }
 0x8f9   : > { %16075 = vst [vmem:[#allocation60_spill] sm:$0xff] %v14189_v22  ;;  %v16091_v22 = vld [vmem:[#allocation54_spill] sm:$0xff] }
 0x8fb   : > { %v5648_v60 = vpop.f32.mrf.mxu2 }
 0x8fc   : > { %v14173_v41 = vmul.f32 0.17677669, %v5648_v60 }
 0x8fe   : > { %v5676_v8 = vsel %vm5465_vm11, %v14173_v41, -inf }
 0x8ff   : > { %5677 = vmax.xlane.f32.xlu0 %v5676_v8  ;;  %v14204_v54 = vpop.permute.xlu0 %7063 }
 0x900   : > { %8992 = vmatmul.msk.bf16.gmra.mxu0 %vm2918_vm1, %v5862_v62  ;;  %9001 = vmatmul.msk.bf16.gmra.mxu2 %vm2918_vm1, %v6110_v32  ;;  %v14197_v45 = vpop.f32.mrf.mxu0  ;;  %v14208_v24 = vpop.permute.xlu2 %6817 }
 0x901   : > { %16076 = vst [vmem:[#allocation132_spill] sm:$0xff] %v14197_v45 }
 0x903   : > { %v5650_v56 = vpop.f32.mrf.mxu2 }
 0x904   : > { %v14181_v19 = vmul.f32 0.17677669, %v5650_v56 }
 0x906   : > { %v5679_v21 = vsel %vm5465_vm11, %v14181_v19, -inf }
 0x907   : > { %5680 = vmax.xlane.f32.xlu2 %v5679_v21 }
 0x908   : > { %v14206_v16 = vpop.f32.mrf.mxu0 }
 0x909   : > { %16077 = vst [vmem:[#allocation133_spill] sm:$0xff] %v14206_v16  ;;  %v16090_v16 = vld [vmem:[#allocation55_spill] sm:$0xff] }
 0x90a   : > { %v16092_v33 = vpack.c.bf16 %v16090_v16, %v16091_v22 }
 0x910   : > { %8993 = vmatmul.msk.bf16.gmra.mxu0 %vm2918_vm1, %v5864_v3  ;;  %9014 = vmatmul.msk.bf16.vlgmr.msrb.gmra.mxu2 %vm2918_vm1, %v6566_v2  ;;  %v14210_v36 = vpop.f32.mrf.mxu0 }
 0x911   : > { %16078 = vst [vmem:[#allocation50_spill] sm:$0xff] %v14210_v36 }
 0x918   : > { %v14223_v59 = vpop.f32.mrf.mxu0 }
 0x919   : > { %16079 = vst [vmem:[#allocation53_spill] sm:$0xff] %v14223_v59 }
 0x91f   : > { %v5471_v47 = vpop.xlane.xlu1 %5470 }
 0x920   : > { %9006 = vmatmul.msk.bf16.vlgmr.msra.gmra.mxu0 %vm2918_vm1, %v14048_v46  ;;  %9015 = vmatmul.msk.bf16.gmra.mxu2 %vm2918_vm1, %v6568_v0  ;;  %v5491_v3 = vsub.f32 %v14111_v55, %v5471_v47 }
 0x922   : > { %v5500_v62 = vmul.f32 1.442695, %v5491_v3  ;;  %v9318_v3 = vld [vmem:[%s11063_s27 + $0x68] sm:$0xff] }
 0x923   : > { %v5653_v27 = vpop.f32.mrf.mxu2 }
 0x92a   : > { %v5474_v13 = vpop.xlane.xlu0 %5473 }
 0x92b   : > { %v5492_v58 = vsub.f32 %v14116_v39, %v5474_v13  ;;  %v5655_v31 = vpop.f32.mrf.mxu2 }
 0x92c   : > { %v14213_v12 = vmul.f32 0.17677669, %v5655_v31 }
 0x92d   : > { %v5502_v37 = vmul.f32 1.442695, %v5492_v58 }
 0x92e   : > { %v5685_v46 = vsel %vm5465_vm11, %v14213_v12, -inf }
 0x92f   : > { %9950 = vpow2.f32 %v5502_v37  ;;  %5686 = vmax.xlane.f32.xlu2 %v5685_v46 }
 0x930   : > { %9007 = vmatmul.msk.bf16.gmra.mxu0 %vm2918_vm1, %v14062_v34  ;;  %9016 = vmatmul.msk.bf16.gmra.mxu2 %vm2918_vm1, %v6570_v23 }
 0x931   : > { %v5468_v50 = vpop.xlane.xlu2 %5467 }
 0x932   : > { %v5490_v44 = vsub.f32 %v14121_v17, %v5468_v50 }
 0x933   : > { %v5658_v39 = vpop.f32.mrf.mxu2 }
 0x934   : > { %v5498_v42 = vmul.f32 1.442695, %v5490_v44  ;;  %v14225_v10 = vmul.f32 0.17677669, %v5658_v39 }
 0x935   : > { %v14227_v48 = vpop.eup %9950 }
 0x936   : > { %9952 = vpow2.f32 %v5498_v42  ;;  %v5520_v53 = vsel %vm5465_vm11, %v14227_v48, 0.0  ;;  %v5688_v34 = vsel %vm5465_vm11, %v14225_v10, -inf  ;;  %v9320_v42 = vld [vmem:[%s11063_s27 + $0x78] sm:$0xff] }
 0x937   : > { %5521 = vadd.xlane.f32.xlu1 %v5520_v53  ;;  %5689 = vmax.xlane.f32.xlu2 %v5688_v34 }
 0x938   : > { %7841 = vmatpush.bf16.msrb.mxu2 %v9320_v42  ;;  %v9314_v42 = vld [vmem:[%s11063_s27 + $0x48] sm:$0xff] }
 0x939   : > { %v5477_v35 = vpop.xlane.xlu2 %5476 }
 0x93a   : > { %v5493_v17 = vsub.f32 %v14128_v57, %v5477_v35  ;;  %v14244_v57 = vmul.f32 0.17677669, %v5653_v27 }
 0x93b   : > { %v5660_v51 = vpop.f32.mrf.mxu2 }
 0x93c   : > { %v14234_v32 = vpop.eup %9952  ;;  %v5504_v60 = vmul.f32 1.442695, %v5493_v17  ;;  %v14237_v2 = vpop.f32.mrf.mxu0  ;;  %v5682_v58 = vsel %vm5465_vm11, %v14244_v57, -inf  ;;  %v9319_v17 = vld [vmem:[%s11063_s27 + $0x70] sm:$0xff] }
 0x93d   : > { %16080 = vst [vmem:[#allocation140_spill] sm:$0xff] %v14237_v2  ;;  %v5514_v8 = vsel %vm5465_vm11, %v14234_v32, 0.0  ;;  %7842 = vmatpush.bf16.msrb.mxu2 %v9319_v17  ;;  %v16094_v2 = vld [vmem:[#allocation58_spill] sm:$0xff] }
 0x93e   : > { %9954 = vpow2.f32 %v5504_v60  ;;  %5515 = vadd.xlane.f32.xlu0 %v5514_v8 }
 0x93f   : > { %9956 = vpow2.f32 %v5500_v62 }
 0x940   : > { %9008 = vmatmul.msk.bf16.gmra.mxu0 %vm2918_vm1, %v14082_v11  ;;  %9017 = vmatmul.msk.bf16.gmra.mxu2 %vm2918_vm1, %v6572_v61 }
 0x941   : > { %v5480_v56 = vpop.xlane.xlu2 %5479  ;;  %7843 = vmatpush.bf16.msrb.mxu2 %v9318_v3  ;;  %v9313_v3 = vld [vmem:[%s11063_s27 + $0x40] sm:$0xff] }
 0x942   : > { %v5494_v21 = vsub.f32 %v14134_v28, %v5480_v56 }
 0x943   : > { %v5663_v55 = vpop.f32.mrf.mxu2 }
 0x944   : > { %v14247_v23 = vpop.eup %9954  ;;  %v5506_v0 = vmul.f32 1.442695, %v5494_v21  ;;  %v14249_v13 = vpop.f32.mrf.mxu0 }
 0x945   : > { %16081 = vst [vmem:[#allocation138_spill] sm:$0xff] %v14249_v13  ;;  %v5523_v11 = vsel %vm5465_vm11, %v14247_v23, 0.0  ;;  %v14255_v27 = vpop.eup %9956 }
 0x946   : > { %9958 = vpow2.f32 %v5506_v0  ;;  %5683 = vmax.xlane.f32.xlu0 %v5682_v58  ;;  %5524 = vadd.xlane.f32.xlu1 %v5523_v11  ;;  %v5517_v44 = vsel %vm5465_vm11, %v14255_v27, 0.0  ;;  %v9317_v0 = vld [vmem:[%s11063_s27 + $0x60] sm:$0xff] }
 0x947   : > { %v5486_v8 = vpop.xlane.xlu0 %5485  ;;  %7844 = vmatpush.bf16.msrb.mxu2 %v9317_v0 }
 0x949   : > { %v5483_v61 = vpop.xlane.xlu2 %5482 }
 0x94a   : > { %v5495_v28 = vsub.f32 %v14143_v25, %v5483_v61  ;;  %v14270_v25 = vmul.f32 0.17677669, %v5660_v51  ;;  %v9316_v61 = vld [vmem:[%s11063_s27 + $0x58] sm:$0xff] }
 0x94b   : > { %v5665_v31 = vpop.f32.mrf.mxu2  ;;  %7845 = vmatpush.bf16.msrb.mxu2 %v9316_v61 }
 0x94c   : > { %v14258_v37 = vpop.eup %9958  ;;  %v5508_v46 = vmul.f32 1.442695, %v5495_v28  ;;  %v5691_v35 = vsel %vm5465_vm11, %v14270_v25, -inf  ;;  %v14284_v51 = vmul.f32 0.17677669, %v5665_v31 }
 0x94d   : > { %v14260_v50 = vpop.f32.mrf.mxu0  ;;  %v5526_v39 = vsel %vm5465_vm11, %v14258_v37, 0.0 }
 0x94e   : > { %16082 = vst [vmem:[#allocation135_spill] sm:$0xff] %v14260_v50  ;;  %9960 = vpow2.f32 %v5508_v46  ;;  %5518 = vadd.xlane.f32.xlu0 %v5517_v44  ;;  %5527 = vadd.xlane.f32.xlu2 %v5526_v39  ;;  %v5697_v21 = vsel %vm5465_vm11, %v14284_v51, -inf  ;;  %v9315_v44 = vld [vmem:[%s11063_s27 + $0x50] sm:$0xff] }
 0x94f   : > { %7846 = vmatpush.bf16.msrb.mxu2 %v9315_v44 }
 0x950   : > { %9009 = vmatmul.msk.bf16.gmra.mxu0 %vm2918_vm1, %v14097_v6  ;;  %9030 = vmatmul.msk.bf16.vlgmr.msra.gmra.mxu2 %vm2918_vm1, %v14185_v29  ;;  %v14282_v29 = vmul.f32 0.17677669, %v5663_v55  ;;  %v5496_v55 = vsub.f32 %v14145_v5, %v5486_v8 }
 0x952   : > { %v5694_v56 = vsel %vm5465_vm11, %v14282_v29, -inf  ;;  %v5510_v28 = vmul.f32 1.442695, %v5496_v55 }
 0x953   : > { %v6140_v53 = vpop.f32.mrf.mxu2  ;;  %7847 = vmatpush.bf16.msrb.mxu2 %v9314_v42 }
 0x954   : > { %v14273_v34 = vpop.eup %9960  ;;  %9962 = vpow2.f32 %v5510_v28 }
 0x955   : > { %v14275_v47 = vpop.f32.mrf.mxu0  ;;  %v5529_v6 = vsel %vm5465_vm11, %v14273_v34, 0.0 }
 0x956   : > { %16083 = vst [vmem:[#allocation134_spill] sm:$0xff] %v14275_v47  ;;  %5692 = vmax.xlane.f32.xlu0 %v5691_v35  ;;  %5530 = vadd.xlane.f32.xlu1 %v5529_v6 }
 0x957   : > { %7848 = vmatpush.bf16.msrb.mxu2 %v9313_v3 }
 0x95a   : > { %v14314_v6 = vpop.eup %9962 }
 0x95b   : > { %v6142_v60 = vpop.f32.mrf.mxu2 }
 0x95c   : > { %v14302_v46 = vmul.f32 0.17677669, %v6142_v60  ;;  %v5532_v60 = vsel %vm5465_vm11, %v14314_v6, 0.0 }
 0x95d   : > { %v5894_v62 = vpop.f32.mrf.mxu0 }
 0x95e   : > { %v14292_v58 = vmul.f32 0.17677669, %v5894_v62  ;;  %5695 = vmax.xlane.f32.xlu0 %v5694_v56  ;;  %5698 = vmax.xlane.f32.xlu1 %v5697_v21  ;;  %v5489_v62 = vpop.xlane.xlu1 %5488  ;;  %v14325_v56 = vmul.f32 0.17677669, %v6140_v53 }
 0x95f   : > { %v5497_v55 = vsub.f32 %v14153_v49, %v5489_v62  ;;  %v16084_v62 = vld [vmem:[#allocation49_spill] sm:$0xff] }
 0x960   : > { %9022 = vmatmul.msk.bf16.vlgmr.msrb.gmra.mxu0 %vm2918_vm1, %v14179_v30  ;;  %9031 = vmatmul.msk.bf16.gmra.mxu2 %vm2918_vm1, %v14191_v20  ;;  %v5922_v11 = vsel %vm5465_vm11, %v14292_v58, -inf  ;;  %v6171_v30 = vsel %vm5465_vm11, %v14302_v46, -inf }
 0x961   : > { %5923 = vmax.xlane.f32.xlu2 %v5922_v11  ;;  %v5512_v11 = vmul.f32 1.442695, %v5497_v55 }
 0x963   : > { %v6145_v31 = vpop.f32.mrf.mxu2  ;;  %9964 = vpow2.f32 %v5512_v11 }
 0x965   : > { %v5896_v5 = vpop.f32.mrf.mxu0 }
 0x966   : > { %v14305_v39 = vmul.f32 0.17677669, %v5896_v5 }
 0x968   : > { %v5925_v20 = vsel %vm5465_vm11, %v14305_v39, -inf }
 0x969   : > { %6172 = vmax.xlane.f32.xlu2 %v6171_v30  ;;  %5926 = vmax.xlane.f32.xlu1 %v5925_v20  ;;  %v14342_v44 = vpop.eup %9964 }
 0x96b   : > { %v14312_v35 = vpop.f32.mrf.mxu2 }
 0x96d   : > { %v5899_v17 = vpop.f32.mrf.mxu0 }
 0x96e   : > { %v14334_v28 = vmul.f32 0.17677669, %v5899_v17  ;;  %v5535_v17 = vsel %vm5465_vm11, %v14342_v44, 0.0 }
 0x970   : > { %9023 = vmatmul.msk.bf16.gmra.mxu0 %vm2918_vm1, %v14220_v15  ;;  %9032 = vmatmul.msk.bf16.gmra.mxu2 %vm2918_vm1, %v14195_v18  ;;  %v6168_v18 = vsel %vm5465_vm11, %v14325_v56, -inf  ;;  %v5928_v49 = vsel %vm5465_vm11, %v14334_v28, -inf }
 0x971   : > { %5533 = vadd.xlane.f32.xlu1 %v5532_v60 }
 0x973   : > { %v14323_v8 = vpop.f32.mrf.mxu2 }
 0x975   : > { %v5901_v21 = vpop.f32.mrf.mxu0 }
 0x976   : > { %v14327_v0 = vmul.f32 0.17677669, %v5901_v21  ;;  %v16085_v21 = vld [vmem:[#allocation48_spill] sm:$0xff] }
 0x977   : > { %v16086_v55 = vpack.c.bf16 %v16084_v62, %v16085_v21 }
 0x978   : > { %v5931_v15 = vsel %vm5465_vm11, %v14327_v0, -inf }
 0x979   : > { %5932 = vmax.xlane.f32.xlu0 %v5931_v15  ;;  %6169 = vmax.xlane.f32.xlu1 %v6168_v18 }
 0x97a   : > { %v5681_v11 = vpop.xlane.xlu2 %5680 }
 0x97b   : > { %v6152_v61 = vpop.f32.mrf.mxu2 }
 0x97d   : > { %v5904_v5 = vpop.f32.mrf.mxu0 }
 0x980   : > { %9024 = vmatmul.msk.bf16.gmra.mxu0 %vm2918_vm1, %v14199_v38  ;;  %9033 = vmatmul.msk.bf16.gmra.mxu2 %vm2918_vm1, %v14204_v54  ;;  %v14350_v54 = vmul.f32 0.17677669, %v6145_v31 }
 0x981   : > { %5929 = vmax.xlane.f32.xlu1 %v5928_v49  ;;  %v14363_v49 = vmul.f32 0.17677669, %v6152_v61 }
 0x982   : > { %v6174_v18 = vsel %vm5465_vm11, %v14350_v54, -inf }
 0x983   : > { %v6155_v53 = vpop.f32.mrf.mxu2 }
 0x985   : > { %v5906_v30 = vpop.f32.mrf.mxu0 }
 0x986   : > { %v14344_v20 = vmul.f32 0.17677669, %v5906_v30  ;;  %v14365_v30 = vmul.f32 0.17677669, %v5904_v5 }
 0x988   : > { %v5937_v42 = vsel %vm5465_vm11, %v14344_v20, -inf  ;;  %v5934_v21 = vsel %vm5465_vm11, %v14365_v30, -inf }
 0x989   : > { %5938 = vmax.xlane.f32.xlu0 %v5937_v42  ;;  %5536 = vadd.xlane.f32.xlu1 %v5535_v17  ;;  %v5701_v17 = vsub.f32 %v14181_v19, %v5681_v11 }
 0x98b   : > { %v6157_v38 = vpop.f32.mrf.mxu2  ;;  %v5710_v61 = vmul.f32 1.442695, %v5701_v17 }
 0x98d   : > { %v5909_v3 = vpop.f32.mrf.mxu0  ;;  %9966 = vpow2.f32 %v5710_v61 }
 0x98e   : > { %v14352_v60 = vmul.f32 0.17677669, %v5909_v3  ;;  %v6183_v3 = vsel %vm5465_vm11, %v14363_v49, -inf }
 0x990   : > { %9025 = vmatmul.msk.bf16.gmra.mxu0 %vm2918_vm1, %v14208_v24  ;;  %7849 = vmatmul.bf16.vlgmr.msrb.gmra.mxu2 %v16086_v55  ;;  %v5940_v15 = vsel %vm5465_vm11, %v14352_v60, -inf  ;;  %v5678_v55 = vpop.xlane.xlu0 %5677 }
 0x991   : > { %5941 = vmax.xlane.f32.xlu0 %v5940_v15  ;;  %6175 = vmax.xlane.f32.xlu1 %v6174_v18  ;;  %v14376_v15 = vmul.f32 0.17677669, %v6157_v38  ;;  %v14379_v18 = vmul.f32 0.17677669, %v14312_v35 }
 0x993   : > { %v6602_v31 = vpop.f32.mrf.mxu2  ;;  %v6189_v17 = vsel %vm5465_vm11, %v14376_v15, -inf  ;;  %v6177_v35 = vsel %vm5465_vm11, %v14379_v18, -inf }
 0x994   : > { %v14424_v26 = vmul.f32 0.17677669, %v6602_v31 }
 0x995   : > { %v5911_v42 = vpop.f32.mrf.mxu0 }
 0x996   : > { %v14367_v24 = vmul.f32 0.17677669, %v5911_v42  ;;  %v5700_v42 = vsub.f32 %v14173_v41, %v5678_v55  ;;  %v14396_v41 = vmul.f32 0.17677669, %v14323_v8  ;;  %16093 = vst [vmem:[#allocation137_spill] sm:$0xff] %v14424_v26 }
 0x998   : > { %v5943_v62 = vsel %vm5465_vm11, %v14367_v24, -inf }
 0x999   : > { %6184 = vmax.xlane.f32.xlu0 %v6183_v3  ;;  %5944 = vmax.xlane.f32.xlu2 %v5943_v62  ;;  %v16087_v3 = vld [vmem:[#allocation52_spill] sm:$0xff]  ;;  %v16088_v62 = vld [vmem:[#allocation51_spill] sm:$0xff] }
 0x99a   : > { %5935 = vmax.xlane.f32.xlu1 %v5934_v21  ;;  %v16089_v59 = vpack.c.bf16 %v16087_v3, %v16088_v62  ;;  %v5708_v21 = vmul.f32 1.442695, %v5700_v42  ;;  %v6180_v42 = vsel %vm5465_vm11, %v14396_v41, -inf }
 0x99b   : > { %v6604_v5 = vpop.f32.mrf.mxu2 }
 0x99c   : > { %9968 = vpow2.f32 %v5708_v21 }
 0x99d   : > { %v6393_v19 = vpop.f32.mrf.mxu0 }
 0x99e   : > { %v14381_v11 = vmul.f32 0.17677669, %v6393_v19  ;;  %v14393_v19 = vpop.eup %9966 }
 0x99f   : > { %v5727_v62 = vsel %vm5465_vm11, %v14393_v19, 0.0 }
 0x9a0   : > { %7854 = vmatmul.bf16.gmra.mxu2 %v16089_v59  ;;  %v6421_v38 = vsel %vm5465_vm11, %v14381_v11, -inf }
 0x9a1   : > { %6190 = vmax.xlane.f32.xlu0 %v6189_v17  ;;  %6422 = vmax.xlane.f32.xlu2 %v6421_v38  ;;  %v14410_v17 = vmul.f32 0.17677669, %v6155_v53 }
 0x9a2   : > { %6178 = vmax.xlane.f32.xlu1 %v6177_v35  ;;  %v14408_v8 = vpop.eup %9968  ;;  %v5687_v38 = vpop.xlane.xlu2 %5686 }
 0x9a3   : > { %v14398_v61 = vpop.f32.mrf.mxu2  ;;  %v5703_v21 = vsub.f32 %v14213_v12, %v5687_v38  ;;  %v6630_v38 = vsel %vm5465_vm11, %v14424_v26, -inf }
 0x9a5   : > { %v6395_v59 = vpop.f32.mrf.mxu0  ;;  %v5714_v53 = vmul.f32 1.442695, %v5703_v21 }
 0x9a6   : > { %v14400_v55 = vmul.f32 0.17677669, %v6395_v59 }
 0x9a7   : > { %9970 = vpow2.f32 %v5714_v53 }
 0x9a8   : > { %v6424_v3 = vsel %vm5465_vm11, %v14400_v55, -inf }
 0x9a9   : > { %6425 = vmax.xlane.f32.xlu0 %v6424_v3  ;;  %5728 = vadd.xlane.f32.xlu2 %v5727_v62  ;;  %v5724_v3 = vsel %vm5465_vm11, %v14408_v8, 0.0  ;;  %v6186_v62 = vsel %vm5465_vm11, %v14410_v17, -inf }
 0x9aa   : > { %6181 = vmax.xlane.f32.xlu1 %v6180_v42  ;;  %v5522_v21 = vpop.xlane.xlu1 %5521  ;;  %v5690_v53 = vpop.xlane.xlu2 %5689 }
 0x9ab   : > { %v14412_v59 = vpop.f32.mrf.mxu2 }
 0x9ad   : > { %v6398_v35 = vpop.f32.mrf.mxu0  ;;  %v14439_v13 = vpop.eup %9970 }
 0x9ae   : > { %v14422_v14 = vmul.f32 0.17677669, %v6398_v35 }
 0x9b0   : > { %7859 = vmatmul.bf16.gmra.mxu2 %v16092_v33  ;;  %v6427_v33 = vsel %vm5465_vm11, %v14422_v14, -inf }
 0x9b1   : > { %5725 = vadd.xlane.f32.xlu0 %v5724_v3  ;;  %v5516_v42 = vpop.xlane.xlu0 %5515 }
 0x9b2   : > { %6187 = vmax.xlane.f32.xlu1 %v6186_v62 }
 0x9b3   : > { %v6612_v16 = vpop.f32.mrf.mxu2 }
 0x9b4   : > { %v14437_v3 = vmul.f32 0.17677669, %v6612_v16  ;;  %v5733_v16 = vsel %vm5465_vm11, %v14439_v13, 0.0 }
 0x9b5   : > { %v6400_v47 = vpop.f32.mrf.mxu0 }
 0x9b6   : > { %v14426_v12 = vmul.f32 0.17677669, %v6400_v47  ;;  %v14435_v47 = vmul.f32 0.17677669, %v6604_v5  ;;  %v6642_v5 = vsel %vm5465_vm11, %v14437_v3, -inf }
 0x9b8   : > { %v6430_v22 = vsel %vm5465_vm11, %v14426_v12, -inf }
 0x9b9   : > { %6428 = vmax.xlane.f32.xlu0 %v6427_v33  ;;  %6431 = vmax.xlane.f32.xlu2 %v6430_v22  ;;  %v5684_v35 = vpop.xlane.xlu0 %5683  ;;  %v5704_v33 = vsub.f32 %v14225_v10, %v5690_v53  ;;  %v16095_v22 = vld [vmem:[#allocation57_spill] sm:$0xff] }
 0x9ba   : > { %6631 = vmax.xlane.f32.xlu1 %v6630_v38  ;;  %v5702_v31 = vsub.f32 %v14244_v57, %v5684_v35  ;;  %v16096_v36 = vpack.c.bf16 %v16094_v2, %v16095_v22  ;;  %v6633_v57 = vsel %vm5465_vm11, %v14435_v47, -inf  ;;  %v5525_v35 = vpop.xlane.xlu1 %5524 }
 0x9bb   : > { %v5716_v10 = vmul.f32 1.442695, %v5704_v33  ;;  %v14453_v2 = vpop.f32.mrf.mxu2 }
 0x9bc   : > { %v5712_v62 = vmul.f32 1.442695, %v5702_v31 }
 0x9bd   : > { %v6403_v50 = vpop.f32.mrf.mxu0 }
 0x9be   : > { %9972 = vpow2.f32 %v5712_v62  ;;  %v16097_v62 = vld [vmem:[#allocation61_spill] sm:$0xff] }
 0x9bf   : > { %9974 = vrcp.f32 %v5516_v42  ;;  %v7477_v53 = vmax.f32 %v16097_v62, 0.0 }
 0x9c0   : > { %7864 = vmatmul.bf16.gmra.mxu2 %v16096_v36 }
 0x9c1   : > { %6634 = vmax.xlane.f32.xlu0 %v6633_v57  ;;  %6643 = vmax.xlane.f32.xlu2 %v6642_v5  ;;  %v5519_v38 = vpop.xlane.xlu0 %5518  ;;  %v16098_v5 = vld [vmem:[#allocation59_spill] sm:$0xff]  ;;  %v7541_v52 = vmul.f32 %v7477_v53, %v7477_v53  ;;  %v16099_v53 = vld [vmem:[#allocation65_spill] sm:$0xff] }
 0x9c2   : > { %5734 = vadd.xlane.f32.xlu1 %v5733_v16  ;;  %9976 = vrcp.f32 %v5519_v38  ;;  %v7473_v45 = vmax.f32 %v16098_v5, 0.0 }
 0x9c3   : > { %9978 = vpow2.f32 %v5716_v10  ;;  %v14467_v10 = vmul.f32 0.17677669, %v14398_v61 }
 0x9c4   : > { %v14451_v42 = vpop.eup %9972  ;;  %v7537_v5 = vmul.f32 %v7473_v45, %v7473_v45  ;;  %9980 = vrcp.f32 %v5525_v35 }
 0x9c5   : > { %v6405_v36 = vpop.f32.mrf.mxu0  ;;  %v9975_v31 = vpop.eup %9974  ;;  %v5730_v4 = vsel %vm5465_vm11, %v14451_v42, 0.0  ;;  %v6636_v45 = vsel %vm5465_vm11, %v14467_v10, -inf }
 0x9c6   : > { %v14456_v22 = vmul.f32 0.17677669, %v6405_v36  ;;  %v5546_v16 = vmul.f32 %v9975_v31, %v14234_v32 }
 0x9c8   : > { %v9977_v57 = vpop.eup %9976  ;;  %v6436_v33 = vsel %vm5465_vm11, %v14456_v22, -inf }
 0x9c9   : > { %v5547_v38 = vmul.f32 %v9977_v57, %v14255_v27  ;;  %5731 = vadd.xlane.f32.xlu0 %v5730_v4  ;;  %v5693_v43 = vpop.xlane.xlu0 %5692  ;;  %v5531_v62 = vpop.xlane.xlu1 %5530  ;;  %v7485_v57 = vmax.f32 %v16099_v53, 0.0 }
 0x9ca   : > { %6437 = vmax.xlane.f32.xlu1 %v6436_v33  ;;  %v5705_v36 = vsub.f32 %v14270_v25, %v5693_v43  ;;  %v14472_v32 = vpop.eup %9978  ;;  %v7585_v43 = vpack.c.bf16 %v7541_v52, %v7537_v5  ;;  %v6617_v27 = vpop.f32.mrf.mxu2 }
 0x9cb   : > { %v5554_v9 = vpack.c.bf16 %v5547_v38, %v5546_v16  ;;  %v5528_v25 = vpop.xlane.xlu2 %5527  ;;  %v9981_v52 = vpop.eup %9980  ;;  %v16100_v16 = vld [vmem:[#allocation64_spill] sm:$0xff] }
 0x9cc   : > { %v5718_v7 = vmul.f32 1.442695, %v5705_v36  ;;  %v5549_v33 = vmul.f32 %v9981_v52, %v14247_v23  ;;  %v7481_v38 = vmax.f32 %v16100_v16, 0.0  ;;  %v14498_v23 = vmul.f32 0.17677669, %v14412_v59 }
 0x9cd   : > { %v6408_v26 = vpop.f32.mrf.mxu0  ;;  %8978 = vmatmul.msk.bf16.vlgmr.msra.gmra.mxu3 %vm5465_vm11, %v5554_v9  ;;  %v5736_v9 = vsel %vm5465_vm11, %v14472_v32, 0.0  ;;  %v14513_v16 = vmul.f32 0.17677669, %v14453_v2 }
 0x9ce   : > { %v14474_v4 = vmul.f32 0.17677669, %v6408_v26  ;;  %6287 = vmatpush.bf16.msra.mxu3 %v6278_v40  ;;  %9982 = vpow2.f32 %v5718_v7  ;;  %v14483_v7 = vmul.f32 0.17677669, %v6403_v50  ;;  %v6639_v59 = vsel %vm5465_vm11, %v14498_v23, -inf }
 0x9cf   : > { %9984 = vrcp.f32 %v5522_v21 }
 0x9d0   : > { %7869 = vmatmul.bf16.gmra.mxu2 %v7585_v43  ;;  %v6439_v63 = vsel %vm5465_vm11, %v14474_v4, -inf  ;;  %v6433_v36 = vsel %vm5465_vm11, %v14483_v7, -inf }
 0x9d1   : > { %6637 = vmax.xlane.f32.xlu0 %v6636_v45  ;;  %6440 = vmax.xlane.f32.xlu2 %v6439_v63  ;;  %v5696_v26 = vpop.xlane.xlu0 %5695  ;;  %v5699_v21 = vpop.xlane.xlu1 %5698  ;;  %v7549_v45 = vmul.f32 %v7485_v57, %v7485_v57 }
 0x9d2   : > { %5737 = vadd.xlane.f32.xlu1 %v5736_v9  ;;  %v5706_v40 = vsub.f32 %v14282_v29, %v5696_v26  ;;  %v6619_v5 = vpop.f32.mrf.mxu2  ;;  %v7545_v26 = vmul.f32 %v7481_v38, %v7481_v38 }
 0x9d4   : > { %v5720_v61 = vmul.f32 1.442695, %v5706_v40  ;;  %v14485_v35 = vpop.eup %9982  ;;  %v5924_v43 = vpop.xlane.xlu2 %5923  ;;  %v14500_v40 = vmul.f32 0.17677669, %v6619_v5  ;;  %v16102_v5 = vld [vmem:[#allocation68_spill] sm:$0xff] }
 0x9d5   : > { %v9985_v31 = vpop.eup %9984  ;;  %v5739_v29 = vsel %vm5465_vm11, %v14485_v35, 0.0  ;;  %v5946_v52 = vsub.f32 %v14292_v58, %v5924_v43  ;;  %v7489_v43 = vmax.f32 %v16102_v5, 0.0 }
 0x9d6   : > { %9986 = vpow2.f32 %v5720_v61  ;;  %v5548_v50 = vmul.f32 %v9985_v31, %v14227_v48  ;;  %v7589_v31 = vpack.c.bf16 %v7549_v45, %v7545_v26  ;;  %v6651_v57 = vsel %vm5465_vm11, %v14500_v40, -inf }
 0x9d7   : > { %9988 = vrcp.f32 %v5531_v62  ;;  %v5954_v53 = vmul.f32 1.442695, %v5946_v52  ;;  %v6645_v45 = vsel %vm5465_vm11, %v14513_v16, -inf }
 0x9d8   : > { %v5555_v63 = vpack.c.bf16 %v5549_v33, %v5548_v50  ;;  %9990 = vrcp.f32 %v5528_v25  ;;  %v14510_v33 = vmul.f32 0.17677669, %v6617_v27  ;;  %v5707_v27 = vsub.f32 %v14284_v51, %v5699_v21 }
 0x9d9   : > { %6434 = vmax.xlane.f32.xlu0 %v6433_v36  ;;  %5740 = vadd.xlane.f32.xlu2 %v5739_v29  ;;  %9992 = vpow2.f32 %v5954_v53  ;;  %v16101_v36 = vld [vmem:[#allocation70_spill] sm:$0xff]  ;;  %v7553_v53 = vmul.f32 %v7489_v43, %v7489_v43  ;;  %v16103_v43 = vld [vmem:[#allocation75_spill] sm:$0xff] }
 0x9da   : > { %v6648_v25 = vsel %vm5465_vm11, %v14510_v33, -inf  ;;  %v7493_v29 = vmax.f32 %v16101_v36, 0.0 }
 0x9dc   : > { %v14495_v9 = vpop.eup %9986  ;;  %v5927_v61 = vpop.xlane.xlu1 %5926  ;;  %v7557_v52 = vmul.f32 %v7493_v29, %v7493_v29 }
 0x9dd   : > { %8979 = vmatmul.msk.bf16.gmra.mxu3 %vm5465_vm11, %v5555_v63  ;;  %v5742_v48 = vsel %vm5465_vm11, %v14495_v9, 0.0  ;;  %v9989_v58 = vpop.eup %9988  ;;  %v6410_v63 = vpop.f32.mrf.mxu0 }
 0x9de   : > { %5743 = vadd.xlane.f32.xlu1 %v5742_v48  ;;  %v9991_v38 = vpop.eup %9990  ;;  %v5551_v50 = vmul.f32 %v9989_v58, %v14273_v34  ;;  %v5722_v48 = vmul.f32 1.442695, %v5707_v27  ;;  %v6173_v36 = vpop.xlane.xlu2 %6172 }
 0x9df   : > { %v5550_v2 = vmul.f32 %v9991_v38, %v14258_v37  ;;  %v14524_v26 = vpop.eup %9992  ;;  %v7593_v37 = vpack.c.bf16 %v7557_v52, %v7553_v53  ;;  %v16104_v52 = vld [vmem:[#allocation73_spill] sm:$0xff] }
 0x9e0   : > { %7874 = vmatmul.bf16.gmra.mxu2 %v7589_v31  ;;  %v5970_v21 = vsel %vm5465_vm11, %v14524_v26, 0.0  ;;  %9994 = vpow2.f32 %v5722_v48  ;;  %v7497_v48 = vmax.f32 %v16104_v52, 0.0 }
 0x9e1   : > { %6640 = vmax.xlane.f32.xlu0 %v6639_v59  ;;  %6652 = vmax.xlane.f32.xlu2 %v6651_v57  ;;  %v5556_v31 = vpack.c.bf16 %v5551_v50, %v5550_v2  ;;  %v14526_v59 = vmul.f32 0.17677669, %v6410_v63  ;;  %v5947_v57 = vsub.f32 %v14305_v39, %v5927_v61  ;;  %v6193_v39 = vsub.f32 %v14302_v46, %v6173_v36 }
 0x9e3   : > { %v6442_v38 = vsel %vm5465_vm11, %v14526_v59, -inf }
 0x9e4   : > { %v5534_v62 = vpop.xlane.xlu1 %5533 }
 0x9e6   : > { %6649 = vmax.xlane.f32.xlu1 %v6648_v25  ;;  %v14533_v25 = vpop.f32.mrf.mxu2  ;;  %v14537_v27 = vpop.eup %9994 }
 0x9e9   : > { %6646 = vmax.xlane.f32.xlu0 %v6645_v45  ;;  %v7501_v45 = vmax.f32 %v16103_v43, 0.0 }
 0x9eb   : > { %v7565_v53 = vmul.f32 %v7501_v45, %v7501_v45  ;;  %v6848_v45 = vpop.f32.mrf.mxu0 }
 0x9ec   : > { %v6170_v34 = vpop.xlane.xlu1 %6169  ;;  %v5933_v29 = vpop.xlane.xlu0 %5932 }
 0x9ed   : > { %v6192_v51 = vsub.f32 %v14325_v56, %v6170_v34  ;;  %8980 = vmatmul.msk.bf16.gmra.mxu3 %vm5465_vm11, %v5556_v31  ;;  %v5956_v56 = vmul.f32 1.442695, %v5947_v57  ;;  %v5949_v61 = vsub.f32 %v14327_v0, %v5933_v29  ;;  %v5745_v31 = vsel %vm5465_vm11, %v14537_v27, 0.0 }
 0x9ee   : > { %5971 = vadd.xlane.f32.xlu1 %v5970_v21  ;;  %v7096_v34 = vpop.f32.mrf.mxu2  ;;  %v7561_v0 = vmul.f32 %v7497_v48, %v7497_v48 }
 0x9ef   : > { %v6200_v58 = vmul.f32 1.442695, %v6192_v51  ;;  %v6202_v51 = vmul.f32 1.442695, %v6193_v39  ;;  %v5960_v46 = vmul.f32 1.442695, %v5949_v61 }
 0x9f0   : > { %7879 = vmatmul.bf16.gmra.mxu2 %v7593_v37 }
 0x9f1   : > { %6443 = vmax.xlane.f32.xlu0 %v6442_v38  ;;  %9996 = vpow2.f32 %v6200_v58  ;;  %v14552_v58 = vmul.f32 0.17677669, %v7096_v34  ;;  %v7597_v38 = vpack.c.bf16 %v7565_v53, %v7561_v0 }
 0x9f2   : > { %9998 = vpow2.f32 %v5956_v56 }
 0x9f4   : > { %v5930_v50 = vpop.xlane.xlu1 %5929 }
 0x9f5   : > { %v5948_v5 = vsub.f32 %v14334_v28, %v5930_v50 }
 0x9f7   : > { %v5958_v2 = vmul.f32 1.442695, %v5948_v5  ;;  %v14543_v63 = vpop.eup %9996  ;;  %v7125_v5 = vsel %vm5465_vm11, %v14552_v58, -inf }
 0x9f8   : > { %v6216_v28 = vsel %vm5465_vm11, %v14543_v63, 0.0  ;;  %v14550_v57 = vpop.eup %9998 }
 0x9f9   : > { %10000 = vpow2.f32 %v5958_v2  ;;  %5746 = vadd.xlane.f32.xlu0 %v5745_v31  ;;  %6217 = vadd.xlane.f32.xlu2 %v6216_v28 }
 0x9fa   : > { %10002 = vrcp.f32 %v5534_v62  ;;  %v5973_v62 = vsel %vm5465_vm11, %v14550_v57, 0.0 }
 0x9fc   : > { %v5939_v21 = vpop.xlane.xlu0 %5938  ;;  %v5537_v37 = vpop.xlane.xlu1 %5536 }
 0x9fd   : > { %10004 = vrcp.f32 %v5537_v37  ;;  %v5951_v36 = vsub.f32 %v14344_v20, %v5939_v21  ;;  %v14580_v21 = vpop.f32.mrf.mxu0 }
 0x9fe   : > { %10006 = vpow2.f32 %v6202_v51 }
 0x9ff   : > { %v14554_v56 = vpop.eup %10000  ;;  %10008 = vpow2.f32 %v5960_v46  ;;  %v5964_v39 = vmul.f32 1.442695, %v5951_v36 }
 0xa00   : > { %7884 = vmatmul.bf16.gmra.mxu2 %v7597_v38  ;;  %v5976_v29 = vsel %vm5465_vm11, %v14554_v56, 0.0  ;;  %v10003_v50 = vpop.eup %10002 }
 0xa01   : > { %5974 = vadd.xlane.f32.xlu0 %v5973_v62  ;;  %5977 = vadd.xlane.f32.xlu1 %v5976_v29  ;;  %v5552_v20 = vmul.f32 %v10003_v50, %v14314_v6  ;;  %10010 = vpow2.f32 %v5964_v39 }
 0xa02   : > { %7126 = vmax.xlane.f32.xlu2 %v7125_v5 }
 0xa03   : > { %v10005_v43 = vpop.eup %10004 }
 0xa04   : > { %v14563_v61 = vpop.eup %10006  ;;  %v5553_v2 = vmul.f32 %v10005_v43, %v14342_v44  ;;  %v5942_v52 = vpop.xlane.xlu0 %5941 }
 0xa05   : > { %v6176_v48 = vpop.xlane.xlu1 %6175  ;;  %v14567_v31 = vpop.eup %10008  ;;  %v5952_v28 = vsub.f32 %v14352_v60, %v5942_v52  ;;  %v6219_v6 = vsel %vm5465_vm11, %v14563_v61, 0.0 }
 0xa06   : > { %v6194_v53 = vsub.f32 %v14350_v54, %v6176_v48  ;;  %v5557_v34 = vpack.c.bf16 %v5553_v2, %v5552_v20  ;;  %v5979_v0 = vsel %vm5465_vm11, %v14567_v31, 0.0 }
 0xa07   : > { %v5966_v51 = vmul.f32 1.442695, %v5952_v28  ;;  %v14578_v54 = vpop.eup %10010 }
 0xa08   : > { %v6204_v46 = vmul.f32 1.442695, %v6194_v53  ;;  %8981 = vmatmul.msk.bf16.gmra.mxu3 %vm5465_vm11, %v5557_v34  ;;  %v5985_v39 = vsel %vm5465_vm11, %v14578_v54, 0.0  ;;  %v7099_v53 = vpop.f32.mrf.mxu2  ;;  %v6853_v34 = vpop.f32.mrf.mxu0 }
 0xa09   : > { %10012 = vpow2.f32 %v5966_v51  ;;  %5980 = vadd.xlane.f32.xlu0 %v5979_v0  ;;  %6220 = vadd.xlane.f32.xlu1 %v6219_v6 }
 0xa0a   : > { %10014 = vpow2.f32 %v6204_v46 }
 0xa0c   : > { %v6185_v44 = vpop.xlane.xlu0 %6184  ;;  %v14576_v60 = vpop.xlane.xlu2 %5944 }
 0xa0d   : > { %v6197_v37 = vsub.f32 %v14363_v49, %v6185_v44  ;;  %v5936_v38 = vpop.xlane.xlu1 %5935  ;;  %v14595_v49 = vmul.f32 0.17677669, %v14533_v25  ;;  %v14612_v44 = vmul.f32 0.17677669, %v7099_v53 }
 0xa0e   : > { %v5950_v36 = vsub.f32 %v14365_v30, %v5936_v38 }
 0xa0f   : > { %v14584_v62 = vpop.eup %10012  ;;  %v6210_v29 = vmul.f32 1.442695, %v6197_v37  ;;  %v7122_v25 = vsel %vm5465_vm11, %v14595_v49, -inf  ;;  %16106 = vst [vmem:[#allocation139_spill] sm:$0xff] %v14612_v44 }
 0xa10   : > { %16105 = vst [vmem:[#allocation136_spill] sm:$0xff] %v14584_v62  ;;  %v14586_v50 = vpop.eup %10014  ;;  %v5962_v5 = vmul.f32 1.442695, %v5950_v36  ;;  %v5988_v43 = vsel %vm5465_vm11, %v14584_v62, 0.0 }
 0xa11   : > { %10016 = vpow2.f32 %v6210_v29  ;;  %v6222_v20 = vsel %vm5465_vm11, %v14586_v50, 0.0  ;;  %5989 = vadd.xlane.f32.xlu2 %v5988_v43  ;;  %5986 = vadd.xlane.f32.xlu1 %v5985_v39 }
 0xa12   : > { %10018 = vpow2.f32 %v5962_v5  ;;  %6223 = vadd.xlane.f32.xlu0 %v6222_v20  ;;  %v7128_v20 = vsel %vm5465_vm11, %v14612_v44, -inf }
 0xa14   : > { %v6191_v30 = vpop.xlane.xlu0 %6190  ;;  %v14598_v48 = vpop.xlane.xlu2 %6422 }
 0xa15   : > { %v6179_v2 = vpop.xlane.xlu1 %6178  ;;  %v6199_v29 = vsub.f32 %v14376_v15, %v6191_v30  ;;  %v14626_v30 = vmul.f32 0.17677669, %v6853_v34 }
 0xa16   : > { %v6195_v52 = vsub.f32 %v14379_v18, %v6179_v2  ;;  %v14610_v18 = vmul.f32 0.17677669, %v6848_v45  ;;  %v7101_v45 = vpop.f32.mrf.mxu2 }
 0xa17   : > { %v14600_v28 = vpop.eup %10016  ;;  %v6214_v15 = vmul.f32 1.442695, %v6199_v29  ;;  %16108 = vst [vmem:[#allocation104_spill] sm:$0xff] %v14626_v30 }
 0xa18   : > { %v14602_v51 = vpop.eup %10018  ;;  %v6206_v46 = vmul.f32 1.442695, %v6195_v52  ;;  %v6231_v0 = vsel %vm5465_vm11, %v14600_v28, 0.0  ;;  %v6876_v2 = vsel %vm5465_vm11, %v14610_v18, -inf  ;;  %v6855_v52 = vpop.f32.mrf.mxu0 }
 0xa19   : > { %v5982_v6 = vsel %vm5465_vm11, %v14602_v51, 0.0  ;;  %6232 = vadd.xlane.f32.xlu2 %v6231_v0  ;;  %7123 = vmax.xlane.f32.xlu1 %v7122_v25 }
 0xa1a   : > { %10020 = vpow2.f32 %v6206_v46  ;;  %5983 = vadd.xlane.f32.xlu0 %v5982_v6 }
 0xa1c   : > { %v6426_v37 = vpop.xlane.xlu0 %6425  ;;  %v5729_v39 = vpop.xlane.xlu2 %5728 }
 0xa1d   : > { %v6182_v38 = vpop.xlane.xlu1 %6181  ;;  %v6446_v25 = vsub.f32 %v14400_v55, %v6426_v37 }
 0xa1e   : > { %v6196_v36 = vsub.f32 %v14396_v41, %v6182_v38  ;;  %v14624_v41 = vmul.f32 0.17677669, %v7101_v45 }
 0xa20   : > { %v14616_v5 = vpop.eup %10020  ;;  %v6208_v43 = vmul.f32 1.442695, %v6196_v36  ;;  %16107 = vst [vmem:[#allocation141_spill] sm:$0xff] %v14624_v41  ;;  %v6882_v36 = vsel %vm5465_vm11, %v14626_v30, -inf  ;;  %v7131_v29 = vsel %vm5465_vm11, %v14624_v41, -inf  ;;  %v6858_v37 = vpop.f32.mrf.mxu0 }
 0xa21   : > { %v6225_v53 = vsel %vm5465_vm11, %v14616_v5, 0.0  ;;  %7129 = vmax.xlane.f32.xlu2 %v7128_v20  ;;  %6877 = vmax.xlane.f32.xlu1 %v6876_v2 }
 0xa22   : > { %10022 = vpow2.f32 %v6208_v43  ;;  %6226 = vadd.xlane.f32.xlu0 %v6225_v53 }
 0xa23   : > { %10024 = vrcp.f32 %v5729_v39  ;;  %v6455_v39 = vmul.f32 1.442695, %v6446_v25  ;;  %v6445_v25 = vsub.f32 %v14381_v11, %v14598_v48 }
 0xa24   : > { %v5726_v46 = vpop.xlane.xlu0 %5725 }
 0xa25   : > { %10026 = vrcp.f32 %v5726_v46  ;;  %v6188_v0 = vpop.xlane.xlu1 %6187 }
 0xa26   : > { %10028 = vpow2.f32 %v6214_v15  ;;  %v6198_v6 = vsub.f32 %v14410_v17, %v6188_v0  ;;  %v14638_v17 = vmul.f32 0.17677669, %v6855_v52 }
 0xa27   : > { %10030 = vpow2.f32 %v6455_v39 }
 0xa28   : > { %v14630_v38 = vpop.eup %10022  ;;  %v6212_v20 = vmul.f32 1.442695, %v6198_v6  ;;  %v6453_v6 = vmul.f32 1.442695, %v6445_v25  ;;  %v6860_v11 = vpop.f32.mrf.mxu0 }
 0xa29   : > { %v10025_v43 = vpop.eup %10024  ;;  %v6228_v34 = vsel %vm5465_vm11, %v14630_v38, 0.0  ;;  %6883 = vmax.xlane.f32.xlu2 %v6882_v36  ;;  %7132 = vmax.xlane.f32.xlu1 %v7131_v29  ;;  %v14646_v36 = vpop.f32.mrf.mxu2 }
 0xa2a   : > { %6229 = vadd.xlane.f32.xlu0 %v6228_v34  ;;  %v5757_v2 = vmul.f32 %v10025_v43, %v14393_v19  ;;  %10032 = vpow2.f32 %v6212_v20 }
 0xa2b   : > { %v10027_v55 = vpop.eup %10026  ;;  %10034 = vpow2.f32 %v6453_v6 }
 0xa2c   : > { %v5756_v45 = vmul.f32 %v10027_v55, %v14408_v8  ;;  %v6429_v53 = vpop.xlane.xlu0 %6428  ;;  %v14642_v15 = vpop.eup %10028  ;;  %v6885_v8 = vsel %vm5465_vm11, %v14638_v17, -inf }
 0xa2d   : > { %v14644_v46 = vpop.xlane.xlu1 %6631  ;;  %v6237_v19 = vsel %vm5465_vm11, %v14642_v15, 0.0  ;;  %v14655_v52 = vpop.xlane.xlu2 %6431 }
 0xa2e   : > { %v5764_v0 = vpack.c.bf16 %v5757_v2, %v5756_v45  ;;  %v14657_v29 = vpop.eup %10030 }
 0xa2f   : > { %16109 = vst [vmem:[#allocation102_spill] sm:$0xff] %v14657_v29  ;;  %v6472_v39 = vsel %vm5465_vm11, %v14657_v29, 0.0 }
 0xa30   : > { %8986 = vmatmul.msk.bf16.vlgmr.msrb.gmra.mxu3 %vm5465_vm11, %v5764_v0  ;;  %v14659_v34 = vpop.eup %10032 }
 0xa31   : > { %6238 = vadd.xlane.f32.xlu2 %v6237_v19  ;;  %6886 = vmax.xlane.f32.xlu1 %v6885_v8  ;;  %v6234_v55 = vsel %vm5465_vm11, %v14659_v34, 0.0  ;;  %v7106_v20 = vpop.f32.mrf.mxu2  ;;  %v14669_v25 = vpop.eup %10034 }
 0xa32   : > { %v14665_v2 = vmul.f32 0.17677669, %v7106_v20  ;;  %16111 = vst [vmem:[#allocation106_spill] sm:$0xff] %v14669_v25  ;;  %v14675_v8 = vpop.f32.mrf.mxu0  ;;  %v14681_v20 = vmul.f32 0.17677669, %v6858_v37 }
 0xa34   : > { %v6635_v43 = vpop.xlane.xlu0 %6634  ;;  %16110 = vst [vmem:[#allocation108_spill] sm:$0xff] %v14665_v2  ;;  %v7137_v6 = vsel %vm5465_vm11, %v14665_v2, -inf  ;;  %v6447_v2 = vsub.f32 %v14422_v14, %v6429_v53  ;;  %v6888_v37 = vsel %vm5465_vm11, %v14681_v20, -inf }
 0xa35   : > { %v5735_v48 = vpop.xlane.xlu1 %5734  ;;  %v14667_v45 = vpop.xlane.xlu2 %6643 }
 0xa36   : > { %10036 = vrcp.f32 %v5735_v48  ;;  %v6469_v48 = vsel %vm5465_vm11, %v14669_v25, 0.0  ;;  %v6655_v25 = vsub.f32 %v14435_v47, %v6635_v43 }
 0xa39   : > { %6473 = vadd.xlane.f32.xlu2 %v6472_v39  ;;  %6235 = vadd.xlane.f32.xlu1 %v6234_v55 }
 0xa3c   : > { %v5732_v0 = vpop.xlane.xlu0 %5731  ;;  %v10037_v39 = vpop.eup %10036 }
 0xa3d   : > { %10038 = vrcp.f32 %v5732_v0  ;;  %v14671_v19 = vpop.xlane.xlu1 %6437  ;;  %v14683_v0 = vmul.f32 0.17677669, %v6860_v11  ;;  %v5759_v41 = vmul.f32 %v10037_v39, %v14439_v13  ;;  %v7109_v13 = vpop.f32.mrf.mxu2 }
 0xa3e   : > { %6725 = vrot.lane.b32.xlu0 %v13645_v1, %s10694_s30  ;;  %v14696_v14 = vmul.f32 0.17677669, %v7109_v13 }
 0xa3f   : > { %v6891_v11 = vsel %vm5465_vm11, %v14683_v0, -inf }
 0xa41   : > { %7138 = vmax.xlane.f32.xlu2 %v7137_v6  ;;  %6470 = vadd.xlane.f32.xlu1 %v6469_v48  ;;  %v6865_v6 = vpop.f32.mrf.mxu0  ;;  %v6664_v48 = vmul.f32 1.442695, %v6655_v25 }
 0xa43   : > { %v10039_v55 = vpop.eup %10038 }
 0xa44   : > { %v5758_v1 = vmul.f32 %v10039_v55, %v14451_v42  ;;  %v6638_v29 = vpop.xlane.xlu0 %6637  ;;  %v14687_v44 = vpop.xlane.xlu2 %6440  ;;  %v6457_v42 = vmul.f32 1.442695, %v6447_v2 }
 0xa45   : > { %v5738_v62 = vpop.xlane.xlu1 %5737 }
 0xa46   : > { %v5765_v30 = vpack.c.bf16 %v5759_v41, %v5758_v1  ;;  %10040 = vrcp.f32 %v5738_v62  ;;  %v14698_v41 = vmul.f32 0.17677669, %v6865_v6  ;;  %v7140_v62 = vsel %vm5465_vm11, %v14696_v14, -inf }
 0xa47   : > { %v5953_v6 = vsub.f32 %v14367_v24, %v14576_v60 }
 0xa48   : > { %8987 = vmatmul.msk.bf16.gmra.mxu3 %vm5465_vm11, %v5765_v30  ;;  %v6448_v30 = vsub.f32 %v14426_v12, %v14655_v52  ;;  %v6897_v2 = vsel %vm5465_vm11, %v14698_v41, -inf }
 0xa49   : > { %6889 = vmax.xlane.f32.xlu2 %v6888_v37  ;;  %6892 = vmax.xlane.f32.xlu1 %v6891_v11 }
 0xa4a   : > { %v6459_v55 = vmul.f32 1.442695, %v6448_v30 }
 0xa4c   : > { %v6435_v47 = vpop.xlane.xlu0 %6434  ;;  %v5741_v53 = vpop.xlane.xlu2 %5740 }
 0xa4d   : > { %10042 = vrcp.f32 %v5741_v53  ;;  %v6449_v43 = vsub.f32 %v14483_v7, %v6435_v47  ;;  %v10041_v25 = vpop.eup %10040 }
 0xa4e   : > { %10044 = vpow2.f32 %v6457_v42  ;;  %v5760_v12 = vmul.f32 %v10041_v25, %v14472_v32  ;;  %v6656_v42 = vsub.f32 %v14467_v10, %v6638_v29 }
 0xa4f   : > { %10046 = vpow2.f32 %v6664_v48  ;;  %v6461_v37 = vmul.f32 1.442695, %v6449_v43  ;;  %v5968_v43 = vmul.f32 1.442695, %v5953_v6 }
 0xa50   : > { %v5583_v39 = vpop.f32.mrf.mxu3  ;;  %10048 = vpow2.f32 %v6459_v55  ;;  %v6666_v24 = vmul.f32 1.442695, %v6656_v42 }
 0xa51   : > { %5603 = vst.msk [vmem:[#allocation3] sm:$0xff] %vm2918_vm1, %v5583_v39  ;;  %6898 = vmax.xlane.f32.xlu2 %v6897_v2  ;;  %7141 = vmax.xlane.f32.xlu1 %v7140_v62  ;;  %10050 = vpow2.f32 %v6461_v37  ;;  %v5744_v53 = vpop.xlane.xlu1 %5743  ;;  %v6658_v39 = vsub.f32 %v14437_v3, %v14667_v45  ;;  %v6450_v2 = vsub.f32 %v14456_v22, %v14671_v19  ;;  %v16112_v22 = vld [vmem:[#allocation137_spill] sm:$0xff] }
 0xa52   : > { %10052 = vpow2.f32 %v5968_v43  ;;  %v6654_v19 = vsub.f32 %v16112_v22, %v14644_v46 }
 0xa53   : > { %v10043_v1 = vpop.eup %10042  ;;  %10054 = vpow2.f32 %v6666_v24  ;;  %v6463_v3 = vmul.f32 1.442695, %v6450_v2 }
 0xa54   : > { %v14708_v11 = vpop.eup %10044  ;;  %v5761_v7 = vmul.f32 %v10043_v1, %v14485_v35  ;;  %v6641_v52 = vpop.xlane.xlu0 %6640  ;;  %v6670_v1 = vmul.f32 1.442695, %v6658_v39 }
 0xa55   : > { %v14712_v13 = vpop.eup %10046  ;;  %v6657_v47 = vsub.f32 %v14498_v23, %v6641_v52  ;;  %v6475_v32 = vsel %vm5465_vm11, %v14708_v11, 0.0 }
 0xa56   : > { %v5766_v48 = vpack.c.bf16 %v5761_v7, %v5760_v12  ;;  %v6681_v35 = vsel %vm5465_vm11, %v14712_v13, 0.0  ;;  %v14724_v60 = vpop.eup %10048 }
 0xa57   : > { %v6668_v10 = vmul.f32 1.442695, %v6657_v47  ;;  %v14726_v29 = vpop.eup %10050  ;;  %v6478_v55 = vsel %vm5465_vm11, %v14724_v60, 0.0  ;;  %v6662_v47 = vmul.f32 1.442695, %v6654_v19 }
 0xa58   : > { %8988 = vmatmul.msk.bf16.gmra.mxu3 %vm5465_vm11, %v5766_v48  ;;  %v5585_v30 = vpop.f32.mrf.mxu3  ;;  %v6481_v25 = vsel %vm5465_vm11, %v14726_v29, 0.0  ;;  %v14737_v12 = vpop.eup %10052 }
 0xa59   : > { %5604 = vst.msk [vmem:[#allocation3 + $0x8] sm:$0xff] %vm2918_vm1, %v5585_v30  ;;  %6476 = vadd.xlane.f32.xlu2 %v6475_v32  ;;  %6682 = vadd.xlane.f32.xlu1 %v6681_v35  ;;  %10056 = vpow2.f32 %v6668_v10  ;;  %v6650_v37 = vpop.xlane.xlu1 %6649  ;;  %v14739_v45 = vpop.eup %10054  ;;  %v5991_v48 = vsel %vm5465_vm11, %v14737_v12, 0.0 }
 0xa5a   : > { %10058 = vpow2.f32 %v6670_v1  ;;  %v6684_v46 = vsel %vm5465_vm11, %v14739_v45, 0.0  ;;  %v14753_v35 = vpop.xlane.xlu2 %6652  ;;  %v6660_v2 = vsub.f32 %v14510_v33, %v6650_v37 }
 0xa5b   : > { %10060 = vpow2.f32 %v6463_v3 }
 0xa5c   : > { %v6647_v23 = vpop.xlane.xlu0 %6646  ;;  %10062 = vrcp.f32 %v5744_v53  ;;  %v6674_v37 = vmul.f32 1.442695, %v6660_v2 }
 0xa5d   : > { %v6659_v6 = vsub.f32 %v14513_v16, %v6647_v23  ;;  %10064 = vpow2.f32 %v6662_v47 }
 0xa5f   : > { %v14743_v52 = vpop.eup %10056  ;;  %v6672_v16 = vmul.f32 1.442695, %v6659_v6 }
 0xa60   : > { %v5588_v62 = vpop.f32.mrf.mxu3  ;;  %v6687_v32 = vsel %vm5465_vm11, %v14743_v52, 0.0  ;;  %v14759_v24 = vpop.eup %10058 }
 0xa61   : > { %5605 = vst.msk [vmem:[#allocation3 + $0x10] sm:$0xff] %vm2918_vm1, %v5588_v62  ;;  %6482 = vadd.xlane.f32.xlu2 %v6481_v25  ;;  %6479 = vadd.xlane.f32.xlu1 %v6478_v55  ;;  %v5972_v10 = vpop.xlane.xlu1 %5971  ;;  %v14761_v39 = vpop.eup %10060  ;;  %v6690_v25 = vsel %vm5465_vm11, %v14759_v24, 0.0 }
 0xa62   : > { %v6484_v53 = vsel %vm5465_vm11, %v14761_v39, 0.0  ;;  %v10063_v55 = vpop.eup %10062 }
 0xa63   : > { %v14771_v3 = vpop.eup %10064  ;;  %v5762_v19 = vmul.f32 %v10063_v55, %v14495_v9 }
 0xa64   : > { %v6444_v7 = vpop.xlane.xlu0 %6443 }
 0xa65   : > { %v6452_v42 = vsub.f32 %v14526_v59, %v6444_v7  ;;  %v14757_v59 = vmul.f32 0.17677669, %v14580_v21 }
 0xa67   : > { %v6467_v43 = vmul.f32 1.442695, %v6452_v42  ;;  %v6879_v62 = vsel %vm5465_vm11, %v14757_v59, -inf }
 0xa68   : > { %5992 = vadd.xlane.f32.xlu0 %v5991_v48  ;;  %v5590_v30 = vpop.f32.mrf.mxu3 }
 0xa69   : > { %5606 = vst.msk [vmem:[#allocation3 + $0x18] sm:$0xff] %vm2918_vm1, %v5590_v30  ;;  %6688 = vadd.xlane.f32.xlu2 %v6687_v32  ;;  %6685 = vadd.xlane.f32.xlu1 %v6684_v46  ;;  %v6678_v30 = vsel %vm5465_vm11, %v14771_v3, 0.0 }
 0xa6c   : > { %v5747_v23 = vpop.xlane.xlu0 %5746  ;;  %v6218_v1 = vpop.xlane.xlu2 %6217 }
 0xa6d   : > { %10066 = vrcp.f32 %v5747_v23 }
 0xa6e   : > { %10068 = vpow2.f32 %v6672_v16 }
 0xa6f   : > { %10070 = vpow2.f32 %v6467_v43  ;;  %v14788_v43 = vmul.f32 0.17677669, %v14646_v36 }
 0xa70   : > { %6880 = vmax.xlane.f32.xlu0 %v6879_v62  ;;  %v5593_v21 = vpop.f32.mrf.mxu3  ;;  %10072 = vrcp.f32 %v5972_v10 }
 0xa71   : > { %5607 = vst.msk [vmem:[#allocation3 + $0x20] sm:$0xff] %vm2918_vm1, %v5593_v21  ;;  %6485 = vadd.xlane.f32.xlu1 %v6484_v53  ;;  %6691 = vadd.xlane.f32.xlu2 %v6690_v25  ;;  %v7134_v55 = vsel %vm5465_vm11, %v14788_v43, -inf }
 0xa73   : > { %v10067_v33 = vpop.eup %10066 }
 0xa74   : > { %v14773_v22 = vpop.eup %10068  ;;  %v5763_v7 = vmul.f32 %v10067_v33, %v14537_v27  ;;  %v5975_v6 = vpop.xlane.xlu0 %5974 }
 0xa75   : > { %v5978_v42 = vpop.xlane.xlu1 %5977  ;;  %v14777_v48 = vpop.eup %10070  ;;  %10074 = vrcp.f32 %v5975_v6  ;;  %v6693_v46 = vsel %vm5465_vm11, %v14773_v22, 0.0 }
 0xa76   : > { %v5767_v47 = vpack.c.bf16 %v5763_v7, %v5762_v19  ;;  %10076 = vpow2.f32 %v6674_v37  ;;  %v6490_v9 = vsel %vm5465_vm11, %v14777_v48, 0.0  ;;  %v10073_v27 = vpop.eup %10072  ;;  %v14790_v10 = vpop.xlane.xlu2 %7126 }
 0xa77   : > { %v6002_v23 = vmul.f32 %v10073_v27, %v14524_v26  ;;  %10078 = vrcp.f32 %v6218_v1  ;;  %v7111_v33 = vpop.f32.mrf.mxu2 }
 0xa78   : > { %6679 = vadd.xlane.f32.xlu0 %v6678_v30  ;;  %8989 = vmatmul.msk.bf16.gmra.mxu3 %vm5465_vm11, %v5767_v47  ;;  %v5595_v32 = vpop.f32.mrf.mxu3  ;;  %v6451_v30 = vsub.f32 %v14474_v4, %v14687_v44  ;;  %v6661_v44 = vsub.f32 %v14500_v40, %v14753_v35 }
 0xa79   : > { %5608 = vst.msk [vmem:[#allocation3 + $0x28] sm:$0xff] %vm2918_vm1, %v5595_v32  ;;  %6694 = vadd.xlane.f32.xlu1 %v6693_v46  ;;  %6491 = vadd.xlane.f32.xlu2 %v6490_v9 }
 0xa7b   : > { %v10075_v16 = vpop.eup %10074 }
 0xa7c   : > { %v6003_v2 = vmul.f32 %v10075_v16, %v14550_v57  ;;  %v5981_v62 = vpop.xlane.xlu0 %5980  ;;  %v14794_v53 = vpop.eup %10076  ;;  %v14801_v57 = vmul.f32 0.17677669, %v7111_v33 }
 0xa7d   : > { %v6221_v21 = vpop.xlane.xlu1 %6220  ;;  %v6696_v36 = vsel %vm5465_vm11, %v14794_v53, 0.0  ;;  %v10079_v26 = vpop.eup %10078 }
 0xa7e   : > { %v6010_v25 = vpack.c.bf16 %v6003_v2, %v6002_v23  ;;  %10080 = vrcp.f32 %v6221_v21  ;;  %v6248_v7 = vmul.f32 %v10079_v26, %v14543_v63  ;;  %v7143_v9 = vsel %vm5465_vm11, %v14801_v57, -inf }
 0xa7f   : > { %10082 = vrcp.f32 %v5981_v62  ;;  %v14814_v63 = vmul.f32 0.17677669, %v14675_v8 }
 0xa80   : > { %7135 = vmax.xlane.f32.xlu0 %v7134_v55  ;;  %8994 = vmatmul.msk.bf16.vlgmr.msrb.gmra.mxu1 %vm5465_vm11, %v6010_v25  ;;  %10084 = vrcp.f32 %v5978_v42  ;;  %v6465_v42 = vmul.f32 1.442695, %v6451_v30 }
 0xa81   : > { %6697 = vadd.xlane.f32.xlu1 %v6696_v36 }
 0xa82   : > { %10086 = vpow2.f32 %v6465_v42 }
 0xa84   : > { %v10081_v1 = vpop.eup %10080  ;;  %v14803_v19 = vpop.xlane.xlu2 %5989 }
 0xa85   : > { %v5987_v37 = vpop.xlane.xlu1 %5986  ;;  %v6249_v6 = vmul.f32 %v10081_v1, %v14563_v61  ;;  %v6224_v47 = vpop.xlane.xlu0 %6223  ;;  %v7147_v1 = vsub.f32 %v14552_v58, %v14790_v10 }
 0xa86   : > { %v10083_v32 = vpop.eup %10082 }
 0xa87   : > { %v6256_v46 = vpack.c.bf16 %v6249_v6, %v6248_v7  ;;  %v10085_v27 = vpop.eup %10084  ;;  %v6005_v16 = vmul.f32 %v10083_v32, %v14567_v31  ;;  %v6894_v31 = vsel %vm5465_vm11, %v14814_v63, -inf }
 0xa88   : > { %7144 = vmax.xlane.f32.xlu0 %v7143_v9  ;;  %v6004_v23 = vmul.f32 %v10085_v27, %v14554_v56  ;;  %v6676_v56 = vmul.f32 1.442695, %v6661_v44  ;;  %v14824_v33 = vpop.eup %10086  ;;  %v7156_v9 = vmul.f32 1.442695, %v7147_v1 }
 0xa89   : > { %9002 = vmatmul.msk.bf16.vlgmr.msra.gmra.mxu3 %vm5465_vm11, %v6256_v46  ;;  %v6487_v6 = vsel %vm5465_vm11, %v14824_v33, 0.0 }
 0xa8a   : > { %v6011_v25 = vpack.c.bf16 %v6005_v16, %v6004_v23 }
 0xa8b   : > { %v5598_v61 = vpop.f32.mrf.mxu3 }
 0xa8c   : > { %5609 = vst.msk [vmem:[#allocation3 + $0x30] sm:$0xff] %vm2918_vm1, %v5598_v61  ;;  %v6233_v21 = vpop.xlane.xlu2 %6232 }
 0xa8d   : > { %v7124_v4 = vpop.xlane.xlu1 %7123  ;;  %v5984_v2 = vpop.xlane.xlu0 %5983 }
 0xa8e   : > { %v7146_v62 = vsub.f32 %v14595_v49, %v7124_v4  ;;  %10088 = vrcp.f32 %v5984_v2 }
 0xa90   : > { %v7154_v55 = vmul.f32 1.442695, %v7146_v62  ;;  %6895 = vmax.xlane.f32.xlu0 %v6894_v31  ;;  %8995 = vmatmul.msk.bf16.gmra.mxu1 %vm5465_vm11, %v6011_v25 }
 0xa92   : > { %10090 = vpow2.f32 %v7154_v55 }
 0xa93   : > { %10092 = vrcp.f32 %v5987_v37  ;;  %v5600_v8 = vpop.f32.mrf.mxu3 }
 0xa94   : > { %10094 = vrcp.f32 %v6224_v47  ;;  %5610 = vst.msk [vmem:[#allocation3 + $0x38] sm:$0xff] %vm2918_vm1, %v5600_v8  ;;  %v10089_v36 = vpop.eup %10088  ;;  %v14832_v37 = vpop.xlane.xlu2 %7129 }
 0xa95   : > { %v6878_v40 = vpop.xlane.xlu1 %6877  ;;  %10096 = vpow2.f32 %v6676_v56  ;;  %v6227_v49 = vpop.xlane.xlu0 %6226  ;;  %v6006_v32 = vmul.f32 %v10089_v36, %v14602_v51 }
 0xa96   : > { %v6900_v35 = vsub.f32 %v14610_v18, %v6878_v40  ;;  %10098 = vrcp.f32 %v6227_v49  ;;  %v7215_v40 = vld.sshfl [vmem:[#allocation1] sm:$0xff pattern:$0x73625140] }
 0xa98   : > { %v14828_v26 = vpop.eup %10090  ;;  %v6908_v7 = vmul.f32 1.442695, %v6900_v35  ;;  %6488 = vadd.xlane.f32.xlu0 %v6487_v6 }
 0xa99   : > { %v7170_v47 = vsel %vm5465_vm11, %v14828_v26, 0.0  ;;  %v10093_v30 = vpop.eup %10092 }
 0xa9a   : > { %10100 = vpow2.f32 %v6908_v7  ;;  %7171 = vadd.xlane.f32.xlu2 %v7170_v47  ;;  %v10095_v18 = vpop.eup %10094  ;;  %v6007_v10 = vmul.f32 %v10093_v30, %v14578_v54 }
 0xa9b   : > { %v14839_v46 = vpop.eup %10096  ;;  %v6250_v42 = vmul.f32 %v10095_v18, %v14586_v50  ;;  %10102 = vpow2.f32 %v7156_v9 }
 0xa9c   : > { %v10099_v58 = vpop.eup %10098  ;;  %v6012_v61 = vpack.c.bf16 %v6007_v10, %v6006_v32  ;;  %v6699_v51 = vsel %vm5465_vm11, %v14839_v46, 0.0  ;;  %v14853_v2 = vpop.xlane.xlu2 %6883  ;;  %v16113_v32 = vld [vmem:[#allocation128_spill] sm:$0xff] }
 0xa9d   : > { %v14842_v27 = vpop.xlane.xlu1 %7132  ;;  %v6251_v16 = vmul.f32 %v10099_v58, %v14616_v5  ;;  %v6230_v4 = vpop.xlane.xlu0 %6229 }
 0xa9e   : > { %10104 = vrcp.f32 %v6230_v4 }
 0xa9f   : > { %v6257_v44 = vpack.c.bf16 %v6251_v16, %v6250_v42  ;;  %10106 = vrcp.f32 %v6233_v21  ;;  %v16114_v16 = vld [vmem:[#allocation126_spill] sm:$0xff] }
 0xaa0   : > { %v14846_v23 = vpop.eup %10100  ;;  %6700 = vadd.xlane.f32.xlu0 %v6699_v51  ;;  %8996 = vmatmul.msk.bf16.gmra.mxu1 %vm5465_vm11, %v6012_v61  ;;  %v6526_v61 = vsel %vm5570_vm3, %v16114_v16, 0 }
 0xaa1   : > { %v6924_v54 = vsel %vm5465_vm11, %v14846_v23, 0.0  ;;  %9003 = vmatmul.msk.bf16.gmra.mxu3 %vm5465_vm11, %v6257_v44  ;;  %v14856_v50 = vpop.eup %10102  ;;  %6535 = vmatpush.bf16.msra.mxu1 %v6526_v61  ;;  %v16118_v61 = vld [vmem:[#allocation106_spill] sm:$0xff] }
 0xaa2   : > { %6925 = vadd.xlane.f32.xlu1 %v6924_v54  ;;  %v7173_v25 = vsel %vm5465_vm11, %v14856_v50, 0.0 }
 0xaa4   : > { %v10105_v62 = vpop.eup %10104  ;;  %v6239_v56 = vpop.xlane.xlu2 %6238 }
 0xaa5   : > { %v6887_v5 = vpop.xlane.xlu1 %6886  ;;  %v10107_v55 = vpop.eup %10106  ;;  %v6252_v31 = vmul.f32 %v10105_v62, %v14630_v38 }
 0xaa6   : > { %v6253_v8 = vmul.f32 %v10107_v55, %v14600_v28  ;;  %v6903_v9 = vsub.f32 %v14638_v17, %v6887_v5  ;;  %v16115_v55 = vld [vmem:[#allocation136_spill] sm:$0xff] }
 0xaa8   : > { %v6258_v35 = vpack.c.bf16 %v6253_v8, %v6252_v31  ;;  %v6914_v42 = vmul.f32 1.442695, %v6903_v9 }
 0xaaa   : > { %7174 = vadd.xlane.f32.xlu1 %v7173_v25 }
 0xaac   : > { %v6474_v1 = vpop.xlane.xlu2 %6473 }
 0xaad   : > { %v6236_v49 = vpop.xlane.xlu1 %6235 }
 0xaae   : > { %10108 = vrcp.f32 %v6236_v49 }
 0xaaf   : > { %10110 = vrcp.f32 %v6239_v56 }
 0xab0   : > { %v6726_v36 = vpop.permute.xlu0 %6725  ;;  %10112 = vpow2.f32 %v6914_v42 }
 0xab1   : > { %9004 = vmatmul.msk.bf16.gmra.mxu3 %vm5465_vm11, %v6258_v35  ;;  %v6740_v21 = vsel %vm5570_vm3, %v6726_v36, 0  ;;  %10114 = vrcp.f32 %v14803_v19  ;;  %v16116_v36 = vld [vmem:[#allocation104_spill] sm:$0xff] }
 0xab2   : > { %7217 = vrot.lane.b32.xlu2 %v7215_v40, %s10693_s20  ;;  %6749 = vmatpush.bf16.msrb.mxu3 %v6740_v21  ;;  %v6902_v19 = vsub.f32 %v16116_v36, %v14853_v2 }
 0xab3   : > { %v14885_v51 = vpop.f32.mrf.mxu3 }
 0xab4   : > { %v10109_v7 = vpop.eup %10108  ;;  %v14867_v30 = vpop.xlane.xlu2 %7138 }
 0xab5   : > { %v10111_v6 = vpop.eup %10110  ;;  %v6254_v38 = vmul.f32 %v10109_v7, %v14659_v34  ;;  %v6471_v47 = vpop.xlane.xlu1 %6470 }
 0xab6   : > { %v6255_v28 = vmul.f32 %v10111_v6, %v14642_v15  ;;  %v14883_v4 = vpop.eup %10112 }
 0xab7   : > { %v6933_v17 = vsel %vm5465_vm11, %v14883_v4, 0.0  ;;  %v10115_v62 = vpop.eup %10114 }
 0xab8   : > { %v6259_v18 = vpack.c.bf16 %v6255_v28, %v6254_v38  ;;  %v6008_v31 = vmul.f32 %v10115_v62, %v16115_v55  ;;  %v6912_v38 = vmul.f32 1.442695, %v6902_v19  ;;  %v16119_v62 = vld [vmem:[#allocation102_spill] sm:$0xff] }
 0xabb   : > { %v14891_v56 = vpop.f32.mrf.mxu3 }
 0xabc   : > { %v14875_v10 = vpop.xlane.xlu2 %6889 }
 0xabd   : > { %v14873_v58 = vpop.xlane.xlu1 %6892 }
 0xac1   : > { %9005 = vmatmul.msk.bf16.gmra.mxu3 %vm5465_vm11, %v6259_v18 }
 0xac3   : > { %6971 = vrot.lane.b32.xlu1 %v16113_v32, %s10695_s26 }
 0xac4   : > { %v14879_v15 = vpop.xlane.xlu2 %6898 }
 0xac5   : > { %v14877_v34 = vpop.xlane.xlu1 %7141 }
 0xacb   : > { %v14900_v28 = vpop.f32.mrf.mxu3 }
 0xacc   : > { %v6477_v5 = vpop.xlane.xlu2 %6476 }
 0xacd   : > { %v6683_v54 = vpop.xlane.xlu1 %6682 }
 0xad3   : > { %v14917_v19 = vpop.f32.mrf.mxu3 }
 0xad4   : > { %v14897_v6 = vpop.xlane.xlu2 %6482 }
 0xad5   : > { %v6480_v21 = vpop.xlane.xlu1 %6479 }
 0xadb   : > { %6934 = vadd.xlane.f32.xlu2 %v6933_v17  ;;  %v5993_v44 = vpop.xlane.xlu0 %5992 }
 0xadc   : > { %10116 = vrcp.f32 %v5993_v44  ;;  %v6689_v44 = vpop.xlane.xlu2 %6688 }
 0xadd   : > { %10118 = vrcp.f32 %v6471_v47 }
 0xae2   : > { %v10117_v25 = vpop.eup %10116 }
 0xae3   : > { %v6009_v8 = vmul.f32 %v10117_v25, %v14737_v12  ;;  %v6881_v40 = vpop.xlane.xlu0 %6880  ;;  %v10119_v32 = vpop.eup %10118 }
 0xae4   : > { %v6901_v49 = vsub.f32 %v14757_v59, %v6881_v40  ;;  %v16117_v59 = vld [vmem:[#allocation139_spill] sm:$0xff]  ;;  %v6501_v17 = vmul.f32 %v10119_v32, %v16118_v61 }
 0xae5   : > { %v6013_v35 = vpack.c.bf16 %v6009_v8, %v6008_v31  ;;  %v7148_v18 = vsub.f32 %v16117_v59, %v14832_v37 }
 0xae6   : > { %v6910_v7 = vmul.f32 1.442695, %v6901_v49  ;;  %v16120_v49 = vld [vmem:[#allocation141_spill] sm:$0xff] }
 0xae7   : > { %8997 = vmatmul.msk.bf16.gmra.mxu1 %vm5465_vm11, %v6013_v35  ;;  %v7158_v16 = vmul.f32 1.442695, %v7148_v18  ;;  %v7149_v35 = vsub.f32 %v16120_v49, %v14842_v27 }
 0xae8   : > { %10120 = vpow2.f32 %v6910_v7 }
 0xae9   : > { %10122 = vrcp.f32 %v6474_v1  ;;  %v6686_v1 = vpop.xlane.xlu1 %6685 }
 0xaea   : > { %10124 = vrcp.f32 %v6683_v54 }
 0xaeb   : > { %v6680_v12 = vpop.xlane.xlu0 %6679 }
 0xaec   : > { %10126 = vrcp.f32 %v6680_v12 }
 0xaed   : > { %10128 = vpow2.f32 %v6912_v38  ;;  %v6907_v38 = vsub.f32 %v14698_v41, %v14879_v15  ;;  %v6692_v41 = vpop.xlane.xlu2 %6691 }
 0xaee   : > { %v14904_v2 = vpop.eup %10120  ;;  %10130 = vpow2.f32 %v7158_v16 }
 0xaef   : > { %v10123_v47 = vpop.eup %10122  ;;  %v6927_v9 = vsel %vm5465_vm11, %v14904_v2, 0.0  ;;  %10132 = vrcp.f32 %v6480_v21  ;;  %v6922_v21 = vmul.f32 1.442695, %v6907_v38 }
 0xaf0   : > { %v10125_v42 = vpop.eup %10124  ;;  %6928 = vadd.xlane.f32.xlu0 %v6927_v9  ;;  %v6502_v25 = vmul.f32 %v10123_v47, %v16119_v62  ;;  %10134 = vrcp.f32 %v6686_v1  ;;  %v6904_v47 = vsub.f32 %v14681_v20, %v14875_v10 }
 0xaf1   : > { %v6711_v37 = vmul.f32 %v10125_v42, %v14712_v13  ;;  %10136 = vrcp.f32 %v6689_v44  ;;  %v6486_v12 = vpop.xlane.xlu1 %6485  ;;  %v14933_v42 = vpop.f32.mrf.mxu3 }
 0xaf2   : > { %v10127_v54 = vpop.eup %10126  ;;  %v6509_v36 = vpack.c.bf16 %v6502_v25, %v6501_v17  ;;  %v6916_v61 = vmul.f32 1.442695, %v6904_v47 }
 0xaf3   : > { %v6710_v55 = vmul.f32 %v10127_v54, %v14771_v3  ;;  %v7136_v31 = vpop.xlane.xlu0 %7135  ;;  %v14912_v8 = vpop.eup %10128 }
 0xaf4   : > { %v7150_v40 = vsub.f32 %v14788_v43, %v7136_v31  ;;  %v6930_v3 = vsel %vm5465_vm11, %v14912_v8, 0.0  ;;  %v7160_v43 = vmul.f32 1.442695, %v7149_v35  ;;  %v14925_v27 = vpop.eup %10130 }
 0xaf5   : > { %v6718_v7 = vpack.c.bf16 %v6711_v37, %v6710_v55  ;;  %v10133_v59 = vpop.eup %10132  ;;  %v6492_v31 = vpop.xlane.xlu2 %6491 }
 0xaf6   : > { %v7162_v13 = vmul.f32 1.442695, %v7150_v40  ;;  %v10135_v18 = vpop.eup %10134  ;;  %v6504_v17 = vmul.f32 %v10133_v59, %v14724_v60  ;;  %v6905_v60 = vsub.f32 %v14683_v0, %v14873_v58 }
 0xaf7   : > { %9010 = vmatmul.msk.bf16.vlgmr.msra.gmra.mxu1 %vm5465_vm11, %v6509_v36  ;;  %9018 = vmatmul.msk.bf16.vlgmr.msrb.gmra.mxu3 %vm5465_vm11, %v6718_v7  ;;  %v10137_v32 = vpop.eup %10136  ;;  %v6712_v44 = vmul.f32 %v10135_v18, %v14739_v45 }
 0xaf8   : > { %10138 = vpow2.f32 %v7162_v13  ;;  %6931 = vadd.xlane.f32.xlu0 %v6930_v3  ;;  %v6713_v20 = vmul.f32 %v10137_v32, %v14743_v52  ;;  %v6918_v0 = vmul.f32 1.442695, %v6905_v60  ;;  %v16121_v3 = vld [vmem:[#allocation108_spill] sm:$0xff] }
 0xaf9   : > { %10140 = vrcp.f32 %v6477_v5  ;;  %v7176_v5 = vsel %vm5465_vm11, %v14925_v27, 0.0  ;;  %v6695_v37 = vpop.xlane.xlu1 %6694 }
 0xafa   : > { %10142 = vpow2.f32 %v7160_v43  ;;  %v6719_v49 = vpack.c.bf16 %v6713_v20, %v6712_v44  ;;  %v7151_v43 = vsub.f32 %v16121_v3, %v14867_v30 }
 0xafb   : > { %v14927_v15 = vpop.xlane.xlu0 %7144  ;;  %10144 = vpow2.f32 %v6922_v21 }
 0xafc   : > { %10146 = vpow2.f32 %v6916_v61 }
 0xafd   : > { %10148 = vrcp.f32 %v6486_v12  ;;  %v6043_v21 = vpop.f32.mrf.mxu1 }
 0xafe   : > { %v14931_v9 = vpop.eup %10138  ;;  %10150 = vrcp.f32 %v6695_v37 }
 0xaff   : > { %v7182_v16 = vsel %vm5465_vm11, %v14931_v9, 0.0  ;;  %v10141_v1 = vpop.eup %10140 }
 0xb00   : > { %7183 = vadd.xlane.f32.xlu1 %v7182_v16  ;;  %7177 = vadd.xlane.f32.xlu0 %v7176_v5  ;;  %v14942_v10 = vpop.eup %10142  ;;  %v6503_v54 = vmul.f32 %v10141_v1, %v14708_v11  ;;  %v7164_v16 = vmul.f32 1.442695, %v7151_v43 }
 0xb01   : > { %v14945_v25 = vpop.eup %10144  ;;  %v7179_v11 = vsel %vm5465_vm11, %v14942_v10, 0.0  ;;  %v6698_v1 = vpop.xlane.xlu1 %6697 }
 0xb02   : > { %v6510_v40 = vpack.c.bf16 %v6504_v17, %v6503_v54  ;;  %v6945_v52 = vsel %vm5465_vm11, %v14945_v25, 0.0  ;;  %v14959_v58 = vpop.eup %10146 }
 0xb03   : > { %v6896_v62 = vpop.xlane.xlu0 %6895  ;;  %v10149_v36 = vpop.eup %10148  ;;  %v6936_v59 = vsel %vm5465_vm11, %v14959_v58, 0.0 }
 0xb04   : > { %v6906_v55 = vsub.f32 %v14814_v63, %v6896_v62  ;;  %v14957_v63 = vpop.f32.mrf.mxu3  ;;  %v10151_v7 = vpop.eup %10150  ;;  %v6506_v18 = vmul.f32 %v10149_v36, %v14761_v39  ;;  %v7152_v39 = vsub.f32 %v14696_v14, %v14877_v34 }
 0xb05   : > { %v6715_v32 = vmul.f32 %v10151_v7, %v14773_v22 }
 0xb06   : > { %v6920_v45 = vmul.f32 1.442695, %v6906_v55  ;;  %v7166_v62 = vmul.f32 1.442695, %v7152_v39 }
 0xb07   : > { %9011 = vmatmul.msk.bf16.gmra.mxu1 %vm5465_vm11, %v6510_v40  ;;  %9019 = vmatmul.msk.bf16.gmra.mxu3 %vm5465_vm11, %v6719_v49  ;;  %v7153_v49 = vsub.f32 %v14801_v57, %v14927_v15 }
 0xb08   : > { %10152 = vpow2.f32 %v6920_v45  ;;  %7180 = vadd.xlane.f32.xlu0 %v7179_v11  ;;  %6946 = vadd.xlane.f32.xlu1 %v6945_v52 }
 0xb09   : > { %10154 = vrcp.f32 %v14897_v6 }
 0xb0a   : > { %10156 = vrcp.f32 %v6692_v41 }
 0xb0b   : > { %v6489_v35 = vpop.xlane.xlu0 %6488  ;;  %10158 = vpow2.f32 %v6918_v0  ;;  %v7168_v0 = vmul.f32 1.442695, %v7153_v49  ;;  %v9311_v49 = vld [vmem:[%s11063_s27 + $0x30] sm:$0xff] }
 0xb0c   : > { %v14973_v47 = vpop.f32.mrf.mxu3  ;;  %10160 = vpow2.f32 %v7164_v16 }
 0xb0d   : > { %v14961_v38 = vpop.xlane.xlu2 %7171  ;;  %10162 = vrcp.f32 %v6489_v35 }
 0xb0e   : > { %v14963_v13 = vpop.eup %10152 }
 0xb0f   : > { %v10155_v12 = vpop.eup %10154  ;;  %v6942_v6 = vsel %vm5465_vm11, %v14963_v13, 0.0 }
 0xb10   : > { %v10157_v41 = vpop.eup %10156  ;;  %6943 = vadd.xlane.f32.xlu2 %v6942_v6  ;;  %6937 = vadd.xlane.f32.xlu0 %v6936_v59  ;;  %v6505_v30 = vmul.f32 %v10155_v12, %v14726_v29 }
 0xb11   : > { %v6714_v5 = vmul.f32 %v10157_v41, %v14759_v24  ;;  %v14977_v61 = vpop.eup %10158  ;;  %v14986_v24 = vpop.f32.mrf.mxu1 }
 0xb12   : > { %v6511_v44 = vpack.c.bf16 %v6506_v18, %v6505_v30  ;;  %v6939_v29 = vsel %vm5465_vm11, %v14977_v61, 0.0  ;;  %v14992_v34 = vpop.eup %10160 }
 0xb13   : > { %v6701_v17 = vpop.xlane.xlu0 %6700  ;;  %v6720_v20 = vpack.c.bf16 %v6715_v32, %v6714_v5  ;;  %v10163_v55 = vpop.eup %10162  ;;  %v7185_v45 = vsel %vm5465_vm11, %v14992_v34, 0.0 }
 0xb14   : > { %10164 = vrcp.f32 %v6701_v17  ;;  %v14988_v37 = vpop.f32.mrf.mxu3 }
 0xb15   : > { %v7218_v54 = vpop.permute.xlu2 %7217  ;;  %10166 = vrcp.f32 %v6492_v31  ;;  %v14990_v14 = vpop.xlane.xlu1 %6925  ;;  %v6507_v31 = vmul.f32 %v10163_v55, %v14824_v33 }
 0xb16   : > { %v7232_v22 = vsel %vm5570_vm3, %v7218_v54, 0  ;;  %10168 = vrcp.f32 %v6698_v1 }
 0xb17   : > { %9012 = vmatmul.msk.bf16.gmra.mxu1 %vm5465_vm11, %v6511_v44  ;;  %9020 = vmatmul.msk.bf16.gmra.mxu3 %vm5465_vm11, %v6720_v20  ;;  %10170 = vpow2.f32 %v7166_v62 }
 0xb18   : > { %6940 = vadd.xlane.f32.xlu0 %v6939_v29  ;;  %7241 = vmatpush.bf16.msra.mxu3 %v7232_v22  ;;  %10172 = vpow2.f32 %v7168_v0 }
 0xb19   : > { %v6048_v35 = vpop.f32.mrf.mxu1 }
 0xb1a   : > { %v10165_v40 = vpop.eup %10164 }
 0xb1b   : > { %v10167_v60 = vpop.eup %10166  ;;  %v6717_v52 = vmul.f32 %v10165_v40, %v14839_v46 }
 0xb1c   : > { %v10169_v11 = vpop.eup %10168  ;;  %v6508_v36 = vmul.f32 %v10167_v60, %v14777_v48  ;;  %v6289_v57 = vpop.f32.mrf.mxu3 }
 0xb1d   : > { %v6716_v7 = vmul.f32 %v10169_v11, %v14794_v53  ;;  %v15003_v3 = vpop.eup %10170  ;;  %v7175_v15 = vpop.xlane.xlu1 %7174  ;;  %v9328_v11 = vld [vmem:[%s11063_s27 + $0xb8] sm:$0xff] }
 0xb1e   : > { %v6512_v43 = vpack.c.bf16 %v6508_v36, %v6507_v31  ;;  %v7188_v33 = vsel %vm5465_vm11, %v15003_v3, 0.0  ;;  %10174 = vrcp.f32 %v7175_v15  ;;  %v15014_v48 = vpop.eup %10172  ;;  %7890 = vmatpush.bf16.msrb.mxu3 %v9328_v11  ;;  %v9309_v15 = vld [vmem:[%s11063_s27 + $0x20] sm:$0xff] }
 0xb1f   : > { %v6721_v12 = vpack.c.bf16 %v6717_v52, %v6716_v7  ;;  %10176 = vrcp.f32 %v14961_v38  ;;  %v7191_v6 = vsel %vm5465_vm11, %v15014_v48, 0.0 }
 0xb20   : > { %7186 = vadd.xlane.f32.xlu0 %v7185_v45  ;;  %10178 = vrcp.f32 %v14990_v14 }
 0xb21   : > { %6071 = vrot.lane.b32.xlu1 %v6043_v21, %s10695_s26  ;;  %v6050_v53 = vpop.f32.mrf.mxu1 }
 0xb24   : > { %v10175_v46 = vpop.eup %10174  ;;  %v6291_v21 = vpop.f32.mrf.mxu3 }
 0xb25   : > { %v10177_v59 = vpop.eup %10176 }
 0xb26   : > { %v10179_v30 = vpop.eup %10178 }
 0xb27   : > { %9013 = vmatmul.msk.bf16.gmra.mxu1 %vm5465_vm11, %v6512_v43  ;;  %9021 = vmatmul.msk.bf16.gmra.mxu3 %vm5465_vm11, %v6721_v12  ;;  %v6956_v1 = vmul.f32 %v10179_v30, %v14846_v23  ;;  %v9327_v43 = vld [vmem:[%s11063_s27 + $0xb0] sm:$0xff] }
 0xb28   : > { %5827 = vrot.lane.b32.xlu2 %v14891_v56, %s10693_s20  ;;  %7189 = vadd.xlane.f32.xlu0 %v7188_v33  ;;  %v7203_v56 = vmul.f32 %v10175_v46, %v14856_v50 }
 0xb29   : > { %5829 = vrot.lane.b32.xlu1 %v14900_v28, %s10693_s20  ;;  %v7202_v28 = vmul.f32 %v10177_v59, %v14828_v26  ;;  %v6053_v38 = vpop.f32.mrf.mxu1  ;;  %7891 = vmatpush.bf16.msrb.mxu3 %v9327_v43  ;;  %v9307_v59 = vld [vmem:[%s11063_s27 + $0x10] sm:$0xff] }
 0xb2b   : > { %v7210_v41 = vpack.c.bf16 %v7203_v56, %v7202_v28  ;;  %v9325_v56 = vld [vmem:[%s11063_s27 + $0xa0] sm:$0xff] }
 0xb2c   : > { %v6294_v18 = vpop.f32.mrf.mxu3 }
 0xb30   : > { %6317 = vrot.lane.b32.xlu2 %v6289_v57, %s10694_s30  ;;  %7192 = vadd.xlane.f32.xlu0 %v7191_v6 }
 0xb31   : > { %6077 = vrot.lane.b32.xlu1 %v6050_v53, %s10695_s26  ;;  %v6055_v32 = vpop.f32.mrf.mxu1 }
 0xb34   : > { %v6296_v16 = vpop.f32.mrf.mxu3 }
 0xb35   : > { %v6972_v26 = vpop.permute.xlu1 %6971 }
 0xb36   : > { %v6986_v50 = vsel %vm5570_vm3, %v6972_v26, 0 }
 0xb37   : > { %9034 = vmatmul.msk.bf16.vlgmr.msra.gmra.mxu3 %vm5465_vm11, %v7210_v41  ;;  %6995 = vmatpush.bf16.msrb.mxu1 %v6986_v50  ;;  %v9306_v41 = vld [vmem:[%s11063_s27 + $0x8] sm:$0xff] }
 0xb38   : > { %5831 = vrot.lane.b32.xlu2 %v14917_v19, %s10693_s20 }
 0xb39   : > { %5833 = vrot.lane.b32.xlu1 %v14933_v42, %s10693_s20 }
 0xb3c   : > { %v6299_v19 = vpop.f32.mrf.mxu3 }
 0xb40   : > { %6321 = vrot.lane.b32.xlu2 %v6294_v18, %s10694_s30 }
 0xb41   : > { %6081 = vrot.lane.b32.xlu1 %v6055_v32, %s10695_s26  ;;  %v9304_v32 = vld [vmem:[%s11057_s14 + $0x38] sm:$0xff] }
 0xb42   : > { %7375 = vmatpush.bf16.msra.mxu0 %v9304_v32 }
 0xb44   : > { %5825 = vrot.lane.b32.xlu0 %v14885_v51, %s10693_s20  ;;  %v6301_v42 = vpop.f32.mrf.mxu3 }
 0xb48   : > { %5835 = vrot.lane.b32.xlu2 %v14957_v63, %s10693_s20 }
 0xb49   : > { %5837 = vrot.lane.b32.xlu1 %v14973_v47, %s10693_s20 }
 0xb4c   : > { %6073 = vrot.lane.b32.xlu0 %v14986_v24, %s10695_s26  ;;  %v6304_v51 = vpop.f32.mrf.mxu3 }
 0xb4e   : > { %v6935_v39 = vpop.xlane.xlu2 %6934 }
 0xb50   : > { %6325 = vrot.lane.b32.xlu2 %v6299_v19, %s10694_s30 }
 0xb54   : > { %6319 = vrot.lane.b32.xlu0 %v6291_v21, %s10694_s30  ;;  %v6306_v22 = vpop.f32.mrf.mxu3 }
 0xb58   : > { %5839 = vrot.lane.b32.xlu2 %v14988_v37, %s10693_s20 }
 0xb5c   : > { %6075 = vrot.lane.b32.xlu0 %v6048_v35, %s10695_s26 }
 0xb60   : > { %6329 = vrot.lane.b32.xlu2 %v6304_v51, %s10694_s30 }
 0xb63   : > { %v6929_v63 = vpop.xlane.xlu0 %6928 }
 0xb64   : > { %10180 = vrcp.f32 %v6929_v63  ;;  %v6058_v47 = vpop.f32.mrf.mxu1  ;;  %6323 = vrot.lane.b32.xlu0 %v6296_v16, %s10694_s30  ;;  %v9305_v63 = vld [vmem:[%s11063_s27] sm:$0xff] }
 0xb6a   : > { %v10181_v5 = vpop.eup %10180 }
 0xb6b   : > { %v6957_v17 = vmul.f32 %v10181_v5, %v14904_v2  ;;  %v6932_v44 = vpop.xlane.xlu0 %6931  ;;  %v9312_v2 = vld [vmem:[%s11063_s27 + $0x38] sm:$0xff] }
 0xb6c   : > { %v6060_v20 = vpop.f32.mrf.mxu1  ;;  %6079 = vrot.lane.b32.xlu0 %v6053_v38, %s10695_s26  ;;  %10182 = vrcp.f32 %v6932_v44  ;;  %7792 = vmatpush.bf16.msra.mxu1 %v9312_v2  ;;  %v9324_v38 = vld [vmem:[%s11063_s27 + $0x98] sm:$0xff]  ;;  %v9302_v44 = vld [vmem:[%s11057_s14 + $0x28] sm:$0xff] }
 0xb6d   : > { %v6964_v54 = vpack.c.bf16 %v6957_v17, %v6956_v1  ;;  %6085 = vrot.lane.b32.xlu1 %v6060_v20, %s10695_s26  ;;  %10184 = vrcp.f32 %v6935_v39  ;;  %v9303_v1 = vld [vmem:[%s11057_s14 + $0x30] sm:$0xff] }
 0xb6e   : > { %7376 = vmatpush.bf16.msra.mxu0 %v9303_v1  ;;  %v16129_v1 = vld [vmem:[#allocation43_spill] sm:$0xff] }
 0xb6f   : > { %9026 = vmatmul.msk.bf16.vlgmr.msrb.gmra.mxu1 %vm5465_vm11, %v6964_v54 }
 0xb70   : > { %7793 = vmatpush.bf16.msra.mxu1 %v9311_v49 }
 0xb72   : > { %v10183_v23 = vpop.eup %10182  ;;  %7377 = vmatpush.bf16.msra.mxu0 %v9302_v44 }
 0xb73   : > { %v7178_v29 = vpop.xlane.xlu0 %7177  ;;  %v10185_v62 = vpop.eup %10184  ;;  %v6958_v37 = vmul.f32 %v10183_v23, %v14912_v8  ;;  %v9310_v8 = vld [vmem:[%s11063_s27 + $0x28] sm:$0xff]  ;;  %v9321_v23 = vld [vmem:[%s11063_s27 + $0x80] sm:$0xff] }
 0xb74   : > { %v6537_v24 = vpop.f32.mrf.mxu1  ;;  %6327 = vrot.lane.b32.xlu0 %v6301_v42, %s10694_s30  ;;  %10186 = vrcp.f32 %v7178_v29  ;;  %v6959_v55 = vmul.f32 %v10185_v62, %v14883_v4  ;;  %v7184_v4 = vpop.xlane.xlu1 %7183  ;;  %7794 = vmatpush.bf16.msra.mxu1 %v9310_v8 }
 0xb75   : > { %6557 = vst.msk [vmem:[#allocation3 + $0x40] sm:$0xff] %vm2918_vm1, %v6537_v24 }
 0xb76   : > { %v6965_v45 = vpack.c.bf16 %v6959_v55, %v6958_v37 }
 0xb78   : > { %7795 = vmatpush.bf16.msra.mxu1 %v9309_v15  ;;  %v9297_v15 = vld [vmem:[%s11057_s14] sm:$0xff] }
 0xb7a   : > { %v6751_v14 = vpop.f32.mrf.mxu3  ;;  %v10187_v31 = vpop.eup %10186 }
 0xb7b   : > { %v7181_v40 = vpop.xlane.xlu0 %7180  ;;  %6779 = vrot.lane.b32.xlu1 %v6751_v14, %s10693_s20  ;;  %v7204_v35 = vmul.f32 %v10187_v31, %v14925_v27  ;;  %v9308_v27 = vld [vmem:[%s11063_s27 + $0x18] sm:$0xff]  ;;  %v9301_v14 = vld [vmem:[%s11057_s14 + $0x20] sm:$0xff] }
 0xb7c   : > { %10188 = vrcp.f32 %v7181_v40  ;;  %v6539_v60 = vpop.f32.mrf.mxu1  ;;  %6083 = vrot.lane.b32.xlu0 %v6058_v47, %s10695_s26  ;;  %7796 = vmatpush.bf16.msra.mxu1 %v9308_v27  ;;  %v6947_v53 = vpop.xlane.xlu1 %6946  ;;  %v9323_v47 = vld [vmem:[%s11063_s27 + $0x90] sm:$0xff]  ;;  %v9300_v40 = vld [vmem:[%s11057_s14 + $0x18] sm:$0xff] }
 0xb7d   : > { %6558 = vst.msk [vmem:[#allocation3 + $0x48] sm:$0xff] %vm2918_vm1, %v6539_v60  ;;  %7378 = vmatpush.bf16.msra.mxu0 %v9301_v14 }
 0xb7f   : > { %9027 = vmatmul.msk.bf16.gmra.mxu1 %vm5465_vm11, %v6965_v45 }
 0xb80   : > { %7797 = vmatpush.bf16.msra.mxu1 %v9307_v59 }
 0xb81   : > { %7379 = vmatpush.bf16.msra.mxu0 %v9300_v40 }
 0xb82   : > { %v10189_v52 = vpop.eup %10188  ;;  %v6753_v0 = vpop.f32.mrf.mxu3 }
 0xb83   : > { %v7205_v36 = vmul.f32 %v10189_v52, %v14942_v10  ;;  %6781 = vrot.lane.b32.xlu2 %v6753_v0, %s10693_s20  ;;  %v6938_v7 = vpop.xlane.xlu0 %6937  ;;  %v6944_v57 = vpop.xlane.xlu2 %6943  ;;  %v9326_v10 = vld [vmem:[%s11063_s27 + $0xa8] sm:$0xff] }
 0xb84   : > { %6331 = vrot.lane.b32.xlu0 %v6306_v22, %s10694_s30  ;;  %v6542_v12 = vpop.f32.mrf.mxu1  ;;  %7892 = vmatpush.bf16.msrb.mxu3 %v9326_v10  ;;  %10190 = vrcp.f32 %v6938_v7  ;;  %v9298_v52 = vld [vmem:[%s11057_s14 + $0x8] sm:$0xff]  ;;  %v16122_v10 = vld [vmem:[#allocation82_spill] sm:$0xff] }
 0xb85   : > { %6559 = vst.msk [vmem:[#allocation3 + $0x50] sm:$0xff] %vm2918_vm1, %v6542_v12  ;;  %v7211_v33 = vpack.c.bf16 %v7205_v36, %v7204_v35  ;;  %7798 = vmatpush.bf16.msra.mxu1 %v9306_v41 }
 0xb87   : > { %9035 = vmatmul.msk.bf16.gmra.mxu3 %vm5465_vm11, %v7211_v33 }
 0xb88   : > { %7893 = vmatpush.bf16.msrb.mxu3 %v9325_v56  ;;  %v16124_v56 = vld [vmem:[#allocation41_spill] sm:$0xff] }
 0xb89   : > { %7799 = vmatpush.bf16.msra.mxu1 %v9305_v63 }
 0xb8a   : > { %v15073_v46 = vpop.f32.mrf.mxu3  ;;  %v10191_v18 = vpop.eup %10190 }
 0xb8b   : > { %v6941_v21 = vpop.xlane.xlu0 %6940  ;;  %v5828_v6 = vpop.permute.xlu2 %5827  ;;  %v6960_v50 = vmul.f32 %v10191_v18, %v14959_v58  ;;  %v9322_v58 = vld [vmem:[%s11063_s27 + $0x88] sm:$0xff] }
 0xb8c   : > { %10192 = vrcp.f32 %v6941_v21  ;;  %5850 = vst.msk [vmem:[#allocation3 + $0x8] sm:$0xff] %vm3400_vm4, %v5828_v6  ;;  %v6544_v28 = vpop.f32.mrf.mxu1  ;;  %7894 = vmatpush.bf16.msrb.mxu3 %v9324_v38  ;;  %v16123_v6 = vld [vmem:[#allocation77_spill] sm:$0xff] }
 0xb8d   : > { %6560 = vst.msk [vmem:[#allocation3 + $0x58] sm:$0xff] %vm2918_vm1, %v6544_v28  ;;  %10194 = vrcp.f32 %v7184_v4  ;;  %v9299_v4 = vld [vmem:[%s11057_s14 + $0x10] sm:$0xff]  ;;  %v7442_v59 = vmax.f32 %v16123_v6, 0.0 }
 0xb8e   : > { %7380 = vmatpush.bf16.msra.mxu0 %v9299_v4  ;;  %v16125_v28 = vld [vmem:[#allocation40_spill] sm:$0xff] }
 0xb8f   : > { %v16126_v41 = vpack.c.bf16 %v16124_v56, %v16125_v28  ;;  %v7506_v32 = vmul.f32 %v7442_v59, %v7442_v59 }
 0xb90   : > { %7895 = vmatpush.bf16.msrb.mxu3 %v9323_v47 }
 0xb92   : > { %v10193_v16 = vpop.eup %10192  ;;  %v15082_v26 = vpop.f32.mrf.mxu3  ;;  %7381 = vmatpush.bf16.msra.mxu0 %v9298_v52 }
 0xb93   : > { %v6961_v19 = vmul.f32 %v10193_v16, %v14977_v61  ;;  %v7187_v42 = vpop.xlane.xlu0 %7186  ;;  %v15086_v51 = vpop.permute.xlu1 %6071 }
 0xb94   : > { %10196 = vrcp.f32 %v7187_v42  ;;  %v15090_v30 = vpop.permute.xlu2 %6317  ;;  %v6547_v5 = vpop.f32.mrf.mxu1  ;;  %7896 = vmatpush.bf16.msrb.mxu3 %v9322_v58 }
 0xb95   : > { %6561 = vst.msk [vmem:[#allocation3 + $0x60] sm:$0xff] %vm2918_vm1, %v6547_v5  ;;  %v6966_v17 = vpack.c.bf16 %v6961_v19, %v6960_v50  ;;  %v10195_v61 = vpop.eup %10194  ;;  %10198 = vrcp.f32 %v6944_v57 }
 0xb96   : > { %10200 = vrcp.f32 %v6947_v53  ;;  %v7206_v39 = vmul.f32 %v10195_v61, %v14931_v9  ;;  %7382 = vmatpush.bf16.msra.mxu0 %v9297_v15  ;;  %v7446_v53 = vmax.f32 %v16122_v10, 0.0  ;;  %v16139_v15 = vld [vmem:[#allocation47_spill] sm:$0xff] }
 0xb97   : > { %9028 = vmatmul.msk.bf16.gmra.mxu1 %vm5465_vm11, %v6966_v17  ;;  %v16130_v17 = vld [vmem:[#allocation42_spill] sm:$0xff] }
 0xb98   : > { %7897 = vmatpush.bf16.msrb.mxu3 %v9321_v23  ;;  %v7510_v38 = vmul.f32 %v7446_v53, %v7446_v53  ;;  %v16131_v58 = vpack.c.bf16 %v16129_v1, %v16130_v17  ;;  %v16142_v53 = vld [vmem:[#allocation80_spill] sm:$0xff] }
 0xb9a   : > { %v10197_v20 = vpop.eup %10196  ;;  %v15097_v54 = vpop.f32.mrf.mxu3  ;;  %v7570_v19 = vpack.c.bf16 %v7510_v38, %v7506_v32 }
 0xb9b   : > { %v7207_v22 = vmul.f32 %v10197_v20, %v14992_v34  ;;  %v7190_v29 = vpop.xlane.xlu0 %7189  ;;  %v5830_v24 = vpop.permute.xlu1 %5829 }
 0xb9c   : > { %5851 = vst.msk [vmem:[#allocation3 + $0x10] sm:$0xff] %vm3400_vm4, %v5830_v24  ;;  %v5832_v2 = vpop.permute.xlu2 %5831  ;;  %v6549_v62 = vpop.f32.mrf.mxu1  ;;  %10202 = vrcp.f32 %v7190_v29  ;;  %v16132_v24 = vld [vmem:[#allocation95_spill] sm:$0xff] }
 0xb9d   : > { %5852 = vst.msk [vmem:[#allocation3 + $0x18] sm:$0xff] %vm3400_vm4, %v5832_v2  ;;  %v7212_v37 = vpack.c.bf16 %v7207_v22, %v7206_v39  ;;  %v10199_v55 = vpop.eup %10198  ;;  %v7462_v23 = vmax.f32 %v16132_v24, 0.0 }
 0xb9e   : > { %6562 = vst.msk [vmem:[#allocation3 + $0x68] sm:$0xff] %vm2918_vm1, %v6549_v62  ;;  %v10201_v9 = vpop.eup %10200  ;;  %v6962_v34 = vmul.f32 %v10199_v55, %v14963_v13  ;;  %v16134_v55 = vld [vmem:[#allocation45_spill] sm:$0xff] }
 0xb9f   : > { %9036 = vmatmul.msk.bf16.gmra.mxu3 %vm5465_vm11, %v7212_v37  ;;  %v6963_v60 = vmul.f32 %v10201_v9, %v14945_v25  ;;  %v16133_v37 = vld [vmem:[#allocation92_spill] sm:$0xff]  ;;  %v7526_v40 = vmul.f32 %v7462_v23, %v7462_v23 }
 0xba0   : > { %v7458_v14 = vmax.f32 %v16133_v37, 0.0  ;;  %v16135_v9 = vld [vmem:[#allocation44_spill] sm:$0xff]  ;;  %v16148_v37 = vld [vmem:[#allocation109_spill] sm:$0xff] }
 0xba1   : > { %v6967_v13 = vpack.c.bf16 %v6963_v60, %v6962_v34  ;;  %v16136_v34 = vpack.c.bf16 %v16134_v55, %v16135_v9  ;;  %v16149_v9 = vld [vmem:[#allocation107_spill] sm:$0xff] }
 0xba2   : > { %v15109_v49 = vpop.f32.mrf.mxu3  ;;  %v10203_v0 = vpop.eup %10202  ;;  %v7522_v60 = vmul.f32 %v7458_v14, %v7458_v14  ;;  %v7486_v14 = vmax.f32 %v16148_v37, 0.0  ;;  %v10216_v37 = vld [vmem:[#allocation2 + $0x50] sm:$0xff] }
 0xba3   : > { %v7193_v45 = vpop.xlane.xlu0 %7192  ;;  %v6078_v8 = vpop.permute.xlu1 %6077  ;;  %v7208_v36 = vmul.f32 %v10203_v0, %v15003_v3  ;;  %v16137_v0 = vld [vmem:[#allocation101_spill] sm:$0xff] }
 0xba4   : > { %10204 = vrcp.f32 %v7193_v45  ;;  %6098 = vst.msk [vmem:[#allocation3 + $0x18] sm:$0xff] %vm3663_vm5, %v6078_v8  ;;  %v6322_v11 = vpop.permute.xlu2 %6321  ;;  %v6552_v31 = vpop.f32.mrf.mxu1  ;;  %v7578_v8 = vpack.c.bf16 %v7526_v40, %v7522_v60 }
 0xba5   : > { %6563 = vst.msk [vmem:[#allocation3 + $0x70] sm:$0xff] %vm2918_vm1, %v6552_v31 }
 0xba7   : > { %9029 = vmatmul.msk.bf16.gmra.mxu1 %vm5465_vm11, %v6967_v13 }
 0xbaa   : > { %v10205_v35 = vpop.eup %10204  ;;  %v15117_v25 = vpop.f32.mrf.mxu3 }
 0xbab   : > { %v7209_v7 = vmul.f32 %v10205_v35, %v15014_v48  ;;  %v5834_v57 = vpop.permute.xlu1 %5833  ;;  %v7470_v35 = vmax.f32 %v16137_v0, 0.0 }
 0xbac   : > { %5853 = vst.msk [vmem:[#allocation3 + $0x20] sm:$0xff] %vm3400_vm4, %v5834_v57  ;;  %v5836_v43 = vpop.permute.xlu2 %5835  ;;  %v6554_v12 = vpop.f32.mrf.mxu1 }
 0xbad   : > { %5854 = vst.msk [vmem:[#allocation3 + $0x28] sm:$0xff] %vm3400_vm4, %v5836_v43  ;;  %v7213_v33 = vpack.c.bf16 %v7209_v7, %v7208_v36  ;;  %v16138_v7 = vld [vmem:[#allocation98_spill] sm:$0xff] }
 0xbae   : > { %6564 = vst.msk [vmem:[#allocation3 + $0x78] sm:$0xff] %vm2918_vm1, %v6554_v12  ;;  %v7466_v57 = vmax.f32 %v16138_v7, 0.0  ;;  %v16140_v43 = vld [vmem:[#allocation46_spill] sm:$0xff] }
 0xbaf   : > { %9037 = vmatmul.msk.bf16.gmra.mxu3 %vm5465_vm11, %v7213_v33  ;;  %v16141_v12 = vpack.c.bf16 %v16139_v15, %v16140_v43  ;;  %v7534_v33 = vmul.f32 %v7470_v35, %v7470_v35  ;;  %v16153_v43 = vld [vmem:[#allocation111_spill] sm:$0xff] }
 0xbb2   : > { %v15126_v27 = vpop.f32.mrf.mxu3 }
 0xbb3   : > { %v6082_v3 = vpop.permute.xlu1 %6081 }
 0xbb4   : > { %6100 = vst.msk [vmem:[#allocation3 + $0x28] sm:$0xff] %vm3663_vm5, %v6082_v3  ;;  %v6326_v48 = vpop.permute.xlu2 %6325  ;;  %v7530_v3 = vmul.f32 %v7466_v57, %v7466_v57 }
 0xbb6   : > { %v5826_v21 = vpop.permute.xlu0 %5825  ;;  %v7582_v6 = vpack.c.bf16 %v7534_v33, %v7530_v3 }
 0xbb7   : > { %5849 = vst.msk [vmem:[#allocation3] sm:$0xff] %vm3400_vm4, %v5826_v21  ;;  %7800 = vmatmul.bf16.vlgmr.msra.gmra.mxu1 %v16126_v41  ;;  %v7476_v21 = vmax.f32 %v16142_v53, 0.0  ;;  %v16143_v41 = vld [vmem:[#allocation76_spill] sm:$0xff] }
 0xbb8   : > { %6095 = vst.msk [vmem:[#allocation3] sm:$0xff] %vm3663_vm5, %v15086_v51  ;;  %v16127_v51 = vld [vmem:[#allocation89_spill] sm:$0xff]  ;;  %v7472_v38 = vmax.f32 %v16143_v41, 0.0 }
 0xbb9   : > { %6341 = vst.msk [vmem:[#allocation3] sm:$0xff] %vm3926_vm6, %v15090_v30  ;;  %v7454_v63 = vmax.f32 %v16127_v51, 0.0  ;;  %v16128_v30 = vld [vmem:[#allocation85_spill] sm:$0xff]  ;;  %v7540_v32 = vmul.f32 %v7476_v21, %v7476_v21 }
 0xbba   : > { %v7243_v18 = vpop.f32.mrf.mxu3  ;;  %v7450_v5 = vmax.f32 %v16128_v30, 0.0  ;;  %v16145_v30 = vld [vmem:[#allocation103_spill] sm:$0xff] }
 0xbbb   : > { %v5838_v16 = vpop.permute.xlu1 %5837  ;;  %7271 = vrot.lane.b32.xlu2 %v7243_v18, %s10694_s30  ;;  %v7518_v61 = vmul.f32 %v7454_v63, %v7454_v63 }
 0xbbc   : > { %5855 = vst.msk [vmem:[#allocation3 + $0x30] sm:$0xff] %vm3400_vm4, %v5838_v16  ;;  %v5840_v50 = vpop.permute.xlu2 %5839  ;;  %v7514_v44 = vmul.f32 %v7450_v5, %v7450_v5  ;;  %v7536_v16 = vmul.f32 %v7472_v38, %v7472_v38  ;;  %v7474_v5 = vmax.f32 %v16145_v30, 0.0  ;;  %v16156_v38 = vld [vmem:[#allocation117_spill] sm:$0xff] }
 0xbbd   : > { %5856 = vst.msk [vmem:[#allocation3 + $0x38] sm:$0xff] %vm3400_vm4, %v5840_v50 }
 0xbbe   : > { %v6074_v42 = vpop.permute.xlu0 %6073  ;;  %v7574_v20 = vpack.c.bf16 %v7518_v61, %v7514_v44  ;;  %v7584_v63 = vpack.c.bf16 %v7540_v32, %v7536_v16  ;;  %v7538_v17 = vmul.f32 %v7474_v5, %v7474_v5  ;;  %v16146_v61 = vld [vmem:[#allocation87_spill] sm:$0xff] }
 0xbbf   : > { %6096 = vst.msk [vmem:[#allocation3 + $0x8] sm:$0xff] %vm3663_vm5, %v6074_v42  ;;  %7898 = vmatmul.bf16.vlgmr.msrb.gmra.mxu3 %v7570_v19  ;;  %v16144_v42 = vld [vmem:[#allocation105_spill] sm:$0xff]  ;;  %v7484_v44 = vmax.f32 %v16146_v61, 0.0  ;;  %v16157_v16 = vld [vmem:[#allocation115_spill] sm:$0xff] }
 0xbc0   : > { %v7303_v22 = vld [vmem:[#allocation3] sm:$0xff]  ;;  %v7478_v51 = vmax.f32 %v16144_v42, 0.0  ;;  %v10214_v5 = vld [vmem:[#allocation2 + $0x30] sm:$0xff] }
 0xbc1   : > { %v7548_v23 = vmul.f32 %v7484_v44, %v7484_v44  ;;  %v10215_v44 = vld [vmem:[#allocation2 + $0x58] sm:$0xff] }
 0xbc2   : > { %v7245_v50 = vpop.f32.mrf.mxu3  ;;  %v7542_v1 = vmul.f32 %v7478_v51, %v7478_v51 }
 0xbc3   : > { %6785 = vrot.lane.b32.xlu2 %v15082_v26, %s10693_s20 }
 0xbc4   : > { %v6330_v2 = vpop.permute.xlu2 %6329 }
 0xbc6   : > { %v6320_v47 = vpop.permute.xlu0 %6319 }
 0xbc7   : > { %6342 = vst.msk [vmem:[#allocation3 + $0x8] sm:$0xff] %vm3926_vm6, %v6320_v47  ;;  %7805 = vmatmul.bf16.gmra.mxu1 %v16131_v58 }
 0xbce   : > { %v6076_v39 = vpop.permute.xlu0 %6075  ;;  %v7304_v29 = vld [vmem:[#allocation3 + $0x8] sm:$0xff] }
 0xbcf   : > { %6097 = vst.msk [vmem:[#allocation3 + $0x10] sm:$0xff] %vm3663_vm5, %v6076_v39  ;;  %7903 = vmatmul.bf16.gmra.mxu3 %v7574_v20  ;;  %v7319_v26 = vpack.c.bf16 %v7304_v29, %v7303_v22  ;;  %v7586_v20 = vpack.c.bf16 %v7542_v1, %v7538_v17  ;;  %v16147_v29 = vld [vmem:[#allocation84_spill] sm:$0xff]  ;;  %v16158_v1 = vld [vmem:[#allocation69_spill] sm:$0xff] }
 0xbd0   : > { %6343 = vst.msk [vmem:[#allocation3 + $0x10] sm:$0xff] %vm3926_vm6, %v6322_v11  ;;  %v5108_v17 = vadd.f32 %v10214_v5, %v16158_v1  ;;  %v16163_v5 = vld [vmem:[#allocation62_spill] sm:$0xff] }
 0xbd1   : > { %7383 = vmatmul.bf16.vlgmr.msra.gmra.mxu0 %v7319_v26  ;;  %v7480_v26 = vmax.f32 %v16147_v29, 0.0 }
 0xbd6   : > { %v6324_v62 = vpop.permute.xlu0 %6323 }
 0xbd7   : > { %6344 = vst.msk [vmem:[#allocation3 + $0x18] sm:$0xff] %vm3926_vm6, %v6324_v62  ;;  %7810 = vmatmul.bf16.gmra.mxu1 %v16136_v34  ;;  %v7305_v31 = vld [vmem:[#allocation3 + $0x10] sm:$0xff]  ;;  %v7550_v34 = vmul.f32 %v7486_v14, %v7486_v14 }
 0xbd8   : > { %v16160_v14 = vld [vmem:[#allocation130_spill] sm:$0xff] }
 0xbdd   : > { %v6782_v45 = vpop.permute.xlu2 %6781 }
 0xbde   : > { %6804 = vst.msk [vmem:[#allocation3 + $0x48] sm:$0xff] %vm3400_vm4, %v6782_v45  ;;  %v6080_v11 = vpop.permute.xlu0 %6079  ;;  %v7306_v4 = vld [vmem:[#allocation3 + $0x18] sm:$0xff]  ;;  %v16150_v45 = vld [vmem:[#allocation93_spill] sm:$0xff] }
 0xbdf   : > { %6099 = vst.msk [vmem:[#allocation3 + $0x20] sm:$0xff] %vm3663_vm5, %v6080_v11  ;;  %v6086_v13 = vpop.permute.xlu1 %6085  ;;  %7908 = vmatmul.bf16.gmra.mxu3 %v7578_v8  ;;  %v7320_v52 = vpack.c.bf16 %v7306_v4, %v7305_v31  ;;  %v7492_v8 = vmax.f32 %v16150_v45, 0.0  ;;  %v16151_v31 = vld [vmem:[#allocation90_spill] sm:$0xff] }
 0xbe0   : > { %6345 = vst.msk [vmem:[#allocation3 + $0x20] sm:$0xff] %vm3926_vm6, %v6326_v48  ;;  %v7488_v4 = vmax.f32 %v16151_v31, 0.0 }
 0xbe1   : > { %6102 = vst.msk [vmem:[#allocation3 + $0x38] sm:$0xff] %vm3663_vm5, %v6086_v13  ;;  %7388 = vmatmul.bf16.gmra.mxu0 %v7320_v52  ;;  %v7556_v13 = vmul.f32 %v7492_v8, %v7492_v8 }
 0xbe2   : > { %v7552_v0 = vmul.f32 %v7488_v4, %v7488_v4 }
 0xbe4   : > { %v7592_v15 = vpack.c.bf16 %v7556_v13, %v7552_v0  ;;  %v10217_v13 = vld [vmem:[#allocation2 + $0x8] sm:$0xff] }
 0xbe6   : > { %v6328_v36 = vpop.permute.xlu0 %6327 }
 0xbe7   : > { %6346 = vst.msk [vmem:[#allocation3 + $0x28] sm:$0xff] %vm3926_vm6, %v6328_v36  ;;  %7815 = vmatmul.bf16.gmra.mxu1 %v16141_v12  ;;  %v7307_v56 = vld [vmem:[#allocation3 + $0x20] sm:$0xff]  ;;  %v7490_v12 = vmax.f32 %v16153_v43, 0.0 }
 0xbe8   : > { %v16152_v36 = vld [vmem:[#allocation113_spill] sm:$0xff] }
 0xbe9   : > { %v7494_v7 = vmax.f32 %v16152_v36, 0.0  ;;  %v7554_v33 = vmul.f32 %v7490_v12, %v7490_v12  ;;  %v9336_v12 = vld [vmem:[%s11063_s27 + $0xf8] sm:$0xff] }
 0xbea   : > { %7939 = vmatpush.bf16.msrb.mxu0 %v9336_v12 }
 0xbec   : > { %v6997_v10 = vpop.f32.mrf.mxu1 }
 0xbed   : > { %v6780_v48 = vpop.permute.xlu1 %6779  ;;  %7025 = vrot.lane.b32.xlu0 %v6997_v10, %s10695_s26  ;;  %v16154_v10 = vld [vmem:[#allocation100_spill] sm:$0xff] }
 0xbee   : > { %6803 = vst.msk [vmem:[#allocation3 + $0x40] sm:$0xff] %vm3400_vm4, %v6780_v48  ;;  %v6084_v59 = vpop.permute.xlu0 %6083  ;;  %v7308_v28 = vld [vmem:[#allocation3 + $0x28] sm:$0xff]  ;;  %v7500_v53 = vmax.f32 %v16154_v10, 0.0 }
 0xbef   : > { %6101 = vst.msk [vmem:[#allocation3 + $0x30] sm:$0xff] %vm3663_vm5, %v6084_v59  ;;  %7913 = vmatmul.bf16.gmra.mxu3 %v7582_v6  ;;  %v7321_v18 = vpack.c.bf16 %v7308_v28, %v7307_v56  ;;  %v16155_v48 = vld [vmem:[#allocation97_spill] sm:$0xff] }
 0xbf0   : > { %6347 = vst.msk [vmem:[#allocation3 + $0x30] sm:$0xff] %vm3926_vm6, %v6330_v2  ;;  %v7544_v2 = vmul.f32 %v7480_v26, %v7480_v26  ;;  %v7496_v6 = vmax.f32 %v16155_v48, 0.0  ;;  %v7564_v59 = vmul.f32 %v7500_v53, %v7500_v53  ;;  %v9333_v48 = vld [vmem:[%s11063_s27 + $0xe0] sm:$0xff] }
 0xbf1   : > { %7393 = vmatmul.bf16.gmra.mxu0 %v7321_v18  ;;  %v7502_v18 = vmax.f32 %v16156_v38, 0.0 }
 0xbf2   : > { %v7588_v55 = vpack.c.bf16 %v7548_v23, %v7544_v2  ;;  %v7560_v28 = vmul.f32 %v7496_v6, %v7496_v6 }
 0xbf4   : > { %v6999_v19 = vpop.f32.mrf.mxu1  ;;  %v7596_v32 = vpack.c.bf16 %v7564_v59, %v7560_v28  ;;  %v9332_v59 = vld [vmem:[%s11063_s27 + $0xd8] sm:$0xff] }
 0xbf5   : > { %7027 = vrot.lane.b32.xlu1 %v6999_v19, %s10695_s26  ;;  %7273 = vrot.lane.b32.xlu0 %v7245_v50, %s10694_s30  ;;  %v7498_v50 = vmax.f32 %v16157_v16, 0.0  ;;  %v7566_v19 = vmul.f32 %v7502_v18, %v7502_v18  ;;  %v9329_v18 = vld [vmem:[%s11063_s27 + $0xc0] sm:$0xff] }
 0xbf6   : > { %v6332_v47 = vpop.permute.xlu0 %6331 }
 0xbf7   : > { %6348 = vst.msk [vmem:[#allocation3 + $0x38] sm:$0xff] %vm3926_vm6, %v6332_v47  ;;  %7820 = vmatmul.bf16.gmra.mxu1 %v7584_v63  ;;  %v7309_v39 = vld [vmem:[#allocation3 + $0x30] sm:$0xff]  ;;  %v7562_v51 = vmul.f32 %v7498_v50, %v7498_v50 }
 0xbf9   : > { %v7598_v47 = vpack.c.bf16 %v7566_v19, %v7562_v51 }
 0xbfc   : > { %v7002_v58 = vpop.f32.mrf.mxu1 }
 0xbfd   : > { %6783 = vrot.lane.b32.xlu1 %v15073_v46, %s10693_s20  ;;  %7029 = vrot.lane.b32.xlu0 %v7002_v58, %s10695_s26  ;;  %v7482_v46 = vmax.f32 %v16149_v9, 0.0 }
 0xbfe   : > { %v7310_v22 = vld [vmem:[#allocation3 + $0x38] sm:$0xff] }
 0xbff   : > { %7918 = vmatmul.bf16.gmra.mxu3 %v7586_v20  ;;  %v7322_v24 = vpack.c.bf16 %v7310_v22, %v7309_v39  ;;  %v7546_v60 = vmul.f32 %v7482_v46, %v7482_v46  ;;  %v16159_v20 = vld [vmem:[#allocation56_spill] sm:$0xff] }
 0xc00   : > { %v5110_v39 = vadd.f32 %v10215_v44, %v16159_v20 }
 0xc01   : > { %7398 = vmatmul.bf16.gmra.mxu0 %v7322_v24  ;;  %v7590_v11 = vpack.c.bf16 %v7550_v34, %v7546_v60 }
 0xc04   : > { %v7004_v62 = vpop.f32.mrf.mxu1 }
 0xc05   : > { %7031 = vrot.lane.b32.xlu1 %v7004_v62, %s10695_s26 }
 0xc07   : > { %7825 = vmatmul.bf16.gmra.mxu1 %v7588_v55  ;;  %v5112_v55 = vadd.f32 %v10216_v37, %v16160_v14 }
 0xc0a   : > { %v7248_v40 = vpop.f32.mrf.mxu3 }
 0xc0b   : > { %7275 = vrot.lane.b32.xlu2 %v7248_v40, %s10694_s30 }
 0xc0d   : > { %6787 = vrot.lane.b32.xlu1 %v15097_v54, %s10693_s20  ;;  %v7558_v54 = vmul.f32 %v7494_v7, %v7494_v7 }
 0xc0f   : > { %7923 = vmatmul.bf16.gmra.mxu3 %v7590_v11  ;;  %v7594_v21 = vpack.c.bf16 %v7558_v54, %v7554_v33  ;;  %v9335_v54 = vld [vmem:[%s11063_s27 + $0xf0] sm:$0xff] }
 0xc10   : > { %7940 = vmatpush.bf16.msrb.mxu0 %v9335_v54  ;;  %v16179_v54 = vld [vmem:[#allocation86_spill] sm:$0xff] }
 0xc12   : > { %v7250_v52 = vpop.f32.mrf.mxu3 }
 0xc13   : > { %6789 = vrot.lane.b32.xlu2 %v15109_v49, %s10693_s20  ;;  %7277 = vrot.lane.b32.xlu0 %v7250_v52, %s10694_s30  ;;  %v16161_v52 = vld [vmem:[#allocation131_spill] sm:$0xff] }
 0xc14   : > { %v7007_v35 = vpop.f32.mrf.mxu1  ;;  %v5114_v0 = vadd.f32 %v10217_v13, %v16161_v52 }
 0xc15   : > { %v7272_v57 = vpop.permute.xlu2 %7271 }
 0xc17   : > { %7830 = vmatmul.bf16.gmra.mxu1 %v7592_v15 }
 0xc1b   : > { %7033 = vrot.lane.b32.xlu0 %v7007_v35, %s10695_s26 }
 0xc1c   : > { %v7009_v3 = vpop.f32.mrf.mxu1 }
 0xc1d   : > { %7035 = vrot.lane.b32.xlu1 %v7009_v3, %s10695_s26  ;;  %v6786_v49 = vpop.permute.xlu2 %6785 }
 0xc1e   : > { %6806 = vst.msk [vmem:[#allocation3 + $0x58] sm:$0xff] %vm3400_vm4, %v6786_v49  ;;  %v9334_v49 = vld [vmem:[%s11063_s27 + $0xe8] sm:$0xff] }
 0xc1f   : > { %7928 = vmatmul.bf16.gmra.mxu3 %v7594_v21  ;;  %7941 = vmatpush.bf16.msrb.mxu0 %v9334_v49 }
 0xc22   : > { %v7253_v56 = vpop.f32.mrf.mxu3 }
 0xc23   : > { %7279 = vrot.lane.b32.xlu2 %v7253_v56, %s10694_s30  ;;  %7942 = vmatpush.bf16.msrb.mxu0 %v9333_v48  ;;  %v9331_v56 = vld [vmem:[%s11063_s27 + $0xd0] sm:$0xff] }
 0xc24   : > { %v7012_v41 = vpop.f32.mrf.mxu1 }
 0xc25   : > { %6791 = vrot.lane.b32.xlu1 %v15117_v25, %s10693_s20 }
 0xc27   : > { %7835 = vmatmul.bf16.gmra.mxu1 %v7596_v32  ;;  %7943 = vmatpush.bf16.msrb.mxu0 %v9332_v59 }
 0xc2a   : > { %v7255_v42 = vpop.f32.mrf.mxu3 }
 0xc2b   : > { %6793 = vrot.lane.b32.xlu2 %v15126_v27, %s10693_s20  ;;  %7281 = vrot.lane.b32.xlu0 %v7255_v42, %s10694_s30 }
 0xc2c   : > { %v7014_v63 = vpop.f32.mrf.mxu1  ;;  %7944 = vmatpush.bf16.msrb.mxu0 %v9331_v56 }
 0xc2d   : > { %7039 = vrot.lane.b32.xlu1 %v7014_v63, %s10695_s26 }
 0xc2f   : > { %7933 = vmatmul.bf16.gmra.mxu3 %v7598_v47 }
 0xc32   : > { %v7258_v30 = vpop.f32.mrf.mxu3 }
 0xc33   : > { %7283 = vrot.lane.b32.xlu2 %v7258_v30, %s10694_s30  ;;  %7037 = vrot.lane.b32.xlu0 %v7012_v41, %s10695_s26  ;;  %v9330_v41 = vld [vmem:[%s11063_s27 + $0xc8] sm:$0xff] }
 0xc34   : > { %7945 = vmatpush.bf16.msrb.mxu0 %v9330_v41  ;;  %v7801_v56 = vpop.f32.mrf.mxu1  ;;  %v7850_v41 = vpop.f32.mrf.mxu2 }
 0xc38   : > { %7946 = vmatpush.bf16.msrb.mxu0 %v9329_v18 }
 0xc3a   : > { %v7260_v25 = vpop.f32.mrf.mxu3 }
 0xc3b   : > { %7285 = vrot.lane.b32.xlu0 %v7260_v25, %s10694_s30  ;;  %v16162_v25 = vld [vmem:[#allocation63_spill] sm:$0xff] }
 0xc3c   : > { %v16164_v1 = vpack.c.bf16 %v16162_v25, %v16163_v5  ;;  %v7852_v5 = vpop.f32.mrf.mxu2 }
 0xc4e   : > { %v7384_v58 = vpop.f32.mrf.mxu0 }
 0xc4f   : > { %v15216_v27 = vadd.f32 %v7384_v58, %v5108_v17  ;;  %v16165_v17 = vld [vmem:[#allocation67_spill] sm:$0xff]  ;;  %v16166_v58 = vld [vmem:[#allocation66_spill] sm:$0xff] }
 0xc50   : > { %v16167_v44 = vpack.c.bf16 %v16165_v17, %v16166_v58  ;;  %v16184_v58 = vld [vmem:[#allocation99_spill] sm:$0xff] }
 0xc56   : > { %v15218_v61 = vpop.f32.mrf.mxu0 }
 0xc5e   : > { %v7389_v22 = vpop.f32.mrf.mxu0 }
 0xc5f   : > { %v15221_v29 = vadd.f32 %v7389_v22, %v5110_v39  ;;  %v7026_v26 = vpop.permute.xlu0 %7025  ;;  %v16168_v39 = vld [vmem:[#allocation72_spill] sm:$0xff]  ;;  %v16169_v22 = vld [vmem:[#allocation71_spill] sm:$0xff] }
 0xc60   : > { %7049 = vst.msk [vmem:[#allocation3 + $0x40] sm:$0xff] %vm3663_vm5, %v7026_v26  ;;  %v16170_v26 = vpack.c.bf16 %v16168_v39, %v16169_v22  ;;  %v16185_v22 = vld [vmem:[#allocation96_spill] sm:$0xff] }
 0xc61   : > { %7295 = vst.msk [vmem:[#allocation3 + $0x40] sm:$0xff] %vm3926_vm6, %v7272_v57 }
 0xc65   : > { %v7276_v24 = vpop.permute.xlu2 %7275 }
 0xc66   : > { %v15225_v23 = vpop.f32.mrf.mxu0 }
 0xc67   : > { %v7028_v2 = vpop.permute.xlu1 %7027  ;;  %v7274_v62 = vpop.permute.xlu0 %7273 }
 0xc68   : > { %7050 = vst.msk [vmem:[#allocation3 + $0x48] sm:$0xff] %vm3663_vm5, %v7028_v2  ;;  %v7311_v45 = vld [vmem:[#allocation3 + $0x40] sm:$0xff] }
 0xc69   : > { %7296 = vst.msk [vmem:[#allocation3 + $0x48] sm:$0xff] %vm3926_vm6, %v7274_v62  ;;  %v16171_v2 = vld [vmem:[#allocation132_spill] sm:$0xff] }
 0xc6d   : > { %v6790_v9 = vpop.permute.xlu2 %6789 }
 0xc6e   : > { %6808 = vst.msk [vmem:[#allocation3 + $0x68] sm:$0xff] %vm3400_vm4, %v6790_v9  ;;  %v7394_v46 = vpop.f32.mrf.mxu0  ;;  %v16173_v9 = vld [vmem:[#allocation78_spill] sm:$0xff] }
 0xc6f   : > { %v15231_v34 = vadd.f32 %v7394_v46, %v5112_v55  ;;  %v6784_v40 = vpop.permute.xlu1 %6783  ;;  %v7030_v60 = vpop.permute.xlu0 %7029  ;;  %v16172_v55 = vld [vmem:[#allocation79_spill] sm:$0xff] }
 0xc70   : > { %6805 = vst.msk [vmem:[#allocation3 + $0x50] sm:$0xff] %vm3400_vm4, %v6784_v40  ;;  %v7312_v8 = vld [vmem:[#allocation3 + $0x48] sm:$0xff]  ;;  %v16174_v46 = vpack.c.bf16 %v16172_v55, %v16173_v9  ;;  %v16175_v40 = vld [vmem:[#allocation83_spill] sm:$0xff] }
 0xc71   : > { %7051 = vst.msk [vmem:[#allocation3 + $0x50] sm:$0xff] %vm3663_vm5, %v7030_v60  ;;  %v7323_v11 = vpack.c.bf16 %v7312_v8, %v7311_v45  ;;  %v7479_v60 = vmax.f32 %v16175_v40, 0.0  ;;  %v16176_v45 = vld [vmem:[#allocation81_spill] sm:$0xff]  ;;  %v7855_v40 = vpop.f32.mrf.mxu2 }
 0xc72   : > { %7297 = vst.msk [vmem:[#allocation3 + $0x50] sm:$0xff] %vm3926_vm6, %v7276_v24  ;;  %v10218_v24 = vld [vmem:[#allocation2 + $0x40] sm:$0xff]  ;;  %v7475_v8 = vmax.f32 %v16176_v45, 0.0 }
 0xc73   : > { %7403 = vmatmul.bf16.gmra.mxu0 %v7323_v11  ;;  %v5116_v62 = vadd.f32 %v10218_v24, %v16171_v2  ;;  %v7543_v11 = vmul.f32 %v7479_v60, %v7479_v60 }
 0xc76   : > { %v15236_v31 = vpop.f32.mrf.mxu0 }
 0xc77   : > { %v7032_v4 = vpop.permute.xlu1 %7031 }
 0xc78   : > { %7052 = vst.msk [vmem:[#allocation3 + $0x58] sm:$0xff] %vm3663_vm5, %v7032_v4  ;;  %v7539_v4 = vmul.f32 %v7475_v8, %v7475_v8 }
 0xc79   : > { %v7313_v3 = vld [vmem:[#allocation3 + $0x50] sm:$0xff] }
 0xc7a   : > { %v7587_v52 = vpack.c.bf16 %v7543_v11, %v7539_v4  ;;  %v10223_v11 = vld [vmem:[#allocation2 + $0x28] sm:$0xff] }
 0xc7b   : > { %v16187_v4 = vld [vmem:[#allocation134_spill] sm:$0xff] }
 0xc7d   : > { %v7280_v35 = vpop.permute.xlu2 %7279 }
 0xc7e   : > { %v7399_v36 = vpop.f32.mrf.mxu0 }
 0xc7f   : > { %v15240_v7 = vadd.f32 %v7399_v36, %v5114_v0  ;;  %v6788_v57 = vpop.permute.xlu1 %6787  ;;  %v10219_v0 = vld [vmem:[#allocation2 + $0x10] sm:$0xff] }
 0xc80   : > { %6807 = vst.msk [vmem:[#allocation3 + $0x60] sm:$0xff] %vm3400_vm4, %v6788_v57 }
 0xc85   : > { %v7278_v15 = vpop.permute.xlu0 %7277  ;;  %v6794_v43 = vpop.permute.xlu2 %6793 }
 0xc86   : > { %7298 = vst.msk [vmem:[#allocation3 + $0x58] sm:$0xff] %vm3926_vm6, %v7278_v15  ;;  %v15268_v20 = vpop.f32.mrf.mxu0  ;;  %v16178_v15 = vld [vmem:[#allocation88_spill] sm:$0xff] }
 0xc87   : > { %6810 = vst.msk [vmem:[#allocation3 + $0x78] sm:$0xff] %vm3400_vm4, %v6794_v43  ;;  %v7487_v43 = vmax.f32 %v16178_v15, 0.0 }
 0xc8d   : > { %v7034_v33 = vpop.permute.xlu0 %7033  ;;  %v7314_v10 = vld [vmem:[#allocation3 + $0x58] sm:$0xff]  ;;  %v7284_v19 = vpop.permute.xlu2 %7283 }
 0xc8e   : > { %7053 = vst.msk [vmem:[#allocation3 + $0x60] sm:$0xff] %vm3663_vm5, %v7034_v33  ;;  %v7324_v53 = vpack.c.bf16 %v7314_v10, %v7313_v3  ;;  %v7483_v33 = vmax.f32 %v16179_v54, 0.0  ;;  %v7551_v3 = vmul.f32 %v7487_v43, %v7487_v43  ;;  %v7851_v43 = vadd.f32 %v7850_v41, %v7801_v56 }
 0xc8f   : > { %7299 = vst.msk [vmem:[#allocation3 + $0x60] sm:$0xff] %vm3926_vm6, %v7280_v35  ;;  %v7036_v21 = vpop.permute.xlu1 %7035  ;;  %v16177_v35 = vld [vmem:[#allocation50_spill] sm:$0xff] }
 0xc90   : > { %7054 = vst.msk [vmem:[#allocation3 + $0x68] sm:$0xff] %vm3663_vm5, %v7036_v21  ;;  %7408 = vmatmul.bf16.gmra.mxu0 %v7324_v53  ;;  %v5118_v36 = vadd.f32 %v10219_v0, %v16177_v35  ;;  %v7547_v10 = vmul.f32 %v7483_v33, %v7483_v33  ;;  %v16180_v21 = vld [vmem:[#allocation94_spill] sm:$0xff] }
 0xc91   : > { %v7495_v48 = vmax.f32 %v16180_v21, 0.0 }
 0xc92   : > { %v7591_v53 = vpack.c.bf16 %v7551_v3, %v7547_v10 }
 0xc96   : > { %v7315_v16 = vld [vmem:[#allocation3 + $0x60] sm:$0xff] }
 0xc97   : > { %v6792_v6 = vpop.permute.xlu1 %6791 }
 0xc98   : > { %6809 = vst.msk [vmem:[#allocation3 + $0x70] sm:$0xff] %vm3400_vm4, %v6792_v6  ;;  %v16181_v6 = vld [vmem:[#allocation91_spill] sm:$0xff] }
 0xc99   : > { %v7491_v59 = vmax.f32 %v16181_v6, 0.0 }
 0xc9b   : > { %v7555_v18 = vmul.f32 %v7491_v59, %v7491_v59  ;;  %v10224_v59 = vld [vmem:[#allocation2] sm:$0xff] }
 0xc9d   : > { %v7282_v28 = vpop.permute.xlu0 %7281 }
 0xc9e   : > { %7300 = vst.msk [vmem:[#allocation3 + $0x68] sm:$0xff] %vm3926_vm6, %v7282_v28  ;;  %v7559_v28 = vmul.f32 %v7495_v48, %v7495_v48 }
 0xc9f   : > { %v7040_v38 = vpop.permute.xlu1 %7039 }
 0xca0   : > { %7056 = vst.msk [vmem:[#allocation3 + $0x78] sm:$0xff] %vm3663_vm5, %v7040_v38  ;;  %v7899_v38 = vpop.f32.mrf.mxu3 }
 0xca1   : > { %v7900_v54 = vadd.f32 %v7899_v38, %v7851_v43 }
 0xca5   : > { %v7038_v32 = vpop.permute.xlu0 %7037  ;;  %v7316_v50 = vld [vmem:[#allocation3 + $0x68] sm:$0xff] }
 0xca6   : > { %7055 = vst.msk [vmem:[#allocation3 + $0x70] sm:$0xff] %vm3663_vm5, %v7038_v32  ;;  %v7325_v42 = vpack.c.bf16 %v7316_v50, %v7315_v16  ;;  %v10220_v32 = vld [vmem:[#allocation2 + $0x60] sm:$0xff] }
 0xca7   : > { %7301 = vst.msk [vmem:[#allocation3 + $0x70] sm:$0xff] %vm3926_vm6, %v7284_v19  ;;  %v16182_v16 = vld [vmem:[#allocation140_spill] sm:$0xff] }
 0xca8   : > { %7413 = vmatmul.bf16.gmra.mxu0 %v7325_v42  ;;  %v5120_v50 = vadd.f32 %v10220_v32, %v16182_v16 }
 0xcad   : > { %v7286_v51 = vpop.permute.xlu0 %7285 }
 0xcae   : > { %7302 = vst.msk [vmem:[#allocation3 + $0x78] sm:$0xff] %vm3926_vm6, %v7286_v51  ;;  %v7317_v63 = vld [vmem:[#allocation3 + $0x70] sm:$0xff]  ;;  %v7595_v51 = vpack.c.bf16 %v7559_v28, %v7555_v18 }
 0xcaf   : > { %v16188_v28 = vld [vmem:[#allocation127_spill] sm:$0xff] }
 0xcb0   : > { %v5109_v18 = vadd.f32 %v10224_v59, %v16188_v28 }
 0xcb5   : > { %v7318_v47 = vld [vmem:[#allocation3 + $0x78] sm:$0xff] }
 0xcb6   : > { %v7326_v30 = vpack.c.bf16 %v7318_v47, %v7317_v63  ;;  %v7803_v63 = vpop.f32.mrf.mxu1  ;;  %v10221_v47 = vld [vmem:[#allocation2 + $0x70] sm:$0xff] }
 0xcb7   : > { %v7853_v48 = vadd.f32 %v7852_v5, %v7803_v63 }
 0xcb8   : > { %7418 = vmatmul.bf16.gmra.mxu0 %v7326_v30  ;;  %v16183_v30 = vld [vmem:[#allocation138_spill] sm:$0xff] }
 0xcb9   : > { %v5121_v25 = vadd.f32 %v10221_v47, %v16183_v30 }
 0xcbe   : > { %v7806_v9 = vpop.f32.mrf.mxu1 }
 0xcbf   : > { %v7856_v38 = vadd.f32 %v7855_v40, %v7806_v9 }
 0xcc8   : > { %7947 = vmatmul.bf16.vlgmr.msrb.gmra.mxu0 %v16164_v1  ;;  %v7901_v1 = vpop.f32.mrf.mxu3 }
 0xcc9   : > { %v7902_v32 = vadd.f32 %v7901_v1, %v7853_v48  ;;  %v10225_v1 = vld [vmem:[#allocation2 + $0x18] sm:$0xff] }
 0xcd0   : > { %v7904_v8 = vpop.f32.mrf.mxu3 }
 0xcd8   : > { %7952 = vmatmul.bf16.gmra.mxu0 %v16167_v44  ;;  %v7503_v44 = vmax.f32 %v16184_v58, 0.0  ;;  %v7906_v15 = vpop.f32.mrf.mxu3 }
 0xcda   : > { %v7567_v24 = vmul.f32 %v7503_v44, %v7503_v44 }
 0xce0   : > { %v7909_v6 = vpop.f32.mrf.mxu3 }
 0xce8   : > { %7957 = vmatmul.bf16.gmra.mxu0 %v16170_v26  ;;  %v7499_v26 = vmax.f32 %v16185_v22, 0.0  ;;  %v7911_v63 = vpop.f32.mrf.mxu3 }
 0xcea   : > { %v7563_v2 = vmul.f32 %v7499_v26, %v7499_v26 }
 0xcec   : > { %v7599_v45 = vpack.c.bf16 %v7567_v24, %v7563_v2 }
 0xcf0   : > { %v7404_v37 = vpop.f32.mrf.mxu0 }
 0xcf1   : > { %v15274_v14 = vadd.f32 %v7404_v37, %v5116_v62  ;;  %v10222_v62 = vld [vmem:[#allocation2 + $0x78] sm:$0xff] }
 0xcf2   : > { %v16186_v37 = vld [vmem:[#allocation135_spill] sm:$0xff] }
 0xcf3   : > { %v5122_v55 = vadd.f32 %v10222_v62, %v16186_v37  ;;  %v7914_v62 = vpop.f32.mrf.mxu3 }
 0xcf8   : > { %7962 = vmatmul.bf16.gmra.mxu0 %v16174_v46  ;;  %v15281_v13 = vpop.f32.mrf.mxu0 }
 0xd08   : > { %7967 = vmatmul.bf16.gmra.mxu0 %v7587_v52  ;;  %v5123_v52 = vadd.f32 %v10223_v11, %v16187_v4  ;;  %v7916_v11 = vpop.f32.mrf.mxu3 }
 0xd0d   : > { %v7409_v57 = vpop.f32.mrf.mxu0 }
 0xd0e   : > { %v15285_v12 = vadd.f32 %v7409_v57, %v5118_v36  ;;  %v7808_v36 = vpop.f32.mrf.mxu1  ;;  %v7857_v57 = vpop.f32.mrf.mxu2 }
 0xd0f   : > { %v7858_v5 = vadd.f32 %v7857_v57, %v7808_v36 }
 0xd11   : > { %v7907_v58 = vadd.f32 %v7906_v15, %v7858_v5 }
 0xd15   : > { %v15288_v49 = vpop.f32.mrf.mxu0 }
 0xd16   : > { %v7860_v21 = vpop.f32.mrf.mxu2 }
 0xd18   : > { %7972 = vmatmul.bf16.gmra.mxu0 %v7591_v53  ;;  %v7811_v53 = vpop.f32.mrf.mxu1 }
 0xd25   : > { %v7414_v19 = vpop.f32.mrf.mxu0 }
 0xd26   : > { %v15293_v42 = vadd.f32 %v7414_v19, %v5120_v50  ;;  %v7425_v50 = vadd.f32 %v15218_v61, %v5109_v18  ;;  %v7862_v19 = vpop.f32.mrf.mxu2  ;;  %v16189_v61 = vld [vmem:[#allocation74_spill] sm:$0xff] }
 0xd28   : > { %7977 = vmatmul.bf16.gmra.mxu0 %v7595_v51  ;;  %v7905_v51 = vadd.f32 %v7904_v8, %v7856_v38 }
 0xd2d   : > { %v7416_v17 = vpop.f32.mrf.mxu0 }
 0xd2e   : > { %v15297_v39 = vadd.f32 %v7416_v17, %v5121_v25  ;;  %v5111_v17 = vadd.f32 %v10225_v1, %v16189_v61  ;;  %v7865_v26 = vpop.f32.mrf.mxu2 }
 0xd30   : > { %v7427_v24 = vadd.f32 %v15225_v23, %v5111_v17  ;;  %v10226_v23 = vld [vmem:[#allocation2 + $0x68] sm:$0xff] }
 0xd35   : > { %v7419_v46 = vpop.f32.mrf.mxu0 }
 0xd36   : > { %v15301_v60 = vadd.f32 %v7419_v46, %v5122_v55  ;;  %v7861_v55 = vadd.f32 %v7860_v21, %v7811_v53 }
 0xd38   : > { %7982 = vmatmul.bf16.gmra.mxu0 %v7599_v45  ;;  %v7867_v45 = vpop.f32.mrf.mxu2 }
 0xd3d   : > { %v7421_v0 = vpop.f32.mrf.mxu0 }
 0xd3e   : > { %v15304_v35 = vadd.f32 %v7421_v0, %v5123_v52  ;;  %v16190_v52 = vld [vmem:[#allocation129_spill] sm:$0xff] }
 0xd3f   : > { %v5113_v0 = vadd.f32 %v10226_v23, %v16190_v52 }
 0xd41   : > { %v7429_v15 = vadd.f32 %v15236_v31, %v5113_v0  ;;  %v10227_v31 = vld [vmem:[#allocation2 + $0x48] sm:$0xff] }
 0xd45   : > { %v7948_v33 = vpop.f32.mrf.mxu0 }
 0xd46   : > { %v7949_v3 = vadd.f32 %v7948_v33, %v7900_v54 }
 0xd48   : > { %v15307_v10 = vadd.f32 %v7949_v3, %v15216_v27  ;;  %v7813_v27 = vpop.f32.mrf.mxu1  ;;  %v7870_v3 = vpop.f32.mrf.mxu2 }
 0xd49   : > { %v7863_v4 = vadd.f32 %v7862_v19, %v7813_v27 }
 0xd4a   : > { %8004 = vst [vmem:[#allocation2 + $0x30] sm:$0xff] %v15307_v10 }
 0xd4b   : > { %v7912_v36 = vadd.f32 %v7911_v63, %v7863_v4 }
 0xd4d   : > { %v7950_v16 = vpop.f32.mrf.mxu0 }
 0xd4e   : > { %v7951_v56 = vadd.f32 %v7950_v16, %v7902_v32  ;;  %v16191_v32 = vld [vmem:[#allocation60_spill] sm:$0xff] }
 0xd4f   : > { %v5115_v16 = vadd.f32 %v10227_v31, %v16191_v32 }
 0xd50   : > { %v15312_v41 = vadd.f32 %v7951_v56, %v7425_v50  ;;  %v7816_v44 = vpop.f32.mrf.mxu1  ;;  %v7872_v50 = vpop.f32.mrf.mxu2 }
 0xd51   : > { %v7866_v53 = vadd.f32 %v7865_v26, %v7816_v44  ;;  %v7431_v19 = vadd.f32 %v15268_v20, %v5115_v16  ;;  %v16192_v20 = vld [vmem:[#allocation133_spill] sm:$0xff] }
 0xd52   : > { %8005 = vst [vmem:[#allocation2] sm:$0xff] %v15312_v41 }
 0xd53   : > { %v7915_v21 = vadd.f32 %v7914_v62, %v7866_v53 }
 0xd55   : > { %v7953_v47 = vpop.f32.mrf.mxu0 }
 0xd56   : > { %v7954_v30 = vadd.f32 %v7953_v47, %v7905_v51 }
 0xd58   : > { %v15316_v25 = vadd.f32 %v7954_v30, %v15221_v29  ;;  %v7910_v29 = vadd.f32 %v7909_v6, %v7861_v55  ;;  %v7818_v40 = vpop.f32.mrf.mxu1  ;;  %v7875_v1 = vpop.f32.mrf.mxu2 }
 0xd59   : > { %v7868_v28 = vadd.f32 %v7867_v45, %v7818_v40 }
 0xd5a   : > { %8006 = vst [vmem:[#allocation2 + $0x58] sm:$0xff] %v15316_v25 }
 0xd5b   : > { %v7917_v56 = vadd.f32 %v7916_v11, %v7868_v28 }
 0xd5d   : > { %v7955_v22 = vpop.f32.mrf.mxu0 }
 0xd5e   : > { %v7956_v2 = vadd.f32 %v7955_v22, %v7907_v58  ;;  %v10228_v22 = vld [vmem:[#allocation2 + $0x20] sm:$0xff] }
 0xd5f   : > { %v5117_v26 = vadd.f32 %v10228_v22, %v16192_v20 }
 0xd60   : > { %v15321_v37 = vadd.f32 %v7956_v2, %v7427_v24  ;;  %v7821_v33 = vpop.f32.mrf.mxu1 }
 0xd61   : > { %v7871_v47 = vadd.f32 %v7870_v3, %v7821_v33  ;;  %v7433_v62 = vadd.f32 %v15281_v13, %v5117_v26 }
 0xd62   : > { %8007 = vst [vmem:[#allocation2 + $0x18] sm:$0xff] %v15321_v37 }
 0xd65   : > { %v7958_v9 = vpop.f32.mrf.mxu0 }
 0xd66   : > { %v7959_v46 = vadd.f32 %v7958_v9, %v7910_v29  ;;  %v7877_v9 = vpop.f32.mrf.mxu2 }
 0xd68   : > { %v15325_v8 = vadd.f32 %v7959_v46, %v15231_v34  ;;  %v7919_v34 = vpop.f32.mrf.mxu3  ;;  %v7823_v18 = vpop.f32.mrf.mxu1 }
 0xd69   : > { %v7873_v44 = vadd.f32 %v7872_v50, %v7823_v18 }
 0xd6a   : > { %8008 = vst [vmem:[#allocation2 + $0x50] sm:$0xff] %v15325_v8 }
 0xd6d   : > { %v7960_v57 = vpop.f32.mrf.mxu0 }
 0xd6e   : > { %v7961_v43 = vadd.f32 %v7960_v57, %v7912_v36  ;;  %v7880_v0 = vpop.f32.mrf.mxu2  ;;  %v10229_v57 = vld [vmem:[#allocation2 + $0x38] sm:$0xff] }
 0xd70   : > { %v15330_v54 = vadd.f32 %v7961_v43, %v7429_v15  ;;  %v7921_v38 = vpop.f32.mrf.mxu3  ;;  %v7826_v30 = vpop.f32.mrf.mxu1  ;;  %v16193_v15 = vld [vmem:[#allocation53_spill] sm:$0xff] }
 0xd71   : > { %v7922_v24 = vadd.f32 %v7921_v38, %v7873_v44  ;;  %v7876_v45 = vadd.f32 %v7875_v1, %v7826_v30  ;;  %v5119_v43 = vadd.f32 %v10229_v57, %v16193_v15 }
 0xd72   : > { %8009 = vst [vmem:[#allocation2 + $0x68] sm:$0xff] %v15330_v54 }
 0xd73   : > { %v7435_v53 = vadd.f32 %v15288_v49, %v5119_v43 }
 0xd75   : > { %v7963_v48 = vpop.f32.mrf.mxu0 }
 0xd76   : > { %v7964_v6 = vadd.f32 %v7963_v48, %v7915_v21 }
 0xd78   : > { %v15334_v59 = vadd.f32 %v7964_v6, %v15240_v7  ;;  %v7920_v7 = vadd.f32 %v7919_v34, %v7871_v47  ;;  %v7924_v17 = vpop.f32.mrf.mxu3  ;;  %v7828_v29 = vpop.f32.mrf.mxu1 }
 0xd79   : > { %v7878_v36 = vadd.f32 %v7877_v9, %v7828_v29  ;;  %v7882_v6 = vpop.f32.mrf.mxu2 }
 0xd7a   : > { %8010 = vst [vmem:[#allocation2 + $0x8] sm:$0xff] %v15334_v59 }
 0xd7d   : > { %v7965_v27 = vpop.f32.mrf.mxu0 }
 0xd7e   : > { %v7966_v51 = vadd.f32 %v7965_v27, %v7917_v56 }
 0xd80   : > { %v15339_v63 = vadd.f32 %v7966_v51, %v7431_v19  ;;  %v7926_v40 = vpop.f32.mrf.mxu3  ;;  %v7831_v52 = vpop.f32.mrf.mxu1 }
 0xd81   : > { %v7927_v33 = vadd.f32 %v7926_v40, %v7878_v36  ;;  %v7881_v48 = vadd.f32 %v7880_v0, %v7831_v52  ;;  %v7885_v19 = vpop.f32.mrf.mxu2 }
 0xd82   : > { %8011 = vst [vmem:[#allocation2 + $0x48] sm:$0xff] %v15339_v63 }
 0xd85   : > { %v7968_v5 = vpop.f32.mrf.mxu0 }
 0xd86   : > { %v7969_v61 = vadd.f32 %v7968_v5, %v7920_v7 }
 0xd88   : > { %v15343_v58 = vadd.f32 %v7969_v61, %v15274_v14  ;;  %v7925_v14 = vadd.f32 %v7924_v17, %v7876_v45  ;;  %v7929_v13 = vpop.f32.mrf.mxu3 }
 0xd89   : > { %v7930_v28 = vadd.f32 %v7929_v13, %v7881_v48  ;;  %v7887_v17 = vpop.f32.mrf.mxu2 }
 0xd8a   : > { %8012 = vst [vmem:[#allocation2 + $0x40] sm:$0xff] %v15343_v58 }
 0xd8d   : > { %v7970_v2 = vpop.f32.mrf.mxu0 }
 0xd8e   : > { %v7971_v55 = vadd.f32 %v7970_v2, %v7922_v24 }
 0xd90   : > { %v15348_v46 = vadd.f32 %v7971_v55, %v7433_v62  ;;  %v7931_v18 = vpop.f32.mrf.mxu3 }
 0xd92   : > { %8013 = vst [vmem:[#allocation2 + $0x20] sm:$0xff] %v15348_v46 }
 0xd95   : > { %v7973_v11 = vpop.f32.mrf.mxu0 }
 0xd96   : > { %v7974_v4 = vadd.f32 %v7973_v11, %v7925_v14 }
 0xd98   : > { %v15352_v23 = vadd.f32 %v7974_v4, %v15285_v12  ;;  %v7833_v12 = vpop.f32.mrf.mxu1  ;;  %v7934_v51 = vpop.f32.mrf.mxu3 }
 0xd99   : > { %v7883_v50 = vadd.f32 %v7882_v6, %v7833_v12 }
 0xd9a   : > { %8014 = vst [vmem:[#allocation2 + $0x10] sm:$0xff] %v15352_v23 }
 0xd9b   : > { %v7932_v56 = vadd.f32 %v7931_v18, %v7883_v50 }
 0xd9d   : > { %v7975_v3 = vpop.f32.mrf.mxu0 }
 0xd9e   : > { %v7976_v34 = vadd.f32 %v7975_v3, %v7927_v33 }
 0xda0   : > { %v15357_v21 = vadd.f32 %v7976_v34, %v7435_v53  ;;  %v7836_v49 = vpop.f32.mrf.mxu1  ;;  %v7936_v44 = vpop.f32.mrf.mxu3 }
 0xda1   : > { %v7886_v7 = vadd.f32 %v7885_v19, %v7836_v49 }
 0xda2   : > { %8015 = vst [vmem:[#allocation2 + $0x38] sm:$0xff] %v15357_v21 }
 0xda3   : > { %v7935_v30 = vadd.f32 %v7934_v51, %v7886_v7 }
 0xda5   : > { %v7978_v31 = vpop.f32.mrf.mxu0 }
 0xda6   : > { %v7979_v32 = vadd.f32 %v7978_v31, %v7930_v28 }
 0xda8   : > { %v15361_v16 = vadd.f32 %v7979_v32, %v15293_v42  ;;  %v7838_v42 = vpop.f32.mrf.mxu1 }
 0xda9   : > { %v7888_v22 = vadd.f32 %v7887_v17, %v7838_v42 }
 0xdaa   : > { %8016 = vst [vmem:[#allocation2 + $0x60] sm:$0xff] %v15361_v16 }
 0xdab   : > { %v7937_v20 = vadd.f32 %v7936_v44, %v7888_v22 }
 0xdad   : > { %v7980_v38 = vpop.f32.mrf.mxu0 }
 0xdae   : > { %v7981_v27 = vadd.f32 %v7980_v38, %v7932_v56 }
 0xdb0   : > { %v15365_v47 = vadd.f32 %v7981_v27, %v15297_v39 }
 0xdb2   : > { %8017 = vst [vmem:[#allocation2 + $0x70] sm:$0xff] %v15365_v47 }
 0xdb5   : > { %v7983_v5 = vpop.f32.mrf.mxu0 }
 0xdb6   : > { %v7984_v1 = vadd.f32 %v7983_v5, %v7935_v30 }
 0xdb8   : > { %v15369_v61 = vadd.f32 %v7984_v1, %v15301_v60 }
 0xdba   : > { %8018 = vst [vmem:[#allocation2 + $0x78] sm:$0xff] %v15369_v61 }
 0xdbd   : > { %v7985_v26 = vpop.f32.mrf.mxu0 }
 0xdbe   : > { %v7986_v24 = vadd.f32 %v7985_v26, %v7937_v20  ;;  %8023 = sbr.rel (%p9198_p1) target bundleno = 3861 (0xf15), region = 124 }
 0xdc0   : > { %v15373_v39 = vadd.f32 %v7986_v24, %v15304_v35 }
 0xdc2   : > { %8019 = vst [vmem:[#allocation2 + $0x28] sm:$0xff] %v15373_v39 }
 0xdc3   : > { %v8039_v60 = vmul.f32 %v15373_v39, %v15373_v39  ;;  %v8037_v2 = vmul.f32 %v15365_v47, %v15365_v47  ;;  %v8035_v62 = vmul.f32 %v15357_v21, %v15357_v21  ;;  %v8038_v35 = vmul.f32 %v15369_v61, %v15369_v61  ;;  %v16195_v43 = vld [vmem:[#allocation39_spill] sm:$0xff] }
 0xdc4   : > { %v8036_v55 = vmul.f32 %v15361_v16, %v15361_v16  ;;  %v8034_v29 = vmul.f32 %v15352_v23, %v15352_v23  ;;  %v8033_v9 = vmul.f32 %v15348_v46, %v15348_v46  ;;  %v8032_v40 = vmul.f32 %v15343_v58, %v15343_v58 }
 0xdc5   : > { %8070 = vadd.xlane.f32.xlu0 %v8039_v60  ;;  %8066 = vadd.xlane.f32.xlu1 %v8037_v2  ;;  %v8031_v45 = vmul.f32 %v15339_v63, %v15339_v63  ;;  %v8030_v14 = vmul.f32 %v15334_v59, %v15334_v59  ;;  %v8029_v11 = vmul.f32 %v15330_v54, %v15330_v54 }
 0xdc6   : > { %8062 = vadd.xlane.f32.xlu2 %v8035_v62  ;;  %v8028_v4 = vmul.f32 %v15325_v8, %v15325_v8  ;;  %v8027_v52 = vmul.f32 %v15321_v37, %v15321_v37  ;;  %v8026_v0 = vmul.f32 %v15316_v25, %v15316_v25  ;;  %v8025_v36 = vmul.f32 %v15312_v41, %v15312_v41 }
 0xdc7   : > { %v8024_v13 = vmul.f32 %v15307_v10, %v15307_v10 }
 0xdcd   : > { %8068 = vadd.xlane.f32.xlu0 %v8038_v35  ;;  %8064 = vadd.xlane.f32.xlu1 %v8036_v55 }
 0xdce   : > { %8060 = vadd.xlane.f32.xlu2 %v8034_v29 }
 0xdd5   : > { %8058 = vadd.xlane.f32.xlu0 %v8033_v9  ;;  %8056 = vadd.xlane.f32.xlu1 %v8032_v40 }
 0xdd6   : > { %8054 = vadd.xlane.f32.xlu2 %v8031_v45 }
 0xddd   : > { %8052 = vadd.xlane.f32.xlu0 %v8030_v14  ;;  %8050 = vadd.xlane.f32.xlu1 %v8029_v11 }
 0xdde   : > { %8048 = vadd.xlane.f32.xlu2 %v8028_v4 }
 0xde5   : > { %8046 = vadd.xlane.f32.xlu0 %v8027_v52  ;;  %8044 = vadd.xlane.f32.xlu1 %v8026_v0 }
 0xde6   : > { %8042 = vadd.xlane.f32.xlu2 %v8025_v36 }
 0xded   : > { %8040 = vadd.xlane.f32.xlu0 %v8024_v13 }
 0xe38   : > { %v8071_v57 = vpop.xlane.xlu0 %8070  ;;  %v8067_v15 = vpop.xlane.xlu1 %8066 }
 0xe39   : > { %v8087_v33 = vmul.f32 %v8071_v57, %v16195_v43  ;;  %v8085_v3 = vmul.f32 %v8067_v15, %v16195_v43  ;;  %v8063_v53 = vpop.xlane.xlu2 %8062 }
 0xe3a   : > { %v8083_v34 = vmul.f32 %v8063_v53, %v16195_v43 }
 0xe3b   : > { %v8103_v48 = vadd.f32 1.1920929e-07, %v8087_v33  ;;  %v15412_v12 = vadd.f32 1.1920929e-07, %v8085_v3 }
 0xe3c   : > { %v15414_v6 = vadd.f32 1.1920929e-07, %v8083_v34 }
 0xe3d   : > { %10230 = vrsqrt.f32 %v8103_v48  ;;  %vm8260_vm3 = vweird.f32 %v8103_v48  ;;  %vm8240_vm6 = vweird.f32 %v15412_v12 }
 0xe3e   : > { %10232 = vrsqrt.f32 %v15412_v12  ;;  %vm8220_vm7 = vweird.f32 %v15414_v6 }
 0xe3f   : > { %10234 = vrsqrt.f32 %v15414_v6 }
 0xe40   : > { %v8069_v28 = vpop.xlane.xlu0 %8068  ;;  %v8065_v18 = vpop.xlane.xlu1 %8064 }
 0xe41   : > { %v8086_v31 = vmul.f32 %v8069_v28, %v16195_v43  ;;  %v8084_v32 = vmul.f32 %v8065_v18, %v16195_v43  ;;  %v8061_v50 = vpop.xlane.xlu2 %8060 }
 0xe42   : > { %v8082_v56 = vmul.f32 %v8061_v50, %v16195_v43 }
 0xe43   : > { %v10231_v49 = vpop.eup %10230  ;;  %v15421_v38 = vadd.f32 1.1920929e-07, %v8086_v31  ;;  %v15423_v27 = vadd.f32 1.1920929e-07, %v8084_v32 }
 0xe44   : > { %v15425_v19 = vpop.eup %10232  ;;  %v8255_v51 = vmul.f32 %v10231_v49, %v8103_v48  ;;  %v15427_v7 = vadd.f32 1.1920929e-07, %v8082_v56  ;;  %vm8261_vm1 = vweird.f32 %v10231_v49 }
 0xe45   : > { %v8235_v30 = vmul.f32 %v15425_v19, %v15412_v12  ;;  %10236 = vrsqrt.f32 %v15421_v38  ;;  %v15433_v1 = vpop.eup %10234  ;;  %vm8262_vm4 = vmor %vm8260_vm3, %vm8261_vm1  ;;  %vm8250_vm5 = vweird.f32 %v15421_v38  ;;  %vm8241_vm13 = vweird.f32 %v15425_v19 }
 0xe46   : > { %v8256_v5 = vmul.f32 %v10231_v49, %v8255_v51  ;;  %10238 = vrsqrt.f32 %v15423_v27  ;;  %v8215_v60 = vmul.f32 %v15433_v1, %v15414_v6  ;;  %vm8230_vm15 = vweird.f32 %v15423_v27  ;;  %vm15486_vm0 = vmor %vm8240_vm6, %vm8241_vm13 }
 0xe47   : > { %v8236_v42 = vmul.f32 %v15425_v19, %v8235_v30  ;;  %10240 = vrsqrt.f32 %v15427_v7  ;;  %vm8221_vm8 = vweird.f32 %v15433_v1  ;;  %vm8210_vm11 = vweird.f32 %v15427_v7 }
 0xe48   : > { %v8059_v17 = vpop.xlane.xlu0 %8058  ;;  %v8057_v44 = vpop.xlane.xlu1 %8056  ;;  %v8257_v22 = vmul.f32 0.5, %v8256_v5  ;;  %v8216_v52 = vmul.f32 %v15433_v1, %v8215_v60  ;;  %vm15524_vm10 = vmor %vm8220_vm7, %vm8221_vm8 }
 0xe49   : > { %v8081_v20 = vmul.f32 %v8059_v17, %v16195_v43  ;;  %v8080_v26 = vmul.f32 %v8057_v44, %v16195_v43  ;;  %v8055_v24 = vpop.xlane.xlu2 %8054  ;;  %v8237_v55 = vmul.f32 0.5, %v8236_v42 }
 0xe4a   : > { %v8079_v2 = vmul.f32 %v8055_v24, %v16195_v43  ;;  %v8258_v62 = vsub.f32 1.5, %v8257_v22  ;;  %v8217_v50 = vmul.f32 0.5, %v8216_v52 }
 0xe4b   : > { %v10237_v35 = vpop.eup %10236  ;;  %v15442_v29 = vadd.f32 1.1920929e-07, %v8081_v20  ;;  %v15444_v9 = vadd.f32 1.1920929e-07, %v8080_v26  ;;  %v8238_v33 = vsub.f32 1.5, %v8237_v55 }
 0xe4c   : > { %v15446_v40 = vpop.eup %10238  ;;  %v8245_v45 = vmul.f32 %v10237_v35, %v15421_v38  ;;  %v8259_v14 = vmul.f32 %v10231_v49, %v8258_v62  ;;  %v15455_v36 = vadd.f32 1.1920929e-07, %v8079_v2  ;;  %vm8251_vm12 = vweird.f32 %v10237_v35 }
 0xe4d   : > { %v15449_v11 = vpop.eup %10240  ;;  %v8225_v4 = vmul.f32 %v15446_v40, %v15423_v27  ;;  %10242 = vrsqrt.f32 %v15442_v29  ;;  %v8239_v51 = vmul.f32 %v15425_v19, %v8238_v33  ;;  %vm8252_vm14 = vmor %vm8250_vm5, %vm8251_vm12  ;;  %vm8231_vm2 = vweird.f32 %v15446_v40 }
 0xe4e   : > { %v8246_v0 = vmul.f32 %v10237_v35, %v8245_v45  ;;  %v8263_v13 = vsel %vm8262_vm4, %v10231_v49, %v8259_v14  ;;  %10244 = vrsqrt.f32 %v15444_v9  ;;  %v8205_v53 = vmul.f32 %v15449_v11, %v15427_v7  ;;  %vm15515_vm9 = vmor %vm8230_vm15, %vm8231_vm2 }
 0xe4f   : > { %v8226_v57 = vmul.f32 %v15446_v40, %v8225_v4  ;;  %v8279_v15 = vmul.f32 %v8263_v13, %v15373_v39  ;;  %10246 = vrsqrt.f32 %v15455_v36  ;;  %v8243_v60 = vsel %vm15486_vm0, %v15425_v19, %v8239_v51 }
 0xe50   : > { %v8247_v3 = vmul.f32 0.5, %v8246_v0  ;;  %v8053_v34 = vpop.xlane.xlu0 %8052  ;;  %v8051_v48 = vpop.xlane.xlu1 %8050  ;;  %v8206_v30 = vmul.f32 %v15449_v11, %v8205_v53  ;;  %v8218_v2 = vsub.f32 1.5, %v8217_v50  ;;  %v8277_v4 = vmul.f32 %v8243_v60, %v15365_v47 }
 0xe51   : > { %v8227_v28 = vmul.f32 0.5, %v8226_v57  ;;  %8283 = vmatpush.xpose.msra.mxu0 %v8279_v15  ;;  %v8078_v18 = vmul.f32 %v8053_v34, %v16195_v43  ;;  %v8077_v31 = vmul.f32 %v8051_v48, %v16195_v43  ;;  %v8049_v49 = vpop.xlane.xlu2 %8048  ;;  %vm8211_vm1 = vweird.f32 %v15449_v11 }
 0xe52   : > { %v8248_v39 = vsub.f32 1.5, %v8247_v3  ;;  %v8076_v26 = vmul.f32 %v8049_v49, %v16195_v43  ;;  %v8219_v13 = vmul.f32 %v15433_v1, %v8218_v2  ;;  %vm15546_vm3 = vmor %vm8210_vm11, %vm8211_vm1  ;;  %vm8200_vm4 = vweird.f32 %v15442_v29 }
 0xe53   : > { %v15467_v32 = vpop.eup %10242  ;;  %v15469_v56 = vadd.f32 1.1920929e-07, %v8078_v18  ;;  %v8228_v17 = vsub.f32 1.5, %v8227_v28  ;;  %v15481_v22 = vadd.f32 1.1920929e-07, %v8077_v31  ;;  %vm8190_vm6 = vweird.f32 %v15444_v9 }
 0xe54   : > { %v8195_v5 = vmul.f32 %v15467_v32, %v15442_v29  ;;  %v8249_v42 = vmul.f32 %v10237_v35, %v8248_v39  ;;  %v15476_v44 = vpop.eup %10244  ;;  %v8223_v28 = vsel %vm15524_vm10, %v15433_v1, %v8219_v13  ;;  %vm8201_vm5 = vweird.f32 %v15467_v32 }
 0xe55   : > { %10248 = vrsqrt.f32 %v15469_v56  ;;  %v15496_v62 = vpop.eup %10246  ;;  %v8185_v55 = vmul.f32 %v15476_v44, %v15444_v9  ;;  %v8229_v14 = vmul.f32 %v15446_v40, %v8228_v17  ;;  %vm8191_vm12 = vweird.f32 %v15476_v44  ;;  %vm8202_vm13 = vmor %vm8200_vm4, %vm8201_vm5 }
 0xe56   : > { %v8253_v20 = vsel %vm8252_vm14, %v10237_v35, %v8249_v42  ;;  %v8207_v35 = vmul.f32 0.5, %v8206_v30  ;;  %v8196_v12 = vmul.f32 %v15467_v32, %v8195_v5  ;;  %10250 = vrsqrt.f32 %v15481_v22  ;;  %vm15584_vm14 = vmor %vm8190_vm6, %vm8191_vm12 }
 0xe57   : > { %v8278_v38 = vmul.f32 %v8253_v20, %v15369_v61  ;;  %v15505_v61 = vadd.f32 1.1920929e-07, %v8076_v26  ;;  %v8175_v19 = vmul.f32 %v15496_v62, %v15455_v36  ;;  %v8186_v15 = vmul.f32 %v15476_v44, %v8185_v55 }
 0xe58   : > { %v8047_v45 = vpop.xlane.xlu0 %8046  ;;  %v8045_v6 = vpop.xlane.xlu1 %8044  ;;  %v8197_v57 = vmul.f32 0.5, %v8196_v12  ;;  %v8233_v47 = vsel %vm15515_vm9, %v15446_v40, %v8229_v14  ;;  %v8208_v3 = vsub.f32 1.5, %v8207_v35  ;;  %v8275_v30 = vmul.f32 %v8223_v28, %v15357_v21 }
 0xe59   : > { %8284 = vmatpush.xpose.msra.mxu0 %v8278_v38  ;;  %v8075_v52 = vmul.f32 %v8047_v45, %v16195_v43  ;;  %10252 = vrsqrt.f32 %v15505_v61  ;;  %v8074_v53 = vmul.f32 %v8045_v6, %v16195_v43  ;;  %v8176_v34 = vmul.f32 %v15496_v62, %v8175_v19  ;;  %v8043_v18 = vpop.xlane.xlu2 %8042 }
 0xe5a   : > { %v8276_v40 = vmul.f32 %v8233_v47, %v15361_v16  ;;  %v8187_v39 = vmul.f32 0.5, %v8186_v15  ;;  %v8209_v7 = vmul.f32 %v15449_v11, %v8208_v3  ;;  %v8198_v49 = vsub.f32 1.5, %v8197_v57 }
 0xe5b   : > { %v15528_v27 = vpop.eup %10248  ;;  %v15535_v48 = vadd.f32 1.1920929e-07, %v8075_v52  ;;  %v15550_v16 = vadd.f32 1.1920929e-07, %v8074_v53  ;;  %v8073_v1 = vmul.f32 %v8043_v18, %v16195_v43  ;;  %v8177_v5 = vmul.f32 0.5, %v8176_v34 }
 0xe5c   : > { %v15541_v31 = vpop.eup %10250  ;;  %v8165_v50 = vmul.f32 %v15528_v27, %v15469_v56  ;;  %v8213_v21 = vsel %vm15546_vm3, %v15449_v11, %v8209_v7  ;;  %v8199_v24 = vmul.f32 %v15467_v32, %v8198_v49  ;;  %v8188_v38 = vsub.f32 1.5, %v8187_v39 }
 0xe5d   : > { %8285 = vmatpush.xpose.msra.mxu0 %v8277_v4  ;;  %v8155_v42 = vmul.f32 %v15541_v31, %v15481_v22  ;;  %10254 = vrsqrt.f32 %v15535_v48  ;;  %v15567_v60 = vadd.f32 1.1920929e-07, %v8073_v1  ;;  %v8274_v11 = vmul.f32 %v8213_v21, %v15352_v23 }
 0xe5e   : > { %v8166_v20 = vmul.f32 %v15528_v27, %v8165_v50  ;;  %10256 = vrsqrt.f32 %v15550_v16  ;;  %v8203_v45 = vsel %vm8202_vm13, %v15467_v32, %v8199_v24  ;;  %v8189_v9 = vmul.f32 %v15476_v44, %v8188_v38 }
 0xe5f   : > { %v15559_v17 = vpop.eup %10252  ;;  %v8156_v2 = vmul.f32 %v15541_v31, %v8155_v42  ;;  %v8178_v14 = vsub.f32 1.5, %v8177_v5  ;;  %10258 = vrsqrt.f32 %v15567_v60  ;;  %vm8180_vm15 = vweird.f32 %v15455_v36 }
 0xe60   : > { %v8041_v26 = vpop.xlane.xlu0 %8040  ;;  %v8145_v35 = vmul.f32 %v15559_v17, %v15505_v61  ;;  %v8167_v55 = vmul.f32 0.5, %v8166_v20  ;;  %vm8181_vm0 = vweird.f32 %v15496_v62  ;;  %v8273_v32 = vmul.f32 %v8203_v45, %v15348_v46 }
 0xe61   : > { %8286 = vmatpush.xpose.msra.mxu0 %v8276_v40  ;;  %v8072_v12 = vmul.f32 %v8041_v26, %v16195_v43  ;;  %v8157_v23 = vmul.f32 0.5, %v8156_v2  ;;  %v8193_v6 = vsel %vm15584_vm14, %v15476_v44, %v8189_v9  ;;  %v8179_v36 = vmul.f32 %v15496_v62, %v8178_v14  ;;  %vm15603_vm2 = vmor %vm8180_vm15, %vm8181_vm0 }
 0xe62   : > { %v8146_v43 = vmul.f32 %v15559_v17, %v8145_v35  ;;  %v8168_v13 = vsub.f32 1.5, %v8167_v55  ;;  %vm8170_vm7 = vweird.f32 %v15469_v56  ;;  %vm8171_vm8 = vweird.f32 %v15528_v27  ;;  %v8280_v55 = vld [vmem:[%s16210_s13] sm:$0x1] }
 0xe63   : > { %v15582_v19 = vpop.eup %10254  ;;  %v15592_v29 = vadd.f32 1.1920929e-07, %v8072_v12  ;;  %v8272_v44 = vmul.f32 %v8193_v6, %v15343_v58  ;;  %v8183_v3 = vsel %vm15603_vm2, %v15496_v62, %v8179_v36  ;;  %v8158_v53 = vsub.f32 1.5, %v8157_v23  ;;  %vm15620_vm9 = vmor %vm8170_vm7, %vm8171_vm8 }
 0xe64   : > { %v15595_v52 = vpop.eup %10256  ;;  %v8135_v0 = vmul.f32 %v15582_v19, %v15535_v48  ;;  %v8147_v46 = vmul.f32 0.5, %v8146_v43  ;;  %v8169_v56 = vmul.f32 %v15528_v27, %v8168_v13  ;;  %vm8160_vm10 = vweird.f32 %v15481_v22 }
 0xe65   : > { %8287 = vmatpush.xpose.msra.mxu0 %v8275_v30  ;;  %v8125_v15 = vmul.f32 %v15595_v52, %v15550_v16  ;;  %10260 = vrsqrt.f32 %v15592_v29  ;;  %v15613_v47 = vpop.eup %10258  ;;  %vm8161_vm11 = vweird.f32 %v15541_v31  ;;  %v8271_v28 = vmul.f32 %v8183_v3, %v15339_v63 }
 0xe66   : > { %v8136_v33 = vmul.f32 %v15582_v19, %v8135_v0  ;;  %v8115_v40 = vmul.f32 %v15613_v47, %v15567_v60  ;;  %v8173_v18 = vsel %vm15620_vm9, %v15528_v27, %v8169_v56  ;;  %v8159_v39 = vmul.f32 %v15541_v31, %v8158_v53  ;;  %vm8162_vm1 = vmor %vm8160_vm10, %vm8161_vm11 }
 0xe67   : > { %v8126_v58 = vmul.f32 %v15595_v52, %v8125_v15  ;;  %v8148_v50 = vsub.f32 1.5, %v8147_v46  ;;  %vm8150_vm3 = vweird.f32 %v15505_v61  ;;  %vm8151_vm4 = vweird.f32 %v15559_v17 }
 0xe68   : > { %v8137_v62 = vmul.f32 0.5, %v8136_v33  ;;  %v8116_v49 = vmul.f32 %v15613_v47, %v8115_v40  ;;  %v8270_v63 = vmul.f32 %v8173_v18, %v15334_v59  ;;  %v8163_v30 = vsel %vm8162_vm1, %v15541_v31, %v8159_v39  ;;  %vm8152_vm5 = vmor %vm8150_vm3, %vm8151_vm4 }
 0xe69   : > { %8288 = vmatpush.xpose.msra.mxu0 %v8274_v11  ;;  %v8127_v22 = vmul.f32 0.5, %v8126_v58  ;;  %v8149_v27 = vmul.f32 %v15559_v17, %v8148_v50  ;;  %vm8140_vm6 = vweird.f32 %v15535_v48  ;;  %vm8141_vm12 = vweird.f32 %v15582_v19 }
 0xe6a   : > { %v8138_v1 = vsub.f32 1.5, %v8137_v62  ;;  %v8117_v61 = vmul.f32 0.5, %v8116_v49  ;;  %v8269_v5 = vmul.f32 %v8163_v30, %v15330_v54  ;;  %vm8142_vm13 = vmor %vm8140_vm6, %vm8141_vm12  ;;  %vm8130_vm14 = vweird.f32 %v15550_v16 }
 0xe6b   : > { %v10261_v7 = vpop.eup %10260  ;;  %v8128_v42 = vsub.f32 1.5, %v8127_v22  ;;  %v8153_v59 = vsel %vm8152_vm5, %v15559_v17, %v8149_v27  ;;  %vm8131_vm15 = vweird.f32 %v15595_v52  ;;  %vm8120_vm2 = vweird.f32 %v15567_v60 }
 0xe6c   : > { %v8105_v51 = vmul.f32 %v10261_v7, %v15592_v29  ;;  %v8139_v21 = vmul.f32 %v15582_v19, %v8138_v1  ;;  %v8268_v31 = vmul.f32 %v8153_v59, %v15325_v8  ;;  %v8118_v48 = vsub.f32 1.5, %v8117_v61  ;;  %vm8132_vm0 = vmor %vm8130_vm14, %vm8131_vm15 }
 0xe6d   : > { %8289 = vmatpush.xpose.msra.mxu0 %v8273_v32  ;;  %v8129_v54 = vmul.f32 %v15595_v52, %v8128_v42  ;;  %vm8121_vm7 = vweird.f32 %v15613_v47  ;;  %vm8110_vm9 = vweird.f32 %v15592_v29  ;;  %vm8111_vm10 = vweird.f32 %v10261_v7 }
 0xe6e   : > { %v8106_v20 = vmul.f32 %v10261_v7, %v8105_v51  ;;  %v8143_v24 = vsel %vm8142_vm13, %v15582_v19, %v8139_v21  ;;  %v8119_v2 = vmul.f32 %v15613_v47, %v8118_v48  ;;  %vm8122_vm8 = vmor %vm8120_vm2, %vm8121_vm7  ;;  %v8282_v45 = vstv %s8281_s28 }
 0xe6f   : > { %v8267_v17 = vmul.f32 %v8143_v24, %v15321_v37  ;;  %v8133_v16 = vsel %vm8132_vm0, %v15595_v52, %v8129_v54  ;;  %vm8112_vm11 = vmor %vm8110_vm9, %vm8111_vm10 }
 0xe70   : > { %v8107_v26 = vmul.f32 0.5, %v8106_v20  ;;  %v8266_v8 = vmul.f32 %v8133_v16, %v15316_v25  ;;  %v8123_v35 = vsel %vm8122_vm8, %v15613_v47, %v8119_v2 }
 0xe71   : > { %8290 = vmatpush.xpose.msra.mxu0 %v8272_v44  ;;  %v8265_v60 = vmul.f32 %v8123_v35, %v15312_v41 }
 0xe72   : > { %v8108_v38 = vsub.f32 1.5, %v8107_v26 }
 0xe74   : > { %v8109_v11 = vmul.f32 %v10261_v7, %v8108_v38 }
 0xe75   : > { %8291 = vmatpush.xpose.msra.mxu0 %v8271_v28 }
 0xe76   : > { %v8113_v37 = vsel %vm8112_vm11, %v10261_v7, %v8109_v11 }
 0xe77   : > { %v8264_v12 = vmul.f32 %v8113_v37, %v15307_v10 }
 0xe79   : > { %8292 = vmatpush.xpose.msra.mxu0 %v8270_v63 }
 0xe7d   : > { %8293 = vmatpush.xpose.msra.mxu0 %v8269_v5 }
 0xe81   : > { %8294 = vmatpush.xpose.msra.mxu0 %v8268_v31 }
 0xe85   : > { %8295 = vmatpush.xpose.msra.mxu0 %v8267_v17 }
 0xe89   : > { %8296 = vmatpush.xpose.msra.mxu0 %v8266_v8 }
 0xe8d   : > { %8297 = vmatpush.xpose.msra.mxu0 %v8265_v60 }
 0xe91   : > { %8298 = vmatpush.xpose.msra.mxu0 %v8264_v12 }
 0xe94   : > { %8299 = vmatmul.f32.vlgmr.msra.gmra.mxu0 %v8280_v55 }
 0xf11   : > { %v8300_v25 = vpop.f32.mrf.mxu0 }
 0xf12   : > { %v8301_v9 = vadd.f32 %v8300_v25, %v8282_v45 }
 0xf14   : > { %8303 = vst [vmem:[#allocation23] sm:$0x1] %v8301_v9 }
 0xf15 PF: > { %s16211_s15 = sld [smem:[#allocation33_spill]]  ;;  %s10696_s11 = smov [#allocation23]  }
 0xf16   : > { %s8310_s19 = sshll.u32 %s10696_s11, 4  ;;  %s16212_s29 = sld [smem:[#allocation148_spill]]  ;;  %s8311_s19 = int_to_ptr.vmem [resolvable:$true] %s8310_s19 }
 0xf1b   : > { %p9513_p4 = scmp.eq.s32.totalorder %s16211_s15, 1 }
 0xf1c   : > { %s8312_s17 = sshll.u32 %s16212_s29, 4  ;;  %s8313_s17 = int_to_ptr.hbm [resolvable:$true] %s8312_s17 }
 0xf1d   : > { %9464 = dma.vmem_to_hbm [thread:$0]  (%p9513_p4), %s8311_s19, 16, %s8313_s17, [#allocation7]  }
 0xf1e   : > { %10661 = dma.done.wait (%p9513_p4), [#allocation7], 16  }
 0xf1f   : > { %10663 = vsyncadd (%p9513_p4), [#allocation7], 4294967280 }
 0xf20 PF: > { %s16213_s30 = sld [smem:[#allocation36_spill]] }
 0xf21   : > { %s16214_s27 = sld [smem:[#allocation31_spill]] }
 0xf22   : > { %s16215_s28 = sld [smem:[#allocation32_spill]] }
 0xf23   : > { %s16216_s29 = sld [smem:[#allocation37_spill]] }
 0xf26   : > { %p34_p5 = scmp.ge.s32.totalorder %s16213_s30, 4  }
 0xf28   :  { %36 = sbr.rel (!%p34_p5) target bundleno = 20 (0x14), region = 197 }
 0xf2d   :  { %8326 = vsyncpa [#allocation6], 1 }
 0xf2e   :  { %8328 = vsyncpa [#allocation6 + $0x1], 1 }
 0xf2f   :  { %8329 = vsyncpa [#allocation9], 1 }
 0xf30   :  { %8331 = vsyncpa [#allocation9 + $0x1], 1 }
 0xf31   :  { %8332 = vsyncpa [#allocation12], 1 }
 0xf32   :  { %8333 = vsyncpa [#allocation15], 1 }
 0xf33   :  { %8334 = vsyncpa [#allocation18], 1 }
 0xf34   :  { %8336 = vsyncpa [#allocation18 + $0x1], 1 }
 0xf35   :  { %8337 = vsyncpa [#allocation21], 1 }
 0xf36   :  { %8339 = vsyncpa [#allocation21 + $0x1], 1 }
 0xf37   :  { %8340 = vsyncpa [#allocation7], 1 }
 0xf38   :  { %8342 = vsyncpa [#allocation7 + $0x1], 1 }

</bundles_post_ra>
